<compile_context>
chip_gen: v7x
topology: tpu7x:2x2x1
jax: 0.10.0
libtpu: 0.0.40
codegen_flags: <defaults>
</compile_context>

<pallas_src>
import jax
import jax.numpy as jnp
from jax.experimental import pallas as pl
from jax.experimental.pallas import tpu as pltpu

DIM_TOKEN = 16          # kwargs 'dimension_token' default
LEAKY_SLOPE = 0.01      # nn.LeakyReLU default negative_slope
INPUT_DIM = 2           # SelfAttention(input_dimension=2, ...)
HIDDEN = 64             # dense head hidden width
LANE = 128              # TPU lane width


def _round_up(x, m):
    return (x + m - 1) // m * m


def _choose_tb(batch, target=1024):
    """Batch tile (lane axis): multiple of 128, >=2 grid steps when possible."""
    b128 = _round_up(batch, LANE)
    tb = min(target, b128)
    # v7x has 2 TensorCores: keep at least 2 parallel grid steps if batch allows.
    if b128 > LANE and b128 // tb < 2:
        tb = max(LANE, _round_up(-(-batch // 2), LANE))
    return tb


# ---------------------------------------------------------------------------
# Fused kernel: Q/K/V projections + softmax attention + dense head.
# One grid step handles a TB-wide batch tile; batch sits on the lane axis.
# ---------------------------------------------------------------------------
def _fused_attention_kernel(obs_ref, a_ref, pq_ref, pk_ref, av_ref, pv_ref,
                            w1t_ref, b1t_ref, w2t_ref, b2t_ref, o_ref):
    obs = obs_ref[...]                          # (N, TB) f32, batch on lanes
    N, TB = obs.shape
    D = DIM_TOKEN

    pq = pq_ref[...]                            # (N, D): pos*Bq + bq (constant-folded)
    pk = pk_ref[...]                            # (N, D): pos*Bk + bk

    # V projection, layout (Nk, D, TB): token outer, feature on sublanes, batch on lanes.
    v = obs[:, None, :] * av_ref[...][None, :, :] + pv_ref[...][:, :, None]

    # Scores s[nk, nq, b] = sum_d k[nk,d,b] * q[nq,d,b], d-loop unrolled on the VPU.
    # Q/K are never materialized: each d-slice is a cheap (N, TB) FMA.
    s = None
    for d in range(D):
        q_d = obs * a_ref[0, d] + pq[:, d:d + 1]        # (Nq, TB)
        k_d = obs * a_ref[1, d] + pk[:, d:d + 1]        # (Nk, TB)
        term = k_d[:, None, :] * q_d[None, :, :]        # (Nk, Nq, TB)
        s = term if s is None else s + term
    s = s * jnp.float32(1.0 / (INPUT_DIM ** 0.5))

    # Softmax over the key axis = axis 0 (elementwise VPU max/add across slabs).
    m = jnp.max(s, axis=0, keepdims=True)               # (1, Nq, TB)
    p = jnp.exp(s - m)
    denom = jnp.sum(p, axis=0, keepdims=True)           # (1, Nq, TB)
    # exact reciprocal: keeps the 2e-5 tolerance vs the reference
    attn = p * pl.reciprocal(denom, approx=False)       # (Nk, Nq, TB)

    # weighted[nq, d, b] = sum_nk attn[nk,nq,b] * v[nk,d,b], key-loop unrolled (VPU).
    w = None
    for nk in range(N):
        term = attn[nk][:, None, :] * v[nk][None, :, :]  # (Nq, D, TB)
        w = term if w is None else w + term

    # Dense head in transposed (batch-on-lanes) space: one K = N*D MXU matmul.
    # Row nq*D + d of emb_t matches torch's .view(B, -1) flattening.
    emb_t = w.reshape(N * D, TB)                         # (N*D, TB)
    h = jnp.dot(w1t_ref[...], emb_t,
                preferred_element_type=jnp.float32) + b1t_ref[...]   # (H, TB)
    h = jnp.where(h >= 0, h, jnp.float32(LEAKY_SLOPE) * h)           # LeakyReLU
    o_ref[...] = jnp.dot(w2t_ref[...], h,
                         preferred_element_type=jnp.float32) + b2t_ref[...]  # (O, TB)


# ---------------------------------------------------------------------------
# Wrapper: layout plumbing (transposes, constant folding of the positional
# encoding into tiny tables), batch padding/tiling, output un-transpose.
# ---------------------------------------------------------------------------
def attention_forward(obs_flat, params):
    B, N = obs_flat.shape
    D = DIM_TOKEN
    H = params["w1"].shape[1]
    O = params["w2"].shape[1]

    TB = _choose_tb(B)
    B_pad = _round_up(B, TB)

    # Observations transposed so the batch is lane-dense in every block.
    obs_t = obs_flat.astype(jnp.float32).T               # (N, B)
    if B_pad != B:
        obs_t = jnp.pad(obs_t, ((0, 0), (0, B_pad - B)))

    # Positional encoding is a compile-time constant: fold pos*B + bias into
    # tiny (N, D) tables; keep only the obs coefficients as live weights.
    pos = jnp.linspace(0.0, 1.0, N, dtype=jnp.float32)   # (N,)
    wq, bq = params["wq"], params["bq"]                   # (2, D), (1, D)
    wk, bk = params["wk"], params["bk"]
    wv, bv = params["wv"], params["bv"]
    a_qk = jnp.stack([wq[0], wk[0]], axis=0)              # (2, D)  -> SMEM scalars
    p_q = pos[:, None] * wq[1][None, :] + bq              # (N, D)
    p_k = pos[:, None] * wk[1][None, :] + bk              # (N, D)
    a_v = wv[0][:, None]                                  # (D, 1)
    p_v = pos[:, None] * wv[1][None, :] + bv              # (N, D)

    # Dense head weights transposed for the batch-on-lanes matmuls.
    w1t = params["w1"].T                                  # (H, N*D)
    b1t = params["b1"].T                                  # (H, 1)
    w2t = params["w2"].T                                  # (O, H)
    b2t = params["b2"].T                                  # (O, 1)

    out_t = pl.pallas_call(
        _fused_attention_kernel,
        out_shape=jax.ShapeDtypeStruct((O, B_pad), jnp.float32),
        grid=(B_pad // TB,),
        in_specs=[
            pl.BlockSpec((N, TB), lambda i: (0, i)),                     # obs (lane-dense)
            pl.BlockSpec(memory_space=pltpu.MemorySpace.SMEM),           # a_qk scalars
            pl.BlockSpec((N, D), lambda i: (0, 0)),                      # p_q
            pl.BlockSpec((N, D), lambda i: (0, 0)),                      # p_k
            pl.BlockSpec((D, 1), lambda i: (0, 0)),                      # a_v
            pl.BlockSpec((N, D), lambda i: (0, 0)),                      # p_v
            pl.BlockSpec((H, N * D), lambda i: (0, 0)),                  # w1^T (resident)
            pl.BlockSpec((H, 1), lambda i: (0, 0)),                      # b1^T
            pl.BlockSpec((O, H), lambda i: (0, 0)),                      # w2^T
            pl.BlockSpec((O, 1), lambda i: (0, 0)),                      # b2^T
        ],
        out_specs=pl.BlockSpec((O, TB), lambda i: (0, i)),               # lane-dense output
        compiler_params=pltpu.CompilerParams(
            dimension_semantics=("parallel",),
            vmem_limit_bytes=32 * 1024 * 1024),
    )(obs_t, a_qk, p_q, p_k, a_v, p_v, w1t, b1t, w2t, b2t)

    return out_t[:, :B].T                                 # (B, O)


# ---------------------------------------------------------------------------
# Pure-JAX reference (mirrors the torch semantics) for validation.
# ---------------------------------------------------------------------------
def attention_forward_ref(obs_flat, params):
    B, N = obs_flat.shape
    obs = obs_flat[:, :, None].astype(jnp.float32)
    pos = jnp.broadcast_to(
        jnp.linspace(0.0, 1.0, N, dtype=jnp.float32)[None, :, None], (B, N, 1))
    x = jnp.concatenate([obs, pos], axis=-1)
    q = x @ params["wq"] + params["bq"]
    k = x @ params["wk"] + params["bk"]
    v = x @ params["wv"] + params["bv"]
    scores = jnp.einsum("bqd,bkd->bqk", q, k) / jnp.float32(INPUT_DIM) ** 0.5
    attn = jax.nn.softmax(scores, axis=2)
    weighted = jnp.einsum("bqk,bkd->bqd", attn, v)
    emb = weighted.reshape(B, -1)
    h = emb @ params["w1"] + params["b1"]
    h = jnp.where(h >= 0, h, LEAKY_SLOPE * h)
    return h @ params["w2"] + params["b2"]


def init_params(key, n_obs, num_outputs):
    ks = jax.random.split(key, 10)
    s = 0.1
    # SelfAttention(2, DIM_TOKEN): nn.Linear(2, 16) x3 (stored as (in, out))
    params = {
        "wq": jax.random.normal(ks[0], (INPUT_DIM, DIM_TOKEN), jnp.float32) * s,
        "bq": jax.random.normal(ks[1], (1, DIM_TOKEN), jnp.float32) * s,
        "wk": jax.random.normal(ks[2], (INPUT_DIM, DIM_TOKEN), jnp.float32) * s,
        "bk": jax.random.normal(ks[3], (1, DIM_TOKEN), jnp.float32) * s,
        "wv": jax.random.normal(ks[4], (INPUT_DIM, DIM_TOKEN), jnp.float32) * s,
        "bv": jax.random.normal(ks[5], (1, DIM_TOKEN), jnp.float32) * s,
        # action_dense_layer: Linear(DIM_TOKEN*n_obs, 64) -> LeakyReLU -> Linear(64, num_outputs)
        "w1": jax.random.normal(ks[6], (DIM_TOKEN * n_obs, HIDDEN), jnp.float32) * s,
        "b1": jax.random.normal(ks[7], (1, HIDDEN), jnp.float32) * s,
        "w2": jax.random.normal(ks[8], (HIDDEN, num_outputs), jnp.float32) * s,
        "b2": jax.random.normal(ks[9], (1, num_outputs), jnp.float32) * s,
    }
    return params
    # TODO(synk): nn.MultiheadAttention and the critic branch are constructed in
    # __init__ but unused by forward(); only the actor path is implemented here.


if __name__ == "__main__":
    key = jax.random.PRNGKey(0)
    k_obs, k_par = jax.random.split(key)

    B = 2           # batch
    N_OBS = 16      # flattened observation size (number of tokens)
    NUM_OUTPUTS = 4

    obs_flat = jax.random.normal(k_obs, (B, N_OBS), jnp.float32)
    params = init_params(k_par, N_OBS, NUM_OUTPUTS)

    fwd = jax.jit(attention_forward)
    out = fwd(obs_flat, params)
    out = jax.block_until_ready(out)

    ref = attention_forward_ref(obs_flat, params)
    assert out.shape == (B, NUM_OUTPUTS)
    assert jnp.allclose(out, ref, atol=2e-5, rtol=2e-5), (out, ref)

    print("KERNEL_OK")
</pallas_src>

<mosaic_0001>
module attributes {stable_mosaic.version = 11 : i64} {
  func.func @_fused_attention_kernel(%arg0: i32, %arg1: memref<16x128xf32, #tpu.memory_space<vmem>>, %arg2: memref<2x16xf32, #tpu.memory_space<smem>>, %arg3: memref<16x16xf32, #tpu.memory_space<vmem>>, %arg4: memref<16x16xf32, #tpu.memory_space<vmem>>, %arg5: memref<16x1xf32, #tpu.memory_space<vmem>>, %arg6: memref<16x16xf32, #tpu.memory_space<vmem>>, %arg7: memref<64x256xf32, #tpu.memory_space<vmem>>, %arg8: memref<64x1xf32, #tpu.memory_space<vmem>>, %arg9: memref<4x64xf32, #tpu.memory_space<vmem>>, %arg10: memref<4x1xf32, #tpu.memory_space<vmem>>, %arg11: memref<4x128xf32, #tpu.memory_space<vmem>>) attributes {dimension_semantics = [#tpu.dimension_semantics<parallel>], iteration_bounds = array<i64: 1>, scalar_prefetch = 0 : i64, scratch_operands = 0 : i64, tpu.core_type = #tpu.core_type<tc>, window_params = [{transform_indices = @transform_0, window_bounds = array<i64: 16, 128>}, {transform_indices = @transform_1, window_bounds = array<i64: 2, 16>}, {pipeline_mode = #tpu.pipeline_mode<synchronous>, transform_indices = @transform_2, window_bounds = array<i64: 16, 16>}, {pipeline_mode = #tpu.pipeline_mode<synchronous>, transform_indices = @transform_3, window_bounds = array<i64: 16, 16>}, {pipeline_mode = #tpu.pipeline_mode<synchronous>, transform_indices = @transform_4, window_bounds = array<i64: 16, 1>}, {pipeline_mode = #tpu.pipeline_mode<synchronous>, transform_indices = @transform_5, window_bounds = array<i64: 16, 16>}, {pipeline_mode = #tpu.pipeline_mode<synchronous>, transform_indices = @transform_6, window_bounds = array<i64: 64, 256>}, {pipeline_mode = #tpu.pipeline_mode<synchronous>, transform_indices = @transform_7, window_bounds = array<i64: 64, 1>}, {pipeline_mode = #tpu.pipeline_mode<synchronous>, transform_indices = @transform_8, window_bounds = array<i64: 4, 64>}, {pipeline_mode = #tpu.pipeline_mode<synchronous>, transform_indices = @transform_9, window_bounds = array<i64: 4, 1>}, {transform_indices = @transform_10, window_bounds = array<i64: 4, 128>}]} {
    %c0 = arith.constant 0 : index
    %c0_0 = arith.constant 0 : index
    %0 = vector.load %arg1[%c0, %c0_0] : memref<16x128xf32, #tpu.memory_space<vmem>>, vector<16x128xf32>
    %c0_1 = arith.constant 0 : index
    %c0_2 = arith.constant 0 : index
    %1 = vector.load %arg3[%c0_1, %c0_2] : memref<16x16xf32, #tpu.memory_space<vmem>>, vector<16x16xf32>
    %c0_3 = arith.constant 0 : index
    %c0_4 = arith.constant 0 : index
    %2 = vector.load %arg4[%c0_3, %c0_4] : memref<16x16xf32, #tpu.memory_space<vmem>>, vector<16x16xf32>
    %3 = vector.shape_cast %0 : vector<16x128xf32> to vector<16x1x128xf32>
    %c0_5 = arith.constant 0 : index
    %c0_6 = arith.constant 0 : index
    %4 = vector.load %arg5[%c0_5, %c0_6] : memref<16x1xf32, #tpu.memory_space<vmem>>, vector<16x1xf32>
    %5 = vector.shape_cast %4 : vector<16x1xf32> to vector<1x16x1xf32>
    %6 = vector.broadcast %3 : vector<16x1x128xf32> to vector<16x16x128xf32>
    %7 = vector.broadcast %5 : vector<1x16x1xf32> to vector<16x16x128xf32>
    %8 = arith.mulf %6, %7 : vector<16x16x128xf32>
    %c0_7 = arith.constant 0 : index
    %c0_8 = arith.constant 0 : index
    %9 = vector.load %arg6[%c0_7, %c0_8] : memref<16x16xf32, #tpu.memory_space<vmem>>, vector<16x16xf32>
    %10 = vector.shape_cast %9 : vector<16x16xf32> to vector<16x16x1xf32>
    %11 = vector.broadcast %10 : vector<16x16x1xf32> to vector<16x16x128xf32>
    %12 = arith.addf %8, %11 : vector<16x16x128xf32>
    %c0_9 = arith.constant 0 : index
    %c0_10 = arith.constant 0 : index
    %13 = memref.load %arg2[%c0_9, %c0_10] : memref<2x16xf32, #tpu.memory_space<smem>>
    %14 = vector.broadcast %13 : f32 to vector<16x128xf32>
    %15 = arith.mulf %0, %14 : vector<16x128xf32>
    %16 = vector.extract_strided_slice %1 {offsets = [0, 0], sizes = [16, 1], strides = [1, 1]} : vector<16x16xf32> to vector<16x1xf32>
    %17 = vector.broadcast %16 : vector<16x1xf32> to vector<16x128xf32>
    %18 = arith.addf %15, %17 : vector<16x128xf32>
    %c1 = arith.constant 1 : index
    %c0_11 = arith.constant 0 : index
    %19 = memref.load %arg2[%c1, %c0_11] : memref<2x16xf32, #tpu.memory_space<smem>>
    %20 = vector.broadcast %19 : f32 to vector<16x128xf32>
    %21 = arith.mulf %0, %20 : vector<16x128xf32>
    %22 = vector.extract_strided_slice %2 {offsets = [0, 0], sizes = [16, 1], strides = [1, 1]} : vector<16x16xf32> to vector<16x1xf32>
    %23 = vector.broadcast %22 : vector<16x1xf32> to vector<16x128xf32>
    %24 = arith.addf %21, %23 : vector<16x128xf32>
    %25 = vector.shape_cast %24 : vector<16x128xf32> to vector<16x1x128xf32>
    %26 = vector.shape_cast %18 : vector<16x128xf32> to vector<1x16x128xf32>
    %27 = vector.broadcast %25 : vector<16x1x128xf32> to vector<16x16x128xf32>
    %28 = vector.broadcast %26 : vector<1x16x128xf32> to vector<16x16x128xf32>
    %29 = arith.mulf %27, %28 : vector<16x16x128xf32>
    %c0_12 = arith.constant 0 : index
    %c1_13 = arith.constant 1 : index
    %30 = memref.load %arg2[%c0_12, %c1_13] : memref<2x16xf32, #tpu.memory_space<smem>>
    %31 = vector.broadcast %30 : f32 to vector<16x128xf32>
    %32 = arith.mulf %0, %31 : vector<16x128xf32>
    %33 = vector.extract_strided_slice %1 {offsets = [0, 1], sizes = [16, 1], strides = [1, 1]} : vector<16x16xf32> to vector<16x1xf32>
    %34 = vector.broadcast %33 : vector<16x1xf32> to vector<16x128xf32>
    %35 = arith.addf %32, %34 : vector<16x128xf32>
    %c1_14 = arith.constant 1 : index
    %c1_15 = arith.constant 1 : index
    %36 = memref.load %arg2[%c1_14, %c1_15] : memref<2x16xf32, #tpu.memory_space<smem>>
    %37 = vector.broadcast %36 : f32 to vector<16x128xf32>
    %38 = arith.mulf %0, %37 : vector<16x128xf32>
    %39 = vector.extract_strided_slice %2 {offsets = [0, 1], sizes = [16, 1], strides = [1, 1]} : vector<16x16xf32> to vector<16x1xf32>
    %40 = vector.broadcast %39 : vector<16x1xf32> to vector<16x128xf32>
    %41 = arith.addf %38, %40 : vector<16x128xf32>
    %42 = vector.shape_cast %41 : vector<16x128xf32> to vector<16x1x128xf32>
    %43 = vector.shape_cast %35 : vector<16x128xf32> to vector<1x16x128xf32>
    %44 = vector.broadcast %42 : vector<16x1x128xf32> to vector<16x16x128xf32>
    %45 = vector.broadcast %43 : vector<1x16x128xf32> to vector<16x16x128xf32>
    %46 = arith.mulf %44, %45 : vector<16x16x128xf32>
    %47 = arith.addf %29, %46 : vector<16x16x128xf32>
    %c0_16 = arith.constant 0 : index
    %c2 = arith.constant 2 : index
    %48 = memref.load %arg2[%c0_16, %c2] : memref<2x16xf32, #tpu.memory_space<smem>>
    %49 = vector.broadcast %48 : f32 to vector<16x128xf32>
    %50 = arith.mulf %0, %49 : vector<16x128xf32>
    %51 = vector.extract_strided_slice %1 {offsets = [0, 2], sizes = [16, 1], strides = [1, 1]} : vector<16x16xf32> to vector<16x1xf32>
    %52 = vector.broadcast %51 : vector<16x1xf32> to vector<16x128xf32>
    %53 = arith.addf %50, %52 : vector<16x128xf32>
    %c1_17 = arith.constant 1 : index
    %c2_18 = arith.constant 2 : index
    %54 = memref.load %arg2[%c1_17, %c2_18] : memref<2x16xf32, #tpu.memory_space<smem>>
    %55 = vector.broadcast %54 : f32 to vector<16x128xf32>
    %56 = arith.mulf %0, %55 : vector<16x128xf32>
    %57 = vector.extract_strided_slice %2 {offsets = [0, 2], sizes = [16, 1], strides = [1, 1]} : vector<16x16xf32> to vector<16x1xf32>
    %58 = vector.broadcast %57 : vector<16x1xf32> to vector<16x128xf32>
    %59 = arith.addf %56, %58 : vector<16x128xf32>
    %60 = vector.shape_cast %59 : vector<16x128xf32> to vector<16x1x128xf32>
    %61 = vector.shape_cast %53 : vector<16x128xf32> to vector<1x16x128xf32>
    %62 = vector.broadcast %60 : vector<16x1x128xf32> to vector<16x16x128xf32>
    %63 = vector.broadcast %61 : vector<1x16x128xf32> to vector<16x16x128xf32>
    %64 = arith.mulf %62, %63 : vector<16x16x128xf32>
    %65 = arith.addf %47, %64 : vector<16x16x128xf32>
    %c0_19 = arith.constant 0 : index
    %c3 = arith.constant 3 : index
    %66 = memref.load %arg2[%c0_19, %c3] : memref<2x16xf32, #tpu.memory_space<smem>>
    %67 = vector.broadcast %66 : f32 to vector<16x128xf32>
    %68 = arith.mulf %0, %67 : vector<16x128xf32>
    %69 = vector.extract_strided_slice %1 {offsets = [0, 3], sizes = [16, 1], strides = [1, 1]} : vector<16x16xf32> to vector<16x1xf32>
    %70 = vector.broadcast %69 : vector<16x1xf32> to vector<16x128xf32>
    %71 = arith.addf %68, %70 : vector<16x128xf32>
    %c1_20 = arith.constant 1 : index
    %c3_21 = arith.constant 3 : index
    %72 = memref.load %arg2[%c1_20, %c3_21] : memref<2x16xf32, #tpu.memory_space<smem>>
    %73 = vector.broadcast %72 : f32 to vector<16x128xf32>
    %74 = arith.mulf %0, %73 : vector<16x128xf32>
    %75 = vector.extract_strided_slice %2 {offsets = [0, 3], sizes = [16, 1], strides = [1, 1]} : vector<16x16xf32> to vector<16x1xf32>
    %76 = vector.broadcast %75 : vector<16x1xf32> to vector<16x128xf32>
    %77 = arith.addf %74, %76 : vector<16x128xf32>
    %78 = vector.shape_cast %77 : vector<16x128xf32> to vector<16x1x128xf32>
    %79 = vector.shape_cast %71 : vector<16x128xf32> to vector<1x16x128xf32>
    %80 = vector.broadcast %78 : vector<16x1x128xf32> to vector<16x16x128xf32>
    %81 = vector.broadcast %79 : vector<1x16x128xf32> to vector<16x16x128xf32>
    %82 = arith.mulf %80, %81 : vector<16x16x128xf32>
    %83 = arith.addf %65, %82 : vector<16x16x128xf32>
    %c0_22 = arith.constant 0 : index
    %c4 = arith.constant 4 : index
    %84 = memref.load %arg2[%c0_22, %c4] : memref<2x16xf32, #tpu.memory_space<smem>>
    %85 = vector.broadcast %84 : f32 to vector<16x128xf32>
    %86 = arith.mulf %0, %85 : vector<16x128xf32>
    %87 = vector.extract_strided_slice %1 {offsets = [0, 4], sizes = [16, 1], strides = [1, 1]} : vector<16x16xf32> to vector<16x1xf32>
    %88 = vector.broadcast %87 : vector<16x1xf32> to vector<16x128xf32>
    %89 = arith.addf %86, %88 : vector<16x128xf32>
    %c1_23 = arith.constant 1 : index
    %c4_24 = arith.constant 4 : index
    %90 = memref.load %arg2[%c1_23, %c4_24] : memref<2x16xf32, #tpu.memory_space<smem>>
    %91 = vector.broadcast %90 : f32 to vector<16x128xf32>
    %92 = arith.mulf %0, %91 : vector<16x128xf32>
    %93 = vector.extract_strided_slice %2 {offsets = [0, 4], sizes = [16, 1], strides = [1, 1]} : vector<16x16xf32> to vector<16x1xf32>
    %94 = vector.broadcast %93 : vector<16x1xf32> to vector<16x128xf32>
    %95 = arith.addf %92, %94 : vector<16x128xf32>
    %96 = vector.shape_cast %95 : vector<16x128xf32> to vector<16x1x128xf32>
    %97 = vector.shape_cast %89 : vector<16x128xf32> to vector<1x16x128xf32>
    %98 = vector.broadcast %96 : vector<16x1x128xf32> to vector<16x16x128xf32>
    %99 = vector.broadcast %97 : vector<1x16x128xf32> to vector<16x16x128xf32>
    %100 = arith.mulf %98, %99 : vector<16x16x128xf32>
    %101 = arith.addf %83, %100 : vector<16x16x128xf32>
    %c0_25 = arith.constant 0 : index
    %c5 = arith.constant 5 : index
    %102 = memref.load %arg2[%c0_25, %c5] : memref<2x16xf32, #tpu.memory_space<smem>>
    %103 = vector.broadcast %102 : f32 to vector<16x128xf32>
    %104 = arith.mulf %0, %103 : vector<16x128xf32>
    %105 = vector.extract_strided_slice %1 {offsets = [0, 5], sizes = [16, 1], strides = [1, 1]} : vector<16x16xf32> to vector<16x1xf32>
    %106 = vector.broadcast %105 : vector<16x1xf32> to vector<16x128xf32>
    %107 = arith.addf %104, %106 : vector<16x128xf32>
    %c1_26 = arith.constant 1 : index
    %c5_27 = arith.constant 5 : index
    %108 = memref.load %arg2[%c1_26, %c5_27] : memref<2x16xf32, #tpu.memory_space<smem>>
    %109 = vector.broadcast %108 : f32 to vector<16x128xf32>
    %110 = arith.mulf %0, %109 : vector<16x128xf32>
    %111 = vector.extract_strided_slice %2 {offsets = [0, 5], sizes = [16, 1], strides = [1, 1]} : vector<16x16xf32> to vector<16x1xf32>
    %112 = vector.broadcast %111 : vector<16x1xf32> to vector<16x128xf32>
    %113 = arith.addf %110, %112 : vector<16x128xf32>
    %114 = vector.shape_cast %113 : vector<16x128xf32> to vector<16x1x128xf32>
    %115 = vector.shape_cast %107 : vector<16x128xf32> to vector<1x16x128xf32>
    %116 = vector.broadcast %114 : vector<16x1x128xf32> to vector<16x16x128xf32>
    %117 = vector.broadcast %115 : vector<1x16x128xf32> to vector<16x16x128xf32>
    %118 = arith.mulf %116, %117 : vector<16x16x128xf32>
    %119 = arith.addf %101, %118 : vector<16x16x128xf32>
    %c0_28 = arith.constant 0 : index
    %c6 = arith.constant 6 : index
    %120 = memref.load %arg2[%c0_28, %c6] : memref<2x16xf32, #tpu.memory_space<smem>>
    %121 = vector.broadcast %120 : f32 to vector<16x128xf32>
    %122 = arith.mulf %0, %121 : vector<16x128xf32>
    %123 = vector.extract_strided_slice %1 {offsets = [0, 6], sizes = [16, 1], strides = [1, 1]} : vector<16x16xf32> to vector<16x1xf32>
    %124 = vector.broadcast %123 : vector<16x1xf32> to vector<16x128xf32>
    %125 = arith.addf %122, %124 : vector<16x128xf32>
    %c1_29 = arith.constant 1 : index
    %c6_30 = arith.constant 6 : index
    %126 = memref.load %arg2[%c1_29, %c6_30] : memref<2x16xf32, #tpu.memory_space<smem>>
    %127 = vector.broadcast %126 : f32 to vector<16x128xf32>
    %128 = arith.mulf %0, %127 : vector<16x128xf32>
    %129 = vector.extract_strided_slice %2 {offsets = [0, 6], sizes = [16, 1], strides = [1, 1]} : vector<16x16xf32> to vector<16x1xf32>
    %130 = vector.broadcast %129 : vector<16x1xf32> to vector<16x128xf32>
    %131 = arith.addf %128, %130 : vector<16x128xf32>
    %132 = vector.shape_cast %131 : vector<16x128xf32> to vector<16x1x128xf32>
    %133 = vector.shape_cast %125 : vector<16x128xf32> to vector<1x16x128xf32>
    %134 = vector.broadcast %132 : vector<16x1x128xf32> to vector<16x16x128xf32>
    %135 = vector.broadcast %133 : vector<1x16x128xf32> to vector<16x16x128xf32>
    %136 = arith.mulf %134, %135 : vector<16x16x128xf32>
    %137 = arith.addf %119, %136 : vector<16x16x128xf32>
    %c0_31 = arith.constant 0 : index
    %c7 = arith.constant 7 : index
    %138 = memref.load %arg2[%c0_31, %c7] : memref<2x16xf32, #tpu.memory_space<smem>>
    %139 = vector.broadcast %138 : f32 to vector<16x128xf32>
    %140 = arith.mulf %0, %139 : vector<16x128xf32>
    %141 = vector.extract_strided_slice %1 {offsets = [0, 7], sizes = [16, 1], strides = [1, 1]} : vector<16x16xf32> to vector<16x1xf32>
    %142 = vector.broadcast %141 : vector<16x1xf32> to vector<16x128xf32>
    %143 = arith.addf %140, %142 : vector<16x128xf32>
    %c1_32 = arith.constant 1 : index
    %c7_33 = arith.constant 7 : index
    %144 = memref.load %arg2[%c1_32, %c7_33] : memref<2x16xf32, #tpu.memory_space<smem>>
    %145 = vector.broadcast %144 : f32 to vector<16x128xf32>
    %146 = arith.mulf %0, %145 : vector<16x128xf32>
    %147 = vector.extract_strided_slice %2 {offsets = [0, 7], sizes = [16, 1], strides = [1, 1]} : vector<16x16xf32> to vector<16x1xf32>
    %148 = vector.broadcast %147 : vector<16x1xf32> to vector<16x128xf32>
    %149 = arith.addf %146, %148 : vector<16x128xf32>
    %150 = vector.shape_cast %149 : vector<16x128xf32> to vector<16x1x128xf32>
    %151 = vector.shape_cast %143 : vector<16x128xf32> to vector<1x16x128xf32>
    %152 = vector.broadcast %150 : vector<16x1x128xf32> to vector<16x16x128xf32>
    %153 = vector.broadcast %151 : vector<1x16x128xf32> to vector<16x16x128xf32>
    %154 = arith.mulf %152, %153 : vector<16x16x128xf32>
    %155 = arith.addf %137, %154 : vector<16x16x128xf32>
    %c0_34 = arith.constant 0 : index
    %c8 = arith.constant 8 : index
    %156 = memref.load %arg2[%c0_34, %c8] : memref<2x16xf32, #tpu.memory_space<smem>>
    %157 = vector.broadcast %156 : f32 to vector<16x128xf32>
    %158 = arith.mulf %0, %157 : vector<16x128xf32>
    %159 = vector.extract_strided_slice %1 {offsets = [0, 8], sizes = [16, 1], strides = [1, 1]} : vector<16x16xf32> to vector<16x1xf32>
    %160 = vector.broadcast %159 : vector<16x1xf32> to vector<16x128xf32>
    %161 = arith.addf %158, %160 : vector<16x128xf32>
    %c1_35 = arith.constant 1 : index
    %c8_36 = arith.constant 8 : index
    %162 = memref.load %arg2[%c1_35, %c8_36] : memref<2x16xf32, #tpu.memory_space<smem>>
    %163 = vector.broadcast %162 : f32 to vector<16x128xf32>
    %164 = arith.mulf %0, %163 : vector<16x128xf32>
    %165 = vector.extract_strided_slice %2 {offsets = [0, 8], sizes = [16, 1], strides = [1, 1]} : vector<16x16xf32> to vector<16x1xf32>
    %166 = vector.broadcast %165 : vector<16x1xf32> to vector<16x128xf32>
    %167 = arith.addf %164, %166 : vector<16x128xf32>
    %168 = vector.shape_cast %167 : vector<16x128xf32> to vector<16x1x128xf32>
    %169 = vector.shape_cast %161 : vector<16x128xf32> to vector<1x16x128xf32>
    %170 = vector.broadcast %168 : vector<16x1x128xf32> to vector<16x16x128xf32>
    %171 = vector.broadcast %169 : vector<1x16x128xf32> to vector<16x16x128xf32>
    %172 = arith.mulf %170, %171 : vector<16x16x128xf32>
    %173 = arith.addf %155, %172 : vector<16x16x128xf32>
    %c0_37 = arith.constant 0 : index
    %c9 = arith.constant 9 : index
    %174 = memref.load %arg2[%c0_37, %c9] : memref<2x16xf32, #tpu.memory_space<smem>>
    %175 = vector.broadcast %174 : f32 to vector<16x128xf32>
    %176 = arith.mulf %0, %175 : vector<16x128xf32>
    %177 = vector.extract_strided_slice %1 {offsets = [0, 9], sizes = [16, 1], strides = [1, 1]} : vector<16x16xf32> to vector<16x1xf32>
    %178 = vector.broadcast %177 : vector<16x1xf32> to vector<16x128xf32>
    %179 = arith.addf %176, %178 : vector<16x128xf32>
    %c1_38 = arith.constant 1 : index
    %c9_39 = arith.constant 9 : index
    %180 = memref.load %arg2[%c1_38, %c9_39] : memref<2x16xf32, #tpu.memory_space<smem>>
    %181 = vector.broadcast %180 : f32 to vector<16x128xf32>
    %182 = arith.mulf %0, %181 : vector<16x128xf32>
    %183 = vector.extract_strided_slice %2 {offsets = [0, 9], sizes = [16, 1], strides = [1, 1]} : vector<16x16xf32> to vector<16x1xf32>
    %184 = vector.broadcast %183 : vector<16x1xf32> to vector<16x128xf32>
    %185 = arith.addf %182, %184 : vector<16x128xf32>
    %186 = vector.shape_cast %185 : vector<16x128xf32> to vector<16x1x128xf32>
    %187 = vector.shape_cast %179 : vector<16x128xf32> to vector<1x16x128xf32>
    %188 = vector.broadcast %186 : vector<16x1x128xf32> to vector<16x16x128xf32>
    %189 = vector.broadcast %187 : vector<1x16x128xf32> to vector<16x16x128xf32>
    %190 = arith.mulf %188, %189 : vector<16x16x128xf32>
    %191 = arith.addf %173, %190 : vector<16x16x128xf32>
    %c0_40 = arith.constant 0 : index
    %c10 = arith.constant 10 : index
    %192 = memref.load %arg2[%c0_40, %c10] : memref<2x16xf32, #tpu.memory_space<smem>>
    %193 = vector.broadcast %192 : f32 to vector<16x128xf32>
    %194 = arith.mulf %0, %193 : vector<16x128xf32>
    %195 = vector.extract_strided_slice %1 {offsets = [0, 10], sizes = [16, 1], strides = [1, 1]} : vector<16x16xf32> to vector<16x1xf32>
    %196 = vector.broadcast %195 : vector<16x1xf32> to vector<16x128xf32>
    %197 = arith.addf %194, %196 : vector<16x128xf32>
    %c1_41 = arith.constant 1 : index
    %c10_42 = arith.constant 10 : index
    %198 = memref.load %arg2[%c1_41, %c10_42] : memref<2x16xf32, #tpu.memory_space<smem>>
    %199 = vector.broadcast %198 : f32 to vector<16x128xf32>
    %200 = arith.mulf %0, %199 : vector<16x128xf32>
    %201 = vector.extract_strided_slice %2 {offsets = [0, 10], sizes = [16, 1], strides = [1, 1]} : vector<16x16xf32> to vector<16x1xf32>
    %202 = vector.broadcast %201 : vector<16x1xf32> to vector<16x128xf32>
    %203 = arith.addf %200, %202 : vector<16x128xf32>
    %204 = vector.shape_cast %203 : vector<16x128xf32> to vector<16x1x128xf32>
    %205 = vector.shape_cast %197 : vector<16x128xf32> to vector<1x16x128xf32>
    %206 = vector.broadcast %204 : vector<16x1x128xf32> to vector<16x16x128xf32>
    %207 = vector.broadcast %205 : vector<1x16x128xf32> to vector<16x16x128xf32>
    %208 = arith.mulf %206, %207 : vector<16x16x128xf32>
    %209 = arith.addf %191, %208 : vector<16x16x128xf32>
    %c0_43 = arith.constant 0 : index
    %c11 = arith.constant 11 : index
    %210 = memref.load %arg2[%c0_43, %c11] : memref<2x16xf32, #tpu.memory_space<smem>>
    %211 = vector.broadcast %210 : f32 to vector<16x128xf32>
    %212 = arith.mulf %0, %211 : vector<16x128xf32>
    %213 = vector.extract_strided_slice %1 {offsets = [0, 11], sizes = [16, 1], strides = [1, 1]} : vector<16x16xf32> to vector<16x1xf32>
    %214 = vector.broadcast %213 : vector<16x1xf32> to vector<16x128xf32>
    %215 = arith.addf %212, %214 : vector<16x128xf32>
    %c1_44 = arith.constant 1 : index
    %c11_45 = arith.constant 11 : index
    %216 = memref.load %arg2[%c1_44, %c11_45] : memref<2x16xf32, #tpu.memory_space<smem>>
    %217 = vector.broadcast %216 : f32 to vector<16x128xf32>
    %218 = arith.mulf %0, %217 : vector<16x128xf32>
    %219 = vector.extract_strided_slice %2 {offsets = [0, 11], sizes = [16, 1], strides = [1, 1]} : vector<16x16xf32> to vector<16x1xf32>
    %220 = vector.broadcast %219 : vector<16x1xf32> to vector<16x128xf32>
    %221 = arith.addf %218, %220 : vector<16x128xf32>
    %222 = vector.shape_cast %221 : vector<16x128xf32> to vector<16x1x128xf32>
    %223 = vector.shape_cast %215 : vector<16x128xf32> to vector<1x16x128xf32>
    %224 = vector.broadcast %222 : vector<16x1x128xf32> to vector<16x16x128xf32>
    %225 = vector.broadcast %223 : vector<1x16x128xf32> to vector<16x16x128xf32>
    %226 = arith.mulf %224, %225 : vector<16x16x128xf32>
    %227 = arith.addf %209, %226 : vector<16x16x128xf32>
    %c0_46 = arith.constant 0 : index
    %c12 = arith.constant 12 : index
    %228 = memref.load %arg2[%c0_46, %c12] : memref<2x16xf32, #tpu.memory_space<smem>>
    %229 = vector.broadcast %228 : f32 to vector<16x128xf32>
    %230 = arith.mulf %0, %229 : vector<16x128xf32>
    %231 = vector.extract_strided_slice %1 {offsets = [0, 12], sizes = [16, 1], strides = [1, 1]} : vector<16x16xf32> to vector<16x1xf32>
    %232 = vector.broadcast %231 : vector<16x1xf32> to vector<16x128xf32>
    %233 = arith.addf %230, %232 : vector<16x128xf32>
    %c1_47 = arith.constant 1 : index
    %c12_48 = arith.constant 12 : index
    %234 = memref.load %arg2[%c1_47, %c12_48] : memref<2x16xf32, #tpu.memory_space<smem>>
    %235 = vector.broadcast %234 : f32 to vector<16x128xf32>
    %236 = arith.mulf %0, %235 : vector<16x128xf32>
    %237 = vector.extract_strided_slice %2 {offsets = [0, 12], sizes = [16, 1], strides = [1, 1]} : vector<16x16xf32> to vector<16x1xf32>
    %238 = vector.broadcast %237 : vector<16x1xf32> to vector<16x128xf32>
    %239 = arith.addf %236, %238 : vector<16x128xf32>
    %240 = vector.shape_cast %239 : vector<16x128xf32> to vector<16x1x128xf32>
    %241 = vector.shape_cast %233 : vector<16x128xf32> to vector<1x16x128xf32>
    %242 = vector.broadcast %240 : vector<16x1x128xf32> to vector<16x16x128xf32>
    %243 = vector.broadcast %241 : vector<1x16x128xf32> to vector<16x16x128xf32>
    %244 = arith.mulf %242, %243 : vector<16x16x128xf32>
    %245 = arith.addf %227, %244 : vector<16x16x128xf32>
    %c0_49 = arith.constant 0 : index
    %c13 = arith.constant 13 : index
    %246 = memref.load %arg2[%c0_49, %c13] : memref<2x16xf32, #tpu.memory_space<smem>>
    %247 = vector.broadcast %246 : f32 to vector<16x128xf32>
    %248 = arith.mulf %0, %247 : vector<16x128xf32>
    %249 = vector.extract_strided_slice %1 {offsets = [0, 13], sizes = [16, 1], strides = [1, 1]} : vector<16x16xf32> to vector<16x1xf32>
    %250 = vector.broadcast %249 : vector<16x1xf32> to vector<16x128xf32>
    %251 = arith.addf %248, %250 : vector<16x128xf32>
    %c1_50 = arith.constant 1 : index
    %c13_51 = arith.constant 13 : index
    %252 = memref.load %arg2[%c1_50, %c13_51] : memref<2x16xf32, #tpu.memory_space<smem>>
    %253 = vector.broadcast %252 : f32 to vector<16x128xf32>
    %254 = arith.mulf %0, %253 : vector<16x128xf32>
    %255 = vector.extract_strided_slice %2 {offsets = [0, 13], sizes = [16, 1], strides = [1, 1]} : vector<16x16xf32> to vector<16x1xf32>
    %256 = vector.broadcast %255 : vector<16x1xf32> to vector<16x128xf32>
    %257 = arith.addf %254, %256 : vector<16x128xf32>
    %258 = vector.shape_cast %257 : vector<16x128xf32> to vector<16x1x128xf32>
    %259 = vector.shape_cast %251 : vector<16x128xf32> to vector<1x16x128xf32>
    %260 = vector.broadcast %258 : vector<16x1x128xf32> to vector<16x16x128xf32>
    %261 = vector.broadcast %259 : vector<1x16x128xf32> to vector<16x16x128xf32>
    %262 = arith.mulf %260, %261 : vector<16x16x128xf32>
    %263 = arith.addf %245, %262 : vector<16x16x128xf32>
    %c0_52 = arith.constant 0 : index
    %c14 = arith.constant 14 : index
    %264 = memref.load %arg2[%c0_52, %c14] : memref<2x16xf32, #tpu.memory_space<smem>>
    %265 = vector.broadcast %264 : f32 to vector<16x128xf32>
    %266 = arith.mulf %0, %265 : vector<16x128xf32>
    %267 = vector.extract_strided_slice %1 {offsets = [0, 14], sizes = [16, 1], strides = [1, 1]} : vector<16x16xf32> to vector<16x1xf32>
    %268 = vector.broadcast %267 : vector<16x1xf32> to vector<16x128xf32>
    %269 = arith.addf %266, %268 : vector<16x128xf32>
    %c1_53 = arith.constant 1 : index
    %c14_54 = arith.constant 14 : index
    %270 = memref.load %arg2[%c1_53, %c14_54] : memref<2x16xf32, #tpu.memory_space<smem>>
    %271 = vector.broadcast %270 : f32 to vector<16x128xf32>
    %272 = arith.mulf %0, %271 : vector<16x128xf32>
    %273 = vector.extract_strided_slice %2 {offsets = [0, 14], sizes = [16, 1], strides = [1, 1]} : vector<16x16xf32> to vector<16x1xf32>
    %274 = vector.broadcast %273 : vector<16x1xf32> to vector<16x128xf32>
    %275 = arith.addf %272, %274 : vector<16x128xf32>
    %276 = vector.shape_cast %275 : vector<16x128xf32> to vector<16x1x128xf32>
    %277 = vector.shape_cast %269 : vector<16x128xf32> to vector<1x16x128xf32>
    %278 = vector.broadcast %276 : vector<16x1x128xf32> to vector<16x16x128xf32>
    %279 = vector.broadcast %277 : vector<1x16x128xf32> to vector<16x16x128xf32>
    %280 = arith.mulf %278, %279 : vector<16x16x128xf32>
    %281 = arith.addf %263, %280 : vector<16x16x128xf32>
    %c0_55 = arith.constant 0 : index
    %c15 = arith.constant 15 : index
    %282 = memref.load %arg2[%c0_55, %c15] : memref<2x16xf32, #tpu.memory_space<smem>>
    %283 = vector.broadcast %282 : f32 to vector<16x128xf32>
    %284 = arith.mulf %0, %283 : vector<16x128xf32>
    %285 = vector.extract_strided_slice %1 {offsets = [0, 15], sizes = [16, 1], strides = [1, 1]} : vector<16x16xf32> to vector<16x1xf32>
    %286 = vector.broadcast %285 : vector<16x1xf32> to vector<16x128xf32>
    %287 = arith.addf %284, %286 : vector<16x128xf32>
    %c1_56 = arith.constant 1 : index
    %c15_57 = arith.constant 15 : index
    %288 = memref.load %arg2[%c1_56, %c15_57] : memref<2x16xf32, #tpu.memory_space<smem>>
    %289 = vector.broadcast %288 : f32 to vector<16x128xf32>
    %290 = arith.mulf %0, %289 : vector<16x128xf32>
    %291 = vector.extract_strided_slice %2 {offsets = [0, 15], sizes = [16, 1], strides = [1, 1]} : vector<16x16xf32> to vector<16x1xf32>
    %292 = vector.broadcast %291 : vector<16x1xf32> to vector<16x128xf32>
    %293 = arith.addf %290, %292 : vector<16x128xf32>
    %294 = vector.shape_cast %293 : vector<16x128xf32> to vector<16x1x128xf32>
    %295 = vector.shape_cast %287 : vector<16x128xf32> to vector<1x16x128xf32>
    %296 = vector.broadcast %294 : vector<16x1x128xf32> to vector<16x16x128xf32>
    %297 = vector.broadcast %295 : vector<1x16x128xf32> to vector<16x16x128xf32>
    %298 = arith.mulf %296, %297 : vector<16x16x128xf32>
    %299 = arith.addf %281, %298 : vector<16x16x128xf32>
    %cst = arith.constant 0.707106769 : f32
    %300 = vector.broadcast %cst : f32 to vector<16x16x128xf32>
    %301 = arith.mulf %299, %300 : vector<16x16x128xf32>
    %cst_58 = arith.constant dense<0xFF800000> : vector<16x128xf32>
    %302 = vector.multi_reduction <maximumf>, %301, %cst_58 [0] : vector<16x16x128xf32> to vector<16x128xf32>
    %303 = vector.shape_cast %302 : vector<16x128xf32> to vector<1x16x128xf32>
    %304 = vector.broadcast %303 : vector<1x16x128xf32> to vector<16x16x128xf32>
    %305 = arith.subf %301, %304 : vector<16x16x128xf32>
    %306 = math.exp %305 : vector<16x16x128xf32>
    %cst_59 = arith.constant dense<0.000000e+00> : vector<16x128xf32>
    %307 = vector.multi_reduction <add>, %306, %cst_59 [0] : vector<16x16x128xf32> to vector<16x128xf32>
    %308 = vector.shape_cast %307 : vector<16x128xf32> to vector<1x16x128xf32>
    %309 = tpu.reciprocal %308 : vector<1x16x128xf32> -> vector<1x16x128xf32>
    %310 = vector.broadcast %309 : vector<1x16x128xf32> to vector<16x16x128xf32>
    %311 = arith.mulf %306, %310 : vector<16x16x128xf32>
    %312 = vector.extract_strided_slice %311 {offsets = [0, 0, 0], sizes = [1, 16, 128], strides = [1, 1, 1]} : vector<16x16x128xf32> to vector<1x16x128xf32>
    %313 = vector.shape_cast %312 : vector<1x16x128xf32> to vector<16x128xf32>
    %314 = vector.shape_cast %313 : vector<16x128xf32> to vector<16x1x128xf32>
    %315 = vector.extract_strided_slice %12 {offsets = [0, 0, 0], sizes = [1, 16, 128], strides = [1, 1, 1]} : vector<16x16x128xf32> to vector<1x16x128xf32>
    %316 = vector.shape_cast %315 : vector<1x16x128xf32> to vector<16x128xf32>
    %317 = vector.shape_cast %316 : vector<16x128xf32> to vector<1x16x128xf32>
    %318 = vector.broadcast %314 : vector<16x1x128xf32> to vector<16x16x128xf32>
    %319 = vector.broadcast %317 : vector<1x16x128xf32> to vector<16x16x128xf32>
    %320 = arith.mulf %318, %319 : vector<16x16x128xf32>
    %321 = vector.extract_strided_slice %311 {offsets = [1, 0, 0], sizes = [1, 16, 128], strides = [1, 1, 1]} : vector<16x16x128xf32> to vector<1x16x128xf32>
    %322 = vector.shape_cast %321 : vector<1x16x128xf32> to vector<16x128xf32>
    %323 = vector.shape_cast %322 : vector<16x128xf32> to vector<16x1x128xf32>
    %324 = vector.extract_strided_slice %12 {offsets = [1, 0, 0], sizes = [1, 16, 128], strides = [1, 1, 1]} : vector<16x16x128xf32> to vector<1x16x128xf32>
    %325 = vector.shape_cast %324 : vector<1x16x128xf32> to vector<16x128xf32>
    %326 = vector.shape_cast %325 : vector<16x128xf32> to vector<1x16x128xf32>
    %327 = vector.broadcast %323 : vector<16x1x128xf32> to vector<16x16x128xf32>
    %328 = vector.broadcast %326 : vector<1x16x128xf32> to vector<16x16x128xf32>
    %329 = arith.mulf %327, %328 : vector<16x16x128xf32>
    %330 = arith.addf %320, %329 : vector<16x16x128xf32>
    %331 = vector.extract_strided_slice %311 {offsets = [2, 0, 0], sizes = [1, 16, 128], strides = [1, 1, 1]} : vector<16x16x128xf32> to vector<1x16x128xf32>
    %332 = vector.shape_cast %331 : vector<1x16x128xf32> to vector<16x128xf32>
    %333 = vector.shape_cast %332 : vector<16x128xf32> to vector<16x1x128xf32>
    %334 = vector.extract_strided_slice %12 {offsets = [2, 0, 0], sizes = [1, 16, 128], strides = [1, 1, 1]} : vector<16x16x128xf32> to vector<1x16x128xf32>
    %335 = vector.shape_cast %334 : vector<1x16x128xf32> to vector<16x128xf32>
    %336 = vector.shape_cast %335 : vector<16x128xf32> to vector<1x16x128xf32>
    %337 = vector.broadcast %333 : vector<16x1x128xf32> to vector<16x16x128xf32>
    %338 = vector.broadcast %336 : vector<1x16x128xf32> to vector<16x16x128xf32>
    %339 = arith.mulf %337, %338 : vector<16x16x128xf32>
    %340 = arith.addf %330, %339 : vector<16x16x128xf32>
    %341 = vector.extract_strided_slice %311 {offsets = [3, 0, 0], sizes = [1, 16, 128], strides = [1, 1, 1]} : vector<16x16x128xf32> to vector<1x16x128xf32>
    %342 = vector.shape_cast %341 : vector<1x16x128xf32> to vector<16x128xf32>
    %343 = vector.shape_cast %342 : vector<16x128xf32> to vector<16x1x128xf32>
    %344 = vector.extract_strided_slice %12 {offsets = [3, 0, 0], sizes = [1, 16, 128], strides = [1, 1, 1]} : vector<16x16x128xf32> to vector<1x16x128xf32>
    %345 = vector.shape_cast %344 : vector<1x16x128xf32> to vector<16x128xf32>
    %346 = vector.shape_cast %345 : vector<16x128xf32> to vector<1x16x128xf32>
    %347 = vector.broadcast %343 : vector<16x1x128xf32> to vector<16x16x128xf32>
    %348 = vector.broadcast %346 : vector<1x16x128xf32> to vector<16x16x128xf32>
    %349 = arith.mulf %347, %348 : vector<16x16x128xf32>
    %350 = arith.addf %340, %349 : vector<16x16x128xf32>
    %351 = vector.extract_strided_slice %311 {offsets = [4, 0, 0], sizes = [1, 16, 128], strides = [1, 1, 1]} : vector<16x16x128xf32> to vector<1x16x128xf32>
    %352 = vector.shape_cast %351 : vector<1x16x128xf32> to vector<16x128xf32>
    %353 = vector.shape_cast %352 : vector<16x128xf32> to vector<16x1x128xf32>
    %354 = vector.extract_strided_slice %12 {offsets = [4, 0, 0], sizes = [1, 16, 128], strides = [1, 1, 1]} : vector<16x16x128xf32> to vector<1x16x128xf32>
    %355 = vector.shape_cast %354 : vector<1x16x128xf32> to vector<16x128xf32>
    %356 = vector.shape_cast %355 : vector<16x128xf32> to vector<1x16x128xf32>
    %357 = vector.broadcast %353 : vector<16x1x128xf32> to vector<16x16x128xf32>
    %358 = vector.broadcast %356 : vector<1x16x128xf32> to vector<16x16x128xf32>
    %359 = arith.mulf %357, %358 : vector<16x16x128xf32>
    %360 = arith.addf %350, %359 : vector<16x16x128xf32>
    %361 = vector.extract_strided_slice %311 {offsets = [5, 0, 0], sizes = [1, 16, 128], strides = [1, 1, 1]} : vector<16x16x128xf32> to vector<1x16x128xf32>
    %362 = vector.shape_cast %361 : vector<1x16x128xf32> to vector<16x128xf32>
    %363 = vector.shape_cast %362 : vector<16x128xf32> to vector<16x1x128xf32>
    %364 = vector.extract_strided_slice %12 {offsets = [5, 0, 0], sizes = [1, 16, 128], strides = [1, 1, 1]} : vector<16x16x128xf32> to vector<1x16x128xf32>
    %365 = vector.shape_cast %364 : vector<1x16x128xf32> to vector<16x128xf32>
    %366 = vector.shape_cast %365 : vector<16x128xf32> to vector<1x16x128xf32>
    %367 = vector.broadcast %363 : vector<16x1x128xf32> to vector<16x16x128xf32>
    %368 = vector.broadcast %366 : vector<1x16x128xf32> to vector<16x16x128xf32>
    %369 = arith.mulf %367, %368 : vector<16x16x128xf32>
    %370 = arith.addf %360, %369 : vector<16x16x128xf32>
    %371 = vector.extract_strided_slice %311 {offsets = [6, 0, 0], sizes = [1, 16, 128], strides = [1, 1, 1]} : vector<16x16x128xf32> to vector<1x16x128xf32>
    %372 = vector.shape_cast %371 : vector<1x16x128xf32> to vector<16x128xf32>
    %373 = vector.shape_cast %372 : vector<16x128xf32> to vector<16x1x128xf32>
    %374 = vector.extract_strided_slice %12 {offsets = [6, 0, 0], sizes = [1, 16, 128], strides = [1, 1, 1]} : vector<16x16x128xf32> to vector<1x16x128xf32>
    %375 = vector.shape_cast %374 : vector<1x16x128xf32> to vector<16x128xf32>
    %376 = vector.shape_cast %375 : vector<16x128xf32> to vector<1x16x128xf32>
    %377 = vector.broadcast %373 : vector<16x1x128xf32> to vector<16x16x128xf32>
    %378 = vector.broadcast %376 : vector<1x16x128xf32> to vector<16x16x128xf32>
    %379 = arith.mulf %377, %378 : vector<16x16x128xf32>
    %380 = arith.addf %370, %379 : vector<16x16x128xf32>
    %381 = vector.extract_strided_slice %311 {offsets = [7, 0, 0], sizes = [1, 16, 128], strides = [1, 1, 1]} : vector<16x16x128xf32> to vector<1x16x128xf32>
    %382 = vector.shape_cast %381 : vector<1x16x128xf32> to vector<16x128xf32>
    %383 = vector.shape_cast %382 : vector<16x128xf32> to vector<16x1x128xf32>
    %384 = vector.extract_strided_slice %12 {offsets = [7, 0, 0], sizes = [1, 16, 128], strides = [1, 1, 1]} : vector<16x16x128xf32> to vector<1x16x128xf32>
    %385 = vector.shape_cast %384 : vector<1x16x128xf32> to vector<16x128xf32>
    %386 = vector.shape_cast %385 : vector<16x128xf32> to vector<1x16x128xf32>
    %387 = vector.broadcast %383 : vector<16x1x128xf32> to vector<16x16x128xf32>
    %388 = vector.broadcast %386 : vector<1x16x128xf32> to vector<16x16x128xf32>
    %389 = arith.mulf %387, %388 : vector<16x16x128xf32>
    %390 = arith.addf %380, %389 : vector<16x16x128xf32>
    %391 = vector.extract_strided_slice %311 {offsets = [8, 0, 0], sizes = [1, 16, 128], strides = [1, 1, 1]} : vector<16x16x128xf32> to vector<1x16x128xf32>
    %392 = vector.shape_cast %391 : vector<1x16x128xf32> to vector<16x128xf32>
    %393 = vector.shape_cast %392 : vector<16x128xf32> to vector<16x1x128xf32>
    %394 = vector.extract_strided_slice %12 {offsets = [8, 0, 0], sizes = [1, 16, 128], strides = [1, 1, 1]} : vector<16x16x128xf32> to vector<1x16x128xf32>
    %395 = vector.shape_cast %394 : vector<1x16x128xf32> to vector<16x128xf32>
    %396 = vector.shape_cast %395 : vector<16x128xf32> to vector<1x16x128xf32>
    %397 = vector.broadcast %393 : vector<16x1x128xf32> to vector<16x16x128xf32>
    %398 = vector.broadcast %396 : vector<1x16x128xf32> to vector<16x16x128xf32>
    %399 = arith.mulf %397, %398 : vector<16x16x128xf32>
    %400 = arith.addf %390, %399 : vector<16x16x128xf32>
    %401 = vector.extract_strided_slice %311 {offsets = [9, 0, 0], sizes = [1, 16, 128], strides = [1, 1, 1]} : vector<16x16x128xf32> to vector<1x16x128xf32>
    %402 = vector.shape_cast %401 : vector<1x16x128xf32> to vector<16x128xf32>
    %403 = vector.shape_cast %402 : vector<16x128xf32> to vector<16x1x128xf32>
    %404 = vector.extract_strided_slice %12 {offsets = [9, 0, 0], sizes = [1, 16, 128], strides = [1, 1, 1]} : vector<16x16x128xf32> to vector<1x16x128xf32>
    %405 = vector.shape_cast %404 : vector<1x16x128xf32> to vector<16x128xf32>
    %406 = vector.shape_cast %405 : vector<16x128xf32> to vector<1x16x128xf32>
    %407 = vector.broadcast %403 : vector<16x1x128xf32> to vector<16x16x128xf32>
    %408 = vector.broadcast %406 : vector<1x16x128xf32> to vector<16x16x128xf32>
    %409 = arith.mulf %407, %408 : vector<16x16x128xf32>
    %410 = arith.addf %400, %409 : vector<16x16x128xf32>
    %411 = vector.extract_strided_slice %311 {offsets = [10, 0, 0], sizes = [1, 16, 128], strides = [1, 1, 1]} : vector<16x16x128xf32> to vector<1x16x128xf32>
    %412 = vector.shape_cast %411 : vector<1x16x128xf32> to vector<16x128xf32>
    %413 = vector.shape_cast %412 : vector<16x128xf32> to vector<16x1x128xf32>
    %414 = vector.extract_strided_slice %12 {offsets = [10, 0, 0], sizes = [1, 16, 128], strides = [1, 1, 1]} : vector<16x16x128xf32> to vector<1x16x128xf32>
    %415 = vector.shape_cast %414 : vector<1x16x128xf32> to vector<16x128xf32>
    %416 = vector.shape_cast %415 : vector<16x128xf32> to vector<1x16x128xf32>
    %417 = vector.broadcast %413 : vector<16x1x128xf32> to vector<16x16x128xf32>
    %418 = vector.broadcast %416 : vector<1x16x128xf32> to vector<16x16x128xf32>
    %419 = arith.mulf %417, %418 : vector<16x16x128xf32>
    %420 = arith.addf %410, %419 : vector<16x16x128xf32>
    %421 = vector.extract_strided_slice %311 {offsets = [11, 0, 0], sizes = [1, 16, 128], strides = [1, 1, 1]} : vector<16x16x128xf32> to vector<1x16x128xf32>
    %422 = vector.shape_cast %421 : vector<1x16x128xf32> to vector<16x128xf32>
    %423 = vector.shape_cast %422 : vector<16x128xf32> to vector<16x1x128xf32>
    %424 = vector.extract_strided_slice %12 {offsets = [11, 0, 0], sizes = [1, 16, 128], strides = [1, 1, 1]} : vector<16x16x128xf32> to vector<1x16x128xf32>
    %425 = vector.shape_cast %424 : vector<1x16x128xf32> to vector<16x128xf32>
    %426 = vector.shape_cast %425 : vector<16x128xf32> to vector<1x16x128xf32>
    %427 = vector.broadcast %423 : vector<16x1x128xf32> to vector<16x16x128xf32>
    %428 = vector.broadcast %426 : vector<1x16x128xf32> to vector<16x16x128xf32>
    %429 = arith.mulf %427, %428 : vector<16x16x128xf32>
    %430 = arith.addf %420, %429 : vector<16x16x128xf32>
    %431 = vector.extract_strided_slice %311 {offsets = [12, 0, 0], sizes = [1, 16, 128], strides = [1, 1, 1]} : vector<16x16x128xf32> to vector<1x16x128xf32>
    %432 = vector.shape_cast %431 : vector<1x16x128xf32> to vector<16x128xf32>
    %433 = vector.shape_cast %432 : vector<16x128xf32> to vector<16x1x128xf32>
    %434 = vector.extract_strided_slice %12 {offsets = [12, 0, 0], sizes = [1, 16, 128], strides = [1, 1, 1]} : vector<16x16x128xf32> to vector<1x16x128xf32>
    %435 = vector.shape_cast %434 : vector<1x16x128xf32> to vector<16x128xf32>
    %436 = vector.shape_cast %435 : vector<16x128xf32> to vector<1x16x128xf32>
    %437 = vector.broadcast %433 : vector<16x1x128xf32> to vector<16x16x128xf32>
    %438 = vector.broadcast %436 : vector<1x16x128xf32> to vector<16x16x128xf32>
    %439 = arith.mulf %437, %438 : vector<16x16x128xf32>
    %440 = arith.addf %430, %439 : vector<16x16x128xf32>
    %441 = vector.extract_strided_slice %311 {offsets = [13, 0, 0], sizes = [1, 16, 128], strides = [1, 1, 1]} : vector<16x16x128xf32> to vector<1x16x128xf32>
    %442 = vector.shape_cast %441 : vector<1x16x128xf32> to vector<16x128xf32>
    %443 = vector.shape_cast %442 : vector<16x128xf32> to vector<16x1x128xf32>
    %444 = vector.extract_strided_slice %12 {offsets = [13, 0, 0], sizes = [1, 16, 128], strides = [1, 1, 1]} : vector<16x16x128xf32> to vector<1x16x128xf32>
    %445 = vector.shape_cast %444 : vector<1x16x128xf32> to vector<16x128xf32>
    %446 = vector.shape_cast %445 : vector<16x128xf32> to vector<1x16x128xf32>
    %447 = vector.broadcast %443 : vector<16x1x128xf32> to vector<16x16x128xf32>
    %448 = vector.broadcast %446 : vector<1x16x128xf32> to vector<16x16x128xf32>
    %449 = arith.mulf %447, %448 : vector<16x16x128xf32>
    %450 = arith.addf %440, %449 : vector<16x16x128xf32>
    %451 = vector.extract_strided_slice %311 {offsets = [14, 0, 0], sizes = [1, 16, 128], strides = [1, 1, 1]} : vector<16x16x128xf32> to vector<1x16x128xf32>
    %452 = vector.shape_cast %451 : vector<1x16x128xf32> to vector<16x128xf32>
    %453 = vector.shape_cast %452 : vector<16x128xf32> to vector<16x1x128xf32>
    %454 = vector.extract_strided_slice %12 {offsets = [14, 0, 0], sizes = [1, 16, 128], strides = [1, 1, 1]} : vector<16x16x128xf32> to vector<1x16x128xf32>
    %455 = vector.shape_cast %454 : vector<1x16x128xf32> to vector<16x128xf32>
    %456 = vector.shape_cast %455 : vector<16x128xf32> to vector<1x16x128xf32>
    %457 = vector.broadcast %453 : vector<16x1x128xf32> to vector<16x16x128xf32>
    %458 = vector.broadcast %456 : vector<1x16x128xf32> to vector<16x16x128xf32>
    %459 = arith.mulf %457, %458 : vector<16x16x128xf32>
    %460 = arith.addf %450, %459 : vector<16x16x128xf32>
    %461 = vector.extract_strided_slice %311 {offsets = [15, 0, 0], sizes = [1, 16, 128], strides = [1, 1, 1]} : vector<16x16x128xf32> to vector<1x16x128xf32>
    %462 = vector.shape_cast %461 : vector<1x16x128xf32> to vector<16x128xf32>
    %463 = vector.shape_cast %462 : vector<16x128xf32> to vector<16x1x128xf32>
    %464 = vector.extract_strided_slice %12 {offsets = [15, 0, 0], sizes = [1, 16, 128], strides = [1, 1, 1]} : vector<16x16x128xf32> to vector<1x16x128xf32>
    %465 = vector.shape_cast %464 : vector<1x16x128xf32> to vector<16x128xf32>
    %466 = vector.shape_cast %465 : vector<16x128xf32> to vector<1x16x128xf32>
    %467 = vector.broadcast %463 : vector<16x1x128xf32> to vector<16x16x128xf32>
    %468 = vector.broadcast %466 : vector<1x16x128xf32> to vector<16x16x128xf32>
    %469 = arith.mulf %467, %468 : vector<16x16x128xf32>
    %470 = arith.addf %460, %469 : vector<16x16x128xf32>
    %471 = vector.shape_cast %470 : vector<16x16x128xf32> to vector<256x128xf32>
    %c0_60 = arith.constant 0 : index
    %c0_61 = arith.constant 0 : index
    %472 = vector.load %arg7[%c0_60, %c0_61] : memref<64x256xf32, #tpu.memory_space<vmem>>, vector<64x256xf32>
    %cst_62 = arith.constant dense<0.000000e+00> : vector<64x128xf32>
    %473 = tpu.matmul %472, %471, %cst_62 {dimension_numbers = #tpu.dot_dimension_numbers<[1], [0], [0], [1], [0, 0, 1, 1], [], []>} : vector<64x256xf32>, vector<256x128xf32>, vector<64x128xf32> -> vector<64x128xf32>
    %c0_63 = arith.constant 0 : index
    %c0_64 = arith.constant 0 : index
    %474 = vector.load %arg8[%c0_63, %c0_64] : memref<64x1xf32, #tpu.memory_space<vmem>>, vector<64x1xf32>
    %475 = vector.broadcast %474 : vector<64x1xf32> to vector<64x128xf32>
    %476 = arith.addf %473, %475 : vector<64x128xf32>
    %cst_65 = arith.constant 0.000000e+00 : f32
    %477 = vector.broadcast %cst_65 : f32 to vector<64x128xf32>
    %478 = arith.cmpf oge, %476, %477 : vector<64x128xf32>
    %cst_66 = arith.constant 0.00999999977 : f32
    %479 = vector.broadcast %cst_66 : f32 to vector<64x128xf32>
    %480 = arith.mulf %479, %476 : vector<64x128xf32>
    %481 = arith.select %478, %476, %480 : vector<64x128xi1>, vector<64x128xf32>
    %c0_67 = arith.constant 0 : index
    %c0_68 = arith.constant 0 : index
    %482 = vector.load %arg9[%c0_67, %c0_68] : memref<4x64xf32, #tpu.memory_space<vmem>>, vector<4x64xf32>
    %cst_69 = arith.constant dense<0.000000e+00> : vector<4x128xf32>
    %483 = tpu.matmul %482, %481, %cst_69 {dimension_numbers = #tpu.dot_dimension_numbers<[1], [0], [0], [1], [0, 0, 1, 1], [], []>} : vector<4x64xf32>, vector<64x128xf32>, vector<4x128xf32> -> vector<4x128xf32>
    %c0_70 = arith.constant 0 : index
    %c0_71 = arith.constant 0 : index
    %484 = vector.load %arg10[%c0_70, %c0_71] : memref<4x1xf32, #tpu.memory_space<vmem>>, vector<4x1xf32>
    %485 = vector.broadcast %484 : vector<4x1xf32> to vector<4x128xf32>
    %486 = arith.addf %483, %485 : vector<4x128xf32>
    %c0_72 = arith.constant 0 : index
    %c0_73 = arith.constant 0 : index
    %487 = vector.load %arg11[%c0_72, %c0_73] : memref<4x128xf32, #tpu.memory_space<vmem>>, vector<4x128xf32>
    tpu.vector_store %arg11[%c0_72, %c0_73], %486 {strides = array<i32>} : memref<4x128xf32, #tpu.memory_space<vmem>>, vector<4x128xf32>,
    return
  }
  func.func @transform_0(%arg0: i32) -> (i32, i32) {
    %c0_i32 = arith.constant 0 : i32
    %c0_i32_0 = arith.constant 0 : i32
    return %c0_i32, %arg0 : i32, i32
  }
  func.func @transform_1(%arg0: i32) -> (i32, i32) {
    %c0_i32 = arith.constant 0 : i32
    %c0_i32_0 = arith.constant 0 : i32
    %c0_i32_1 = arith.constant 0 : i32
    return %c0_i32, %c0_i32_0 : i32, i32
  }
  func.func @transform_2(%arg0: i32) -> (i32, i32) {
    %c0_i32 = arith.constant 0 : i32
    %c0_i32_0 = arith.constant 0 : i32
    %c0_i32_1 = arith.constant 0 : i32
    return %c0_i32, %c0_i32_0 : i32, i32
  }
  func.func @transform_3(%arg0: i32) -> (i32, i32) {
    %c0_i32 = arith.constant 0 : i32
    %c0_i32_0 = arith.constant 0 : i32
    %c0_i32_1 = arith.constant 0 : i32
    return %c0_i32, %c0_i32_0 : i32, i32
  }
  func.func @transform_4(%arg0: i32) -> (i32, i32) {
    %c0_i32 = arith.constant 0 : i32
    %c0_i32_0 = arith.constant 0 : i32
    %c0_i32_1 = arith.constant 0 : i32
    return %c0_i32, %c0_i32_0 : i32, i32
  }
  func.func @transform_5(%arg0: i32) -> (i32, i32) {
    %c0_i32 = arith.constant 0 : i32
    %c0_i32_0 = arith.constant 0 : i32
    %c0_i32_1 = arith.constant 0 : i32
    return %c0_i32, %c0_i32_0 : i32, i32
  }
  func.func @transform_6(%arg0: i32) -> (i32, i32) {
    %c0_i32 = arith.constant 0 : i32
    %c0_i32_0 = arith.constant 0 : i32
    %c0_i32_1 = arith.constant 0 : i32
    return %c0_i32, %c0_i32_0 : i32, i32
  }
  func.func @transform_7(%arg0: i32) -> (i32, i32) {
    %c0_i32 = arith.constant 0 : i32
    %c0_i32_0 = arith.constant 0 : i32
    %c0_i32_1 = arith.constant 0 : i32
    return %c0_i32, %c0_i32_0 : i32, i32
  }
  func.func @transform_8(%arg0: i32) -> (i32, i32) {
    %c0_i32 = arith.constant 0 : i32
    %c0_i32_0 = arith.constant 0 : i32
    %c0_i32_1 = arith.constant 0 : i32
    return %c0_i32, %c0_i32_0 : i32, i32
  }
  func.func @transform_9(%arg0: i32) -> (i32, i32) {
    %c0_i32 = arith.constant 0 : i32
    %c0_i32_0 = arith.constant 0 : i32
    %c0_i32_1 = arith.constant 0 : i32
    return %c0_i32, %c0_i32_0 : i32, i32
  }
  func.func @transform_10(%arg0: i32) -> (i32, i32) {
    %c0_i32 = arith.constant 0 : i32
    %c0_i32_0 = arith.constant 0 : i32
    return %c0_i32, %arg0 : i32, i32
  }
}

</mosaic_0001>

<bundles_post_ra>
// kernel: attention_forward.1
= control target key start
LH: loop header
LB: loop body
LE: loop exit
PB: predicated region body
PF: predicated region fallthrough
CT: control target
= control target key end

     0   :  { %15 = vsyncpa [#allocation3], 0  ;;  %s15440_s0 = inlined_call_operand.vmem [shape: f32[16,128], index: 0, kind: input, shape index: {}]   ;;  %s15441_s1 = inlined_call_operand.vmem [shape: f32[2,16], index: 1, kind: input, shape index: {}]   ;;  %s15442_s2 = inlined_call_operand.vmem [shape: f32[16,16], index: 2, kind: input, shape index: {}]   ;;  %s15443_s3 = inlined_call_operand.vmem [shape: f32[16,16], index: 3, kind: input, shape index: {}]   ;;  %s15444_s4 = inlined_call_operand.vmem [shape: f32[16,1], index: 4, kind: input, shape index: {}]   ;;  %s15445_s5 = inlined_call_operand.vmem [shape: f32[16,16], index: 5, kind: input, shape index: {}]   ;;  %s15446_s6 = inlined_call_operand.vmem [shape: f32[64,256], index: 6, kind: input, shape index: {}]   ;;  %s15447_s7 = inlined_call_operand.vmem [shape: f32[64,1], index: 7, kind: input, shape index: {}]   ;;  %s15448_s8 = inlined_call_operand.vmem [shape: f32[4,64], index: 8, kind: input, shape index: {}]   ;;  %s15449_s9 = inlined_call_operand.vmem [shape: f32[4,1], index: 9, kind: input, shape index: {}]   ;;  %s15450_s10 = inlined_call_operand.vmem [shape: f32[4,128], index: 10, kind: output, shape index: {}]  }
   0x1   :  { %s24_s15 = sshll.u32 %s15441_s1, 4  ;;  %s25_s15 = int_to_ptr.vmem [resolvable:$true] %s24_s15 }
   0x2   :  { %s9493_s16 = scalar_lea.vmem %s25_s15, 32  ;;  %p9498_p1 = scmp.lt.s32.totalorder %s25_s15, %s25_s15 }
   0x3   :  { %p9494_p0 = scmp.ne.s32.totalorder %s25_s15, %s9493_s16  ;;  %p9499_p2 = scmp.lt.s32.totalorder %s9493_s16, %s9493_s16 }
   0x5   :  { %p9500_p3 = por %p9499_p2, %p9498_p1 }
   0x7   :  { %p9501_p4 = pnand %p9500_p3, %p9494_p0 }
   0x9   :  { %9504 = shalt.err (!%p9501_p4)
}
   0xa   :  { %s9507_s17 = smov [#allocation2]  }
   0xb   :  { %27 = dma.vmem_to_smem %s25_s15, 32, %s9507_s17, [#allocation3]  }
   0xc   :  { %9505 = dma.done.wait [#allocation3], 32  }
   0xd   :  { %9506 = vsyncadd [#allocation3], 4294967264 }
   0xe   :  { %47 = sfence }
   0xf   :  { %v9589_v0 = vld [vmem:[%s15443_s3] sm:$0xff]  ;;  %v9508_v1 = vmov 2   ;;  %v15452_v2 = vmov 0   ;;  %v9597_v3 = vld [vmem:[%s15443_s3 + $0x8] sm:$0xff]  ;;  %v9510_v4 = vmov 3   ;;  %v9511_v6 = vmov 4  }
  0x10   :  { %9368 = vset.pattern.permute.xlu1 %v9508_v1  ;;  %9367 = vset.pattern.permute.xlu0 %v15452_v2  ;;  %v9604_v5 = vld [vmem:[%s15442_s2 + $0x8] sm:$0xff]  ;;  %v9512_v7 = vmov 1   ;;  %v9513_v8 = vmov 5   ;;  %v9615_v9 = vld [vmem:[%s15442_s2] sm:$0xff]  ;;  %v9514_v10 = vmov 7   ;;  %v9515_v11 = vmov 6  }
  0x11   :  { %1023 = vperm.xlu1 %9368, %v9589_v0   ;;  %510 = vperm.xlu0 %9367, %v9589_v0   ;;  %v15463_v12 = vmov 9   ;;  %v15457_v13 = vmov 11   ;;  %v9518_v14 = vmov 8   ;;  %v15456_v15 = vmov 10   ;;  %s9667_s24 = sld [smem:[#allocation2 + $0x82]]  ;;  %s9669_s25 = sld [smem:[#allocation2 + $0x83]] }
  0x12   :  { %v15453_v16 = vmov 15   ;;  %v15455_v17 = vmov 12   ;;  %v15454_v18 = vmov 13   ;;  %v15459_v19 = vmov 14   ;;  %s9671_s26 = sld [smem:[#allocation2 + $0x84]]  ;;  %s9674_s27 = sld [smem:[#allocation2 + $0x80]] }
  0x13   :  { %v60_v20 = vlaneseq  ;;  %v9524_v21 = vmov 1966171168   ;;  %s9677_s28 = sld [smem:[#allocation2 + $0x81]]  ;;  %s9680_s29 = sld [smem:[#allocation2]]  ;;  %v155_v26 = vld [vmem:[%s15444_s4 + $0x8] sm:$0xff]  ;;  %v9703_v27 = vld [vmem:[%s15445_s5] sm:$0xff] }
  0x14   :  { %v58_v22 = vunpack.c.l.s4 %v9524_v21  ;;  %s9685_s30 = sld [smem:[#allocation2 + $0x85]]  ;;  %s9687_s11 = sld [smem:[#allocation2 + $0x1]]  ;;  %v9710_v29 = vld [vmem:[%s15440_s0] sm:$0xff]  ;;  %v9724_v34 = vld [vmem:[%s15440_s0 + $0x8] sm:$0xff]  ;;  %vm9526_vm0 = vmmov 0   ;;  %vm9106_vm9 = vcmask 523264  }
  0x15   :  { %9369 = vset.pattern.permute.xlu1 %v9510_v4  ;;  %515 = vperm.xlu0 %9367, %v9597_v3   ;;  %v9683_v23 = vshrl.u32 %v60_v20, 7  ;;  %s9689_s12 = sld [smem:[#allocation2 + $0x86]]  ;;  %s9692_s13 = sld [smem:[#allocation2 + $0x4]] }
  0x16   :  { %1295 = vperm.xlu1 %9369, %v9589_v0   ;;  %v59_v24 = vunpack.c.0.s8 %v58_v22  ;;  %s9694_s14 = sld [smem:[#allocation2 + $0x87]]  ;;  %s9714_s20 = sld [smem:[#allocation2 + $0x2]] }
  0x17   :  { %v293_v25 = vsub.s32 1, %v9683_v23  ;;  %v1019_v28 = vstv %s9667_s24  ;;  %v1291_v30 = vstv %s9669_s25  ;;  %v9718_v32 = vsub.s32 0, %v9683_v23  ;;  %s9727_s3 = sld [smem:[#allocation2 + $0x89]]  ;;  %s9729_s23 = sld [smem:[#allocation2 + $0x6]] }
  0x18   :  { %v1563_v31 = vstv %s9671_s26  ;;  %v505_v33 = vstv %s9674_s27  ;;  %v9732_v35 = vsub.s32 %v59_v24, %v9683_v23  ;;  %v15467_v38 = vsub.s32 2, %v9683_v23  ;;  %s9755_s24 = sld [smem:[#allocation2 + $0x3]]  ;;  %s9757_s26 = sld [smem:[#allocation2 + $0x88]] }
  0x19   :  { %499 = vperm.xlu0 %9367, %v9604_v5   ;;  %16101 = vst [vmem:[#allocation5_spill] sm:$0xff] %v9718_v32  ;;  %v747_v36 = vstv %s9677_s28  ;;  %v9738_v37 = vrot.slane %v9703_v27, %v293_v25  ;;  %v9742_v39 = vmul.f32 %v1019_v28, %v9710_v29  ;;  %v9745_v40 = vmul.f32 %v505_v33, %v9710_v29  ;;  %s9774_s27 = sld [smem:[#allocation2 + $0x8b]]  ;;  %s9776_s28 = sld [smem:[#allocation2 + $0x8]] }
  0x1a   :  { %9370 = vset.pattern.permute.xlu1 %v9511_v6  ;;  %16102 = vst [vmem:[#allocation6_spill] sm:$0xff] %v9732_v35  ;;  %v9750_v41 = vmul.f32 %v1291_v30, %v9710_v29  ;;  %v9753_v42 = vmul.f32 %v1563_v31, %v9710_v29  ;;  %v9760_v43 = vmul.f32 %v505_v33, %v9724_v34  ;;  %v489_v44 = vstv %s9680_s29  ;;  %s9804_s29 = sld [smem:[#allocation2 + $0x5]]  ;;  %s11190_s18 = sld [smem:[#allocation2 + $0xf]] }
  0x1b   :  { %1567 = vperm.xlu1 %9370, %v9589_v0   ;;  %v1835_v45 = vstv %s9685_s30  ;;  %v733_v46 = vstv %s9687_s11  ;;  %v9767_v47 = vmul.f32 %v1019_v28, %v9724_v34  ;;  %v9770_v48 = vmul.f32 %v747_v36, %v9724_v34  ;;  %s9806_s11 = sld [smem:[#allocation2 + $0x8a]]  ;;  %s11314_s19 = sld [smem:[#allocation2 + $0xd]] }
  0x1c   :  { %v2107_v49 = vstv %s9689_s12  ;;  %v1549_v50 = vstv %s9692_s13  ;;  %v9780_v51 = vmul.f32 %v747_v36, %v9710_v29  ;;  %v15462_v52 = vstv %s9694_s14  ;;  %s9843_s12 = sld [smem:[#allocation2 + $0xa]] }
  0x1d   :  { %9374 = vset.pattern.permute.xlu0 %v9508_v1  ;;  %v9787_v53 = vrot.slane %v9703_v27, %v15467_v38  ;;  %v315_v54 = vsub.s32 3, %v9683_v23  ;;  %v9791_v55 = vmul.f32 %v489_v44, %v9724_v34  ;;  %v9796_v56 = vmul.f32 %v1835_v45, %v9710_v29 }
  0x1e   :  { %1027 = vperm.xlu0 %9374, %v9597_v3   ;;  %v9799_v57 = vmul.f32 %v733_v46, %v9710_v29  ;;  %v9802_v58 = vmul.f32 %v733_v46, %v9724_v34  ;;  %v9809_v59 = vmul.f32 %v2107_v49, %v9710_v29  ;;  %v9812_v60 = vmul.f32 %v489_v44, %v9710_v29 }
  0x1f   :  { %9371 = vset.pattern.permute.xlu1 %v9512_v7  ;;  %16103 = vst [vmem:[#allocation7_spill] sm:$0xff] %v9787_v53  ;;  %v9815_v61 = vmul.f32 %v1549_v50, %v9724_v34  ;;  %v1005_v62 = vstv %s9714_s20  ;;  %v9821_v63 = vmul.f32 %v15462_v52, %v9710_v29  ;;  %v1277_v21 = vstv %s9755_s24 }
  0x20   :  { %755 = vperm.xlu1 %9371, %v9597_v3   ;;  %v9838_v20 = vmul.f32 %v1005_v62, %v9724_v34  ;;  %v2651_v22 = vstv %s9757_s26  ;;  %v359_v24 = vsub.s32 7, %v9683_v23  ;;  %v9853_v28 = vmul.f32 %v1291_v30, %v9724_v34 }
  0x21   :  { %v9861_v33 = vmul.f32 %v1005_v62, %v9710_v29  ;;  %v9864_v36 = vmul.f32 %v2107_v49, %v9724_v34  ;;  %v15465_v46 = vstv %s9774_s27  ;;  %v15466_v30 = vstv %s9776_s28 }
  0x22   :  { %9375 = vset.pattern.permute.xlu0 %v9512_v7  ;;  %v9876_v62 = vmul.f32 %v1277_v21, %v9724_v34  ;;  %v9916_v52 = vmul.f32 %v1835_v45, %v9724_v34 }
  0x23   :  { %751 = vperm.xlu0 %9375, %v9589_v0  }
  0x24   :  { %9372 = vset.pattern.permute.xlu1 %v9513_v8  ;;  %16109 = vst [vmem:[#allocation13_spill] sm:$0xff] %v9916_v52 }
  0x25   :  { %1839 = vperm.xlu1 %9372, %v9589_v0  }
  0x27   :  { %737 = vperm.xlu0 %9375, %v9615_v9  }
  0x29   :  { %9373 = vset.pattern.permute.xlu1 %v9512_v7  ;;  %v9828_v7 = vmul.f32 %v1563_v31, %v9724_v34 }
  0x2a   :  { %741 = vperm.xlu1 %9373, %v9604_v5  }
  0x2b   :  { %9380 = vset.pattern.permute.xlu0 %v9514_v10 }
  0x2c   :  { %2383 = vperm.xlu0 %9380, %v9589_v0  }
  0x2e   :  { %9376 = vset.pattern.permute.xlu1 %v9515_v11 }
  0x2f   :  { %2111 = vperm.xlu1 %9376, %v9589_v0  }
  0x30   :  { %9383 = vset.pattern.permute.xlu0 %v9511_v6 }
  0x31   :  { %1571 = vperm.xlu0 %9383, %v9597_v3  }
  0x33   :  { %9377 = vset.pattern.permute.xlu1 %v15452_v2 }
  0x34   :  { %494 = vperm.xlu1 %9377, %v9615_v9  }
  0x35   :  { %1557 = vperm.xlu0 %9383, %v9604_v5  }
  0x38   :  { %9378 = vset.pattern.permute.xlu1 %v9508_v1 }
  0x39   :  { %9387 = vset.pattern.permute.xlu0 %v15463_v12  ;;  %1013 = vperm.xlu1 %9378, %v9604_v5  }
  0x3a   :  { %2927 = vperm.xlu0 %9387, %v9589_v0  }
  0x3d   :  { %9379 = vset.pattern.permute.xlu1 %v9510_v4 }
  0x3e   :  { %9390 = vset.pattern.permute.xlu0 %v9515_v11  ;;  %1299 = vperm.xlu1 %9379, %v9597_v3  }
  0x3f   :  { %2115 = vperm.xlu0 %9390, %v9597_v3  }
  0x42   :  { %9381 = vset.pattern.permute.xlu1 %v9508_v1  ;;  %v15451_v1 = vstv %s9727_s3 }
  0x43   :  { %2101 = vperm.xlu0 %9390, %v9604_v5   ;;  %1009 = vperm.xlu1 %9381, %v9615_v9  }
  0x47   :  { %9382 = vset.pattern.permute.xlu1 %v9510_v4  ;;  %9394 = vset.pattern.permute.xlu0 %v15457_v13  ;;  %v3195_v13 = vstv %s9806_s11  ;;  %s10882_s11 = sld [smem:[#allocation2 + $0x8e]] }
  0x48   :  { %1285 = vperm.xlu1 %9382, %v9604_v5   ;;  %3471 = vperm.xlu0 %9394, %v9589_v0   ;;  %v9940_v52 = vmul.f32 %v3195_v13, %v9710_v29 }
  0x4a   :  { %16113 = vst [vmem:[#allocation16_spill] sm:$0xff] %v9940_v52 }
  0x4c   :  { %9384 = vset.pattern.permute.xlu1 %v9518_v14  ;;  %9397 = vset.pattern.permute.xlu0 %v9518_v14 }
  0x4d   :  { %2655 = vperm.xlu1 %9384, %v9589_v0   ;;  %2659 = vperm.xlu0 %9397, %v9597_v3  }
  0x51   :  { %9385 = vset.pattern.permute.xlu1 %v9510_v4  ;;  %2645 = vperm.xlu0 %9397, %v9604_v5   ;;  %v15461_v4 = vstv %s9729_s23 }
  0x52   :  { %1281 = vperm.xlu1 %9385, %v9615_v9   ;;  %v9858_v31 = vmul.f32 %v15461_v4, %v9724_v34  ;;  %v9903_v4 = vmul.f32 %v2651_v22, %v9724_v34 }
  0x55   :  { %9403 = vset.pattern.permute.xlu0 %v15456_v15 }
  0x56   :  { %9386 = vset.pattern.permute.xlu1 %v9513_v8  ;;  %3203 = vperm.xlu0 %9403, %v9597_v3  }
  0x57   :  { %1843 = vperm.xlu1 %9386, %v9597_v3  }
  0x5a   :  { %3189 = vperm.xlu0 %9403, %v9604_v5  }
  0x5b   :  { %9388 = vset.pattern.permute.xlu1 %v9511_v6  ;;  %v326_v6 = vsub.s32 4, %v9683_v23 }
  0x5c   :  { %1553 = vperm.xlu1 %9388, %v9615_v9  }
  0x5d   :  { %v9867_v44 = vrot.slane %v9703_v27, %v326_v6 }
  0x5e   :  { %9407 = vset.pattern.permute.xlu0 %v15453_v16 }
  0x5f   :  { %4559 = vperm.xlu0 %9407, %v9589_v0   ;;  %16105 = vst [vmem:[#allocation9_spill] sm:$0xff] %v9867_v44 }
  0x60   :  { %9389 = vset.pattern.permute.xlu1 %v9513_v8 }
  0x61   :  { %1829 = vperm.xlu1 %9389, %v9604_v5  }
  0x63   :  { %9410 = vset.pattern.permute.xlu0 %v15455_v17 }
  0x64   :  { %3747 = vperm.xlu0 %9410, %v9597_v3  }
  0x65   :  { %9391 = vset.pattern.permute.xlu1 %v15456_v15  ;;  %v1821_v15 = vstv %s9804_s29  ;;  %s10880_s29 = sld [smem:[#allocation2 + $0x9]] }
  0x66   :  { %3199 = vperm.xlu1 %9391, %v9589_v0   ;;  %v9935_v45 = vmul.f32 %v1821_v15, %v9724_v34 }
  0x68   :  { %9411 = vset.pattern.permute.xlu0 %v15454_v18  ;;  %v9889_v18 = vmul.f32 %v1277_v21, %v9710_v29  ;;  %16112 = vst [vmem:[#allocation15_spill] sm:$0xff] %v9935_v45  ;;  %v9954_v45 = vmul.f32 %v1821_v15, %v9710_v29  ;;  %v16118_v15 = vstv %s9694_s14 }
  0x69   :  { %4015 = vperm.xlu0 %9411, %v9589_v0  }
  0x6a   :  { %9392 = vset.pattern.permute.xlu1 %v9513_v8  ;;  %v9832_v8 = vrot.slane %v9703_v27, %v315_v54  ;;  %16107 = vst [vmem:[#allocation11_spill] sm:$0xff] %v9889_v18  ;;  %16116 = vst [vmem:[#allocation18_spill] sm:$0xff] %v9954_v45 }
  0x6b   :  { %1825 = vperm.xlu1 %9392, %v9615_v9  }
  0x6c   :  { %16104 = vst [vmem:[#allocation8_spill] sm:$0xff] %v9832_v8 }
  0x6d   :  { %4019 = vperm.xlu0 %9411, %v9597_v3  }
  0x6f   :  { %9393 = vset.pattern.permute.xlu1 %v9514_v10 }
  0x70   :  { %2387 = vperm.xlu1 %9393, %v9597_v3  }
  0x71   :  { %9414 = vset.pattern.permute.xlu0 %v15459_v19  ;;  %v9900_v19 = vmul.f32 %v15465_v46, %v9710_v29  ;;  %v9927_v46 = vmul.f32 %v1549_v50, %v9710_v29 }
  0x72   :  { %4291 = vperm.xlu0 %9414, %v9597_v3  }
  0x73   :  { %16110 = vst [vmem:[#allocation14_spill] sm:$0xff] %v9927_v46 }
  0x74   :  { %9395 = vset.pattern.permute.xlu1 %v9515_v11  ;;  %v348_v11 = vsub.s32 6, %v9683_v23 }
  0x75   :  { %2097 = vperm.xlu1 %9395, %v9615_v9  }
  0x76   :  { %9416 = vset.pattern.permute.xlu0 %v15453_v16  ;;  %v9885_v16 = vrot.slane %v9703_v27, %v348_v11 }
  0x77   :  { %4563 = vperm.xlu0 %9416, %v9597_v3  }
  0x79   :  { %9396 = vset.pattern.permute.xlu1 %v9514_v10 }
  0x7a   :  { %2373 = vperm.xlu1 %9396, %v9604_v5  }
  0x7b   :  { %4545 = vperm.xlu0 %9416, %v9615_v9  }
  0x7e   :  { %9398 = vset.pattern.permute.xlu1 %v15455_v17  ;;  %v9892_v17 = vrot.slane %v9703_v27, %v359_v24 }
  0x7f   :  { %3743 = vperm.xlu1 %9398, %v9589_v0   ;;  %9419 = vset.pattern.permute.xlu0 %v15452_v2  ;;  %v9882_v2 = vmul.f32 %v2651_v22, %v9710_v29 }
  0x80   :  { %243 = vperm.xlu0 %9419, %v155_v26   ;;  %v9848_v26 = vmul.f32 %v15451_v1, %v9710_v29  ;;  %v279_v1 = vld [vmem:[%s15445_s5 + $0x8] sm:$0xff] }
  0x81   :  { %v9911_v21 = vrot.slane %v279_v1, %v9718_v32  ;;  %v9924_v22 = vrot.slane %v279_v1, %v293_v25  ;;  %v9944_v46 = vrot.slane %v279_v1, %v326_v6  ;;  %v9956_v52 = vrot.slane %v279_v1, %v348_v11 }
  0x82   :  { %v9972_v11 = vrot.slane %v279_v1, %v359_v24 }
  0x83   :  { %9399 = vset.pattern.permute.xlu1 %v9514_v10  ;;  %v337_v10 = vsub.s32 5, %v9683_v23 }
  0x84   :  { %2369 = vperm.xlu1 %9399, %v9615_v9   ;;  %296 = vbcast.lane.b32.xlu0 %v9738_v37, 256 }
  0x85   :  { %v9879_v49 = vrot.slane %v9703_v27, %v337_v10 }
  0x87   :  { %16106 = vst [vmem:[#allocation10_spill] sm:$0xff] %v9879_v49 }
  0x88   :  { %9400 = vset.pattern.permute.xlu1 %v15463_v12  ;;  %307 = vbcast.lane.b32.xlu0 %v9787_v53, 256  ;;  %v9920_v12 = vrot.slane %v9703_v27, %v9718_v32  ;;  %v9937_v27 = vrot.slane %v279_v1, %v315_v54  ;;  %v9951_v54 = vrot.slane %v279_v1, %v337_v10 }
  0x89   :  { %2931 = vperm.xlu1 %9400, %v9597_v3   ;;  %v9970_v10 = vmul.f32 %v16118_v15, %v9724_v34 }
  0x8b   :  { %16119 = vst [vmem:[#allocation20_spill] sm:$0xff] %v9970_v10 }
  0x8c   :  { %318 = vbcast.lane.b32.xlu0 %v9832_v8, 256 }
  0x8d   :  { %9401 = vset.pattern.permute.xlu1 %v9518_v14  ;;  %v9908_v14 = vmul.f32 %v15466_v30, %v9724_v34 }
  0x8e   :  { %2641 = vperm.xlu1 %9401, %v9615_v9  }
  0x8f   :  { %16108 = vst [vmem:[#allocation12_spill] sm:$0xff] %v9908_v14  ;;  %v16111_v14 = vsub.s32 2, %v9683_v23  ;;  %v16114_v23 = vmov 9  }
  0x90   :  { %v1024_v30 = vpop.permute.xlu1 %1023  ;;  %v511_v38 = vpop.permute.xlu0 %510  ;;  %329 = vbcast.lane.b32.xlu0 %v9867_v44, 256  ;;  %v15472_v44 = vstv %s9843_s12 }
  0x91   :  { %v9932_v18 = vrot.slane %v279_v1, %v16111_v14  ;;  %v1030_v25 = vadd.f32 %v1024_v30, %v9742_v39  ;;  %v518_v50 = vadd.f32 %v511_v38, %v9745_v40  ;;  %v9949_v14 = vmul.f32 %v3195_v13, %v9724_v34 }
  0x92   :  { %9402 = vset.pattern.permute.xlu1 %v16114_v23  ;;  %v9965_v13 = vmul.f32 %v15472_v44, %v9724_v34 }
  0x93   :  { %16115 = vst [vmem:[#allocation17_spill] sm:$0xff] %v9949_v14  ;;  %v1034_v39 = vcombine.high %v1030_v25, %v1030_v25  ;;  %v1041_v38 = vrot.slane %v1030_v25, %v9732_v35  ;;  %v522_v40 = vcombine.high %v518_v50, %v518_v50  ;;  %v529_v6 = vrot.slane %v518_v50, %v9732_v35 }
  0x94   :  { %2917 = vperm.xlu1 %9402, %v9604_v5   ;;  %v516_v30 = vpop.permute.xlu0 %515  ;;  %340 = vbcast.lane.b32.xlu0 %v9879_v49, 256  ;;  %16117 = vst [vmem:[#allocation19_spill] sm:$0xff] %v9965_v13  ;;  %v16120_v25 = vstv %s9729_s23  ;;  %s10820_s23 = sld [smem:[#allocation2 + $0x8c]] }
  0x95   :  { %v9977_v45 = vmul.f32 %v16120_v25, %v9710_v29  ;;  %v1048_v50 = vrot.slane %v1034_v39, %v9732_v35  ;;  %v1049_v14 = vcombine.high %v1041_v38, %v1041_v38  ;;  %v1057_v8 = vrot.slane %v1041_v38, %v9732_v35  ;;  %v1296_v53 = vpop.permute.xlu1 %1295 }
  0x96   :  { %v536_v49 = vrot.slane %v522_v40, %v9732_v35  ;;  %v537_v44 = vcombine.high %v529_v6, %v529_v6  ;;  %v545_v13 = vrot.slane %v529_v6, %v9732_v35  ;;  %v1302_v34 = vadd.f32 %v1296_v53, %v9750_v41 }
  0x97   :  { %16121 = vst [vmem:[#allocation21_spill] sm:$0xff] %v9977_v45  ;;  %v519_v1 = vadd.f32 %v516_v30, %v9760_v43  ;;  %v1050_v24 = vcombine.high %v1048_v50, %v1048_v50  ;;  %v1064_v15 = vrot.slane %v1048_v50, %v9732_v35  ;;  %v1071_v29 = vrot.slane %v1049_v14, %v9732_v35 }
  0x98   :  { %v1079_v25 = vcombine.high %v1057_v8, %v1057_v8  ;;  %v16122_v39 = vmov 14   ;;  %v9989_v38 = vrot.slane %v1057_v8, %v9718_v32  ;;  %v538_v40 = vcombine.high %v536_v49, %v536_v49  ;;  %v500_v41 = vpop.permute.xlu0 %499  ;;  %351 = vbcast.lane.b32.xlu0 %v9885_v16, 256 }
  0x99   :  { %9404 = vset.pattern.permute.xlu1 %v16122_v39  ;;  %v552_v45 = vrot.slane %v536_v49, %v9732_v35  ;;  %v559_v6 = vrot.slane %v537_v44, %v9732_v35  ;;  %v1078_v43 = vrot.slane %v1050_v24, %v9732_v35  ;;  %v1080_v53 = vcombine.high %v1064_v15, %v1064_v15 }
  0x9a   :  { %16123 = vst [vmem:[#allocation22_spill] sm:$0xff] %v9989_v38  ;;  %4287 = vperm.xlu1 %9404, %v9589_v0   ;;  %v1081_v30 = vcombine.high %v1071_v29, %v1071_v29  ;;  %v9996_v14 = vrot.slane %v1071_v29, %v9718_v32  ;;  %v10000_v8 = vrot.slane %v1079_v25, %v9718_v32  ;;  %v1568_v0 = vpop.permute.xlu1 %1567 }
  0x9b   :  { %v10003_v50 = vrot.slane %v1064_v15, %v9718_v32  ;;  %v566_v44 = vrot.slane %v538_v40, %v9732_v35  ;;  %v567_v49 = vcombine.high %v545_v13, %v545_v13  ;;  %v1082_v38 = vcombine.high %v1078_v43, %v1078_v43 }
  0x9c   :  { %16124 = vst [vmem:[#allocation23_spill] sm:$0xff] %v9996_v14  ;;  %16125 = vst [vmem:[#allocation24_spill] sm:$0xff] %v10000_v8  ;;  %v10007_v24 = vrot.slane %v1081_v30, %v9718_v32  ;;  %v10010_v10 = vrot.slane %v1078_v43, %v9718_v32  ;;  %v10013_v29 = vrot.slane %v1080_v53, %v9718_v32  ;;  %362 = vbcast.lane.b32.xlu0 %v9892_v17, 256 }
  0x9d   :  { %16126 = vst [vmem:[#allocation25_spill] sm:$0xff] %v10003_v50  ;;  %v568_v14 = vcombine.high %v552_v45, %v552_v45  ;;  %v569_v25 = vcombine.high %v559_v6, %v559_v6  ;;  %v570_v8 = vcombine.high %v566_v44, %v566_v44  ;;  %v10016_v15 = vrot.slane %v545_v13, %v9718_v32 }
  0x9e   :  { %16127 = vst [vmem:[#allocation26_spill] sm:$0xff] %v10007_v24  ;;  %16128 = vst [vmem:[#allocation27_spill] sm:$0xff] %v10010_v10  ;;  %9405 = vset.pattern.permute.xlu1 %v16114_v23  ;;  %v10020_v40 = vrot.slane %v1082_v38, %v9718_v32  ;;  %v10023_v30 = vrot.slane %v559_v6, %v9718_v32  ;;  %v10026_v43 = vrot.slane %v567_v49, %v9718_v32 }
  0x9f   :  { %16129 = vst [vmem:[#allocation28_spill] sm:$0xff] %v10013_v29  ;;  %16130 = vst [vmem:[#allocation29_spill] sm:$0xff] %v10016_v15  ;;  %v10029_v53 = vrot.slane %v552_v45, %v9718_v32  ;;  %2913 = vperm.xlu1 %9405, %v9615_v9   ;;  %v1028_v29 = vpop.permute.xlu0 %1027  ;;  %v10033_v13 = vrot.slane %v569_v25, %v9718_v32  ;;  %v10036_v23 = vrot.slane %v566_v44, %v9718_v32  ;;  %v756_v50 = vpop.permute.xlu1 %755 }
  0xa0   :  { %16131 = vst [vmem:[#allocation30_spill] sm:$0xff] %v10020_v40  ;;  %16132 = vst [vmem:[#allocation31_spill] sm:$0xff] %v10023_v30  ;;  %v10039_v38 = vrot.slane %v568_v14, %v9718_v32  ;;  %v10042_v6 = vrot.slane %v570_v8, %v9718_v32  ;;  %v1306_v49 = vcombine.high %v1302_v34, %v1302_v34  ;;  %373 = vbcast.lane.b32.xlu0 %v9911_v21, 256 }
  0xa1   :  { %16133 = vst [vmem:[#allocation32_spill] sm:$0xff] %v10026_v43  ;;  %16134 = vst [vmem:[#allocation33_spill] sm:$0xff] %v10029_v53  ;;  %v1313_v45 = vrot.slane %v1302_v34, %v9732_v35  ;;  %v571_v40 = vcombine.high %v519_v1, %v519_v1  ;;  %v578_v10 = vrot.slane %v519_v1, %v9732_v35  ;;  %v16139_v1 = vmov 11  }
  0xa2   :  { %16135 = vst [vmem:[#allocation34_spill] sm:$0xff] %v10033_v13  ;;  %16136 = vst [vmem:[#allocation35_spill] sm:$0xff] %v10036_v23  ;;  %v1574_v25 = vadd.f32 %v1568_v0, %v9753_v42  ;;  %v10049_v44 = vadd.f32 %v500_v41, %v9791_v55  ;;  %v10052_v14 = vadd.f32 %v1028_v29, %v9767_v47  ;;  %v16144_v43 = vmov 10  }
  0xa3   :  { %16137 = vst [vmem:[#allocation36_spill] sm:$0xff] %v10039_v38  ;;  %16138 = vst [vmem:[#allocation37_spill] sm:$0xff] %v10042_v6  ;;  %v10055_v8 = vadd.f32 %v756_v50, %v9770_v48  ;;  %v1320_v24 = vrot.slane %v1306_v49, %v9732_v35  ;;  %v1321_v6 = vcombine.high %v1313_v45, %v1313_v45  ;;  %9406 = vset.pattern.permute.xlu1 %v16139_v1  ;;  %v752_v47 = vpop.permute.xlu0 %751 }
  0xa4   :  { %v1329_v34 = vrot.slane %v1313_v45, %v9732_v35  ;;  %v585_v38 = vrot.slane %v571_v40, %v9732_v35  ;;  %v586_v23 = vcombine.high %v578_v10, %v578_v10  ;;  %v594_v42 = vrot.slane %v578_v10, %v9732_v35  ;;  %3475 = vperm.xlu1 %9406, %v9597_v3  }
  0xa5   :  { %v1578_v55 = vcombine.high %v1574_v25, %v1574_v25  ;;  %v1585_v41 = vrot.slane %v1574_v25, %v9732_v35  ;;  %v1322_v48 = vcombine.high %v1320_v24, %v1320_v24  ;;  %v1336_v50 = vrot.slane %v1320_v24, %v9732_v35  ;;  %v10072_v25 = vpop.permute.xlu1 %1839  ;;  %384 = vbcast.lane.b32.xlu0 %v9924_v22, 256 }
  0xa6   :  { %v1343_v0 = vrot.slane %v1321_v6, %v9732_v35  ;;  %v1351_v29 = vcombine.high %v1329_v34, %v1329_v34  ;;  %v10068_v40 = vrot.slane %v1329_v34, %v9718_v32  ;;  %v587_v49 = vcombine.high %v585_v38, %v585_v38 }
  0xa7   :  { %v601_v10 = vrot.slane %v585_v38, %v9732_v35  ;;  %v608_v45 = vrot.slane %v586_v23, %v9732_v35  ;;  %v1350_v3 = vrot.slane %v1322_v48, %v9732_v35  ;;  %v1352_v53 = vcombine.high %v1336_v50, %v1336_v50 }
  0xa8   :  { %16140 = vst [vmem:[#allocation38_spill] sm:$0xff] %v10068_v40  ;;  %v1353_v13 = vcombine.high %v1343_v0, %v1343_v0  ;;  %v10076_v24 = vrot.slane %v1343_v0, %v9718_v32  ;;  %v10079_v6 = vrot.slane %v1351_v29, %v9718_v32  ;;  %v10082_v34 = vrot.slane %v1336_v50, %v9718_v32  ;;  %v10095_v29 = vpop.permute.xlu0 %737 }
  0xa9   :  { %v615_v40 = vrot.slane %v587_v49, %v9732_v35  ;;  %v616_v38 = vcombine.high %v594_v42, %v594_v42  ;;  %9408 = vset.pattern.permute.xlu1 %v16144_v43  ;;  %v1354_v23 = vcombine.high %v1350_v3, %v1350_v3  ;;  %v10090_v48 = vrot.slane %v1350_v3, %v9718_v32 }
  0xaa   :  { %16141 = vst [vmem:[#allocation39_spill] sm:$0xff] %v10076_v24  ;;  %16142 = vst [vmem:[#allocation40_spill] sm:$0xff] %v10079_v6  ;;  %v10087_v30 = vrot.slane %v1353_v13, %v9718_v32  ;;  %v10093_v0 = vrot.slane %v1352_v53, %v9718_v32  ;;  %3185 = vperm.xlu1 %9408, %v9615_v9   ;;  %v617_v50 = vcombine.high %v601_v10, %v601_v10 }
  0xab   :  { %16143 = vst [vmem:[#allocation41_spill] sm:$0xff] %v10082_v34  ;;  %16146 = vst [vmem:[#allocation43_spill] sm:$0xff] %v10090_v48  ;;  %v618_v34 = vcombine.high %v608_v45, %v608_v45  ;;  %v619_v49 = vcombine.high %v615_v40, %v615_v40  ;;  %v10099_v6 = vrot.slane %v594_v42, %v9718_v32  ;;  %395 = vbcast.lane.b32.xlu0 %v9932_v18, 256 }
  0xac   :  { %16145 = vst [vmem:[#allocation42_spill] sm:$0xff] %v10087_v30  ;;  %16147 = vst [vmem:[#allocation44_spill] sm:$0xff] %v10093_v0  ;;  %v10103_v43 = vrot.slane %v1354_v23, %v9718_v32  ;;  %v10106_v13 = vrot.slane %v608_v45, %v9718_v32  ;;  %v10109_v53 = vrot.slane %v616_v38, %v9718_v32  ;;  %v10114_v0 = vpop.permute.xlu1 %741 }
  0xad   :  { %16148 = vst [vmem:[#allocation45_spill] sm:$0xff] %v10099_v6  ;;  %v10112_v3 = vrot.slane %v601_v10, %v9718_v32  ;;  %v10117_v48 = vrot.slane %v618_v34, %v9718_v32  ;;  %v10120_v42 = vrot.slane %v615_v40, %v9718_v32  ;;  %v10123_v23 = vrot.slane %v617_v50, %v9718_v32  ;;  %v10133_v34 = vpop.permute.xlu0 %2383 }
  0xae   :  { %16149 = vst [vmem:[#allocation46_spill] sm:$0xff] %v10103_v43  ;;  %16150 = vst [vmem:[#allocation47_spill] sm:$0xff] %v10106_v13  ;;  %v10126_v45 = vrot.slane %v619_v49, %v9718_v32  ;;  %v1592_v38 = vrot.slane %v1578_v55, %v9732_v35  ;;  %v1593_v43 = vcombine.high %v1585_v41, %v1585_v41  ;;  %9409 = vset.pattern.permute.xlu1 %v16139_v1 }
  0xaf   :  { %16151 = vst [vmem:[#allocation48_spill] sm:$0xff] %v10109_v53  ;;  %16152 = vst [vmem:[#allocation49_spill] sm:$0xff] %v10112_v3  ;;  %v1601_v10 = vrot.slane %v1585_v41, %v9732_v35  ;;  %v1083_v30 = vcombine.high %v10052_v14, %v10052_v14  ;;  %v1090_v40 = vrot.slane %v10052_v14, %v9732_v35  ;;  %3461 = vperm.xlu1 %9409, %v9604_v5  }
  0xb0   :  { %16153 = vst [vmem:[#allocation50_spill] sm:$0xff] %v10117_v48  ;;  %16154 = vst [vmem:[#allocation51_spill] sm:$0xff] %v10120_v42  ;;  %v811_v50 = vcombine.high %v10055_v8, %v10055_v8  ;;  %v818_v49 = vrot.slane %v10055_v8, %v9732_v35  ;;  %v10142_v55 = vadd.f32 %v752_v47, %v9780_v51  ;;  %v10153_v51 = vpop.permute.xlu1 %2111  ;;  %406 = vbcast.lane.b32.xlu0 %v9937_v27, 256 }
  0xb1   :  { %16155 = vst [vmem:[#allocation52_spill] sm:$0xff] %v10123_v23  ;;  %16156 = vst [vmem:[#allocation53_spill] sm:$0xff] %v10126_v45  ;;  %v1594_v41 = vcombine.high %v1592_v38, %v1592_v38  ;;  %v1608_v24 = vrot.slane %v1592_v38, %v9732_v35  ;;  %v1615_v1 = vrot.slane %v1593_v43, %v9732_v35 }
  0xb2   :  { %v1623_v45 = vcombine.high %v1601_v10, %v1601_v10  ;;  %v10149_v14 = vrot.slane %v1601_v10, %v9718_v32  ;;  %v1097_v23 = vrot.slane %v1083_v30, %v9732_v35  ;;  %v1098_v42 = vcombine.high %v1090_v40, %v1090_v40 }
  0xb3   :  { %v1106_v8 = vrot.slane %v1090_v40, %v9732_v35  ;;  %v1622_v47 = vrot.slane %v1594_v41, %v9732_v35  ;;  %v1624_v3 = vcombine.high %v1608_v24, %v1608_v24  ;;  %v1625_v48 = vcombine.high %v1615_v1, %v1615_v1  ;;  %3457 = vperm.xlu1 %9409, %v9615_v9  }
  0xb4   :  { %16157 = vst [vmem:[#allocation54_spill] sm:$0xff] %v10149_v14  ;;  %v10157_v38 = vrot.slane %v1615_v1, %v9718_v32  ;;  %v10160_v43 = vrot.slane %v1623_v45, %v9718_v32  ;;  %v10163_v10 = vrot.slane %v1608_v24, %v9718_v32  ;;  %v1099_v14 = vcombine.high %v1097_v23, %v1097_v23  ;;  %v10176_v45 = vpop.permute.xlu0 %1571 }
  0xb5   :  { %v1113_v30 = vrot.slane %v1097_v23, %v9732_v35  ;;  %v1626_v40 = vcombine.high %v1622_v47, %v1622_v47  ;;  %v10168_v53 = vrot.slane %v1625_v48, %v9718_v32  ;;  %v10171_v41 = vrot.slane %v1622_v47, %v9718_v32  ;;  %417 = vbcast.lane.b32.xlu0 %v9944_v46, 256 }
  0xb6   :  { %16158 = vst [vmem:[#allocation55_spill] sm:$0xff] %v10157_v38  ;;  %16159 = vst [vmem:[#allocation56_spill] sm:$0xff] %v10160_v43  ;;  %v10174_v1 = vrot.slane %v1624_v3, %v9718_v32  ;;  %v1120_v24 = vrot.slane %v1098_v42, %v9732_v35  ;;  %v1127_v23 = vrot.slane %v1099_v14, %v9732_v35 }
  0xb7   :  { %16160 = vst [vmem:[#allocation57_spill] sm:$0xff] %v10163_v10  ;;  %16161 = vst [vmem:[#allocation58_spill] sm:$0xff] %v10168_v53  ;;  %v1128_v10 = vcombine.high %v1106_v8, %v1106_v8  ;;  %v1129_v43 = vcombine.high %v1113_v30, %v1113_v30  ;;  %v10182_v38 = vrot.slane %v1626_v40, %v9718_v32  ;;  %v16169_v40 = vmov 12  }
  0xb8   :  { %16162 = vst [vmem:[#allocation59_spill] sm:$0xff] %v10171_v41  ;;  %16163 = vst [vmem:[#allocation60_spill] sm:$0xff] %v10174_v1  ;;  %v10185_v48 = vrot.slane %v1106_v8, %v9718_v32  ;;  %v10188_v47 = vrot.slane %v1113_v30, %v9718_v32  ;;  %v825_v3 = vrot.slane %v811_v50, %v9732_v35  ;;  %v10191_v1 = vpop.permute.xlu1 %494  ;;  %9412 = vset.pattern.permute.xlu1 %v16169_v40 }
  0xb9   :  { %16164 = vst [vmem:[#allocation61_spill] sm:$0xff] %v10182_v38  ;;  %v1130_v41 = vcombine.high %v1120_v24, %v1120_v24  ;;  %v1131_v53 = vcombine.high %v1127_v23, %v1127_v23  ;;  %v10194_v42 = vrot.slane %v1120_v24, %v9718_v32  ;;  %v10197_v14 = vrot.slane %v1128_v10, %v9718_v32 }
  0xba   :  { %16165 = vst [vmem:[#allocation62_spill] sm:$0xff] %v10185_v48  ;;  %16166 = vst [vmem:[#allocation63_spill] sm:$0xff] %v10188_v47  ;;  %v10201_v8 = vrot.slane %v1127_v23, %v9718_v32  ;;  %v10204_v30 = vrot.slane %v1129_v43, %v9718_v32  ;;  %v826_v38 = vcombine.high %v818_v49, %v818_v49  ;;  %3733 = vperm.xlu1 %9412, %v9604_v5  }
  0xbb   :  { %16167 = vst [vmem:[#allocation64_spill] sm:$0xff] %v10194_v42  ;;  %16168 = vst [vmem:[#allocation65_spill] sm:$0xff] %v10197_v14  ;;  %v827_v50 = vcombine.high %v825_v3, %v825_v3  ;;  %v10208_v47 = vrot.slane %v1130_v41, %v9718_v32  ;;  %v10211_v24 = vrot.slane %v1131_v53, %v9718_v32  ;;  %428 = vbcast.lane.b32.xlu0 %v9951_v54, 256 }
  0xbc   :  { %16170 = vst [vmem:[#allocation66_spill] sm:$0xff] %v10201_v8  ;;  %16171 = vst [vmem:[#allocation67_spill] sm:$0xff] %v10204_v30  ;;  %v834_v10 = vrot.slane %v818_v49, %v9732_v35  ;;  %v841_v40 = vrot.slane %v825_v3, %v9732_v35  ;;  %v848_v23 = vrot.slane %v826_v38, %v9732_v35  ;;  %v10222_v8 = vpop.permute.xlu0 %1557 }
  0xbd   :  { %16172 = vst [vmem:[#allocation68_spill] sm:$0xff] %v10208_v47  ;;  %16173 = vst [vmem:[#allocation69_spill] sm:$0xff] %v10211_v24  ;;  %v855_v43 = vrot.slane %v827_v50, %v9732_v35  ;;  %v762_v30 = vcombine.high %v10142_v55, %v10142_v55  ;;  %v769_v41 = vrot.slane %v10142_v55, %v9732_v35  ;;  %v10230_v47 = vpop.permute.xlu1 %1013 }
  0xbe   :  { %v856_v53 = vcombine.high %v834_v10, %v834_v10  ;;  %v857_v24 = vcombine.high %v841_v40, %v841_v40  ;;  %v10225_v49 = vrot.slane %v834_v10, %v9718_v32  ;;  %v10228_v3 = vrot.slane %v841_v40, %v9718_v32  ;;  %3729 = vperm.xlu1 %9412, %v9615_v9  }
  0xbf   :  { %v858_v38 = vcombine.high %v848_v23, %v848_v23  ;;  %v859_v50 = vcombine.high %v855_v43, %v855_v43  ;;  %v10233_v14 = vrot.slane %v848_v23, %v9718_v32  ;;  %v10236_v42 = vrot.slane %v855_v43, %v9718_v32  ;;  %439 = vbcast.lane.b32.xlu0 %v9956_v52, 256 }
  0xc0   :  { %16174 = vst [vmem:[#allocation70_spill] sm:$0xff] %v10225_v49  ;;  %16175 = vst [vmem:[#allocation71_spill] sm:$0xff] %v10228_v3  ;;  %v10240_v55 = vrot.slane %v856_v53, %v9718_v32  ;;  %v10243_v10 = vrot.slane %v857_v24, %v9718_v32  ;;  %v776_v40 = vrot.slane %v762_v30, %v9732_v35 }
  0xc1   :  { %16176 = vst [vmem:[#allocation72_spill] sm:$0xff] %v10233_v14  ;;  %16177 = vst [vmem:[#allocation73_spill] sm:$0xff] %v10236_v42  ;;  %v777_v48 = vcombine.high %v769_v41, %v769_v41  ;;  %v10248_v3 = vrot.slane %v858_v38, %v9718_v32  ;;  %v10251_v23 = vrot.slane %v859_v50, %v9718_v32  ;;  %v10256_v42 = vpop.permute.xlu0 %2927 }
  0xc2   :  { %16178 = vst [vmem:[#allocation74_spill] sm:$0xff] %v10240_v55  ;;  %16179 = vst [vmem:[#allocation75_spill] sm:$0xff] %v10243_v10  ;;  %v785_v43 = vrot.slane %v769_v41, %v9732_v35  ;;  %v1846_v53 = vadd.f32 %v10072_v25, %v9796_v56  ;;  %v778_v24 = vcombine.high %v776_v40, %v776_v40  ;;  %v10269_v56 = vpop.permute.xlu1 %1299 }
  0xc3   :  { %16180 = vst [vmem:[#allocation76_spill] sm:$0xff] %v10248_v3  ;;  %16181 = vst [vmem:[#allocation77_spill] sm:$0xff] %v10251_v23  ;;  %v792_v10 = vrot.slane %v776_v40, %v9732_v35  ;;  %v799_v30 = vrot.slane %v777_v48, %v9732_v35  ;;  %v10262_v55 = vadd.f32 %v10095_v29, %v9799_v57  ;;  %v16184_v3 = vmov 13   ;;  %450 = vbcast.lane.b32.xlu0 %v9972_v11, 256 }
  0xc4   :  { %v807_v38 = vcombine.high %v785_v43, %v785_v43  ;;  %v10265_v50 = vrot.slane %v785_v43, %v9718_v32  ;;  %v1850_v23 = vcombine.high %v1846_v53, %v1846_v53  ;;  %v1857_v41 = vrot.slane %v1846_v53, %v9732_v35  ;;  %9413 = vset.pattern.permute.xlu1 %v16184_v3 }
  0xc5   :  { %16182 = vst [vmem:[#allocation78_spill] sm:$0xff] %v10262_v55  ;;  %v806_v25 = vrot.slane %v778_v24, %v9732_v35  ;;  %v808_v40 = vcombine.high %v792_v10, %v792_v10  ;;  %v809_v14 = vcombine.high %v799_v30, %v799_v30  ;;  %v10273_v48 = vrot.slane %v799_v30, %v9718_v32 }
  0xc6   :  { %16183 = vst [vmem:[#allocation79_spill] sm:$0xff] %v10265_v50  ;;  %4005 = vperm.xlu1 %9413, %v9604_v5   ;;  %v10277_v57 = vrot.slane %v807_v38, %v9718_v32  ;;  %v10280_v29 = vrot.slane %v792_v10, %v9718_v32  ;;  %v1864_v43 = vrot.slane %v1850_v23, %v9732_v35 }
  0xc7   :  { %16185 = vst [vmem:[#allocation80_spill] sm:$0xff] %v10273_v48  ;;  %v1865_v3 = vcombine.high %v1857_v41, %v1857_v41  ;;  %v810_v53 = vcombine.high %v806_v25, %v806_v25  ;;  %v10285_v24 = vrot.slane %v809_v14, %v9718_v32  ;;  %v10288_v30 = vrot.slane %v806_v25, %v9718_v32 }
  0xc8   :  { %16186 = vst [vmem:[#allocation81_spill] sm:$0xff] %v10277_v57  ;;  %16187 = vst [vmem:[#allocation82_spill] sm:$0xff] %v10280_v29  ;;  %v10291_v55 = vrot.slane %v808_v40, %v9718_v32  ;;  %v1866_v38 = vcombine.high %v1864_v43, %v1864_v43  ;;  %v1873_v49 = vrot.slane %v1857_v41, %v9732_v35  ;;  %v10296_v29 = vpop.permute.xlu0 %2115  ;;  %v10310_v41 = vpop.permute.xlu1 %1009 }
  0xc9   :  { %16188 = vst [vmem:[#allocation83_spill] sm:$0xff] %v10285_v24  ;;  %16189 = vst [vmem:[#allocation84_spill] sm:$0xff] %v10288_v30  ;;  %v1880_v10 = vrot.slane %v1864_v43, %v9732_v35  ;;  %v1887_v23 = vrot.slane %v1865_v3, %v9732_v35  ;;  %v10299_v57 = vrot.slane %v810_v53, %v9718_v32 }
  0xca   :  { %16190 = vst [vmem:[#allocation85_spill] sm:$0xff] %v10291_v55  ;;  %v10303_v14 = vadd.f32 %v10114_v0, %v9802_v58  ;;  %v2390_v25 = vadd.f32 %v10133_v34, %v9821_v63  ;;  %v2118_v40 = vadd.f32 %v10153_v51, %v9809_v59  ;;  %4001 = vperm.xlu1 %9413, %v9615_v9  }
  0xcb   :  { %16191 = vst [vmem:[#allocation86_spill] sm:$0xff] %v10299_v57  ;;  %v1894_v43 = vrot.slane %v1866_v38, %v9732_v35  ;;  %v1895_v3 = vcombine.high %v1873_v49, %v1873_v49  ;;  %v1896_v55 = vcombine.high %v1880_v10, %v1880_v10  ;;  %v1897_v53 = vcombine.high %v1887_v23, %v1887_v23 }
  0xcc   :  { %v10315_v58 = vrot.slane %v1873_v49, %v9718_v32  ;;  %v10318_v0 = vrot.slane %v1887_v23, %v9718_v32  ;;  %v10321_v63 = vrot.slane %v1880_v10, %v9718_v32  ;;  %v2394_v59 = vcombine.high %v2390_v25, %v2390_v25  ;;  %v8922_v49 = vld [vmem:[%s15447_s7] sm:$0xff] }
  0xcd   :  { %v1898_v34 = vcombine.high %v1894_v43, %v1894_v43  ;;  %v10324_v51 = vrot.slane %v1895_v3, %v9718_v32  ;;  %v10327_v38 = vrot.slane %v1897_v53, %v9718_v32  ;;  %v10330_v57 = vrot.slane %v1894_v43, %v9718_v32  ;;  %8932 = vperm.xlu0 %9419, %v8922_v49  }
  0xce   :  { %16192 = vst [vmem:[#allocation87_spill] sm:$0xff] %v10315_v58  ;;  %16193 = vst [vmem:[#allocation88_spill] sm:$0xff] %v10318_v0  ;;  %v10336_v23 = vrot.slane %v1896_v55, %v9718_v32  ;;  %v2401_v10 = vrot.slane %v2390_v25, %v9732_v35  ;;  %v2122_v0 = vcombine.high %v2118_v40, %v2118_v40  ;;  %9415 = vset.pattern.permute.xlu1 %v16122_v39  ;;  %v10351_v55 = vpop.permute.xlu0 %2101  ;;  %v10354_v25 = vpop.permute.xlu1 %1285 }
  0xcf   :  { %16194 = vst [vmem:[#allocation89_spill] sm:$0xff] %v10321_v63  ;;  %16195 = vst [vmem:[#allocation90_spill] sm:$0xff] %v10324_v51  ;;  %v2408_v63 = vrot.slane %v2394_v59, %v9732_v35  ;;  %v10342_v3 = vrot.slane %v1898_v34, %v9718_v32  ;;  %v2129_v43 = vrot.slane %v2118_v40, %v9732_v35  ;;  %4277 = vperm.xlu1 %9415, %v9604_v5  }
  0xd0   :  { %16196 = vst [vmem:[#allocation91_spill] sm:$0xff] %v10327_v38  ;;  %16197 = vst [vmem:[#allocation92_spill] sm:$0xff] %v10330_v57  ;;  %v1575_v53 = vadd.f32 %v10176_v45, %v9828_v7  ;;  %v10349_v57 = vadd.f32 %v10191_v1, %v9812_v60  ;;  %v2409_v59 = vcombine.high %v2401_v10, %v2401_v10  ;;  %v8924_v1 = vld [vmem:[%s15447_s7 + $0x10] sm:$0xff] }
  0xd1   :  { %16198 = vst [vmem:[#allocation93_spill] sm:$0xff] %v10336_v23  ;;  %16199 = vst [vmem:[#allocation94_spill] sm:$0xff] %v10342_v3  ;;  %v2410_v39 = vcombine.high %v2408_v63, %v2408_v63  ;;  %v2417_v34 = vrot.slane %v2401_v10, %v9732_v35  ;;  %v2424_v3 = vrot.slane %v2408_v63, %v9732_v35  ;;  %8942 = vperm.xlu0 %9419, %v8924_v1  }
  0xd2   :  { %16200 = vst [vmem:[#allocation95_spill] sm:$0xff] %v10349_v57  ;;  %v2136_v40 = vrot.slane %v2122_v0, %v9732_v35  ;;  %v2137_v7 = vcombine.high %v2129_v43, %v2129_v43  ;;  %v2145_v45 = vrot.slane %v2129_v43, %v9732_v35  ;;  %v1627_v60 = vcombine.high %v1575_v53, %v1575_v53  ;;  %v10372_v43 = vpop.permute.xlu0 %3471 }
  0xd3   :  { %v2431_v5 = vrot.slane %v2409_v59, %v9732_v35  ;;  %v2438_v57 = vrot.slane %v2410_v39, %v9732_v35  ;;  %v2439_v23 = vcombine.high %v2417_v34, %v2417_v34  ;;  %v2440_v38 = vcombine.high %v2424_v3, %v2424_v3  ;;  %4273 = vperm.xlu1 %9415, %v9615_v9  }
  0xd4   :  { %v10366_v10 = vrot.slane %v2417_v34, %v9718_v32  ;;  %v10369_v63 = vrot.slane %v2424_v3, %v9718_v32  ;;  %v2138_v0 = vcombine.high %v2136_v40, %v2136_v40  ;;  %v2152_v49 = vrot.slane %v2136_v40, %v9732_v35  ;;  %v10381_v34 = vpop.permute.xlu1 %2655 }
  0xd5   :  { %v2441_v51 = vcombine.high %v2431_v5, %v2431_v5  ;;  %v2442_v58 = vcombine.high %v2438_v57, %v2438_v57  ;;  %v10376_v59 = vrot.slane %v2431_v5, %v9718_v32  ;;  %v10379_v39 = vrot.slane %v2439_v23, %v9718_v32 }
  0xd6   :  { %16201 = vst [vmem:[#allocation96_spill] sm:$0xff] %v10366_v10  ;;  %16202 = vst [vmem:[#allocation97_spill] sm:$0xff] %v10369_v63  ;;  %v10384_v3 = vrot.slane %v2438_v57, %v9718_v32  ;;  %v10387_v40 = vrot.slane %v2440_v38, %v9718_v32  ;;  %v2159_v63 = vrot.slane %v2137_v7, %v9732_v35  ;;  %v8926_v57 = vld [vmem:[%s15447_s7 + $0x20] sm:$0xff] }
  0xd7   :  { %16203 = vst [vmem:[#allocation98_spill] sm:$0xff] %v10376_v59  ;;  %16204 = vst [vmem:[#allocation99_spill] sm:$0xff] %v10379_v39  ;;  %v2166_v9 = vrot.slane %v2138_v0, %v9732_v35  ;;  %v10392_v10 = vrot.slane %v2441_v51, %v9718_v32  ;;  %v10395_v5 = vrot.slane %v2442_v58, %v9718_v32  ;;  %v16211_v0 = vmov 15   ;;  %8952 = vperm.xlu0 %9419, %v8926_v57  }
  0xd8   :  { %16205 = vst [vmem:[#allocation100_spill] sm:$0xff] %v10384_v3  ;;  %16206 = vst [vmem:[#allocation101_spill] sm:$0xff] %v10387_v40  ;;  %v2167_v23 = vcombine.high %v2145_v45, %v2145_v45  ;;  %v2168_v39 = vcombine.high %v2152_v49, %v2152_v49  ;;  %v2169_v1 = vcombine.high %v2159_v63, %v2159_v63  ;;  %9417 = vset.pattern.permute.xlu1 %v16211_v0 }
  0xd9   :  { %16207 = vst [vmem:[#allocation102_spill] sm:$0xff] %v10392_v10  ;;  %16208 = vst [vmem:[#allocation103_spill] sm:$0xff] %v10395_v5  ;;  %v2170_v3 = vcombine.high %v2166_v9, %v2166_v9  ;;  %v10401_v38 = vrot.slane %v2145_v45, %v9718_v32  ;;  %v10404_v7 = vrot.slane %v2159_v63, %v9718_v32  ;;  %v9490_v45 = vld [vmem:[%s15442_s2 + $0x8] sm:$0xff]  ;;  %v10432_v10 = vpop.permute.xlu1 %1281  ;;  %s11316_s2 = sld [smem:[#allocation2 + $0xe]] }
  0xda   :  { %v10408_v51 = vrot.slane %v2167_v23, %v9718_v32  ;;  %v10411_v58 = vrot.slane %v2152_v49, %v9718_v32  ;;  %v10414_v5 = vrot.slane %v2166_v9, %v9718_v32  ;;  %v10417_v40 = vrot.slane %v2168_v39, %v9718_v32  ;;  %4549 = vperm.xlu1 %9417, %v9490_v45   ;;  %v10430_v9 = vpop.permute.xlu0 %2659 }
  0xdb   :  { %16209 = vst [vmem:[#allocation104_spill] sm:$0xff] %v10401_v38  ;;  %16210 = vst [vmem:[#allocation105_spill] sm:$0xff] %v10404_v7  ;;  %v10423_v63 = vrot.slane %v2169_v1, %v9718_v32  ;;  %v10426_v23 = vrot.slane %v2170_v3, %v9718_v32  ;;  %v1634_v49 = vrot.slane %v1575_v53, %v9732_v35 }
  0xdc   :  { %16212 = vst [vmem:[#allocation106_spill] sm:$0xff] %v10408_v51  ;;  %16213 = vst [vmem:[#allocation107_spill] sm:$0xff] %v10411_v58  ;;  %v1641_v0 = vrot.slane %v1627_v60, %v9732_v35  ;;  %v10436_v39 = vadd.f32 %v10222_v8, %v9815_v61  ;;  %v10440_v1 = vadd.f32 %v10230_v47, %v9838_v20  ;;  %v154_v60 = vld [vmem:[%s15444_s4] sm:$0xff]  ;;  %v8928_v20 = vld [vmem:[%s15447_s7 + $0x30] sm:$0xff]  ;;  %v16219_v8 = vmov 0  }
  0xdd   :  { %16214 = vst [vmem:[#allocation108_spill] sm:$0xff] %v10414_v5  ;;  %16215 = vst [vmem:[#allocation109_spill] sm:$0xff] %v10417_v40  ;;  %v2934_v3 = vadd.f32 %v10256_v42, %v9848_v26  ;;  %v1303_v53 = vadd.f32 %v10269_v56, %v9853_v28  ;;  %v1642_v45 = vcombine.high %v1634_v49, %v1634_v49  ;;  %8962 = vperm.xlu0 %9419, %v8928_v20  }
  0xde   :  { %16216 = vst [vmem:[#allocation110_spill] sm:$0xff] %v10423_v63  ;;  %16217 = vst [vmem:[#allocation111_spill] sm:$0xff] %v10426_v23  ;;  %v1643_v57 = vcombine.high %v1641_v0, %v1641_v0  ;;  %v1650_v59 = vrot.slane %v1634_v49, %v9732_v35  ;;  %v1657_v61 = vrot.slane %v1641_v0, %v9732_v35  ;;  %9418 = vset.pattern.permute.xlu1 %v16219_v8  ;;  %v10466_v63 = vpop.permute.xlu1 %1843 }
  0xdf   :  { %16218 = vst [vmem:[#allocation112_spill] sm:$0xff] %v10436_v39  ;;  %v2938_v47 = vcombine.high %v2934_v3, %v2934_v3  ;;  %v2945_v26 = vrot.slane %v2934_v3, %v9732_v35  ;;  %v1355_v42 = vcombine.high %v1303_v53, %v1303_v53  ;;  %v1362_v28 = vrot.slane %v1303_v53, %v9732_v35 }
  0xe0   :  { %v1664_v56 = vrot.slane %v1642_v45, %v9732_v35  ;;  %v1671_v23 = vrot.slane %v1643_v57, %v9732_v35  ;;  %v1672_v40 = vcombine.high %v1650_v59, %v1650_v59  ;;  %v1673_v49 = vcombine.high %v1657_v61, %v1657_v61  ;;  %238 = vperm.xlu1 %9418, %v154_v60   ;;  %v10474_v60 = vpop.permute.xlu0 %2645 }
  0xe1   :  { %v10460_v0 = vrot.slane %v1650_v59, %v9718_v32  ;;  %v10463_v5 = vrot.slane %v1657_v61, %v9718_v32  ;;  %v2952_v3 = vrot.slane %v2938_v47, %v9732_v35  ;;  %v2953_v58 = vcombine.high %v2945_v26, %v2945_v26  ;;  %v9100_v59 = vld [vmem:[%s15449_s9] sm:$0xf]  ;;  %s10805_s9 = sld [smem:[#allocation2 + $0x7]] }
  0xe2   :  { %v1674_v53 = vcombine.high %v1664_v56, %v1664_v56  ;;  %v1675_v8 = vcombine.high %v1671_v23, %v1671_v23  ;;  %v10469_v45 = vrot.slane %v1664_v56, %v9718_v32  ;;  %v10472_v57 = vrot.slane %v1672_v40, %v9718_v32  ;;  %9103 = vperm.xlu0 %9419, %v9100_v59  }
  0xe3   :  { %16220 = vst [vmem:[#allocation113_spill] sm:$0xff] %v10460_v0  ;;  %16221 = vst [vmem:[#allocation114_spill] sm:$0xff] %v10463_v5  ;;  %v10480_v61 = vrot.slane %v1671_v23, %v9718_v32  ;;  %v10483_v47 = vrot.slane %v1673_v49, %v9718_v32  ;;  %v2954_v20 = vcombine.high %v2952_v3, %v2952_v3 }
  0xe4   :  { %16222 = vst [vmem:[#allocation115_spill] sm:$0xff] %v10469_v45  ;;  %16223 = vst [vmem:[#allocation116_spill] sm:$0xff] %v10472_v57  ;;  %v2961_v51 = vrot.slane %v2945_v26, %v9732_v35  ;;  %v10487_v56 = vrot.slane %v1674_v53, %v9718_v32  ;;  %v10490_v40 = vrot.slane %v1675_v8, %v9718_v32  ;;  %285 = vbcast.lane.b32.xlu1 %v9920_v12, 256 }
  0xe5   :  { %16224 = vst [vmem:[#allocation117_spill] sm:$0xff] %v10480_v61  ;;  %16225 = vst [vmem:[#allocation118_spill] sm:$0xff] %v10483_v47  ;;  %v2968_v7 = vrot.slane %v2952_v3, %v9732_v35  ;;  %v2975_v38 = vrot.slane %v2953_v58, %v9732_v35  ;;  %v2982_v23 = vrot.slane %v2954_v20, %v9732_v35  ;;  %v10506_v58 = vpop.permute.xlu1 %1553 }
  0xe6   :  { %16226 = vst [vmem:[#allocation119_spill] sm:$0xff] %v10487_v56  ;;  %16227 = vst [vmem:[#allocation120_spill] sm:$0xff] %v10490_v40  ;;  %v2983_v61 = vcombine.high %v2961_v51, %v2961_v51  ;;  %v10497_v49 = vrot.slane %v2961_v51, %v9718_v32  ;;  %v1369_v26 = vrot.slane %v1355_v42, %v9732_v35  ;;  %v10508_v40 = vpop.permute.xlu0 %3203 }
  0xe7   :  { %v2984_v53 = vcombine.high %v2968_v7, %v2968_v7  ;;  %v2985_v47 = vcombine.high %v2975_v38, %v2975_v38  ;;  %v10501_v8 = vrot.slane %v2975_v38, %v9718_v32  ;;  %v10504_v3 = vrot.slane %v2968_v7, %v9718_v32 }
  0xe8   :  { %16228 = vst [vmem:[#allocation121_spill] sm:$0xff] %v10497_v49  ;;  %v2986_v20 = vcombine.high %v2982_v23, %v2982_v23  ;;  %v10511_v5 = vrot.slane %v2983_v61, %v9718_v32  ;;  %v10514_v51 = vrot.slane %v2982_v23, %v9718_v32  ;;  %v1370_v42 = vcombine.high %v1362_v28, %v1362_v28 }
  0xe9   :  { %16229 = vst [vmem:[#allocation122_spill] sm:$0xff] %v10501_v8  ;;  %16230 = vst [vmem:[#allocation123_spill] sm:$0xff] %v10504_v3  ;;  %v10517_v59 = vrot.slane %v2985_v47, %v9718_v32  ;;  %v10520_v38 = vrot.slane %v2984_v53, %v9718_v32  ;;  %v1371_v7 = vcombine.high %v1369_v26, %v1369_v26  ;;  %289 = vbcast.lane.b32.xlu1 %v9920_v12, 264 }
  0xea   :  { %16231 = vst [vmem:[#allocation124_spill] sm:$0xff] %v10511_v5  ;;  %16232 = vst [vmem:[#allocation125_spill] sm:$0xff] %v10514_v51  ;;  %v1378_v3 = vrot.slane %v1362_v28, %v9732_v35  ;;  %v10525_v8 = vrot.slane %v2986_v20, %v9718_v32  ;;  %v1385_v61 = vrot.slane %v1369_v26, %v9732_v35 }
  0xeb   :  { %16233 = vst [vmem:[#allocation126_spill] sm:$0xff] %v10517_v59  ;;  %16234 = vst [vmem:[#allocation127_spill] sm:$0xff] %v10520_v38  ;;  %v1392_v23 = vrot.slane %v1370_v42, %v9732_v35  ;;  %v2119_v51 = vadd.f32 %v10296_v29, %v9864_v36  ;;  %v1399_v47 = vrot.slane %v1371_v7, %v9732_v35  ;;  %v10545_v42 = vpop.permute.xlu1 %1829 }
  0xec   :  { %16235 = vst [vmem:[#allocation128_spill] sm:$0xff] %v10525_v8  ;;  %v1400_v59 = vcombine.high %v1378_v3, %v1378_v3  ;;  %v10533_v53 = vrot.slane %v1378_v3, %v9718_v32  ;;  %v10537_v28 = vadd.f32 %v10351_v55, %v9858_v31  ;;  %v1401_v12 = vcombine.high %v1385_v61, %v1385_v61  ;;  %v10554_v31 = vpop.permute.xlu0 %3189 }
  0xed   :  { %v1402_v20 = vcombine.high %v1392_v23, %v1392_v23  ;;  %v10540_v8 = vrot.slane %v1392_v23, %v9718_v32  ;;  %v10543_v26 = vrot.slane %v1385_v61, %v9718_v32  ;;  %v1403_v36 = vcombine.high %v1399_v47, %v1399_v47  ;;  %300 = vbcast.lane.b32.xlu1 %v9738_v37, 264 }
  0xee   :  { %16236 = vst [vmem:[#allocation129_spill] sm:$0xff] %v10533_v53  ;;  %16237 = vst [vmem:[#allocation130_spill] sm:$0xff] %v10537_v28  ;;  %v10548_v29 = vrot.slane %v1400_v59, %v9718_v32  ;;  %v10551_v3 = vrot.slane %v1399_v47, %v9718_v32  ;;  %v2171_v7 = vcombine.high %v2119_v51, %v2119_v51 }
  0xef   :  { %16238 = vst [vmem:[#allocation131_spill] sm:$0xff] %v10540_v8  ;;  %16239 = vst [vmem:[#allocation132_spill] sm:$0xff] %v10543_v26  ;;  %v10557_v55 = vrot.slane %v1402_v20, %v9718_v32  ;;  %v10560_v61 = vrot.slane %v1401_v12, %v9718_v32  ;;  %v2178_v23 = vrot.slane %v2119_v51, %v9732_v35 }
  0xf0   :  { %16240 = vst [vmem:[#allocation133_spill] sm:$0xff] %v10548_v29  ;;  %16241 = vst [vmem:[#allocation134_spill] sm:$0xff] %v10551_v3  ;;  %v10565_v59 = vadd.f32 %v10310_v41, %v9861_v33  ;;  %v10568_v47 = vrot.slane %v1403_v36, %v9718_v32  ;;  %v2185_v38 = vrot.slane %v2171_v7, %v9732_v35 }
  0xf1   :  { %16242 = vst [vmem:[#allocation135_spill] sm:$0xff] %v10557_v55  ;;  %16243 = vst [vmem:[#allocation136_spill] sm:$0xff] %v10560_v61  ;;  %v10573_v37 = vadd.f32 %v10354_v25, %v9876_v62  ;;  %v3478_v20 = vadd.f32 %v10372_v43, %v9900_v19  ;;  %v2186_v12 = vcombine.high %v2178_v23, %v2178_v23  ;;  %v16246_v25 = vld [vmem:[#allocation7_spill] sm:$0xff]  ;;  %v10589_v19 = vpop.permute.xlu0 %4559 }
  0xf2   :  { %16244 = vst [vmem:[#allocation137_spill] sm:$0xff] %v10565_v59  ;;  %16245 = vst [vmem:[#allocation138_spill] sm:$0xff] %v10568_v47  ;;  %v2194_v5 = vrot.slane %v2178_v23, %v9732_v35  ;;  %v2662_v51 = vadd.f32 %v10381_v34, %v9882_v2  ;;  %v10582_v33 = vadd.f32 %v10430_v9, %v9903_v4  ;;  %311 = vbcast.lane.b32.xlu1 %v16246_v25, 264  ;;  %v10587_v59 = vpop.permute.xlu1 %3199 }
  0xf3   :  { %v2187_v41 = vcombine.high %v2185_v38, %v2185_v38  ;;  %v2201_v36 = vrot.slane %v2185_v38, %v9732_v35  ;;  %v3482_v7 = vcombine.high %v3478_v20, %v3478_v20  ;;  %v3489_v62 = vrot.slane %v3478_v20, %v9732_v35 }
  0xf4   :  { %v2208_v43 = vrot.slane %v2186_v12, %v9732_v35  ;;  %v2216_v23 = vcombine.high %v2194_v5, %v2194_v5  ;;  %v10593_v2 = vrot.slane %v2194_v5, %v9718_v32  ;;  %v2666_v4 = vcombine.high %v2662_v51, %v2662_v51 }
  0xf5   :  { %v2215_v34 = vrot.slane %v2187_v41, %v9732_v35  ;;  %v2217_v9 = vcombine.high %v2201_v36, %v2201_v36  ;;  %v10597_v38 = vrot.slane %v2201_v36, %v9718_v32  ;;  %v3496_v20 = vrot.slane %v3482_v7, %v9732_v35  ;;  %v16253_v36 = vld [vmem:[#allocation8_spill] sm:$0xff] }
  0xf6   :  { %16247 = vst [vmem:[#allocation7_spill] sm:$0xff] %v10593_v2  ;;  %v2218_v25 = vcombine.high %v2208_v43, %v2208_v43  ;;  %v10601_v49 = vrot.slane %v2208_v43, %v9718_v32  ;;  %v10604_v28 = vrot.slane %v2216_v23, %v9718_v32  ;;  %v3497_v12 = vcombine.high %v3489_v62, %v3489_v62 }
  0xf7   :  { %16248 = vst [vmem:[#allocation139_spill] sm:$0xff] %v10597_v38  ;;  %v2219_v56 = vcombine.high %v2215_v34, %v2215_v34  ;;  %v10607_v5 = vrot.slane %v2215_v34, %v9718_v32  ;;  %v10610_v41 = vrot.slane %v2217_v9, %v9718_v32  ;;  %v3498_v2 = vcombine.high %v3496_v20, %v3496_v20 }
  0xf8   :  { %16249 = vst [vmem:[#allocation140_spill] sm:$0xff] %v10601_v49  ;;  %16250 = vst [vmem:[#allocation141_spill] sm:$0xff] %v10604_v28  ;;  %322 = vbcast.lane.b32.xlu1 %v16253_v36, 264  ;;  %v10614_v7 = vrot.slane %v2218_v25, %v9718_v32  ;;  %v3505_v43 = vrot.slane %v3489_v62, %v9732_v35  ;;  %v3512_v38 = vrot.slane %v3496_v20, %v9732_v35  ;;  %v10619_v28 = vpop.permute.xlu1 %1825 }
  0xf9   :  { %16251 = vst [vmem:[#allocation142_spill] sm:$0xff] %v10607_v5  ;;  %16252 = vst [vmem:[#allocation143_spill] sm:$0xff] %v10610_v41  ;;  %v3519_v23 = vrot.slane %v3497_v12, %v9732_v35  ;;  %v10622_v34 = vrot.slane %v2219_v56, %v9718_v32  ;;  %v3526_v9 = vrot.slane %v3498_v2, %v9732_v35  ;;  %v10627_v5 = vpop.permute.xlu0 %3747 }
  0xfa   :  { %16254 = vst [vmem:[#allocation8_spill] sm:$0xff] %v10614_v7  ;;  %v2673_v41 = vrot.slane %v2662_v51, %v9732_v35  ;;  %v2680_v36 = vrot.slane %v2666_v4, %v9732_v35  ;;  %v3527_v25 = vcombine.high %v3505_v43, %v3505_v43  ;;  %v3528_v7 = vcombine.high %v3512_v38, %v3512_v38  ;;  %v16260_v51 = vld [vmem:[#allocation9_spill] sm:$0xff] }
  0xfb   :  { %16255 = vst [vmem:[#allocation144_spill] sm:$0xff] %v10622_v34  ;;  %v3529_v62 = vcombine.high %v3519_v23, %v3519_v23  ;;  %v10630_v20 = vrot.slane %v3505_v43, %v9718_v32  ;;  %v3530_v12 = vcombine.high %v3526_v9, %v3526_v9  ;;  %v10633_v49 = vrot.slane %v3519_v23, %v9718_v32 }
  0xfc   :  { %v10636_v56 = vrot.slane %v3512_v38, %v9718_v32  ;;  %v10639_v2 = vrot.slane %v3526_v9, %v9718_v32  ;;  %333 = vbcast.lane.b32.xlu1 %v16260_v51, 264  ;;  %v10643_v4 = vrot.slane %v3527_v25, %v9718_v32  ;;  %v10649_v43 = vrot.slane %v3528_v7, %v9718_v32  ;;  %v16265_v51 = vld [vmem:[#allocation11_spill] sm:$0xff] }
  0xfd   :  { %16256 = vst [vmem:[#allocation145_spill] sm:$0xff] %v10630_v20  ;;  %16257 = vst [vmem:[#allocation146_spill] sm:$0xff] %v10633_v49  ;;  %v10646_v34 = vrot.slane %v3529_v62, %v9718_v32  ;;  %v2681_v20 = vcombine.high %v2673_v41, %v2673_v41  ;;  %v10652_v23 = vrot.slane %v3530_v12, %v9718_v32 }
  0xfe   :  { %16258 = vst [vmem:[#allocation147_spill] sm:$0xff] %v10636_v56  ;;  %16259 = vst [vmem:[#allocation148_spill] sm:$0xff] %v10639_v2  ;;  %v2682_v38 = vcombine.high %v2680_v36, %v2680_v36  ;;  %v2689_v56 = vrot.slane %v2673_v41, %v9732_v35  ;;  %v2696_v9 = vrot.slane %v2680_v36, %v9732_v35  ;;  %v10656_v2 = vpop.permute.xlu1 %2387 }
  0xff   :  { %16261 = vst [vmem:[#allocation9_spill] sm:$0xff] %v10643_v4  ;;  %16262 = vst [vmem:[#allocation149_spill] sm:$0xff] %v10646_v34  ;;  %v2703_v25 = vrot.slane %v2681_v20, %v9732_v35  ;;  %v2715_v62 = vcombine.high %v10582_v33, %v10582_v33  ;;  %v2722_v7 = vrot.slane %v10582_v33, %v9732_v35  ;;  %v16268_v34 = vld [vmem:[#allocation10_spill] sm:$0xff]  ;;  %v10672_v20 = vpop.permute.xlu0 %4015 }
 0x100   :  { %16263 = vst [vmem:[#allocation150_spill] sm:$0xff] %v10649_v43  ;;  %16264 = vst [vmem:[#allocation151_spill] sm:$0xff] %v10652_v23  ;;  %v10665_v43 = vadd.f32 %v10432_v10, %v16265_v51  ;;  %v2710_v12 = vrot.slane %v2682_v38, %v9732_v35  ;;  %v2711_v23 = vcombine.high %v2689_v56, %v2689_v56  ;;  %344 = vbcast.lane.b32.xlu1 %v16268_v34, 264 }
 0x101   :  { %v2712_v41 = vcombine.high %v2696_v9, %v2696_v9  ;;  %v10669_v36 = vrot.slane %v2689_v56, %v9718_v32  ;;  %v2713_v4 = vcombine.high %v2703_v25, %v2703_v25  ;;  %v10675_v49 = vrot.slane %v2703_v25, %v9718_v32 }
 0x102   :  { %16266 = vst [vmem:[#allocation11_spill] sm:$0xff] %v10665_v43  ;;  %v10678_v33 = vrot.slane %v2696_v9, %v9718_v32  ;;  %v2729_v10 = vrot.slane %v2715_v62, %v9732_v35  ;;  %v2714_v51 = vcombine.high %v2710_v12, %v2710_v12  ;;  %v10682_v38 = vrot.slane %v2711_v23, %v9718_v32 }
 0x103   :  { %16267 = vst [vmem:[#allocation152_spill] sm:$0xff] %v10669_v36  ;;  %16269 = vst [vmem:[#allocation10_spill] sm:$0xff] %v10675_v49  ;;  %v10685_v56 = vrot.slane %v2710_v12, %v9718_v32  ;;  %v10688_v34 = vrot.slane %v2712_v41, %v9718_v32  ;;  %v10691_v43 = vrot.slane %v2713_v4, %v9718_v32  ;;  %v16278_v41 = vld [vmem:[#allocation13_spill] sm:$0xff] }
 0x104   :  { %16270 = vst [vmem:[#allocation153_spill] sm:$0xff] %v10678_v33  ;;  %16271 = vst [vmem:[#allocation154_spill] sm:$0xff] %v10682_v38  ;;  %v2730_v25 = vcombine.high %v2722_v7, %v2722_v7  ;;  %v2731_v49 = vcombine.high %v2729_v10, %v2729_v10  ;;  %v2738_v9 = vrot.slane %v2722_v7, %v9732_v35  ;;  %v10694_v33 = vpop.permute.xlu1 %2097  ;;  %v16276_v38 = vld [vmem:[#allocation12_spill] sm:$0xff]  ;;  %355 = vbcast.lane.b32.xlu1 %v9885_v16, 264 }
 0x105   :  { %16272 = vst [vmem:[#allocation155_spill] sm:$0xff] %v10685_v56  ;;  %16273 = vst [vmem:[#allocation156_spill] sm:$0xff] %v10688_v34  ;;  %v10697_v62 = vrot.slane %v2714_v51, %v9718_v32  ;;  %v2745_v23 = vrot.slane %v2729_v10, %v9732_v35  ;;  %v10702_v12 = vadd.f32 %v10474_v60, %v16276_v38  ;;  %v10716_v38 = vpop.permute.xlu0 %4019 }
 0x106   :  { %16274 = vst [vmem:[#allocation157_spill] sm:$0xff] %v10691_v43  ;;  %v1847_v34 = vadd.f32 %v10466_v63, %v16278_v41  ;;  %v2752_v4 = vrot.slane %v2730_v25, %v9732_v35  ;;  %v2759_v7 = vrot.slane %v2731_v49, %v9732_v35  ;;  %v2760_v56 = vcombine.high %v2738_v9, %v2738_v9 }
 0x107   :  { %16275 = vst [vmem:[#allocation158_spill] sm:$0xff] %v10697_v62  ;;  %16277 = vst [vmem:[#allocation12_spill] sm:$0xff] %v10702_v12  ;;  %v10710_v43 = vrot.slane %v2738_v9, %v9718_v32  ;;  %v2761_v51 = vcombine.high %v2745_v23, %v2745_v23  ;;  %v10713_v10 = vrot.slane %v2745_v23, %v9718_v32 }
 0x108   :  { %v1899_v62 = vcombine.high %v1847_v34, %v1847_v34  ;;  %v1906_v60 = vrot.slane %v1847_v34, %v9732_v35  ;;  %v2762_v63 = vcombine.high %v2752_v4, %v2752_v4  ;;  %v2763_v41 = vcombine.high %v2759_v7, %v2759_v7  ;;  %366 = vbcast.lane.b32.xlu1 %v9892_v17, 264  ;;  %v10732_v34 = vpop.permute.xlu1 %2373  ;;  %v16289_v17 = vld [vmem:[#allocation15_spill] sm:$0xff] }
 0x109   :  { %16279 = vst [vmem:[#allocation13_spill] sm:$0xff] %v10710_v43  ;;  %16280 = vst [vmem:[#allocation159_spill] sm:$0xff] %v10713_v10  ;;  %v10719_v16 = vrot.slane %v2752_v4, %v9718_v32  ;;  %v10722_v49 = vrot.slane %v2760_v56, %v9718_v32  ;;  %v10725_v25 = vrot.slane %v2759_v7, %v9718_v32  ;;  %v16287_v7 = vld [vmem:[#allocation14_spill] sm:$0xff] }
 0x10a   :  { %v10728_v9 = vrot.slane %v2761_v51, %v9718_v32  ;;  %v1913_v23 = vrot.slane %v1899_v62, %v9732_v35  ;;  %v1914_v10 = vcombine.high %v1906_v60, %v1906_v60  ;;  %v10735_v43 = vrot.slane %v2762_v63, %v9718_v32 }
 0x10b   :  { %16281 = vst [vmem:[#allocation160_spill] sm:$0xff] %v10719_v16  ;;  %16282 = vst [vmem:[#allocation161_spill] sm:$0xff] %v10722_v49  ;;  %v10738_v4 = vrot.slane %v2763_v41, %v9718_v32  ;;  %v1922_v56 = vrot.slane %v1906_v60, %v9732_v35  ;;  %v10749_v49 = vadd.f32 %v10545_v42, %v16289_v17  ;;  %v16292_v41 = vld [vmem:[#allocation16_spill] sm:$0xff]  ;;  %v10763_v42 = vpop.permute.xlu0 %4291 }
 0x10c   :  { %16283 = vst [vmem:[#allocation162_spill] sm:$0xff] %v10725_v25  ;;  %16284 = vst [vmem:[#allocation163_spill] sm:$0xff] %v10728_v9  ;;  %v10743_v25 = vadd.f32 %v10506_v58, %v16287_v7  ;;  %v1915_v51 = vcombine.high %v1913_v23, %v1913_v23  ;;  %v1929_v62 = vrot.slane %v1913_v23, %v9732_v35  ;;  %377 = vbcast.lane.b32.xlu1 %v9911_v21, 264 }
 0x10d   :  { %16285 = vst [vmem:[#allocation164_spill] sm:$0xff] %v10735_v43  ;;  %16286 = vst [vmem:[#allocation165_spill] sm:$0xff] %v10738_v4  ;;  %v1936_v9 = vrot.slane %v1914_v10, %v9732_v35  ;;  %v1944_v63 = vcombine.high %v1922_v56, %v1922_v56  ;;  %v10752_v43 = vrot.slane %v1922_v56, %v9718_v32  ;;  %v16293_v4 = vld [vmem:[#allocation17_spill] sm:$0xff] }
 0x10e   :  { %16288 = vst [vmem:[#allocation14_spill] sm:$0xff] %v10743_v25  ;;  %16290 = vst [vmem:[#allocation15_spill] sm:$0xff] %v10749_v49  ;;  %v3206_v60 = vadd.f32 %v10587_v59, %v16292_v41  ;;  %v3207_v58 = vadd.f32 %v10508_v40, %v16293_v4  ;;  %v1943_v7 = vrot.slane %v1915_v51, %v9732_v35  ;;  %v10772_v4 = vpop.permute.xlu1 %3743 }
 0x10f   :  { %16291 = vst [vmem:[#allocation166_spill] sm:$0xff] %v10752_v43  ;;  %v1945_v25 = vcombine.high %v1929_v62, %v1929_v62  ;;  %v1946_v23 = vcombine.high %v1936_v9, %v1936_v9  ;;  %v10760_v10 = vrot.slane %v1936_v9, %v9718_v32  ;;  %v10766_v56 = vrot.slane %v1944_v63, %v9718_v32 }
 0x110   :  { %v10769_v17 = vrot.slane %v1929_v62, %v9718_v32  ;;  %v3210_v59 = vcombine.high %v3206_v60, %v3206_v60  ;;  %v3217_v40 = vrot.slane %v3206_v60, %v9732_v35  ;;  %v1947_v51 = vcombine.high %v1943_v7, %v1943_v7  ;;  %388 = vbcast.lane.b32.xlu1 %v9924_v22, 264 }
 0x111   :  { %16294 = vst [vmem:[#allocation16_spill] sm:$0xff] %v10760_v10  ;;  %16295 = vst [vmem:[#allocation17_spill] sm:$0xff] %v10766_v56  ;;  %v10775_v41 = vrot.slane %v1946_v23, %v9718_v32  ;;  %v10778_v9 = vrot.slane %v1943_v7, %v9718_v32  ;;  %v10781_v21 = vrot.slane %v1945_v25, %v9718_v32  ;;  %v16303_v7 = vld [vmem:[#allocation19_spill] sm:$0xff] }
 0x112   :  { %16296 = vst [vmem:[#allocation167_spill] sm:$0xff] %v10769_v17  ;;  %v3224_v63 = vrot.slane %v3210_v59, %v9732_v35  ;;  %v3225_v16 = vcombine.high %v3217_v40, %v3217_v40  ;;  %v3233_v62 = vrot.slane %v3217_v40, %v9732_v35  ;;  %v3259_v36 = vcombine.high %v3207_v58, %v3207_v58  ;;  %v16301_v17 = vld [vmem:[#allocation18_spill] sm:$0xff] }
 0x113   :  { %16297 = vst [vmem:[#allocation168_spill] sm:$0xff] %v10775_v41  ;;  %16298 = vst [vmem:[#allocation169_spill] sm:$0xff] %v10778_v9  ;;  %v10786_v60 = vrot.slane %v1947_v51, %v9718_v32  ;;  %v3266_v12 = vrot.slane %v3207_v58, %v9732_v35  ;;  %v10791_v23 = vadd.f32 %v10619_v28, %v16301_v17  ;;  %v10807_v17 = vpop.permute.xlu0 %4563 }
 0x114   :  { %16299 = vst [vmem:[#allocation170_spill] sm:$0xff] %v10781_v21  ;;  %v10795_v9 = vadd.f32 %v10554_v31, %v16303_v7  ;;  %v3226_v25 = vcombine.high %v3224_v63, %v3224_v63  ;;  %v3240_v59 = vrot.slane %v3224_v63, %v9732_v35  ;;  %v3247_v40 = vrot.slane %v3225_v16, %v9732_v35  ;;  %v2370_v31 = vpop.permute.xlu1 %2369 }
 0x115   :  { %16300 = vst [vmem:[#allocation171_spill] sm:$0xff] %v10786_v60  ;;  %16302 = vst [vmem:[#allocation18_spill] sm:$0xff] %v10791_v23  ;;  %v3255_v21 = vcombine.high %v3233_v62, %v3233_v62  ;;  %v10801_v51 = vrot.slane %v3233_v62, %v9718_v32  ;;  %v3273_v58 = vrot.slane %v3259_v36, %v9732_v35  ;;  %399 = vbcast.lane.b32.xlu1 %v9932_v18, 264 }
 0x116   :  { %16304 = vst [vmem:[#allocation19_spill] sm:$0xff] %v10795_v9  ;;  %v3274_v60 = vcombine.high %v3266_v12, %v3266_v12  ;;  %v3282_v28 = vrot.slane %v3266_v12, %v9732_v35  ;;  %v3254_v22 = vrot.slane %v3226_v25, %v9732_v35  ;;  %v3256_v7 = vcombine.high %v3240_v59, %v3240_v59 }
 0x117   :  { %16305 = vst [vmem:[#allocation172_spill] sm:$0xff] %v10801_v51  ;;  %v3257_v63 = vcombine.high %v3247_v40, %v3247_v40  ;;  %v10811_v16 = vrot.slane %v3247_v40, %v9718_v32  ;;  %v10814_v62 = vrot.slane %v3255_v21, %v9718_v32  ;;  %v10817_v36 = vrot.slane %v3240_v59, %v9718_v32 }
 0x118   :  { %v3275_v23 = vcombine.high %v3273_v58, %v3273_v58  ;;  %v3289_v12 = vrot.slane %v3273_v58, %v9732_v35  ;;  %v3258_v51 = vcombine.high %v3254_v22, %v3254_v22  ;;  %v10827_v40 = vrot.slane %v3254_v22, %v9718_v32  ;;  %v16315_v22 = vld [vmem:[#allocation20_spill] sm:$0xff] }
 0x119   :  { %16306 = vst [vmem:[#allocation173_spill] sm:$0xff] %v10811_v16  ;;  %16307 = vst [vmem:[#allocation174_spill] sm:$0xff] %v10814_v62  ;;  %v10824_v25 = vrot.slane %v3257_v63, %v9718_v32  ;;  %v10830_v21 = vrot.slane %v3256_v7, %v9718_v32  ;;  %v3296_v59 = vrot.slane %v3274_v60, %v9732_v35  ;;  %410 = vbcast.lane.b32.xlu1 %v9937_v27, 264  ;;  %v16322_v27 = vld [vmem:[#allocation21_spill] sm:$0xff] }
 0x11a   :  { %16308 = vst [vmem:[#allocation175_spill] sm:$0xff] %v10817_v36  ;;  %16310 = vst [vmem:[#allocation177_spill] sm:$0xff] %v10827_v40  ;;  %v3303_v36 = vrot.slane %v3275_v23, %v9732_v35  ;;  %v3304_v62 = vcombine.high %v3282_v28, %v3282_v28  ;;  %v3305_v58 = vcombine.high %v3289_v12, %v3289_v12  ;;  %v16328_v9 = vstv %s10820_s23 }
 0x11b   :  { %16309 = vst [vmem:[#allocation176_spill] sm:$0xff] %v10824_v25  ;;  %16311 = vst [vmem:[#allocation178_spill] sm:$0xff] %v10830_v21  ;;  %v10835_v16 = vrot.slane %v3258_v51, %v9718_v32  ;;  %v10838_v18 = vrot.slane %v3282_v28, %v9718_v32  ;;  %v10841_v63 = vrot.slane %v3289_v12, %v9718_v32  ;;  %v2932_v21 = vpop.permute.xlu1 %2931  ;;  %v10852_v51 = vpop.permute.xlu0 %4545 }
 0x11c   :  { %v2391_v7 = vadd.f32 %v10656_v2, %v16315_v22  ;;  %v3306_v40 = vcombine.high %v3296_v59, %v3296_v59  ;;  %v3307_v60 = vcombine.high %v3303_v36, %v3303_v36  ;;  %v10846_v23 = vrot.slane %v3296_v59, %v9718_v32 }
 0x11d   :  { %16312 = vst [vmem:[#allocation179_spill] sm:$0xff] %v10835_v16  ;;  %16313 = vst [vmem:[#allocation180_spill] sm:$0xff] %v10838_v18  ;;  %v10849_v25 = vrot.slane %v3304_v62, %v9718_v32  ;;  %v10855_v28 = vrot.slane %v3303_v36, %v9718_v32  ;;  %v10858_v12 = vrot.slane %v3305_v58, %v9718_v32  ;;  %v2365_v36 = vstv %s10805_s9 }
 0x11e   :  { %16314 = vst [vmem:[#allocation181_spill] sm:$0xff] %v10841_v63  ;;  %16316 = vst [vmem:[#allocation20_spill] sm:$0xff] %v10846_v23  ;;  %v2443_v2 = vcombine.high %v2391_v7, %v2391_v7  ;;  %v2450_v22 = vrot.slane %v2391_v7, %v9732_v35  ;;  %v10862_v59 = vrot.slane %v3306_v40, %v9718_v32  ;;  %v10877_v7 = vld [vmem:[%s15440_s0 + $0x8] sm:$0xff]  ;;  %421 = vbcast.lane.b32.xlu1 %v9944_v46, 264 }
 0x11f   :  { %16317 = vst [vmem:[#allocation182_spill] sm:$0xff] %v10849_v25  ;;  %16318 = vst [vmem:[#allocation183_spill] sm:$0xff] %v10855_v28  ;;  %v10865_v62 = vrot.slane %v3307_v60, %v9718_v32  ;;  %v10869_v63 = vadd.f32 %v10694_v33, %v16322_v27  ;;  %v2367_v40 = vmul.f32 %v10877_v7, %v2365_v36  ;;  %v10888_v60 = vld [vmem:[%s15440_s0] sm:$0xff]  ;;  %v10911_v41 = vpop.permute.xlu0 %243  ;;  %s10956_s0 = sld [smem:[#allocation2 + $0x8f]] }
 0x120   :  { %16319 = vst [vmem:[#allocation184_spill] sm:$0xff] %v10858_v12  ;;  %16320 = vst [vmem:[#allocation185_spill] sm:$0xff] %v10862_v59  ;;  %v2457_v28 = vrot.slane %v2443_v2, %v9732_v35  ;;  %v2458_v58 = vcombine.high %v2450_v22, %v2450_v22  ;;  %v2466_v12 = vrot.slane %v2450_v22, %v9732_v35  ;;  %v16324_v22 = vstv %s9727_s3  ;;  %s10963_s3 = sld [smem:[#allocation2 + $0x8d]] }
 0x121   :  { %16321 = vst [vmem:[#allocation186_spill] sm:$0xff] %v10865_v62  ;;  %16323 = vst [vmem:[#allocation21_spill] sm:$0xff] %v10869_v63  ;;  %v2366_v2 = vmul.f32 %v10888_v60, %v2365_v36  ;;  %v2925_v27 = vmul.f32 %v10877_v7, %v16324_v22  ;;  %v2642_v63 = vpop.permute.xlu1 %2641  ;;  %v16325_v62 = vstv %s9776_s28  ;;  %v10904_v36 = vadd.f32 %v10732_v34, %v2367_v40 }
 0x122   :  { %v2638_v59 = vmul.f32 %v10888_v60, %v16325_v62  ;;  %v2459_v25 = vcombine.high %v2457_v28, %v2457_v28  ;;  %v2473_v23 = vrot.slane %v2457_v28, %v9732_v35  ;;  %v2480_v33 = vrot.slane %v2458_v58, %v9732_v35  ;;  %432 = vbcast.lane.b32.xlu1 %v9951_v54, 264 }
 0x123   :  { %v2488_v18 = vcombine.high %v2466_v12, %v2466_v12  ;;  %v10901_v16 = vrot.slane %v2466_v12, %v9718_v32  ;;  %16327 = vst [vmem:[#allocation188_spill] sm:$0xff] %v10904_v36  ;;  %v3740_v22 = vmul.f32 %v10888_v60, %v16328_v9  ;;  %v10909_v46 = vadd.f32 %v2370_v31, %v2366_v2 }
 0x124   :  { %v2487_v62 = vrot.slane %v2459_v25, %v9732_v35  ;;  %v2489_v56 = vcombine.high %v2473_v23, %v2473_v23  ;;  %v2490_v28 = vcombine.high %v2480_v33, %v2480_v33  ;;  %v10915_v58 = vrot.slane %v2480_v33, %v9718_v32 }
 0x125   :  { %16326 = vst [vmem:[#allocation187_spill] sm:$0xff] %v10901_v16  ;;  %16329 = vst [vmem:[#allocation189_spill] sm:$0xff] %v10909_v46  ;;  %v10918_v12 = vrot.slane %v2488_v18, %v9718_v32  ;;  %v10921_v34 = vrot.slane %v2473_v23, %v9718_v32  ;;  %v3750_v9 = vadd.f32 %v10772_v4, %v3740_v22  ;;  %v2918_v2 = vpop.permute.xlu1 %2917  ;;  %v15638_v22 = vstv %s10882_s11 }
 0x126   :  { %16330 = vst [vmem:[#allocation190_spill] sm:$0xff] %v10915_v58  ;;  %v2935_v31 = vadd.f32 %v2932_v21, %v2925_v27  ;;  %v2491_v40 = vcombine.high %v2487_v62, %v2487_v62  ;;  %v10926_v25 = vrot.slane %v2490_v28, %v9718_v32  ;;  %v10929_v33 = vrot.slane %v2487_v62, %v9718_v32 }
 0x127   :  { %16331 = vst [vmem:[#allocation191_spill] sm:$0xff] %v10918_v12  ;;  %16332 = vst [vmem:[#allocation192_spill] sm:$0xff] %v10921_v34  ;;  %v10932_v18 = vrot.slane %v2489_v56, %v9718_v32  ;;  %v3754_v46 = vcombine.high %v3750_v9, %v3750_v9  ;;  %v3761_v23 = vrot.slane %v3750_v9, %v9732_v35  ;;  %v2909_v27 = vstv %s10880_s29  ;;  %v10947_v9 = vpop.permute.xlu0 %296 }
 0x128   :  { %16333 = vst [vmem:[#allocation193_spill] sm:$0xff] %v10926_v25  ;;  %16334 = vst [vmem:[#allocation194_spill] sm:$0xff] %v10929_v33  ;;  %v2987_v34 = vcombine.high %v2935_v31, %v2935_v31  ;;  %v2994_v4 = vrot.slane %v2935_v31, %v9732_v35  ;;  %v10937_v54 = vrot.slane %v2491_v40, %v9718_v32  ;;  %443 = vbcast.lane.b32.xlu1 %v9956_v52, 264 }
 0x129   :  { %16335 = vst [vmem:[#allocation195_spill] sm:$0xff] %v10932_v18  ;;  %v10939_v21 = vadd.f32 %v2642_v63, %v2638_v59  ;;  %v3768_v62 = vrot.slane %v3754_v46, %v9732_v35  ;;  %v3769_v28 = vcombine.high %v3761_v23, %v3761_v23  ;;  %v3777_v56 = vrot.slane %v3761_v23, %v9732_v35 }
 0x12a   :  { %16336 = vst [vmem:[#allocation196_spill] sm:$0xff] %v10937_v54  ;;  %v3001_v18 = vrot.slane %v2987_v34, %v9732_v35  ;;  %v3002_v33 = vcombine.high %v2994_v4, %v2994_v4  ;;  %v3010_v31 = vrot.slane %v2994_v4, %v9732_v35  ;;  %v2911_v40 = vmul.f32 %v10877_v7, %v2909_v27  ;;  %v4288_v54 = vpop.permute.xlu1 %4287 }
 0x12b   :  { %16337 = vst [vmem:[#allocation197_spill] sm:$0xff] %v10939_v21  ;;  %v4284_v63 = vmul.f32 %v10888_v60, %v15638_v22  ;;  %v3770_v59 = vcombine.high %v3768_v62, %v3768_v62  ;;  %v3784_v46 = vrot.slane %v3768_v62, %v9732_v35  ;;  %v3791_v21 = vrot.slane %v3769_v28, %v9732_v35 }
 0x12c   :  { %v3799_v23 = vcombine.high %v3777_v56, %v3777_v56  ;;  %v10959_v52 = vrot.slane %v3777_v56, %v9718_v32  ;;  %v3003_v34 = vcombine.high %v3001_v18, %v3001_v18  ;;  %v3017_v4 = vrot.slane %v3001_v18, %v9732_v35  ;;  %454 = vbcast.lane.b32.xlu1 %v9972_v11, 264 }
 0x12d   :  { %v3024_v25 = vrot.slane %v3002_v33, %v9732_v35  ;;  %v3798_v22 = vrot.slane %v3770_v59, %v9732_v35  ;;  %v3800_v12 = vcombine.high %v3784_v46, %v3784_v46  ;;  %v3801_v62 = vcombine.high %v3791_v21, %v3791_v21  ;;  %v8923_v59 = vld [vmem:[%s15447_s7 + $0x8] sm:$0xff] }
 0x12e   :  { %16338 = vst [vmem:[#allocation198_spill] sm:$0xff] %v10959_v52  ;;  %v10967_v28 = vrot.slane %v3791_v21, %v9718_v32  ;;  %v10971_v58 = vrot.slane %v3799_v23, %v9718_v32  ;;  %v10974_v56 = vrot.slane %v3784_v46, %v9718_v32  ;;  %v3031_v18 = vrot.slane %v3003_v34, %v9732_v35  ;;  %v10989_v23 = vpop.permute.xlu0 %307 }
 0x12f   :  { %v3032_v33 = vcombine.high %v3010_v31, %v3010_v31  ;;  %v3802_v52 = vcombine.high %v3798_v22, %v3798_v22  ;;  %v10981_v16 = vrot.slane %v3801_v62, %v9718_v32  ;;  %v10984_v21 = vrot.slane %v3798_v22, %v9718_v32 }
 0x130   :  { %16339 = vst [vmem:[#allocation199_spill] sm:$0xff] %v10967_v28  ;;  %16340 = vst [vmem:[#allocation200_spill] sm:$0xff] %v10971_v58  ;;  %v10987_v11 = vrot.slane %v3800_v12, %v9718_v32  ;;  %v3033_v46 = vcombine.high %v3017_v4, %v3017_v4  ;;  %v3035_v34 = vcombine.high %v3031_v18, %v3031_v18  ;;  %v2914_v28 = vpop.permute.xlu1 %2913  ;;  %8937 = vperm.xlu1 %9418, %v8923_v59  }
 0x131   :  { %16341 = vst [vmem:[#allocation201_spill] sm:$0xff] %v10974_v56  ;;  %16342 = vst [vmem:[#allocation202_spill] sm:$0xff] %v10981_v16  ;;  %v3034_v56 = vcombine.high %v3024_v25, %v3024_v25  ;;  %v10992_v58 = vrot.slane %v3010_v31, %v9718_v32  ;;  %v10995_v62 = vrot.slane %v3802_v52, %v9718_v32  ;;  %v15655_v59 = vstv %s10956_s0 }
 0x132   :  { %16343 = vst [vmem:[#allocation203_spill] sm:$0xff] %v10984_v21  ;;  %16344 = vst [vmem:[#allocation204_spill] sm:$0xff] %v10987_v11  ;;  %v10998_v22 = vrot.slane %v3024_v25, %v9718_v32  ;;  %v11001_v12 = vrot.slane %v3032_v33, %v9718_v32  ;;  %v11004_v11 = vrot.slane %v3017_v4, %v9718_v32  ;;  %v8925_v33 = vld [vmem:[%s15447_s7 + $0x18] sm:$0xff]  ;;  %v16355_v16 = vstv %s10820_s23 }
 0x133   :  { %16345 = vst [vmem:[#allocation205_spill] sm:$0xff] %v10992_v58  ;;  %16346 = vst [vmem:[#allocation206_spill] sm:$0xff] %v10995_v62  ;;  %v11007_v31 = vrot.slane %v3034_v56, %v9718_v32  ;;  %v11010_v21 = vrot.slane %v3031_v18, %v9718_v32  ;;  %v11013_v52 = vrot.slane %v3033_v46, %v9718_v32 }
 0x134   :  { %16347 = vst [vmem:[#allocation207_spill] sm:$0xff] %v10998_v22  ;;  %16348 = vst [vmem:[#allocation208_spill] sm:$0xff] %v11001_v12  ;;  %v11016_v25 = vrot.slane %v3035_v34, %v9718_v32  ;;  %v11021_v62 = vadd.f32 %v2918_v2, %v2911_v40  ;;  %v4294_v4 = vadd.f32 %v4288_v54, %v4284_v63  ;;  %8947 = vperm.xlu1 %9418, %v8925_v33   ;;  %v3476_v54 = vpop.permute.xlu1 %3475 }
 0x135   :  { %16349 = vst [vmem:[#allocation209_spill] sm:$0xff] %v11004_v11  ;;  %16350 = vst [vmem:[#allocation210_spill] sm:$0xff] %v11007_v31  ;;  %v2910_v56 = vmul.f32 %v10888_v60, %v2909_v27  ;;  %v4556_v18 = vmul.f32 %v10888_v60, %v15655_v59  ;;  %v3741_v46 = vmul.f32 %v10877_v7, %v16355_v16  ;;  %v11039_v27 = vpop.permute.xlu0 %318 }
 0x136   :  { %16351 = vst [vmem:[#allocation211_spill] sm:$0xff] %v11010_v21  ;;  %16352 = vst [vmem:[#allocation212_spill] sm:$0xff] %v11013_v52  ;;  %v4011_v52 = vstv %s10963_s3  ;;  %v16356_v21 = vstv %s9774_s27  ;;  %v4305_v11 = vrot.slane %v4294_v4, %v9732_v35 }
 0x137   :  { %16353 = vst [vmem:[#allocation213_spill] sm:$0xff] %v11016_v25  ;;  %16354 = vst [vmem:[#allocation214_spill] sm:$0xff] %v11021_v62  ;;  %v3469_v34 = vmul.f32 %v10877_v7, %v16356_v21  ;;  %v4298_v25 = vcombine.high %v4294_v4, %v4294_v4  ;;  %v11036_v31 = vadd.f32 %v2914_v28, %v2910_v56  ;;  %v8927_v28 = vld [vmem:[%s15447_s7 + $0x28] sm:$0xff] }
 0x138   :  { %v4012_v2 = vmul.f32 %v10888_v60, %v4011_v52  ;;  %v4566_v40 = vadd.f32 %v10589_v19, %v4556_v18  ;;  %v3751_v63 = vadd.f32 %v10627_v5, %v3741_v46  ;;  %v11046_v59 = vmul.f32 %v10877_v7, %v4011_v52  ;;  %8957 = vperm.xlu1 %9418, %v8927_v28   ;;  %v11065_v12 = vpop.permute.xlu1 %3185 }
 0x139   :  { %16357 = vst [vmem:[#allocation215_spill] sm:$0xff] %v11036_v31  ;;  %v11043_v16 = vadd.f32 %v3476_v54, %v3469_v34  ;;  %v4312_v21 = vrot.slane %v4298_v25, %v9732_v35  ;;  %v4313_v4 = vcombine.high %v4305_v11, %v4305_v11  ;;  %v4321_v33 = vrot.slane %v4305_v11, %v9732_v35 }
 0x13a   :  { %v11054_v56 = vadd.f32 %v10672_v20, %v4012_v2  ;;  %v4570_v19 = vcombine.high %v4566_v40, %v4566_v40  ;;  %v4577_v5 = vrot.slane %v4566_v40, %v9732_v35  ;;  %v3803_v18 = vcombine.high %v3751_v63, %v3751_v63  ;;  %v8929_v40 = vld [vmem:[%s15447_s7 + $0x38] sm:$0xff]  ;;  %s11188_s7 = sld [smem:[#allocation2 + $0xb]] }
 0x13b   :  { %v3810_v46 = vrot.slane %v3751_v63, %v9732_v35  ;;  %v4314_v52 = vcombine.high %v4312_v21, %v4312_v21  ;;  %v4328_v34 = vrot.slane %v4312_v21, %v9732_v35  ;;  %v4335_v54 = vrot.slane %v4313_v4, %v9732_v35 }
 0x13c   :  { %v4343_v31 = vcombine.high %v4321_v33, %v4321_v33  ;;  %v11061_v25 = vrot.slane %v4321_v33, %v9718_v32  ;;  %v4584_v11 = vrot.slane %v4570_v19, %v9732_v35  ;;  %v4585_v20 = vcombine.high %v4577_v5, %v4577_v5  ;;  %v11074_v33 = vpop.permute.xlu0 %329  ;;  %8967 = vperm.xlu1 %9418, %v8929_v40  }
 0x13d   :  { %v4593_v2 = vrot.slane %v4577_v5, %v9732_v35  ;;  %v4342_v63 = vrot.slane %v4314_v52, %v9732_v35  ;;  %v4344_v21 = vcombine.high %v4328_v34, %v4328_v34  ;;  %v4345_v4 = vcombine.high %v4335_v54, %v4335_v54 }
 0x13e   :  { %16358 = vst [vmem:[#allocation216_spill] sm:$0xff] %v11061_v25  ;;  %v11072_v28 = vrot.slane %v4335_v54, %v9718_v32  ;;  %v11077_v19 = vrot.slane %v4343_v31, %v9718_v32  ;;  %v11080_v5 = vrot.slane %v4328_v34, %v9718_v32  ;;  %v4586_v25 = vcombine.high %v4584_v11, %v4584_v11 }
 0x13f   :  { %v4600_v22 = vrot.slane %v4584_v11, %v9732_v35  ;;  %v4346_v58 = vcombine.high %v4342_v63, %v4342_v63  ;;  %v11084_v62 = vrot.slane %v4345_v4, %v9718_v32  ;;  %v11087_v52 = vrot.slane %v4342_v63, %v9718_v32 }
 0x140   :  { %16359 = vst [vmem:[#allocation217_spill] sm:$0xff] %v11072_v28  ;;  %16360 = vst [vmem:[#allocation218_spill] sm:$0xff] %v11077_v19  ;;  %v11090_v54 = vrot.slane %v4344_v21, %v9718_v32  ;;  %v4607_v31 = vrot.slane %v4585_v20, %v9732_v35  ;;  %v4614_v19 = vrot.slane %v4586_v25, %v9732_v35  ;;  %v11104_v21 = vpop.permute.xlu1 %3461 }
 0x141   :  { %16361 = vst [vmem:[#allocation219_spill] sm:$0xff] %v11080_v5  ;;  %16362 = vst [vmem:[#allocation220_spill] sm:$0xff] %v11084_v62  ;;  %v4615_v34 = vcombine.high %v4593_v2, %v4593_v2  ;;  %v4616_v5 = vcombine.high %v4600_v22, %v4600_v22  ;;  %v11095_v28 = vrot.slane %v4346_v58, %v9718_v32 }
 0x142   :  { %16363 = vst [vmem:[#allocation221_spill] sm:$0xff] %v11087_v52  ;;  %16364 = vst [vmem:[#allocation222_spill] sm:$0xff] %v11090_v54  ;;  %v11098_v11 = vrot.slane %v4593_v2, %v9718_v32  ;;  %v11101_v4 = vrot.slane %v4600_v22, %v9718_v32  ;;  %v3817_v63 = vrot.slane %v3803_v18, %v9732_v35 }
 0x143   :  { %16365 = vst [vmem:[#allocation223_spill] sm:$0xff] %v11095_v28  ;;  %v4617_v40 = vcombine.high %v4607_v31, %v4607_v31  ;;  %v4618_v54 = vcombine.high %v4614_v19, %v4614_v19  ;;  %v11107_v20 = vrot.slane %v4607_v31, %v9718_v32  ;;  %v11110_v25 = vrot.slane %v4615_v34, %v9718_v32 }
 0x144   :  { %16366 = vst [vmem:[#allocation224_spill] sm:$0xff] %v11098_v11  ;;  %16367 = vst [vmem:[#allocation225_spill] sm:$0xff] %v11101_v4  ;;  %v11113_v58 = vrot.slane %v4614_v19, %v9718_v32  ;;  %v11116_v2 = vrot.slane %v4616_v5, %v9718_v32  ;;  %v3818_v22 = vcombine.high %v3810_v46, %v3810_v46  ;;  %v11118_v11 = vpop.permute.xlu0 %340 }
 0x145   :  { %16368 = vst [vmem:[#allocation226_spill] sm:$0xff] %v11107_v20  ;;  %16369 = vst [vmem:[#allocation227_spill] sm:$0xff] %v11110_v25  ;;  %v3819_v4 = vcombine.high %v3817_v63, %v3817_v63  ;;  %v11121_v18 = vrot.slane %v4617_v40, %v9718_v32  ;;  %v11124_v28 = vrot.slane %v4618_v54, %v9718_v32  ;;  %v11134_v25 = vpop.permute.xlu1 %3457 }
 0x146   :  { %16370 = vst [vmem:[#allocation228_spill] sm:$0xff] %v11113_v58  ;;  %16371 = vst [vmem:[#allocation229_spill] sm:$0xff] %v11116_v2  ;;  %v3826_v31 = vrot.slane %v3810_v46, %v9732_v35  ;;  %v3833_v34 = vrot.slane %v3817_v63, %v9732_v35  ;;  %v3840_v19 = vrot.slane %v3818_v22, %v9732_v35 }
 0x147   :  { %16372 = vst [vmem:[#allocation230_spill] sm:$0xff] %v11121_v18  ;;  %16373 = vst [vmem:[#allocation231_spill] sm:$0xff] %v11124_v28  ;;  %v3847_v58 = vrot.slane %v3819_v4, %v9732_v35  ;;  %v4026_v5 = vcombine.high %v11054_v56, %v11054_v56  ;;  %v4033_v2 = vrot.slane %v11054_v56, %v9732_v35 }
 0x148   :  { %v3848_v40 = vcombine.high %v3826_v31, %v3826_v31  ;;  %v3849_v18 = vcombine.high %v3833_v34, %v3833_v34  ;;  %v11137_v54 = vrot.slane %v3826_v31, %v9718_v32  ;;  %v11140_v46 = vrot.slane %v3833_v34, %v9718_v32 }
 0x149   :  { %v3850_v63 = vcombine.high %v3840_v19, %v3840_v19  ;;  %v3851_v22 = vcombine.high %v3847_v58, %v3847_v58  ;;  %v11143_v4 = vrot.slane %v3840_v19, %v9718_v32  ;;  %v11146_v28 = vrot.slane %v3847_v58, %v9718_v32 }
 0x14a   :  { %16374 = vst [vmem:[#allocation232_spill] sm:$0xff] %v11137_v54  ;;  %16375 = vst [vmem:[#allocation233_spill] sm:$0xff] %v11140_v46  ;;  %v11149_v56 = vrot.slane %v3848_v40, %v9718_v32  ;;  %v11152_v20 = vrot.slane %v3849_v18, %v9718_v32  ;;  %v4040_v31 = vrot.slane %v4026_v5, %v9732_v35 }
 0x14b   :  { %16376 = vst [vmem:[#allocation234_spill] sm:$0xff] %v11143_v4  ;;  %16377 = vst [vmem:[#allocation235_spill] sm:$0xff] %v11146_v28  ;;  %v4041_v52 = vcombine.high %v4033_v2, %v4033_v2  ;;  %v11156_v34 = vrot.slane %v3850_v63, %v9718_v32  ;;  %v11159_v62 = vrot.slane %v3851_v22, %v9718_v32  ;;  %v11164_v28 = vpop.permute.xlu0 %351  ;;  %v11170_v63 = vpop.permute.xlu1 %3733 }
 0x14c   :  { %16378 = vst [vmem:[#allocation236_spill] sm:$0xff] %v11149_v56  ;;  %16379 = vst [vmem:[#allocation237_spill] sm:$0xff] %v11152_v20  ;;  %v4049_v19 = vrot.slane %v4033_v2, %v9732_v35  ;;  %v3531_v58 = vcombine.high %v11043_v16, %v11043_v16  ;;  %v4042_v40 = vcombine.high %v4040_v31, %v4040_v31 }
 0x14d   :  { %16380 = vst [vmem:[#allocation238_spill] sm:$0xff] %v11156_v34  ;;  %16381 = vst [vmem:[#allocation239_spill] sm:$0xff] %v11159_v62  ;;  %v4056_v18 = vrot.slane %v4040_v31, %v9732_v35  ;;  %v4063_v20 = vrot.slane %v4041_v52, %v9732_v35  ;;  %v3538_v5 = vrot.slane %v11043_v16, %v9732_v35 }
 0x14e   :  { %v4071_v46 = vcombine.high %v4049_v19, %v4049_v19  ;;  %v11173_v22 = vrot.slane %v4049_v19, %v9718_v32  ;;  %v3545_v2 = vrot.slane %v3531_v58, %v9732_v35  ;;  %v4023_v62 = vadd.f32 %v10716_v38, %v11046_v59 }
 0x14f   :  { %v4070_v34 = vrot.slane %v4042_v40, %v9732_v35  ;;  %v4072_v56 = vcombine.high %v4056_v18, %v4056_v18  ;;  %v4073_v31 = vcombine.high %v4063_v20, %v4063_v20  ;;  %v11180_v52 = vrot.slane %v4063_v20, %v9718_v32  ;;  %v11201_v58 = vpop.permute.xlu1 %3729 }
 0x150   :  { %16382 = vst [vmem:[#allocation240_spill] sm:$0xff] %v11173_v22  ;;  %v11183_v16 = vrot.slane %v4071_v46, %v9718_v32  ;;  %v11186_v4 = vrot.slane %v4056_v18, %v9718_v32  ;;  %v3546_v19 = vcombine.high %v3538_v5, %v3538_v5  ;;  %v3547_v22 = vcombine.high %v3545_v2, %v3545_v2 }
 0x151   :  { %16383 = vst [vmem:[#allocation241_spill] sm:$0xff] %v11180_v52  ;;  %v4074_v38 = vcombine.high %v4070_v34, %v4070_v34  ;;  %v11193_v59 = vrot.slane %v4073_v31, %v9718_v32  ;;  %v11196_v20 = vrot.slane %v4070_v34, %v9718_v32  ;;  %v11199_v46 = vrot.slane %v4072_v56, %v9718_v32  ;;  %v11207_v52 = vpop.permute.xlu0 %362 }
 0x152   :  { %16384 = vst [vmem:[#allocation242_spill] sm:$0xff] %v11183_v16  ;;  %16385 = vst [vmem:[#allocation243_spill] sm:$0xff] %v11186_v4  ;;  %v3554_v40 = vrot.slane %v3538_v5, %v9732_v35  ;;  %v3561_v18 = vrot.slane %v3545_v2, %v9732_v35  ;;  %v3568_v4 = vrot.slane %v3546_v19, %v9732_v35  ;;  %v16390_v56 = vstv %s9843_s12  ;;  %s11303_s12 = sld [smem:[#allocation2 + $0xc]] }
 0x153   :  { %16386 = vst [vmem:[#allocation244_spill] sm:$0xff] %v11193_v59  ;;  %16387 = vst [vmem:[#allocation245_spill] sm:$0xff] %v11196_v20  ;;  %v3575_v16 = vrot.slane %v3547_v22, %v9732_v35  ;;  %v11210_v31 = vrot.slane %v4074_v38, %v9718_v32  ;;  %v4075_v34 = vcombine.high %v4023_v62, %v4023_v62 }
 0x154   :  { %16388 = vst [vmem:[#allocation246_spill] sm:$0xff] %v11199_v46  ;;  %v4082_v20 = vrot.slane %v4023_v62, %v9732_v35  ;;  %v3182_v46 = vmul.f32 %v10888_v60, %v16390_v56  ;;  %v3576_v59 = vcombine.high %v3554_v40, %v3554_v40  ;;  %v3577_v54 = vcombine.high %v3561_v18, %v3561_v18 }
 0x155   :  { %16389 = vst [vmem:[#allocation247_spill] sm:$0xff] %v11210_v31  ;;  %v3578_v5 = vcombine.high %v3568_v4, %v3568_v4  ;;  %v3579_v2 = vcombine.high %v3575_v16, %v3575_v16  ;;  %v11217_v22 = vrot.slane %v3554_v40, %v9718_v32  ;;  %v11220_v19 = vrot.slane %v3568_v4, %v9718_v32  ;;  %v11240_v4 = vpop.permute.xlu1 %4005 }
 0x156   :  { %v11223_v38 = vrot.slane %v3561_v18, %v9718_v32  ;;  %v11226_v62 = vrot.slane %v3575_v16, %v9718_v32  ;;  %v11229_v56 = vrot.slane %v3576_v59, %v9718_v32  ;;  %v11235_v36 = vrot.slane %v3577_v54, %v9718_v32 }
 0x157   :  { %16391 = vst [vmem:[#allocation248_spill] sm:$0xff] %v11217_v22  ;;  %16392 = vst [vmem:[#allocation249_spill] sm:$0xff] %v11220_v19  ;;  %v11232_v31 = vrot.slane %v3578_v5, %v9718_v32  ;;  %v11238_v40 = vrot.slane %v3579_v2, %v9718_v32  ;;  %v4089_v18 = vrot.slane %v4075_v34, %v9732_v35  ;;  %v16400_v59 = vstv %s10882_s11  ;;  %v11255_v2 = vpop.permute.xlu0 %373 }
 0x158   :  { %16393 = vst [vmem:[#allocation250_spill] sm:$0xff] %v11223_v38  ;;  %16394 = vst [vmem:[#allocation251_spill] sm:$0xff] %v11226_v62  ;;  %v4090_v38 = vcombine.high %v4082_v20, %v4082_v20  ;;  %v4098_v16 = vrot.slane %v4082_v20, %v9732_v35  ;;  %v11245_v62 = vadd.f32 %v11065_v12, %v3182_v46 }
 0x159   :  { %16395 = vst [vmem:[#allocation252_spill] sm:$0xff] %v11229_v56  ;;  %16396 = vst [vmem:[#allocation253_spill] sm:$0xff] %v11232_v31  ;;  %v4285_v5 = vmul.f32 %v10877_v7, %v16400_v59  ;;  %v3453_v31 = vstv %s11188_s7  ;;  %v16401_v56 = vstv %s10956_s0  ;;  %v4105_v19 = vrot.slane %v4089_v18, %v9732_v35 }
 0x15a   :  { %16397 = vst [vmem:[#allocation254_spill] sm:$0xff] %v11235_v36  ;;  %16398 = vst [vmem:[#allocation255_spill] sm:$0xff] %v11238_v40  ;;  %v4557_v54 = vmul.f32 %v10877_v7, %v16401_v56  ;;  %v4091_v40 = vcombine.high %v4089_v18, %v4089_v18  ;;  %v4112_v34 = vrot.slane %v4090_v38, %v9732_v35 }
 0x15b   :  { %16399 = vst [vmem:[#allocation256_spill] sm:$0xff] %v11245_v62  ;;  %v4120_v22 = vcombine.high %v4098_v16, %v4098_v16  ;;  %v11260_v20 = vrot.slane %v4098_v16, %v9718_v32  ;;  %v4295_v12 = vadd.f32 %v10763_v42, %v4285_v5  ;;  %v3455_v46 = vmul.f32 %v10877_v7, %v3453_v31  ;;  %v11265_v62 = vpop.permute.xlu1 %4001 }
 0x15c   :  { %v4567_v59 = vadd.f32 %v10807_v17, %v4557_v54  ;;  %v4119_v56 = vrot.slane %v4091_v40, %v9732_v35  ;;  %v4121_v36 = vcombine.high %v4105_v19, %v4105_v19  ;;  %v4122_v10 = vcombine.high %v4112_v34, %v4112_v34 }
 0x15d   :  { %16402 = vst [vmem:[#allocation257_spill] sm:$0xff] %v11260_v20  ;;  %v11269_v18 = vrot.slane %v4112_v34, %v9718_v32  ;;  %v11272_v38 = vrot.slane %v4120_v22, %v9718_v32  ;;  %v11275_v16 = vrot.slane %v4105_v19, %v9718_v32  ;;  %v4347_v42 = vcombine.high %v4295_v12, %v4295_v12 }
 0x15e   :  { %v4354_v5 = vrot.slane %v4295_v12, %v9732_v35  ;;  %v4123_v20 = vcombine.high %v4119_v56, %v4119_v56  ;;  %v11279_v17 = vrot.slane %v4122_v10, %v9718_v32  ;;  %v11282_v40 = vrot.slane %v4119_v56, %v9718_v32 }
 0x15f   :  { %16403 = vst [vmem:[#allocation258_spill] sm:$0xff] %v11269_v18  ;;  %16404 = vst [vmem:[#allocation259_spill] sm:$0xff] %v11272_v38  ;;  %v11285_v54 = vrot.slane %v4121_v36, %v9718_v32  ;;  %v4361_v34 = vrot.slane %v4347_v42, %v9732_v35  ;;  %v11290_v19 = vadd.f32 %v11104_v21, %v3455_v46  ;;  %v11299_v36 = vpop.permute.xlu1 %4277 }
 0x160   :  { %16405 = vst [vmem:[#allocation260_spill] sm:$0xff] %v11275_v16  ;;  %16406 = vst [vmem:[#allocation261_spill] sm:$0xff] %v11279_v17  ;;  %v4362_v22 = vcombine.high %v4354_v5, %v4354_v5  ;;  %v4370_v38 = vrot.slane %v4354_v5, %v9732_v35  ;;  %v11292_v16 = vpop.permute.xlu0 %384  ;;  %v11295_v12 = vrot.slane %v4123_v20, %v9718_v32 }
 0x161   :  { %16407 = vst [vmem:[#allocation262_spill] sm:$0xff] %v11282_v40  ;;  %16408 = vst [vmem:[#allocation263_spill] sm:$0xff] %v11285_v54  ;;  %v4619_v10 = vcombine.high %v4567_v59, %v4567_v59  ;;  %v4626_v56 = vrot.slane %v4567_v59, %v9732_v35  ;;  %v3454_v40 = vmul.f32 %v10888_v60, %v3453_v31 }
 0x162   :  { %16409 = vst [vmem:[#allocation264_spill] sm:$0xff] %v11290_v19  ;;  %16410 = vst [vmem:[#allocation265_spill] sm:$0xff] %v11295_v12  ;;  %v4363_v54 = vcombine.high %v4361_v34, %v4361_v34  ;;  %v4377_v42 = vrot.slane %v4361_v34, %v9732_v35  ;;  %v4384_v5 = vrot.slane %v4362_v22, %v9732_v35 }
 0x163   :  { %v4392_v17 = vcombine.high %v4370_v38, %v4370_v38  ;;  %v11306_v21 = vrot.slane %v4370_v38, %v9718_v32  ;;  %v4633_v20 = vrot.slane %v4619_v10, %v9732_v35  ;;  %v4634_v46 = vcombine.high %v4626_v56, %v4626_v56 }
 0x164   :  { %v4642_v59 = vrot.slane %v4626_v56, %v9732_v35  ;;  %v4391_v31 = vrot.slane %v4363_v54, %v9732_v35  ;;  %v4393_v12 = vcombine.high %v4377_v42, %v4377_v42  ;;  %v4394_v18 = vcombine.high %v4384_v5, %v4384_v5  ;;  %v4274_v56 = vpop.permute.xlu1 %4273 }
 0x165   :  { %16411 = vst [vmem:[#allocation266_spill] sm:$0xff] %v11306_v21  ;;  %v11312_v19 = vrot.slane %v4384_v5, %v9718_v32  ;;  %v11319_v34 = vrot.slane %v4392_v17, %v9718_v32  ;;  %v11322_v38 = vrot.slane %v4377_v42, %v9718_v32  ;;  %v4635_v22 = vcombine.high %v4633_v20, %v4633_v20  ;;  %v11334_v17 = vpop.permute.xlu0 %395 }
 0x166   :  { %v4649_v10 = vrot.slane %v4633_v20, %v9732_v35  ;;  %v4395_v54 = vcombine.high %v4391_v31, %v4391_v31  ;;  %v11326_v21 = vrot.slane %v4394_v18, %v9718_v32  ;;  %v11329_v5 = vrot.slane %v4391_v31, %v9718_v32 }
 0x167   :  { %16412 = vst [vmem:[#allocation267_spill] sm:$0xff] %v11312_v19  ;;  %16413 = vst [vmem:[#allocation268_spill] sm:$0xff] %v11319_v34  ;;  %v11332_v19 = vrot.slane %v4393_v12, %v9718_v32  ;;  %v4656_v42 = vrot.slane %v4634_v46, %v9732_v35  ;;  %v4664_v20 = vcombine.high %v4642_v59, %v4642_v59 }
 0x168   :  { %16414 = vst [vmem:[#allocation269_spill] sm:$0xff] %v11322_v38  ;;  %16415 = vst [vmem:[#allocation270_spill] sm:$0xff] %v11326_v21  ;;  %v4663_v38 = vrot.slane %v4635_v22, %v9732_v35  ;;  %v4665_v34 = vcombine.high %v4649_v10, %v4649_v10  ;;  %v11339_v43 = vrot.slane %v4395_v54, %v9718_v32 }
 0x169   :  { %16416 = vst [vmem:[#allocation271_spill] sm:$0xff] %v11329_v5  ;;  %16417 = vst [vmem:[#allocation272_spill] sm:$0xff] %v11332_v19  ;;  %v11342_v18 = vrot.slane %v4642_v59, %v9718_v32  ;;  %v11345_v31 = vrot.slane %v4649_v10, %v9718_v32  ;;  %v11348_v12 = vadd.f32 %v11134_v25, %v3454_v40  ;;  %v3725_v40 = vstv %s11303_s12 }
 0x16a   :  { %16418 = vst [vmem:[#allocation273_spill] sm:$0xff] %v11339_v43  ;;  %v4666_v19 = vcombine.high %v4656_v42, %v4656_v42  ;;  %v4667_v46 = vcombine.high %v4663_v38, %v4663_v38  ;;  %v11351_v22 = vrot.slane %v4656_v42, %v9718_v32  ;;  %v11354_v54 = vrot.slane %v4664_v20, %v9718_v32 }
 0x16b   :  { %16419 = vst [vmem:[#allocation274_spill] sm:$0xff] %v11342_v18  ;;  %16420 = vst [vmem:[#allocation275_spill] sm:$0xff] %v11345_v31  ;;  %v11357_v59 = vrot.slane %v4663_v38, %v9718_v32  ;;  %v11360_v10 = vrot.slane %v4665_v34, %v9718_v32  ;;  %v16426_v31 = vstv %s11190_s18  ;;  %v3727_v20 = vmul.f32 %v10877_v7, %v3725_v40 }
 0x16c   :  { %16421 = vst [vmem:[#allocation276_spill] sm:$0xff] %v11348_v12  ;;  %16422 = vst [vmem:[#allocation277_spill] sm:$0xff] %v11351_v22  ;;  %v4542_v25 = vmul.f32 %v10888_v60, %v16426_v31  ;;  %v4550_v12 = vpop.permute.xlu1 %4549  ;;  %v11367_v18 = vrot.slane %v4666_v19, %v9718_v32  ;;  %v11370_v42 = vrot.slane %v4667_v46, %v9718_v32  ;;  %v3997_v34 = vstv %s11314_s19  ;;  %v407_v22 = vpop.permute.xlu0 %406 }
 0x16d   :  { %16423 = vst [vmem:[#allocation278_spill] sm:$0xff] %v11354_v54  ;;  %16424 = vst [vmem:[#allocation279_spill] sm:$0xff] %v11357_v59  ;;  %v3726_v54 = vmul.f32 %v10888_v60, %v3725_v40  ;;  %v16430_v59 = vmov %v16426_v31  ;;  %v11383_v43 = vadd.f32 %v11170_v63, %v3727_v20  ;;  %v3999_v46 = vmul.f32 %v10877_v7, %v3997_v34 }
 0x16e   :  { %16425 = vst [vmem:[#allocation280_spill] sm:$0xff] %v11360_v10  ;;  %16427 = vst [vmem:[#allocation281_spill] sm:$0xff] %v11367_v18  ;;  %v11375_v38 = vadd.f32 %v10852_v51, %v4542_v25  ;;  %v4269_v10 = vstv %s11316_s2  ;;  %v4543_v31 = vmul.f32 %v10877_v7, %v16430_v59  ;;  %v112_v59 = vrot.slane %v10877_v7, %v9732_v35 }
 0x16f   :  { %16428 = vst [vmem:[#allocation282_spill] sm:$0xff] %v11370_v42  ;;  %16431 = vst [vmem:[#allocation284_spill] sm:$0xff] %v11383_v43  ;;  %v11386_v19 = vadd.f32 %v11201_v58, %v3726_v54  ;;  %v3998_v42 = vmul.f32 %v10888_v60, %v3997_v34  ;;  %v4271_v40 = vmul.f32 %v10877_v7, %v4269_v10 }
 0x170   :  { %16429 = vst [vmem:[#allocation283_spill] sm:$0xff] %v11375_v38  ;;  %v4270_v51 = vmul.f32 %v10888_v60, %v4269_v10  ;;  %v11392_v25 = vadd.f32 %v4550_v12, %v4543_v31  ;;  %v11397_v38 = vadd.f32 %v11240_v4, %v3999_v46  ;;  %v11402_v58 = vpop.permute.xlu1 %238  ;;  %v63_v54 = vrot.slane %v10888_v60, %v9732_v35 }
 0x171   :  { %16432 = vst [vmem:[#allocation285_spill] sm:$0xff] %v11386_v19  ;;  %v11400_v63 = vadd.f32 %v11265_v62, %v3998_v42  ;;  %v105_v20 = vcombine.high %v10877_v7, %v10877_v7  ;;  %v11409_v12 = vadd.f32 %v11299_v36, %v4271_v40  ;;  %v128_v34 = vrot.slane %v112_v59, %v9732_v35  ;;  %v418_v36 = vpop.permute.xlu0 %417 }
 0x172   :  { %16433 = vst [vmem:[#allocation286_spill] sm:$0xff] %v11392_v25  ;;  %16434 = vst [vmem:[#allocation287_spill] sm:$0xff] %v11397_v38  ;;  %v11411_v10 = vadd.f32 %v4274_v56, %v4270_v51  ;;  %v120_v4 = vcombine.high %v112_v59, %v112_v59  ;;  %v79_v31 = vrot.slane %v63_v54, %v9732_v35 }
 0x173   :  { %16435 = vst [vmem:[#allocation288_spill] sm:$0xff] %v11400_v63  ;;  %16436 = vst [vmem:[#allocation289_spill] sm:$0xff] %v11409_v12  ;;  %v71_v62 = vcombine.high %v63_v54, %v63_v54  ;;  %v119_v42 = vrot.slane %v105_v20, %v9732_v35  ;;  %v56_v46 = vcombine.high %v10888_v60, %v10888_v60 }
 0x174   :  { %16437 = vst [vmem:[#allocation290_spill] sm:$0xff] %v11411_v10  ;;  %v191_v63 = vrot.slane %v128_v34, %v9718_v32  ;;  %v142_v7 = vrot.slane %v120_v4, %v9732_v35  ;;  %v150_v19 = vcombine.high %v128_v34, %v128_v34  ;;  %v11422_v56 = vmul.f32 %v10016_v15, %v10049_v44  ;;  %v286_v40 = vpop.permute.xlu1 %285 }
 0x175   :  { %v159_v51 = vrot.slane %v79_v31, %v9718_v32  ;;  %v93_v59 = vrot.slane %v71_v62, %v9732_v35  ;;  %v101_v54 = vcombine.high %v79_v31, %v79_v31  ;;  %v135_v20 = vrot.slane %v119_v42, %v9732_v35 }
 0x176   :  { %v262_v60 = vmul.f32 %v11402_v58, %v191_v63  ;;  %v195_v10 = vrot.slane %v142_v7, %v9718_v32  ;;  %v199_v4 = vrot.slane %v150_v19, %v9718_v32  ;;  %v152_v34 = vcombine.high %v142_v7, %v142_v7 }
 0x177   :  { %v246_v18 = vmul.f32 %v11402_v58, %v159_v51  ;;  %v247_v15 = vmul.f32 %v10911_v41, %v159_v51  ;;  %v163_v25 = vrot.slane %v93_v59, %v9718_v32  ;;  %v167_v5 = vrot.slane %v101_v54, %v9718_v32 }
 0x178   :  { %v11435_v62 = vadd.f32 %v11255_v2, %v262_v60  ;;  %v264_v31 = vmul.f32 %v11402_v58, %v195_v10  ;;  %v266_v21 = vmul.f32 %v11402_v58, %v199_v4  ;;  %v203_v12 = vrot.slane %v152_v34, %v9718_v32  ;;  %v290_v19 = vpop.permute.xlu1 %289  ;;  %v429_v34 = vpop.permute.xlu0 %428 }
 0x179   :  { %v11440_v38 = vadd.f32 %v286_v40, %v246_v18  ;;  %v248_v7 = vmul.f32 %v11402_v58, %v163_v25  ;;  %v249_v51 = vmul.f32 %v10911_v41, %v163_v25  ;;  %v250_v43 = vmul.f32 %v11402_v58, %v167_v5 }
 0x17a   :  { %16438 = vst [vmem:[#allocation291_spill] sm:$0xff] %v11435_v62  ;;  %v11446_v54 = vadd.f32 %v11292_v16, %v264_v31  ;;  %v11448_v2 = vadd.f32 %v290_v19, %v247_v15  ;;  %v11451_v60 = vadd.f32 %v11334_v17, %v266_v21  ;;  %v268_v62 = vmul.f32 %v11402_v58, %v203_v12 }
 0x17b   :  { %16439 = vst [vmem:[#allocation292_spill] sm:$0xff] %v11440_v38  ;;  %v11455_v18 = vadd.f32 %v10947_v9, %v248_v7  ;;  %v251_v40 = vmul.f32 %v10911_v41, %v167_v5  ;;  %v11459_v25 = vadd.f32 %v10989_v23, %v250_v43  ;;  %v207_v38 = vrot.slane %v135_v20, %v9718_v32 }
 0x17c   :  { %16440 = vst [vmem:[#allocation293_spill] sm:$0xff] %v11446_v54  ;;  %16441 = vst [vmem:[#allocation294_spill] sm:$0xff] %v11448_v2  ;;  %v11462_v16 = vadd.f32 %v407_v22, %v268_v62  ;;  %v103_v15 = vcombine.high %v93_v59, %v93_v59  ;;  %v121_v31 = vcombine.high %v119_v42, %v119_v42  ;;  %v301_v17 = vpop.permute.xlu1 %300 }
 0x17d   :  { %16442 = vst [vmem:[#allocation295_spill] sm:$0xff] %v11451_v60  ;;  %16443 = vst [vmem:[#allocation296_spill] sm:$0xff] %v11455_v18  ;;  %v70_v21 = vrot.slane %v56_v46, %v9732_v35  ;;  %v270_v19 = vmul.f32 %v11402_v58, %v207_v38  ;;  %v151_v60 = vcombine.high %v135_v20, %v135_v20  ;;  %v16475_v18 = vld [vmem:[#allocation52_spill] sm:$0xff] }
 0x17e   :  { %16444 = vst [vmem:[#allocation297_spill] sm:$0xff] %v11459_v25  ;;  %16445 = vst [vmem:[#allocation298_spill] sm:$0xff] %v11462_v16  ;;  %v11467_v9 = vmul.f32 %v10911_v41, %v191_v63  ;;  %v11470_v5 = vmul.f32 %v10911_v41, %v195_v10  ;;  %v11472_v43 = vadd.f32 %v301_v17, %v249_v51 }
 0x17f   :  { %v171_v23 = vrot.slane %v103_v15, %v9718_v32  ;;  %v149_v22 = vrot.slane %v121_v31, %v9732_v35  ;;  %v86_v42 = vrot.slane %v70_v21, %v9732_v35  ;;  %v11477_v59 = vadd.f32 %v418_v36, %v270_v19  ;;  %v440_v15 = vpop.permute.xlu0 %439 }
 0x180   :  { %16446 = vst [vmem:[#allocation299_spill] sm:$0xff] %v11472_v43  ;;  %v215_v46 = vrot.slane %v151_v60, %v9718_v32  ;;  %v72_v62 = vcombine.high %v70_v21, %v70_v21  ;;  %v11481_v20 = vmul.f32 %v10911_v41, %v199_v4  ;;  %v312_v31 = vpop.permute.xlu1 %311  ;;  %v729_v2 = vmul.f32 %v16475_v18, %v10049_v44 }
 0x181   :  { %16447 = vst [vmem:[#allocation300_spill] sm:$0xff] %v11477_v59  ;;  %v252_v63 = vmul.f32 %v11402_v58, %v171_v23  ;;  %v253_v10 = vmul.f32 %v10911_v41, %v171_v23  ;;  %v211_v7 = vrot.slane %v149_v22, %v9718_v32  ;;  %v175_v51 = vrot.slane %v86_v42, %v9718_v32 }
 0x182   :  { %v274_v17 = vmul.f32 %v11402_v58, %v215_v46  ;;  %v100_v36 = vrot.slane %v72_v62, %v9732_v35  ;;  %v153_v19 = vcombine.high %v149_v22, %v149_v22  ;;  %v102_v60 = vcombine.high %v86_v42, %v86_v42 }
 0x183   :  { %v11489_v21 = vadd.f32 %v312_v31, %v251_v40  ;;  %v11492_v4 = vadd.f32 %v11039_v27, %v252_v63  ;;  %v272_v59 = vmul.f32 %v11402_v58, %v211_v7  ;;  %v254_v23 = vmul.f32 %v11402_v58, %v175_v51 }
 0x184   :  { %v255_v16 = vmul.f32 %v10911_v41, %v175_v51  ;;  %v11497_v54 = vadd.f32 %v440_v15, %v274_v17  ;;  %v179_v25 = vrot.slane %v100_v36, %v9718_v32  ;;  %v219_v43 = vrot.slane %v153_v19, %v9718_v32  ;;  %v323_v42 = vpop.permute.xlu1 %322 }
 0x185   :  { %16448 = vst [vmem:[#allocation301_spill] sm:$0xff] %v11489_v21  ;;  %16449 = vst [vmem:[#allocation302_spill] sm:$0xff] %v11492_v4  ;;  %v11501_v62 = vadd.f32 %v429_v34, %v272_v59  ;;  %v11504_v40 = vadd.f32 %v11074_v33, %v254_v23  ;;  %v183_v27 = vrot.slane %v102_v60, %v9718_v32  ;;  %v451_v34 = vpop.permute.xlu0 %450 }
 0x186   :  { %16450 = vst [vmem:[#allocation303_spill] sm:$0xff] %v11497_v54  ;;  %v104_v22 = vcombine.high %v100_v36, %v100_v36  ;;  %v256_v63 = vmul.f32 %v11402_v58, %v179_v25  ;;  %v257_v31 = vmul.f32 %v10911_v41, %v179_v25  ;;  %v276_v51 = vmul.f32 %v11402_v58, %v219_v43 }
 0x187   :  { %16451 = vst [vmem:[#allocation304_spill] sm:$0xff] %v11501_v62  ;;  %16452 = vst [vmem:[#allocation305_spill] sm:$0xff] %v11504_v40  ;;  %v11511_v15 = vmul.f32 %v10911_v41, %v203_v12  ;;  %v11513_v17 = vadd.f32 %v323_v42, %v253_v10  ;;  %v258_v59 = vmul.f32 %v11402_v58, %v183_v27  ;;  %v16470_v62 = vld [vmem:[#allocation37_spill] sm:$0xff] }
 0x188   :  { %v259_v33 = vmul.f32 %v10911_v41, %v183_v27  ;;  %v187_v19 = vrot.slane %v104_v22, %v9718_v32  ;;  %v11519_v36 = vadd.f32 %v11118_v11, %v256_v63  ;;  %v11521_v60 = vadd.f32 %v451_v34, %v276_v51  ;;  %v334_v11 = vpop.permute.xlu1 %333  ;;  %v16476_v32 = vld [vmem:[#allocation53_spill] sm:$0xff] }
 0x189   :  { %16453 = vst [vmem:[#allocation306_spill] sm:$0xff] %v11511_v15  ;;  %16454 = vst [vmem:[#allocation307_spill] sm:$0xff] %v11513_v17  ;;  %v11524_v25 = vmul.f32 %v10911_v41, %v207_v38  ;;  %v11527_v12 = vmul.f32 %v10911_v41, %v211_v7  ;;  %v11530_v10 = vadd.f32 %v11164_v28, %v258_v59  ;;  %v16462_v38 = vld [vmem:[#allocation31_spill] sm:$0xff]  ;;  %v16463_v7 = vld [vmem:[#allocation32_spill] sm:$0xff] }
 0x18a   :  { %16455 = vst [vmem:[#allocation308_spill] sm:$0xff] %v11519_v36  ;;  %16456 = vst [vmem:[#allocation309_spill] sm:$0xff] %v11521_v60  ;;  %v260_v23 = vmul.f32 %v11402_v58, %v187_v19  ;;  %v261_v27 = vmul.f32 %v10911_v41, %v187_v19  ;;  %v11535_v22 = vmul.f32 %v10911_v41, %v215_v46  ;;  %v16464_v28 = vld [vmem:[#allocation34_spill] sm:$0xff]  ;;  %v16467_v46 = vld [vmem:[#allocation33_spill] sm:$0xff] }
 0x18b   :  { %16457 = vst [vmem:[#allocation310_spill] sm:$0xff] %v11524_v25  ;;  %16458 = vst [vmem:[#allocation311_spill] sm:$0xff] %v11527_v12  ;;  %v11538_v42 = vmul.f32 %v10911_v41, %v219_v43  ;;  %v703_v63 = vmul.f32 %v16462_v38, %v10049_v44  ;;  %v705_v51 = vmul.f32 %v16463_v7, %v10049_v44  ;;  %v16468_v41 = vld [vmem:[#allocation35_spill] sm:$0xff]  ;;  %v16469_v60 = vld [vmem:[#allocation36_spill] sm:$0xff] }
 0x18c   :  { %16459 = vst [vmem:[#allocation312_spill] sm:$0xff] %v11530_v10  ;;  %16460 = vst [vmem:[#allocation313_spill] sm:$0xff] %v11535_v22  ;;  %v707_v34 = vmul.f32 %v16464_v28, %v10049_v44  ;;  %v11546_v59 = vadd.f32 %v334_v11, %v255_v16  ;;  %v11549_v58 = vadd.f32 %v11207_v52, %v260_v23  ;;  %v16471_v52 = vld [vmem:[#allocation48_spill] sm:$0xff]  ;;  %v16472_v11 = vld [vmem:[#allocation50_spill] sm:$0xff]  ;;  %v345_v21 = vpop.permute.xlu1 %344 }
 0x18d   :  { %16461 = vst [vmem:[#allocation314_spill] sm:$0xff] %v11538_v42  ;;  %v709_v19 = vmul.f32 %v16467_v46, %v10049_v44  ;;  %v711_v43 = vmul.f32 %v16468_v41, %v10049_v44  ;;  %v713_v54 = vmul.f32 %v16469_v60, %v10049_v44  ;;  %v715_v10 = vmul.f32 %v16470_v62, %v10049_v44  ;;  %v16474_v17 = vld [vmem:[#allocation51_spill] sm:$0xff]  ;;  %v16479_v62 = vld [vmem:[#allocation82_spill] sm:$0xff] }
 0x18e   :  { %16465 = vst [vmem:[#allocation315_spill] sm:$0xff] %v11546_v59  ;;  %16466 = vst [vmem:[#allocation316_spill] sm:$0xff] %v11549_v58  ;;  %v717_v36 = vmul.f32 %v10099_v6, %v10049_v44  ;;  %v719_v16 = vmul.f32 %v10106_v13, %v10049_v44  ;;  %v721_v23 = vmul.f32 %v16471_v52, %v10049_v44  ;;  %v16473_v59 = vld [vmem:[#allocation49_spill] sm:$0xff]  ;;  %v16481_v60 = vld [vmem:[#allocation86_spill] sm:$0xff] }
 0x18f   :  { %v723_v58 = vmul.f32 %v16472_v11, %v10049_v44  ;;  %v725_v40 = vmul.f32 %v16473_v59, %v10049_v44  ;;  %v727_v4 = vmul.f32 %v16474_v17, %v10049_v44  ;;  %v731_v35 = vmul.f32 %v16476_v32, %v10049_v44  ;;  %v16478_v59 = vld [vmem:[#allocation81_spill] sm:$0xff] }
 0x190   :  { %v941_v13 = vmul.f32 %v10265_v50, %v10303_v14  ;;  %v943_v52 = vmul.f32 %v10273_v48, %v10303_v14  ;;  %v11579_v11 = vadd.f32 %v345_v21, %v257_v31  ;;  %v945_v6 = vmul.f32 %v16478_v59, %v10303_v14  ;;  %v16480_v32 = vld [vmem:[#allocation85_spill] sm:$0xff]  ;;  %v16482_v21 = vld [vmem:[#allocation70_spill] sm:$0xff]  ;;  %v356_v7 = vpop.permute.xlu1 %355 }
 0x191   :  { %v947_v17 = vmul.f32 %v10285_v24, %v10303_v14  ;;  %v949_v18 = vmul.f32 %v16479_v62, %v10303_v14  ;;  %v951_v44 = vmul.f32 %v10288_v30, %v10303_v14  ;;  %v953_v50 = vmul.f32 %v16480_v32, %v10303_v14  ;;  %v16484_v24 = vld [vmem:[#allocation74_spill] sm:$0xff]  ;;  %v16485_v62 = vld [vmem:[#allocation76_spill] sm:$0xff]  ;;  %v16486_v30 = vld [vmem:[#allocation71_spill] sm:$0xff] }
 0x192   :  { %16477 = vst [vmem:[#allocation317_spill] sm:$0xff] %v11579_v11  ;;  %v955_v48 = vmul.f32 %v16481_v60, %v10303_v14  ;;  %v957_v31 = vmul.f32 %v16482_v21, %v10303_v14  ;;  %v16483_v11 = vld [vmem:[#allocation72_spill] sm:$0xff]  ;;  %v961_v41 = vmul.f32 %v16484_v24, %v10303_v14  ;;  %v963_v46 = vmul.f32 %v16485_v62, %v10303_v14  ;;  %v16487_v32 = vld [vmem:[#allocation73_spill] sm:$0xff]  ;;  %v16488_v60 = vld [vmem:[#allocation75_spill] sm:$0xff] }
 0x193   :  { %v959_v59 = vmul.f32 %v16483_v11, %v10303_v14  ;;  %v965_v28 = vmul.f32 %v16486_v30, %v10303_v14  ;;  %v967_v38 = vmul.f32 %v16487_v32, %v10303_v14  ;;  %v969_v42 = vmul.f32 %v16488_v60, %v10303_v14  ;;  %v16489_v21 = vld [vmem:[#allocation77_spill] sm:$0xff] }
 0x194   :  { %v971_v22 = vmul.f32 %v16489_v21, %v10303_v14  ;;  %v973_v11 = vadd.f32 %v941_v13, %v11422_v56  ;;  %v11610_v49 = vadd.f32 %v356_v7, %v259_v33  ;;  %v975_v24 = vadd.f32 %v943_v52, %v703_v63  ;;  %v367_v47 = vpop.permute.xlu1 %366  ;;  %v16492_v13 = vld [vmem:[#allocation22_spill] sm:$0xff]  ;;  %v16496_v33 = vld [vmem:[#allocation25_spill] sm:$0xff] }
 0x195   :  { %v977_v12 = vadd.f32 %v945_v6, %v705_v51  ;;  %v979_v62 = vadd.f32 %v947_v17, %v707_v34  ;;  %v981_v25 = vadd.f32 %v949_v18, %v709_v19  ;;  %v983_v57 = vadd.f32 %v951_v44, %v711_v43  ;;  %v16493_v6 = vld [vmem:[#allocation23_spill] sm:$0xff]  ;;  %v16502_v63 = vld [vmem:[#allocation65_spill] sm:$0xff] }
 0x196   :  { %16490 = vst [vmem:[#allocation318_spill] sm:$0xff] %v11610_v49  ;;  %v985_v30 = vadd.f32 %v953_v50, %v713_v54  ;;  %v987_v45 = vadd.f32 %v955_v48, %v715_v10  ;;  %v989_v0 = vadd.f32 %v957_v31, %v717_v36  ;;  %v991_v39 = vadd.f32 %v959_v59, %v719_v16  ;;  %v16494_v50 = vld [vmem:[#allocation24_spill] sm:$0xff]  ;;  %v16495_v54 = vld [vmem:[#allocation26_spill] sm:$0xff]  ;;  %v16504_v59 = vld [vmem:[#allocation63_spill] sm:$0xff] }
 0x197   :  { %v993_v32 = vadd.f32 %v961_v41, %v721_v23  ;;  %v995_v15 = vadd.f32 %v963_v46, %v723_v58  ;;  %v997_v60 = vadd.f32 %v965_v28, %v725_v40  ;;  %v999_v61 = vadd.f32 %v967_v38, %v727_v4  ;;  %v16499_v36 = vld [vmem:[#allocation30_spill] sm:$0xff]  ;;  %v16503_v28 = vld [vmem:[#allocation68_spill] sm:$0xff]  ;;  %v16506_v41 = vld [vmem:[#allocation67_spill] sm:$0xff] }
 0x198   :  { %v1001_v3 = vadd.f32 %v969_v42, %v729_v2  ;;  %v1003_v14 = vadd.f32 %v971_v22, %v731_v35  ;;  %v11612_v21 = vadd.f32 %v367_v47, %v261_v27  ;;  %v1213_v56 = vmul.f32 %v16492_v13, %v10440_v1  ;;  %v16497_v2 = vld [vmem:[#allocation27_spill] sm:$0xff]  ;;  %v16498_v47 = vld [vmem:[#allocation28_spill] sm:$0xff]  ;;  %v16500_v27 = vld [vmem:[#allocation62_spill] sm:$0xff]  ;;  %v378_v51 = vpop.permute.xlu1 %377 }
 0x199   :  { %v1215_v18 = vmul.f32 %v16493_v6, %v10440_v1  ;;  %v1217_v48 = vmul.f32 %v16494_v50, %v10440_v1  ;;  %v1219_v17 = vmul.f32 %v16495_v54, %v10440_v1  ;;  %v1221_v40 = vmul.f32 %v16496_v33, %v10440_v1  ;;  %v16501_v42 = vld [vmem:[#allocation64_spill] sm:$0xff]  ;;  %v16505_v46 = vld [vmem:[#allocation66_spill] sm:$0xff]  ;;  %v16508_v52 = vld [vmem:[#allocation69_spill] sm:$0xff] }
 0x19a   :  { %16491 = vst [vmem:[#allocation319_spill] sm:$0xff] %v11612_v21  ;;  %v1223_v35 = vmul.f32 %v16497_v2, %v10440_v1  ;;  %v1225_v4 = vmul.f32 %v16498_v47, %v10440_v1  ;;  %v1227_v10 = vmul.f32 %v16499_v36, %v10440_v1  ;;  %v1229_v22 = vmul.f32 %v16500_v27, %v10440_v1 }
 0x19b   :  { %v1231_v38 = vmul.f32 %v16501_v42, %v10440_v1  ;;  %v1233_v7 = vmul.f32 %v16502_v63, %v10440_v1  ;;  %v1235_v34 = vmul.f32 %v16503_v28, %v10440_v1  ;;  %v1237_v58 = vmul.f32 %v16504_v59, %v10440_v1 }
 0x19c   :  { %v1239_v19 = vmul.f32 %v16505_v46, %v10440_v1  ;;  %v1241_v43 = vmul.f32 %v16506_v41, %v10440_v1  ;;  %v11645_v16 = vadd.f32 %v378_v51, %v11467_v9  ;;  %v1243_v23 = vmul.f32 %v16508_v52, %v10440_v1  ;;  %v389_v46 = vpop.permute.xlu1 %388 }
 0x19d   :  { %v1245_v44 = vadd.f32 %v1213_v56, %v973_v11  ;;  %v1247_v31 = vadd.f32 %v1215_v18, %v975_v24  ;;  %v1249_v21 = vadd.f32 %v1217_v48, %v977_v12  ;;  %v1251_v49 = vadd.f32 %v1219_v17, %v979_v62  ;;  %v16510_v24 = vld [vmem:[#allocation38_spill] sm:$0xff]  ;;  %v16511_v62 = vld [vmem:[#allocation39_spill] sm:$0xff] }
 0x19e   :  { %16507 = vst [vmem:[#allocation22_spill] sm:$0xff] %v11645_v16  ;;  %v1253_v28 = vadd.f32 %v1221_v40, %v981_v25  ;;  %v1255_v63 = vadd.f32 %v1223_v35, %v983_v57  ;;  %v1257_v42 = vadd.f32 %v1225_v4, %v985_v30  ;;  %v1259_v59 = vadd.f32 %v1227_v10, %v987_v45  ;;  %v16512_v30 = vld [vmem:[#allocation40_spill] sm:$0xff]  ;;  %v16514_v45 = vld [vmem:[#allocation41_spill] sm:$0xff]  ;;  %v16517_v25 = vld [vmem:[#allocation46_spill] sm:$0xff] }
 0x19f   :  { %v1261_v27 = vadd.f32 %v1229_v22, %v989_v0  ;;  %v1263_v36 = vadd.f32 %v1231_v38, %v991_v39  ;;  %v1265_v47 = vadd.f32 %v1233_v7, %v993_v32  ;;  %v1267_v2 = vadd.f32 %v1235_v34, %v995_v15  ;;  %v16513_v39 = vld [vmem:[#allocation42_spill] sm:$0xff]  ;;  %v16520_v22 = vld [vmem:[#allocation136_spill] sm:$0xff] }
 0x1a0   :  { %v1269_v41 = vadd.f32 %v1237_v58, %v997_v60  ;;  %v1271_v33 = vadd.f32 %v1239_v19, %v999_v61  ;;  %v11650_v9 = vadd.f32 %v389_v46, %v11470_v5  ;;  %v1273_v51 = vadd.f32 %v1241_v43, %v1001_v3  ;;  %v16515_v5 = vld [vmem:[#allocation43_spill] sm:$0xff]  ;;  %v16516_v3 = vld [vmem:[#allocation44_spill] sm:$0xff]  ;;  %v400_v56 = vpop.permute.xlu1 %399  ;;  %v16519_v4 = vld [vmem:[#allocation134_spill] sm:$0xff] }
 0x1a1   :  { %v1275_v1 = vadd.f32 %v1243_v23, %v1003_v14  ;;  %v1485_v12 = vmul.f32 %v16510_v24, %v10573_v37  ;;  %v1487_v57 = vmul.f32 %v16511_v62, %v10573_v37  ;;  %v1489_v0 = vmul.f32 %v16512_v30, %v10573_v37  ;;  %v16521_v7 = vld [vmem:[#allocation138_spill] sm:$0xff] }
 0x1a2   :  { %16509 = vst [vmem:[#allocation23_spill] sm:$0xff] %v11650_v9  ;;  %v1491_v32 = vmul.f32 %v16513_v39, %v10573_v37  ;;  %v1493_v61 = vmul.f32 %v16514_v45, %v10573_v37  ;;  %v1495_v15 = vmul.f32 %v16515_v5, %v10573_v37  ;;  %v1497_v60 = vmul.f32 %v16516_v3, %v10573_v37 }
 0x1a3   :  { %v1499_v11 = vmul.f32 %v16517_v25, %v10573_v37  ;;  %v1501_v14 = vmul.f32 %v10533_v53, %v10573_v37  ;;  %v1503_v18 = vmul.f32 %v10540_v8, %v10573_v37  ;;  %v1505_v48 = vmul.f32 %v10548_v29, %v10573_v37 }
 0x1a4   :  { %v1507_v17 = vmul.f32 %v10557_v55, %v10573_v37  ;;  %v1509_v40 = vmul.f32 %v10543_v26, %v10573_v37  ;;  %v11679_v35 = vadd.f32 %v400_v56, %v11481_v20  ;;  %v1511_v10 = vmul.f32 %v16519_v4, %v10573_v37  ;;  %v411_v55 = vpop.permute.xlu1 %410  ;;  %v16522_v4 = vld [vmem:[#allocation306_spill] sm:$0xff] }
 0x1a5   :  { %v1513_v38 = vmul.f32 %v16520_v22, %v10573_v37  ;;  %v1515_v34 = vmul.f32 %v16521_v7, %v10573_v37  ;;  %v1517_v58 = vadd.f32 %v1485_v12, %v1245_v44  ;;  %v1519_v46 = vadd.f32 %v1487_v57, %v1247_v31  ;;  %v16524_v44 = vld [vmem:[#allocation112_spill] sm:$0xff]  ;;  %v16525_v31 = vld [vmem:[#allocation54_spill] sm:$0xff]  ;;  %v16533_v57 = vld [vmem:[#allocation113_spill] sm:$0xff] }
 0x1a6   :  { %16518 = vst [vmem:[#allocation320_spill] sm:$0xff] %v11679_v35  ;;  %v1521_v19 = vadd.f32 %v1489_v0, %v1249_v21  ;;  %v1523_v43 = vadd.f32 %v1491_v32, %v1251_v49  ;;  %v1525_v23 = vadd.f32 %v1493_v61, %v1253_v28  ;;  %v1527_v9 = vadd.f32 %v1495_v15, %v1255_v63  ;;  %v16526_v49 = vld [vmem:[#allocation55_spill] sm:$0xff]  ;;  %v16535_v15 = vld [vmem:[#allocation116_spill] sm:$0xff] }
 0x1a7   :  { %v1529_v16 = vadd.f32 %v1497_v60, %v1257_v42  ;;  %v1531_v26 = vadd.f32 %v1499_v11, %v1259_v59  ;;  %v1533_v20 = vadd.f32 %v1501_v14, %v1261_v27  ;;  %v1535_v56 = vadd.f32 %v1503_v18, %v1263_v36  ;;  %v16527_v42 = vld [vmem:[#allocation56_spill] sm:$0xff]  ;;  %v16528_v36 = vld [vmem:[#allocation58_spill] sm:$0xff]  ;;  %v16530_v27 = vld [vmem:[#allocation59_spill] sm:$0xff] }
 0x1a8   :  { %v1537_v35 = vadd.f32 %v1505_v48, %v1265_v47  ;;  %v1539_v29 = vadd.f32 %v1507_v17, %v1267_v2  ;;  %v11688_v8 = vadd.f32 %v411_v55, %v16522_v4  ;;  %v1541_v22 = vadd.f32 %v1509_v40, %v1269_v41  ;;  %v16529_v2 = vld [vmem:[#allocation57_spill] sm:$0xff]  ;;  %v16531_v59 = vld [vmem:[#allocation60_spill] sm:$0xff]  ;;  %v16534_v32 = vld [vmem:[#allocation115_spill] sm:$0xff] }
 0x1a9   :  { %v1543_v53 = vadd.f32 %v1511_v10, %v1271_v33  ;;  %v1545_v25 = vadd.f32 %v1513_v38, %v1273_v51  ;;  %v1547_v37 = vadd.f32 %v1515_v34, %v1275_v1  ;;  %v1757_v21 = vmul.f32 %v16525_v31, %v16524_v44  ;;  %v422_v51 = vpop.permute.xlu1 %421  ;;  %v16532_v1 = vld [vmem:[#allocation61_spill] sm:$0xff]  ;;  %v16536_v11 = vld [vmem:[#allocation310_spill] sm:$0xff]  ;;  %v16538_v18 = vld [vmem:[#allocation119_spill] sm:$0xff] }
 0x1aa   :  { %16523 = vst [vmem:[#allocation306_spill] sm:$0xff] %v11688_v8  ;;  %v1759_v63 = vmul.f32 %v16526_v49, %v16524_v44  ;;  %v1761_v28 = vmul.f32 %v16527_v42, %v16524_v44  ;;  %v1763_v47 = vmul.f32 %v16528_v36, %v16524_v44  ;;  %v1765_v55 = vmul.f32 %v16529_v2, %v16524_v44  ;;  %v16539_v17 = vld [vmem:[#allocation114_spill] sm:$0xff]  ;;  %v16540_v4 = vld [vmem:[#allocation117_spill] sm:$0xff]  ;;  %v16542_v8 = vld [vmem:[#allocation120_spill] sm:$0xff] }
 0x1ab   :  { %v1767_v33 = vmul.f32 %v16530_v27, %v16524_v44  ;;  %v1769_v41 = vmul.f32 %v16531_v59, %v16524_v44  ;;  %v1771_v12 = vmul.f32 %v16532_v1, %v16524_v44  ;;  %v1773_v0 = vmul.f32 %v16533_v57, %v16524_v44  ;;  %v16541_v38 = vld [vmem:[#allocation118_spill] sm:$0xff]  ;;  %v16543_v36 = vld [vmem:[#allocation311_spill] sm:$0xff] }
 0x1ac   :  { %v1775_v61 = vmul.f32 %v16534_v32, %v16524_v44  ;;  %v1777_v60 = vmul.f32 %v16535_v15, %v16524_v44  ;;  %v11713_v14 = vadd.f32 %v422_v51, %v16536_v11  ;;  %v1779_v48 = vmul.f32 %v16538_v18, %v16524_v44 }
 0x1ad   :  { %v1781_v40 = vmul.f32 %v16539_v17, %v16524_v44  ;;  %v1783_v10 = vmul.f32 %v16540_v4, %v16524_v44  ;;  %v1785_v34 = vmul.f32 %v16541_v38, %v16524_v44  ;;  %v1787_v32 = vmul.f32 %v16542_v8, %v16524_v44  ;;  %v433_v59 = vpop.permute.xlu1 %432 }
 0x1ae   :  { %16537 = vst [vmem:[#allocation112_spill] sm:$0xff] %v11713_v14  ;;  %v1789_v57 = vadd.f32 %v1757_v21, %v1517_v58  ;;  %v1791_v15 = vadd.f32 %v1759_v63, %v1519_v46  ;;  %v1793_v1 = vadd.f32 %v1761_v28, %v1521_v19  ;;  %v1795_v51 = vadd.f32 %v1763_v47, %v1523_v43  ;;  %v16545_v58 = vld [vmem:[#allocation15_spill] sm:$0xff]  ;;  %v16547_v43 = vld [vmem:[#allocation88_spill] sm:$0xff]  ;;  %v16553_v21 = vld [vmem:[#allocation94_spill] sm:$0xff] }
 0x1af   :  { %v1797_v11 = vadd.f32 %v1765_v55, %v1525_v23  ;;  %v1799_v14 = vadd.f32 %v1767_v33, %v1527_v9  ;;  %v1801_v18 = vadd.f32 %v1769_v41, %v1529_v16  ;;  %v1803_v27 = vadd.f32 %v1771_v12, %v1531_v26  ;;  %v16546_v46 = vld [vmem:[#allocation87_spill] sm:$0xff]  ;;  %v16548_v16 = vld [vmem:[#allocation90_spill] sm:$0xff]  ;;  %v16555_v47 = vld [vmem:[#allocation313_spill] sm:$0xff] }
 0x1b0   :  { %v1805_v2 = vadd.f32 %v1773_v0, %v1533_v20  ;;  %v1807_v17 = vadd.f32 %v1775_v61, %v1535_v56  ;;  %v11726_v42 = vadd.f32 %v433_v59, %v16543_v36  ;;  %v1809_v4 = vadd.f32 %v1777_v60, %v1537_v35  ;;  %v16549_v23 = vld [vmem:[#allocation91_spill] sm:$0xff]  ;;  %v16550_v56 = vld [vmem:[#allocation89_spill] sm:$0xff]  ;;  %v16554_v28 = vld [vmem:[#allocation166_spill] sm:$0xff] }
 0x1b1   :  { %v1811_v49 = vadd.f32 %v1779_v48, %v1539_v29  ;;  %v1813_v38 = vadd.f32 %v1781_v40, %v1541_v22  ;;  %v1815_v31 = vadd.f32 %v1783_v10, %v1543_v53  ;;  %v1817_v7 = vadd.f32 %v1785_v34, %v1545_v25  ;;  %v444_v29 = vpop.permute.xlu1 %443  ;;  %v16551_v53 = vld [vmem:[#allocation92_spill] sm:$0xff]  ;;  %v16552_v22 = vld [vmem:[#allocation93_spill] sm:$0xff]  ;;  %v16560_v61 = vld [vmem:[#allocation167_spill] sm:$0xff] }
 0x1b2   :  { %16544 = vst [vmem:[#allocation310_spill] sm:$0xff] %v11726_v42  ;;  %v1819_v44 = vadd.f32 %v1787_v32, %v1547_v37  ;;  %v2029_v19 = vmul.f32 %v16546_v46, %v16545_v58  ;;  %v2031_v9 = vmul.f32 %v16547_v43, %v16545_v58  ;;  %v2033_v26 = vmul.f32 %v16548_v16, %v16545_v58  ;;  %v16557_v33 = vld [vmem:[#allocation16_spill] sm:$0xff]  ;;  %v16558_v41 = vld [vmem:[#allocation17_spill] sm:$0xff]  ;;  %v16562_v10 = vld [vmem:[#allocation170_spill] sm:$0xff] }
 0x1b3   :  { %v2035_v20 = vmul.f32 %v16549_v23, %v16545_v58  ;;  %v2037_v35 = vmul.f32 %v16550_v56, %v16545_v58  ;;  %v2039_v25 = vmul.f32 %v16551_v53, %v16545_v58  ;;  %v2041_v37 = vmul.f32 %v16552_v22, %v16545_v58  ;;  %v16559_v0 = vld [vmem:[#allocation168_spill] sm:$0xff]  ;;  %v16561_v48 = vld [vmem:[#allocation169_spill] sm:$0xff]  ;;  %v16564_v56 = vld [vmem:[#allocation314_spill] sm:$0xff] }
 0x1b4   :  { %v2043_v63 = vmul.f32 %v16553_v21, %v16545_v58  ;;  %v2045_v36 = vmul.f32 %v16554_v28, %v16545_v58  ;;  %v11747_v55 = vadd.f32 %v444_v29, %v16555_v47  ;;  %v2047_v59 = vmul.f32 %v16557_v33, %v16545_v58  ;;  %v16563_v29 = vld [vmem:[#allocation171_spill] sm:$0xff] }
 0x1b5   :  { %v2049_v12 = vmul.f32 %v16558_v41, %v16545_v58  ;;  %v2051_v32 = vmul.f32 %v16559_v0, %v16545_v58  ;;  %v2053_v60 = vmul.f32 %v16560_v61, %v16545_v58  ;;  %v2055_v40 = vmul.f32 %v16561_v48, %v16545_v58  ;;  %v455_v41 = vpop.permute.xlu1 %454 }
 0x1b6   :  { %16556 = vst [vmem:[#allocation311_spill] sm:$0xff] %v11747_v55  ;;  %v2057_v34 = vmul.f32 %v16562_v10, %v16545_v58  ;;  %v2059_v47 = vmul.f32 %v16563_v29, %v16545_v58  ;;  %v2061_v55 = vadd.f32 %v2029_v19, %v1789_v57  ;;  %v2063_v42 = vadd.f32 %v2031_v9, %v1791_v15  ;;  %v16566_v57 = vld [vmem:[#allocation130_spill] sm:$0xff]  ;;  %v16567_v15 = vld [vmem:[#allocation104_spill] sm:$0xff]  ;;  %v16575_v9 = vld [vmem:[#allocation7_spill] sm:$0xff] }
 0x1b7   :  { %v2065_v33 = vadd.f32 %v2033_v26, %v1793_v1  ;;  %v2067_v28 = vadd.f32 %v2035_v20, %v1795_v51  ;;  %v2069_v21 = vadd.f32 %v2037_v35, %v1797_v11  ;;  %v2071_v22 = vadd.f32 %v2039_v25, %v1799_v14  ;;  %v16568_v51 = vld [vmem:[#allocation105_spill] sm:$0xff]  ;;  %v16569_v14 = vld [vmem:[#allocation106_spill] sm:$0xff]  ;;  %v16576_v20 = vld [vmem:[#allocation140_spill] sm:$0xff] }
 0x1b8   :  { %v2073_v0 = vadd.f32 %v2041_v37, %v1801_v18  ;;  %v2075_v53 = vadd.f32 %v2043_v63, %v1803_v27  ;;  %v11764_v61 = vadd.f32 %v455_v41, %v16564_v56  ;;  %v2077_v23 = vadd.f32 %v2045_v36, %v1805_v2  ;;  %v16570_v18 = vld [vmem:[#allocation110_spill] sm:$0xff]  ;;  %v16571_v2 = vld [vmem:[#allocation107_spill] sm:$0xff]  ;;  %v16577_v35 = vld [vmem:[#allocation141_spill] sm:$0xff] }
 0x1b9   :  { %v2079_v48 = vadd.f32 %v2047_v59, %v1807_v17  ;;  %v2081_v16 = vadd.f32 %v2049_v12, %v1809_v4  ;;  %v2083_v43 = vadd.f32 %v2051_v32, %v1811_v49  ;;  %v2085_v10 = vadd.f32 %v2053_v60, %v1813_v38  ;;  %v16572_v49 = vld [vmem:[#allocation108_spill] sm:$0xff]  ;;  %v16574_v38 = vld [vmem:[#allocation111_spill] sm:$0xff]  ;;  %v16580_v41 = vld [vmem:[#allocation142_spill] sm:$0xff] }
 0x1ba   :  { %16565 = vst [vmem:[#allocation15_spill] sm:$0xff] %v11764_v61  ;;  %v2087_v46 = vadd.f32 %v2055_v40, %v1815_v31  ;;  %v2089_v8 = vadd.f32 %v2057_v34, %v1817_v7  ;;  %v2091_v58 = vadd.f32 %v2059_v47, %v1819_v44  ;;  %v2301_v1 = vmul.f32 %v16567_v15, %v16566_v57  ;;  %v16573_v7 = vld [vmem:[#allocation109_spill] sm:$0xff]  ;;  %v16578_v37 = vld [vmem:[#allocation8_spill] sm:$0xff]  ;;  %v16579_v36 = vld [vmem:[#allocation139_spill] sm:$0xff] }
 0x1bb   :  { %v2303_v11 = vmul.f32 %v16568_v51, %v16566_v57  ;;  %v2305_v27 = vmul.f32 %v16569_v14, %v16566_v57  ;;  %v2307_v19 = vmul.f32 %v16570_v18, %v16566_v57  ;;  %v2309_v17 = vmul.f32 %v16571_v2, %v16566_v57  ;;  %v16581_v32 = vld [vmem:[#allocation143_spill] sm:$0xff]  ;;  %v16582_v40 = vld [vmem:[#allocation144_spill] sm:$0xff] }
 0x1bc   :  { %v2311_v31 = vmul.f32 %v16572_v49, %v16566_v57  ;;  %v2313_v4 = vmul.f32 %v16573_v7, %v16566_v57  ;;  %v2315_v44 = vmul.f32 %v16574_v38, %v16566_v57  ;;  %v2317_v26 = vmul.f32 %v16575_v9, %v16566_v57  ;;  %v16584_v29 = vld [vmem:[#allocation96_spill] sm:$0xff] }
 0x1bd   :  { %v2319_v56 = vmul.f32 %v16576_v20, %v16566_v57  ;;  %v2321_v25 = vmul.f32 %v16577_v35, %v16566_v57  ;;  %v2323_v63 = vmul.f32 %v16578_v37, %v16566_v57  ;;  %v2325_v59 = vmul.f32 %v16579_v36, %v16566_v57 }
 0x1be   :  { %v2327_v12 = vmul.f32 %v16580_v41, %v16566_v57  ;;  %v2329_v60 = vmul.f32 %v16581_v32, %v16566_v57  ;;  %v2331_v34 = vmul.f32 %v16582_v40, %v16566_v57  ;;  %v2333_v47 = vadd.f32 %v2301_v1, %v2061_v55  ;;  %v16583_v32 = vld [vmem:[#allocation188_spill] sm:$0xff]  ;;  %v16585_v55 = vld [vmem:[#allocation98_spill] sm:$0xff] }
 0x1bf   :  { %v2335_v61 = vadd.f32 %v2303_v11, %v2063_v42  ;;  %v2337_v20 = vadd.f32 %v2305_v27, %v2065_v33  ;;  %v2339_v9 = vadd.f32 %v2307_v19, %v2067_v28  ;;  %v2341_v35 = vadd.f32 %v2309_v17, %v2069_v21  ;;  %v16586_v28 = vld [vmem:[#allocation99_spill] sm:$0xff]  ;;  %v16593_v57 = vld [vmem:[#allocation190_spill] sm:$0xff]  ;;  %v16595_v19 = vld [vmem:[#allocation193_spill] sm:$0xff] }
 0x1c0   :  { %v2343_v38 = vadd.f32 %v2311_v31, %v2071_v22  ;;  %v2345_v7 = vadd.f32 %v2313_v4, %v2073_v0  ;;  %v2347_v37 = vadd.f32 %v2315_v44, %v2075_v53  ;;  %v2349_v49 = vadd.f32 %v2317_v26, %v2077_v23  ;;  %v16587_v22 = vld [vmem:[#allocation102_spill] sm:$0xff]  ;;  %v16588_v23 = vld [vmem:[#allocation97_spill] sm:$0xff]  ;;  %v16591_v0 = vld [vmem:[#allocation103_spill] sm:$0xff] }
 0x1c1   :  { %v2351_v2 = vadd.f32 %v2319_v56, %v2079_v48  ;;  %v2353_v36 = vadd.f32 %v2321_v25, %v2081_v16  ;;  %v2355_v18 = vadd.f32 %v2323_v63, %v2083_v43  ;;  %v2357_v14 = vadd.f32 %v2325_v59, %v2085_v10  ;;  %v16589_v43 = vld [vmem:[#allocation100_spill] sm:$0xff]  ;;  %v16592_v10 = vld [vmem:[#allocation187_spill] sm:$0xff]  ;;  %v16597_v44 = vld [vmem:[#allocation194_spill] sm:$0xff] }
 0x1c2   :  { %v2359_v41 = vadd.f32 %v2327_v12, %v2087_v46  ;;  %v2361_v51 = vadd.f32 %v2329_v60, %v2089_v8  ;;  %v2363_v15 = vadd.f32 %v2331_v34, %v2091_v58  ;;  %v2573_v3 = vmul.f32 %v16584_v29, %v16583_v32  ;;  %v16590_v8 = vld [vmem:[#allocation101_spill] sm:$0xff]  ;;  %v16594_v11 = vld [vmem:[#allocation191_spill] sm:$0xff]  ;;  %v16596_v31 = vld [vmem:[#allocation192_spill] sm:$0xff] }
 0x1c3   :  { %v2575_v42 = vmul.f32 %v16585_v55, %v16583_v32  ;;  %v2577_v21 = vmul.f32 %v16586_v28, %v16583_v32  ;;  %v2579_v53 = vmul.f32 %v16587_v22, %v16583_v32  ;;  %v2581_v16 = vmul.f32 %v16588_v23, %v16583_v32  ;;  %v16598_v56 = vld [vmem:[#allocation195_spill] sm:$0xff]  ;;  %v16599_v63 = vld [vmem:[#allocation196_spill] sm:$0xff] }
 0x1c4   :  { %v2583_v46 = vmul.f32 %v16589_v43, %v16583_v32  ;;  %v2585_v33 = vmul.f32 %v16590_v8, %v16583_v32  ;;  %v2587_v48 = vmul.f32 %v16591_v0, %v16583_v32  ;;  %v2589_v58 = vmul.f32 %v16592_v10, %v16583_v32  ;;  %v16601_v29 = vld [vmem:[#allocation152_spill] sm:$0xff] }
 0x1c5   :  { %v2591_v1 = vmul.f32 %v16593_v57, %v16583_v32  ;;  %v2593_v27 = vmul.f32 %v16594_v11, %v16583_v32  ;;  %v2595_v17 = vmul.f32 %v16595_v19, %v16583_v32  ;;  %v2597_v4 = vmul.f32 %v16596_v31, %v16583_v32 }
 0x1c6   :  { %v2599_v26 = vmul.f32 %v16597_v44, %v16583_v32  ;;  %v2601_v25 = vmul.f32 %v16598_v56, %v16583_v32  ;;  %v2603_v59 = vmul.f32 %v16599_v63, %v16583_v32  ;;  %v2605_v12 = vadd.f32 %v2573_v3, %v2333_v47  ;;  %v16600_v56 = vld [vmem:[#allocation12_spill] sm:$0xff]  ;;  %v16602_v3 = vld [vmem:[#allocation10_spill] sm:$0xff] }
 0x1c7   :  { %v2607_v60 = vadd.f32 %v2575_v42, %v2335_v61  ;;  %v2609_v34 = vadd.f32 %v2577_v21, %v2337_v20  ;;  %v2611_v57 = vadd.f32 %v2579_v53, %v2339_v9  ;;  %v2613_v11 = vadd.f32 %v2581_v16, %v2341_v35  ;;  %v16603_v9 = vld [vmem:[#allocation154_spill] sm:$0xff]  ;;  %v16610_v32 = vld [vmem:[#allocation160_spill] sm:$0xff]  ;;  %v16611_v42 = vld [vmem:[#allocation161_spill] sm:$0xff] }
 0x1c8   :  { %v2615_v10 = vadd.f32 %v2583_v46, %v2343_v38  ;;  %v2617_v0 = vadd.f32 %v2585_v33, %v2345_v7  ;;  %v2619_v19 = vadd.f32 %v2587_v48, %v2347_v37  ;;  %v2621_v8 = vadd.f32 %v2589_v58, %v2349_v49  ;;  %v16604_v7 = vld [vmem:[#allocation157_spill] sm:$0xff]  ;;  %v16608_v35 = vld [vmem:[#allocation158_spill] sm:$0xff]  ;;  %v16612_v53 = vld [vmem:[#allocation164_spill] sm:$0xff] }
 0x1c9   :  { %v2623_v43 = vadd.f32 %v2591_v1, %v2351_v2  ;;  %v2625_v31 = vadd.f32 %v2593_v27, %v2353_v36  ;;  %v2627_v23 = vadd.f32 %v2595_v17, %v2355_v18  ;;  %v2629_v22 = vadd.f32 %v2597_v4, %v2357_v14  ;;  %v16605_v2 = vld [vmem:[#allocation153_spill] sm:$0xff]  ;;  %v16606_v14 = vld [vmem:[#allocation155_spill] sm:$0xff]  ;;  %v16614_v48 = vld [vmem:[#allocation162_spill] sm:$0xff] }
 0x1ca   :  { %v2631_v44 = vadd.f32 %v2599_v26, %v2359_v41  ;;  %v2633_v28 = vadd.f32 %v2601_v25, %v2361_v51  ;;  %v2635_v55 = vadd.f32 %v2603_v59, %v2363_v15  ;;  %v2845_v40 = vmul.f32 %v16601_v29, %v16600_v56  ;;  %v16607_v15 = vld [vmem:[#allocation156_spill] sm:$0xff]  ;;  %v16609_v36 = vld [vmem:[#allocation13_spill] sm:$0xff]  ;;  %v16613_v46 = vld [vmem:[#allocation159_spill] sm:$0xff] }
 0x1cb   :  { %v2847_v61 = vmul.f32 %v16602_v3, %v16600_v56  ;;  %v2849_v20 = vmul.f32 %v16603_v9, %v16600_v56  ;;  %v2851_v38 = vmul.f32 %v16604_v7, %v16600_v56  ;;  %v2853_v49 = vmul.f32 %v16605_v2, %v16600_v56  ;;  %v16615_v1 = vld [vmem:[#allocation163_spill] sm:$0xff]  ;;  %v16616_v17 = vld [vmem:[#allocation165_spill] sm:$0xff] }
 0x1cc   :  { %v2855_v18 = vmul.f32 %v16606_v14, %v16600_v56  ;;  %v2857_v51 = vmul.f32 %v16607_v15, %v16600_v56  ;;  %v2859_v37 = vmul.f32 %v16608_v35, %v16600_v56  ;;  %v2861_v41 = vmul.f32 %v16609_v36, %v16600_v56  ;;  %v16618_v29 = vld [vmem:[#allocation121_spill] sm:$0xff] }
 0x1cd   :  { %v2863_v47 = vmul.f32 %v16610_v32, %v16600_v56  ;;  %v2865_v21 = vmul.f32 %v16611_v42, %v16600_v56  ;;  %v2867_v16 = vmul.f32 %v16612_v53, %v16600_v56  ;;  %v2869_v33 = vmul.f32 %v16613_v46, %v16600_v56 }
 0x1ce   :  { %v2871_v58 = vmul.f32 %v16614_v48, %v16600_v56  ;;  %v2873_v27 = vmul.f32 %v16615_v1, %v16600_v56  ;;  %v2875_v4 = vmul.f32 %v16616_v17, %v16600_v56  ;;  %v2877_v26 = vadd.f32 %v2845_v40, %v2605_v12  ;;  %v16617_v1 = vld [vmem:[#allocation214_spill] sm:$0xff] }
 0x1cf   :  { %v2879_v25 = vadd.f32 %v2847_v61, %v2607_v60  ;;  %v2881_v59 = vadd.f32 %v2849_v20, %v2609_v34  ;;  %v2883_v32 = vadd.f32 %v2851_v38, %v2611_v57  ;;  %v2885_v42 = vadd.f32 %v2853_v49, %v2613_v11  ;;  %v16619_v40 = vld [vmem:[#allocation122_spill] sm:$0xff]  ;;  %v16620_v57 = vld [vmem:[#allocation124_spill] sm:$0xff]  ;;  %v16627_v60 = vld [vmem:[#allocation207_spill] sm:$0xff] }
 0x1d0   :  { %v2887_v36 = vadd.f32 %v2855_v18, %v2615_v10  ;;  %v2889_v35 = vadd.f32 %v2857_v51, %v2617_v0  ;;  %v2891_v53 = vadd.f32 %v2859_v37, %v2619_v19  ;;  %v2893_v15 = vadd.f32 %v2861_v41, %v2621_v8  ;;  %v16621_v0 = vld [vmem:[#allocation126_spill] sm:$0xff]  ;;  %v16625_v19 = vld [vmem:[#allocation128_spill] sm:$0xff]  ;;  %v16630_v18 = vld [vmem:[#allocation209_spill] sm:$0xff] }
 0x1d1   :  { %v2895_v14 = vadd.f32 %v2863_v47, %v2623_v43  ;;  %v2897_v46 = vadd.f32 %v2865_v21, %v2625_v31  ;;  %v2899_v2 = vadd.f32 %v2867_v16, %v2627_v23  ;;  %v2901_v7 = vadd.f32 %v2869_v33, %v2629_v22  ;;  %v16622_v43 = vld [vmem:[#allocation123_spill] sm:$0xff]  ;;  %v16623_v22 = vld [vmem:[#allocation125_spill] sm:$0xff]  ;;  %v16628_v61 = vld [vmem:[#allocation208_spill] sm:$0xff] }
 0x1d2   :  { %v2903_v48 = vadd.f32 %v2871_v58, %v2631_v44  ;;  %v2905_v9 = vadd.f32 %v2873_v27, %v2633_v28  ;;  %v2907_v3 = vadd.f32 %v2875_v4, %v2635_v55  ;;  %v3117_v63 = vmul.f32 %v16618_v29, %v16617_v1  ;;  %v16624_v55 = vld [vmem:[#allocation127_spill] sm:$0xff]  ;;  %v16626_v44 = vld [vmem:[#allocation205_spill] sm:$0xff]  ;;  %v16629_v38 = vld [vmem:[#allocation210_spill] sm:$0xff] }
 0x1d3   :  { %v3119_v56 = vmul.f32 %v16619_v40, %v16617_v1  ;;  %v3121_v11 = vmul.f32 %v16620_v57, %v16617_v1  ;;  %v3123_v10 = vmul.f32 %v16621_v0, %v16617_v1  ;;  %v3125_v8 = vmul.f32 %v16622_v43, %v16617_v1  ;;  %v16631_v37 = vld [vmem:[#allocation211_spill] sm:$0xff]  ;;  %v16632_v47 = vld [vmem:[#allocation212_spill] sm:$0xff]  ;;  %v16633_v16 = vld [vmem:[#allocation213_spill] sm:$0xff] }
 0x1d4   :  { %v3127_v23 = vmul.f32 %v16623_v22, %v16617_v1  ;;  %v3129_v28 = vmul.f32 %v16624_v55, %v16617_v1  ;;  %v3131_v31 = vmul.f32 %v16625_v19, %v16617_v1  ;;  %v3133_v12 = vmul.f32 %v16626_v44, %v16617_v1  ;;  %v16635_v29 = vld [vmem:[#allocation172_spill] sm:$0xff] }
 0x1d5   :  { %v3135_v34 = vmul.f32 %v16627_v60, %v16617_v1  ;;  %v3137_v20 = vmul.f32 %v16628_v61, %v16617_v1  ;;  %v3139_v49 = vmul.f32 %v16629_v38, %v16617_v1  ;;  %v3141_v51 = vmul.f32 %v16630_v18, %v16617_v1 }
 0x1d6   :  { %v3143_v41 = vmul.f32 %v16631_v37, %v16617_v1  ;;  %v3145_v21 = vmul.f32 %v16632_v47, %v16617_v1  ;;  %v3147_v33 = vmul.f32 %v16633_v16, %v16617_v1  ;;  %v3149_v58 = vadd.f32 %v3117_v63, %v2877_v26  ;;  %v16634_v47 = vld [vmem:[#allocation19_spill] sm:$0xff]  ;;  %v16636_v63 = vld [vmem:[#allocation173_spill] sm:$0xff] }
 0x1d7   :  { %v3151_v27 = vadd.f32 %v3119_v56, %v2879_v25  ;;  %v3153_v4 = vadd.f32 %v3121_v11, %v2881_v59  ;;  %v3155_v60 = vadd.f32 %v3123_v10, %v2883_v32  ;;  %v3157_v61 = vadd.f32 %v3125_v8, %v2885_v42  ;;  %v16637_v32 = vld [vmem:[#allocation174_spill] sm:$0xff]  ;;  %v16644_v25 = vld [vmem:[#allocation20_spill] sm:$0xff]  ;;  %v16646_v10 = vld [vmem:[#allocation185_spill] sm:$0xff] }
 0x1d8   :  { %v3159_v44 = vadd.f32 %v3127_v23, %v2887_v36  ;;  %v3161_v19 = vadd.f32 %v3129_v28, %v2889_v35  ;;  %v3163_v38 = vadd.f32 %v3131_v31, %v2891_v53  ;;  %v3165_v55 = vadd.f32 %v3133_v12, %v2893_v15  ;;  %v16638_v35 = vld [vmem:[#allocation176_spill] sm:$0xff]  ;;  %v16642_v53 = vld [vmem:[#allocation179_spill] sm:$0xff]  ;;  %v16645_v56 = vld [vmem:[#allocation182_spill] sm:$0xff] }
 0x1d9   :  { %v3167_v22 = vadd.f32 %v3135_v34, %v2895_v14  ;;  %v3169_v18 = vadd.f32 %v3137_v20, %v2897_v46  ;;  %v3171_v43 = vadd.f32 %v3139_v49, %v2899_v2  ;;  %v3173_v0 = vadd.f32 %v3141_v51, %v2901_v7  ;;  %v16639_v14 = vld [vmem:[#allocation175_spill] sm:$0xff]  ;;  %v16640_v7 = vld [vmem:[#allocation177_spill] sm:$0xff]  ;;  %v16649_v34 = vld [vmem:[#allocation184_spill] sm:$0xff] }
 0x1da   :  { %v3175_v37 = vadd.f32 %v3143_v41, %v2903_v48  ;;  %v3177_v57 = vadd.f32 %v3145_v21, %v2905_v9  ;;  %v3179_v40 = vadd.f32 %v3147_v33, %v2907_v3  ;;  %v3389_v17 = vmul.f32 %v16635_v29, %v16634_v47  ;;  %v16641_v3 = vld [vmem:[#allocation178_spill] sm:$0xff]  ;;  %v16643_v48 = vld [vmem:[#allocation180_spill] sm:$0xff]  ;;  %v16647_v23 = vld [vmem:[#allocation181_spill] sm:$0xff] }
 0x1db   :  { %v3391_v1 = vmul.f32 %v16636_v63, %v16634_v47  ;;  %v3393_v42 = vmul.f32 %v16637_v32, %v16634_v47  ;;  %v3395_v36 = vmul.f32 %v16638_v35, %v16634_v47  ;;  %v3397_v15 = vmul.f32 %v16639_v14, %v16634_v47  ;;  %v16648_v31 = vld [vmem:[#allocation183_spill] sm:$0xff]  ;;  %v16650_v49 = vld [vmem:[#allocation186_spill] sm:$0xff]  ;;  %v16652_v29 = vld [vmem:[#allocation145_spill] sm:$0xff] }
 0x1dc   :  { %v3399_v2 = vmul.f32 %v16640_v7, %v16634_v47  ;;  %v3401_v9 = vmul.f32 %v16641_v3, %v16634_v47  ;;  %v3403_v46 = vmul.f32 %v16642_v53, %v16634_v47  ;;  %v3405_v26 = vmul.f32 %v16643_v48, %v16634_v47 }
 0x1dd   :  { %v3407_v59 = vmul.f32 %v16644_v25, %v16634_v47  ;;  %v3409_v11 = vmul.f32 %v16645_v56, %v16634_v47  ;;  %v3411_v8 = vmul.f32 %v16646_v10, %v16634_v47  ;;  %v3413_v28 = vmul.f32 %v16647_v23, %v16634_v47 }
 0x1de   :  { %v3415_v12 = vmul.f32 %v16648_v31, %v16634_v47  ;;  %v3417_v20 = vmul.f32 %v16649_v34, %v16634_v47  ;;  %v3419_v51 = vmul.f32 %v16650_v49, %v16634_v47  ;;  %v3421_v41 = vadd.f32 %v3389_v17, %v3149_v58  ;;  %v16651_v34 = vld [vmem:[#allocation264_spill] sm:$0xff]  ;;  %v16653_v17 = vld [vmem:[#allocation146_spill] sm:$0xff] }
 0x1df   :  { %v3423_v21 = vadd.f32 %v3391_v1, %v3151_v27  ;;  %v3425_v33 = vadd.f32 %v3393_v42, %v3153_v4  ;;  %v3427_v25 = vadd.f32 %v3395_v36, %v3155_v60  ;;  %v3429_v56 = vadd.f32 %v3397_v15, %v3157_v61  ;;  %v16654_v60 = vld [vmem:[#allocation9_spill] sm:$0xff]  ;;  %v16662_v1 = vld [vmem:[#allocation252_spill] sm:$0xff] }
 0x1e0   :  { %v3431_v48 = vadd.f32 %v3399_v2, %v3159_v44  ;;  %v3433_v53 = vadd.f32 %v3401_v9, %v3161_v19  ;;  %v3435_v10 = vadd.f32 %v3403_v46, %v3163_v38  ;;  %v3437_v3 = vadd.f32 %v3405_v26, %v3165_v55  ;;  %v16655_v19 = vld [vmem:[#allocation149_spill] sm:$0xff]  ;;  %v16659_v38 = vld [vmem:[#allocation151_spill] sm:$0xff]  ;;  %v16664_v2 = vld [vmem:[#allocation250_spill] sm:$0xff] }
 0x1e1   :  { %v3439_v7 = vadd.f32 %v3407_v59, %v3167_v22  ;;  %v3441_v23 = vadd.f32 %v3409_v11, %v3169_v18  ;;  %v3443_v14 = vadd.f32 %v3411_v8, %v3171_v43  ;;  %v3445_v35 = vadd.f32 %v3413_v28, %v3173_v0  ;;  %v16656_v22 = vld [vmem:[#allocation147_spill] sm:$0xff]  ;;  %v16657_v0 = vld [vmem:[#allocation148_spill] sm:$0xff]  ;;  %v16661_v27 = vld [vmem:[#allocation249_spill] sm:$0xff] }
 0x1e2   :  { %v3447_v31 = vadd.f32 %v3415_v12, %v3175_v37  ;;  %v3449_v32 = vadd.f32 %v3417_v20, %v3177_v57  ;;  %v3451_v63 = vadd.f32 %v3419_v51, %v3179_v40  ;;  %v3661_v16 = vmul.f32 %v16652_v29, %v16651_v34  ;;  %v16658_v40 = vld [vmem:[#allocation150_spill] sm:$0xff]  ;;  %v16660_v37 = vld [vmem:[#allocation248_spill] sm:$0xff]  ;;  %v16663_v36 = vld [vmem:[#allocation253_spill] sm:$0xff] }
 0x1e3   :  { %v3663_v47 = vmul.f32 %v16653_v17, %v16651_v34  ;;  %v3665_v61 = vmul.f32 %v16654_v60, %v16651_v34  ;;  %v3667_v44 = vmul.f32 %v16655_v19, %v16651_v34  ;;  %v3669_v55 = vmul.f32 %v16656_v22, %v16651_v34  ;;  %v16665_v46 = vld [vmem:[#allocation251_spill] sm:$0xff]  ;;  %v16666_v59 = vld [vmem:[#allocation254_spill] sm:$0xff] }
 0x1e4   :  { %v3671_v43 = vmul.f32 %v16657_v0, %v16651_v34  ;;  %v3673_v57 = vmul.f32 %v16658_v40, %v16651_v34  ;;  %v3675_v18 = vmul.f32 %v16659_v38, %v16651_v34  ;;  %v3677_v58 = vmul.f32 %v16660_v37, %v16651_v34  ;;  %v16667_v8 = vld [vmem:[#allocation255_spill] sm:$0xff]  ;;  %v16669_v29 = vld [vmem:[#allocation198_spill] sm:$0xff] }
 0x1e5   :  { %v3679_v4 = vmul.f32 %v16661_v27, %v16651_v34  ;;  %v3681_v42 = vmul.f32 %v16662_v1, %v16651_v34  ;;  %v3683_v15 = vmul.f32 %v16663_v36, %v16651_v34  ;;  %v3685_v9 = vmul.f32 %v16664_v2, %v16651_v34 }
 0x1e6   :  { %v3687_v26 = vmul.f32 %v16665_v46, %v16651_v34  ;;  %v3689_v11 = vmul.f32 %v16666_v59, %v16651_v34  ;;  %v3691_v28 = vmul.f32 %v16667_v8, %v16651_v34  ;;  %v3693_v12 = vadd.f32 %v3661_v16, %v3421_v41  ;;  %v16668_v59 = vld [vmem:[#allocation284_spill] sm:$0xff]  ;;  %v16670_v16 = vld [vmem:[#allocation199_spill] sm:$0xff] }
 0x1e7   :  { %v3695_v20 = vadd.f32 %v3663_v47, %v3423_v21  ;;  %v3697_v51 = vadd.f32 %v3665_v61, %v3425_v33  ;;  %v3699_v27 = vadd.f32 %v3667_v44, %v3427_v25  ;;  %v3701_v1 = vadd.f32 %v3669_v55, %v3429_v56  ;;  %v16671_v25 = vld [vmem:[#allocation200_spill] sm:$0xff]  ;;  %v16678_v21 = vld [vmem:[#allocation234_spill] sm:$0xff] }
 0x1e8   :  { %v3703_v37 = vadd.f32 %v3671_v43, %v3431_v48  ;;  %v3705_v38 = vadd.f32 %v3673_v57, %v3433_v53  ;;  %v3707_v36 = vadd.f32 %v3675_v18, %v3435_v10  ;;  %v3709_v40 = vadd.f32 %v3677_v58, %v3437_v3  ;;  %v16672_v53 = vld [vmem:[#allocation202_spill] sm:$0xff]  ;;  %v16679_v47 = vld [vmem:[#allocation236_spill] sm:$0xff]  ;;  %v16681_v43 = vld [vmem:[#allocation233_spill] sm:$0xff] }
 0x1e9   :  { %v3711_v0 = vadd.f32 %v3679_v4, %v3439_v7  ;;  %v3713_v2 = vadd.f32 %v3681_v42, %v3441_v23  ;;  %v3715_v22 = vadd.f32 %v3683_v15, %v3443_v14  ;;  %v3717_v19 = vadd.f32 %v3685_v9, %v3445_v35  ;;  %v16673_v7 = vld [vmem:[#allocation201_spill] sm:$0xff]  ;;  %v16674_v35 = vld [vmem:[#allocation203_spill] sm:$0xff]  ;;  %v16676_v10 = vld [vmem:[#allocation206_spill] sm:$0xff] }
 0x1ea   :  { %v3719_v46 = vadd.f32 %v3687_v26, %v3447_v31  ;;  %v3721_v60 = vadd.f32 %v3689_v11, %v3449_v32  ;;  %v3723_v17 = vadd.f32 %v3691_v28, %v3451_v63  ;;  %v3933_v49 = vmul.f32 %v16669_v29, %v16668_v59  ;;  %v16675_v63 = vld [vmem:[#allocation204_spill] sm:$0xff]  ;;  %v16680_v44 = vld [vmem:[#allocation238_spill] sm:$0xff]  ;;  %v16682_v18 = vld [vmem:[#allocation235_spill] sm:$0xff] }
 0x1eb   :  { %v3935_v34 = vmul.f32 %v16670_v16, %v16668_v59  ;;  %v3937_v56 = vmul.f32 %v16671_v25, %v16668_v59  ;;  %v3939_v48 = vmul.f32 %v16672_v53, %v16668_v59  ;;  %v3941_v3 = vmul.f32 %v16673_v7, %v16668_v59  ;;  %v16677_v31 = vld [vmem:[#allocation232_spill] sm:$0xff]  ;;  %v16683_v4 = vld [vmem:[#allocation237_spill] sm:$0xff]  ;;  %v16684_v15 = vld [vmem:[#allocation239_spill] sm:$0xff] }
 0x1ec   :  { %v3943_v14 = vmul.f32 %v16674_v35, %v16668_v59  ;;  %v3945_v32 = vmul.f32 %v16675_v63, %v16668_v59  ;;  %v3947_v23 = vmul.f32 %v16676_v10, %v16668_v59  ;;  %v3949_v41 = vmul.f32 %v16677_v31, %v16668_v59  ;;  %v16686_v29 = vld [vmem:[#allocation240_spill] sm:$0xff] }
 0x1ed   :  { %v3951_v33 = vmul.f32 %v16678_v21, %v16668_v59  ;;  %v3953_v61 = vmul.f32 %v16679_v47, %v16668_v59  ;;  %v3955_v55 = vmul.f32 %v16680_v44, %v16668_v59  ;;  %v3957_v57 = vmul.f32 %v16681_v43, %v16668_v59 }
 0x1ee   :  { %v3959_v58 = vmul.f32 %v16682_v18, %v16668_v59  ;;  %v3961_v42 = vmul.f32 %v16683_v4, %v16668_v59  ;;  %v3963_v9 = vmul.f32 %v16684_v15, %v16668_v59  ;;  %v3965_v26 = vadd.f32 %v3933_v49, %v3693_v12  ;;  %v16685_v4 = vld [vmem:[#allocation287_spill] sm:$0xff]  ;;  %v16687_v49 = vld [vmem:[#allocation241_spill] sm:$0xff] }
 0x1ef   :  { %v3967_v11 = vadd.f32 %v3935_v34, %v3695_v20  ;;  %v3969_v28 = vadd.f32 %v3937_v56, %v3697_v51  ;;  %v3971_v21 = vadd.f32 %v3939_v48, %v3699_v27  ;;  %v3973_v47 = vadd.f32 %v3941_v3, %v3701_v1  ;;  %v16688_v27 = vld [vmem:[#allocation242_spill] sm:$0xff]  ;;  %v16696_v34 = vld [vmem:[#allocation259_spill] sm:$0xff]  ;;  %v16697_v48 = vld [vmem:[#allocation261_spill] sm:$0xff] }
 0x1f0   :  { %v3975_v31 = vadd.f32 %v3943_v14, %v3703_v37  ;;  %v3977_v10 = vadd.f32 %v3945_v32, %v3705_v38  ;;  %v3979_v44 = vadd.f32 %v3947_v23, %v3707_v36  ;;  %v3981_v63 = vadd.f32 %v3949_v41, %v3709_v40  ;;  %v16689_v38 = vld [vmem:[#allocation244_spill] sm:$0xff]  ;;  %v16693_v36 = vld [vmem:[#allocation247_spill] sm:$0xff]  ;;  %v16695_v20 = vld [vmem:[#allocation258_spill] sm:$0xff] }
 0x1f1   :  { %v3983_v35 = vadd.f32 %v3951_v33, %v3711_v0  ;;  %v3985_v43 = vadd.f32 %v3953_v61, %v3713_v2  ;;  %v3987_v7 = vadd.f32 %v3955_v55, %v3715_v22  ;;  %v3989_v53 = vadd.f32 %v3957_v57, %v3717_v19  ;;  %v16690_v0 = vld [vmem:[#allocation243_spill] sm:$0xff]  ;;  %v16691_v19 = vld [vmem:[#allocation245_spill] sm:$0xff]  ;;  %v16698_v14 = vld [vmem:[#allocation260_spill] sm:$0xff] }
 0x1f2   :  { %v3991_v18 = vadd.f32 %v3959_v58, %v3719_v46  ;;  %v3993_v25 = vadd.f32 %v3961_v42, %v3721_v60  ;;  %v3995_v16 = vadd.f32 %v3963_v9, %v3723_v17  ;;  %v4205_v8 = vmul.f32 %v16686_v29, %v16685_v4  ;;  %v16692_v17 = vld [vmem:[#allocation246_spill] sm:$0xff]  ;;  %v16694_v46 = vld [vmem:[#allocation257_spill] sm:$0xff]  ;;  %v16700_v33 = vld [vmem:[#allocation263_spill] sm:$0xff] }
 0x1f3   :  { %v4207_v59 = vmul.f32 %v16687_v49, %v16685_v4  ;;  %v4209_v1 = vmul.f32 %v16688_v27, %v16685_v4  ;;  %v4211_v37 = vmul.f32 %v16689_v38, %v16685_v4  ;;  %v4213_v40 = vmul.f32 %v16690_v0, %v16685_v4  ;;  %v16699_v23 = vld [vmem:[#allocation262_spill] sm:$0xff]  ;;  %v16701_v55 = vld [vmem:[#allocation265_spill] sm:$0xff]  ;;  %v16703_v29 = vld [vmem:[#allocation216_spill] sm:$0xff] }
 0x1f4   :  { %v4215_v22 = vmul.f32 %v16691_v19, %v16685_v4  ;;  %v4217_v60 = vmul.f32 %v16692_v17, %v16685_v4  ;;  %v4219_v2 = vmul.f32 %v16693_v36, %v16685_v4  ;;  %v4221_v12 = vmul.f32 %v16694_v46, %v16685_v4 }
 0x1f5   :  { %v4223_v51 = vmul.f32 %v16695_v20, %v16685_v4  ;;  %v4225_v56 = vmul.f32 %v16696_v34, %v16685_v4  ;;  %v4227_v3 = vmul.f32 %v16697_v48, %v16685_v4  ;;  %v4229_v32 = vmul.f32 %v16698_v14, %v16685_v4 }
 0x1f6   :  { %v4231_v41 = vmul.f32 %v16699_v23, %v16685_v4  ;;  %v4233_v61 = vmul.f32 %v16700_v33, %v16685_v4  ;;  %v4235_v57 = vmul.f32 %v16701_v55, %v16685_v4  ;;  %v4237_v58 = vadd.f32 %v4205_v8, %v3965_v26  ;;  %v16702_v33 = vld [vmem:[#allocation289_spill] sm:$0xff] }
 0x1f7   :  { %v4239_v42 = vadd.f32 %v4207_v59, %v3967_v11  ;;  %v4241_v9 = vadd.f32 %v4209_v1, %v3969_v28  ;;  %v4243_v20 = vadd.f32 %v4211_v37, %v3971_v21  ;;  %v4245_v34 = vadd.f32 %v4213_v40, %v3973_v47  ;;  %v16704_v8 = vld [vmem:[#allocation217_spill] sm:$0xff]  ;;  %v16705_v21 = vld [vmem:[#allocation218_spill] sm:$0xff]  ;;  %v16712_v11 = vld [vmem:[#allocation267_spill] sm:$0xff] }
 0x1f8   :  { %v4247_v46 = vadd.f32 %v4215_v22, %v3975_v31  ;;  %v4249_v36 = vadd.f32 %v4217_v60, %v3977_v10  ;;  %v4251_v48 = vadd.f32 %v4219_v2, %v3979_v44  ;;  %v4253_v17 = vadd.f32 %v4221_v12, %v3981_v63  ;;  %v16706_v10 = vld [vmem:[#allocation220_spill] sm:$0xff]  ;;  %v16710_v44 = vld [vmem:[#allocation223_spill] sm:$0xff]  ;;  %v16714_v37 = vld [vmem:[#allocation270_spill] sm:$0xff] }
 0x1f9   :  { %v4255_v19 = vadd.f32 %v4223_v51, %v3983_v35  ;;  %v4257_v14 = vadd.f32 %v4225_v56, %v3985_v43  ;;  %v4259_v0 = vadd.f32 %v4227_v3, %v3987_v7  ;;  %v4261_v38 = vadd.f32 %v4229_v32, %v3989_v53  ;;  %v16707_v35 = vld [vmem:[#allocation219_spill] sm:$0xff]  ;;  %v16708_v53 = vld [vmem:[#allocation221_spill] sm:$0xff]  ;;  %v16713_v59 = vld [vmem:[#allocation268_spill] sm:$0xff] }
 0x1fa   :  { %v4263_v23 = vadd.f32 %v4231_v41, %v3991_v18  ;;  %v4265_v27 = vadd.f32 %v4233_v61, %v3993_v25  ;;  %v4267_v49 = vadd.f32 %v4235_v57, %v3995_v16  ;;  %v4477_v15 = vmul.f32 %v16703_v29, %v16702_v33  ;;  %v16709_v16 = vld [vmem:[#allocation222_spill] sm:$0xff]  ;;  %v16715_v22 = vld [vmem:[#allocation269_spill] sm:$0xff]  ;;  %v16716_v2 = vld [vmem:[#allocation271_spill] sm:$0xff] }
 0x1fb   :  { %v4479_v4 = vmul.f32 %v16704_v8, %v16702_v33  ;;  %v4481_v47 = vmul.f32 %v16705_v21, %v16702_v33  ;;  %v4483_v31 = vmul.f32 %v16706_v10, %v16702_v33  ;;  %v4485_v63 = vmul.f32 %v16707_v35, %v16702_v33  ;;  %v16711_v18 = vld [vmem:[#allocation266_spill] sm:$0xff]  ;;  %v16717_v51 = vld [vmem:[#allocation272_spill] sm:$0xff]  ;;  %v16718_v3 = vld [vmem:[#allocation273_spill] sm:$0xff] }
 0x1fc   :  { %v4487_v7 = vmul.f32 %v16708_v53, %v16702_v33  ;;  %v4489_v25 = vmul.f32 %v16709_v16, %v16702_v33  ;;  %v4491_v43 = vmul.f32 %v16710_v44, %v16702_v33  ;;  %v4493_v26 = vmul.f32 %v16711_v18, %v16702_v33  ;;  %v16720_v29 = vld [vmem:[#allocation224_spill] sm:$0xff] }
 0x1fd   :  { %v4495_v28 = vmul.f32 %v16712_v11, %v16702_v33  ;;  %v4497_v1 = vmul.f32 %v16713_v59, %v16702_v33  ;;  %v4499_v40 = vmul.f32 %v16714_v37, %v16702_v33  ;;  %v4501_v60 = vmul.f32 %v16715_v22, %v16702_v33 }
 0x1fe   :  { %v4503_v12 = vmul.f32 %v16716_v2, %v16702_v33  ;;  %v4505_v56 = vmul.f32 %v16717_v51, %v16702_v33  ;;  %v4507_v32 = vmul.f32 %v16718_v3, %v16702_v33  ;;  %v4509_v41 = vadd.f32 %v4477_v15, %v4237_v58  ;;  %v16719_v51 = vld [vmem:[#allocation286_spill] sm:$0xff] }
 0x1ff   :  { %v4511_v61 = vadd.f32 %v4479_v4, %v4239_v42  ;;  %v4513_v57 = vadd.f32 %v4481_v47, %v4241_v9  ;;  %v4515_v11 = vadd.f32 %v4483_v31, %v4243_v20  ;;  %v4517_v59 = vadd.f32 %v4485_v63, %v4245_v34  ;;  %v16721_v15 = vld [vmem:[#allocation226_spill] sm:$0xff]  ;;  %v16722_v20 = vld [vmem:[#allocation227_spill] sm:$0xff]  ;;  %v16729_v42 = vld [vmem:[#allocation277_spill] sm:$0xff] }
 0x200   :  { %v4519_v18 = vadd.f32 %v4487_v7, %v4247_v46  ;;  %v4521_v44 = vadd.f32 %v4489_v25, %v4249_v36  ;;  %v4523_v37 = vadd.f32 %v4491_v43, %v4251_v48  ;;  %v4525_v16 = vadd.f32 %v4493_v26, %v4253_v17  ;;  %v16723_v36 = vld [vmem:[#allocation230_spill] sm:$0xff]  ;;  %v16727_v48 = vld [vmem:[#allocation231_spill] sm:$0xff]  ;;  %v16731_v31 = vld [vmem:[#allocation281_spill] sm:$0xff] }
 0x201   :  { %v4527_v53 = vadd.f32 %v4495_v28, %v4255_v19  ;;  %v4529_v22 = vadd.f32 %v4497_v1, %v4257_v14  ;;  %v4531_v35 = vadd.f32 %v4499_v40, %v4259_v0  ;;  %v4533_v10 = vadd.f32 %v4501_v60, %v4261_v38  ;;  %v16724_v19 = vld [vmem:[#allocation225_spill] sm:$0xff]  ;;  %v16725_v38 = vld [vmem:[#allocation228_spill] sm:$0xff]  ;;  %v16730_v4 = vld [vmem:[#allocation278_spill] sm:$0xff] }
 0x202   :  { %v4535_v2 = vadd.f32 %v4503_v12, %v4263_v23  ;;  %v4537_v21 = vadd.f32 %v4505_v56, %v4265_v27  ;;  %v4539_v8 = vadd.f32 %v4507_v32, %v4267_v49  ;;  %v4749_v55 = vmul.f32 %v16720_v29, %v16719_v51  ;;  %v16726_v49 = vld [vmem:[#allocation229_spill] sm:$0xff]  ;;  %v16728_v23 = vld [vmem:[#allocation274_spill] sm:$0xff]  ;;  %v16732_v7 = vld [vmem:[#allocation275_spill] sm:$0xff] }
 0x203   :  { %v4751_v33 = vmul.f32 %v16721_v15, %v16719_v51  ;;  %v4753_v34 = vmul.f32 %v16722_v20, %v16719_v51  ;;  %v4755_v46 = vmul.f32 %v16723_v36, %v16719_v51  ;;  %v4757_v17 = vmul.f32 %v16724_v19, %v16719_v51  ;;  %v16733_v43 = vld [vmem:[#allocation279_spill] sm:$0xff]  ;;  %v16734_v28 = vld [vmem:[#allocation280_spill] sm:$0xff]  ;;  %v16735_v40 = vld [vmem:[#allocation282_spill] sm:$0xff] }
 0x204   :  { %v4759_v0 = vmul.f32 %v16725_v38, %v16719_v51  ;;  %v4761_v27 = vmul.f32 %v16726_v49, %v16719_v51  ;;  %v4763_v14 = vmul.f32 %v16727_v48, %v16719_v51  ;;  %v4765_v58 = vmul.f32 %v16728_v23, %v16719_v51 }
 0x205   :  { %v4767_v9 = vmul.f32 %v16729_v42, %v16719_v51  ;;  %v4769_v47 = vmul.f32 %v16730_v4, %v16719_v51  ;;  %v4771_v63 = vmul.f32 %v16731_v31, %v16719_v51  ;;  %v4773_v25 = vmul.f32 %v16732_v7, %v16719_v51 }
 0x206   :  { %v4775_v26 = vmul.f32 %v16733_v43, %v16719_v51  ;;  %v4777_v1 = vmul.f32 %v16734_v28, %v16719_v51  ;;  %v4779_v60 = vmul.f32 %v16735_v40, %v16719_v51  ;;  %v4781_v12 = vadd.f32 %v4749_v55, %v4509_v41 }
 0x207   :  { %v4783_v56 = vadd.f32 %v4751_v33, %v4511_v61  ;;  %v4785_v32 = vadd.f32 %v4753_v34, %v4513_v57  ;;  %v4787_v42 = vadd.f32 %v4755_v46, %v4515_v11  ;;  %v4789_v4 = vadd.f32 %v4757_v17, %v4517_v59  ;;  %v16738_v17 = vld [vmem:[#allocation31_spill] sm:$0xff] }
 0x208   :  { %v4791_v23 = vadd.f32 %v4759_v0, %v4519_v18  ;;  %v4793_v48 = vadd.f32 %v4761_v27, %v4521_v44  ;;  %v4795_v31 = vadd.f32 %v4763_v14, %v4523_v37  ;;  %v4797_v49 = vadd.f32 %v4765_v58, %v4525_v16  ;;  %v16736_v16 = vld [vmem:[#allocation95_spill] sm:$0xff]  ;;  %v16743_v58 = vld [vmem:[#allocation36_spill] sm:$0xff] }
 0x209   :  { %v4799_v38 = vadd.f32 %v4767_v9, %v4527_v53  ;;  %v4801_v7 = vadd.f32 %v4769_v47, %v4529_v22  ;;  %v4803_v19 = vadd.f32 %v4771_v63, %v4531_v35  ;;  %v4805_v36 = vadd.f32 %v4773_v25, %v4533_v10  ;;  %v16737_v53 = vld [vmem:[#allocation29_spill] sm:$0xff]  ;;  %v16742_v14 = vld [vmem:[#allocation35_spill] sm:$0xff] }
 0x20a   :  { %v4807_v43 = vadd.f32 %v4775_v26, %v4535_v2  ;;  %v4809_v20 = vadd.f32 %v4777_v1, %v4537_v21  ;;  %v4811_v15 = vadd.f32 %v4779_v60, %v4539_v8  ;;  %v12086_v28 = vmul.f32 0.70710677, %v4781_v12  ;;  %v16744_v9 = vld [vmem:[#allocation37_spill] sm:$0xff]  ;;  %v16748_v1 = vld [vmem:[#allocation50_spill] sm:$0xff] }
 0x20b   :  { %v12088_v29 = vmul.f32 0.70710677, %v4783_v56  ;;  %v12090_v55 = vmul.f32 0.70710677, %v4785_v32  ;;  %v12092_v51 = vmul.f32 0.70710677, %v4787_v42  ;;  %v700_v18 = vmul.f32 %v16737_v53, %v16736_v16 }
 0x20c   :  { %v12094_v11 = vmul.f32 0.70710677, %v4789_v4  ;;  %v12096_v44 = vmul.f32 0.70710677, %v4791_v23  ;;  %v12100_v35 = vmul.f32 0.70710677, %v4793_v48  ;;  %v712_v42 = vmul.f32 %v16743_v58, %v16736_v16 }
 0x20d   :  { %v12102_v10 = vmul.f32 0.70710677, %v4795_v31  ;;  %v12104_v8 = vmul.f32 0.70710677, %v4797_v49  ;;  %v4859_v21 = vmax.f32 %v12086_v28, %v12090_v55  ;;  %v12108_v59 = vmul.f32 0.70710677, %v4799_v38 }
 0x20e   :  { %v12110_v37 = vmul.f32 0.70710677, %v4801_v7  ;;  %v12112_v22 = vmul.f32 0.70710677, %v4803_v19  ;;  %v4860_v2 = vmax.f32 %v12088_v29, %v12092_v51  ;;  %v12116_v41 = vmul.f32 0.70710677, %v4805_v36 }
 0x20f   :  { %v12118_v61 = vmul.f32 0.70710677, %v4807_v43  ;;  %v12120_v57 = vmul.f32 0.70710677, %v4809_v20  ;;  %v4861_v33 = vmax.f32 %v4859_v21, %v12094_v11  ;;  %v12123_v34 = vmul.f32 0.70710677, %v4811_v15 }
 0x210   :  { %v4862_v46 = vmax.f32 %v4860_v2, %v12096_v44  ;;  %v702_v38 = vmul.f32 %v16738_v17, %v16736_v16  ;;  %v16739_v19 = vld [vmem:[#allocation32_spill] sm:$0xff]  ;;  %v16740_v36 = vld [vmem:[#allocation34_spill] sm:$0xff]  ;;  %v16741_v20 = vld [vmem:[#allocation33_spill] sm:$0xff]  ;;  %v710_v15 = vmul.f32 %v16742_v14, %v16736_v16  ;;  %v714_v4 = vmul.f32 %v16744_v9, %v16736_v16 }
 0x211   :  { %v704_v0 = vmul.f32 %v16739_v19, %v16736_v16  ;;  %v4863_v49 = vmax.f32 %v4861_v33, %v12100_v35  ;;  %v706_v27 = vmul.f32 %v16740_v36, %v16736_v16  ;;  %v708_v48 = vmul.f32 %v16741_v20, %v16736_v16  ;;  %v16745_v47 = vld [vmem:[#allocation45_spill] sm:$0xff]  ;;  %v16746_v7 = vld [vmem:[#allocation47_spill] sm:$0xff]  ;;  %v16747_v43 = vld [vmem:[#allocation48_spill] sm:$0xff] }
 0x212   :  { %v4864_v23 = vmax.f32 %v4862_v46, %v12102_v10  ;;  %v716_v31 = vmul.f32 %v16745_v47, %v16736_v16  ;;  %v718_v25 = vmul.f32 %v16746_v7, %v16736_v16  ;;  %v720_v26 = vmul.f32 %v16747_v43, %v16736_v16  ;;  %v16749_v56 = vld [vmem:[#allocation49_spill] sm:$0xff]  ;;  %v16750_v53 = vld [vmem:[#allocation51_spill] sm:$0xff]  ;;  %v16751_v2 = vld [vmem:[#allocation52_spill] sm:$0xff] }
 0x213   :  { %v4865_v63 = vmax.f32 %v4863_v49, %v12104_v8  ;;  %v722_v60 = vmul.f32 %v16748_v1, %v16736_v16  ;;  %v724_v32 = vmul.f32 %v16749_v56, %v16736_v16  ;;  %v726_v21 = vmul.f32 %v16750_v53, %v16736_v16  ;;  %v16752_v17 = vld [vmem:[#allocation53_spill] sm:$0xff]  ;;  %v16753_v49 = vld [vmem:[#allocation78_spill] sm:$0xff]  ;;  %v16754_v36 = vld [vmem:[#allocation79_spill] sm:$0xff] }
 0x214   :  { %v4866_v12 = vmax.f32 %v4864_v23, %v12108_v59  ;;  %v12158_v33 = vmul.f32 %v16751_v2, %v16736_v16  ;;  %v12163_v19 = vmul.f32 %v16752_v17, %v16736_v16  ;;  %v940_v20 = vmul.f32 %v16754_v36, %v16753_v49  ;;  %v16755_v14 = vld [vmem:[#allocation80_spill] sm:$0xff]  ;;  %v16756_v9 = vld [vmem:[#allocation81_spill] sm:$0xff]  ;;  %v16757_v7 = vld [vmem:[#allocation83_spill] sm:$0xff] }
 0x215   :  { %v4867_v46 = vmax.f32 %v4865_v63, %v12110_v37  ;;  %v942_v23 = vmul.f32 %v16755_v14, %v16753_v49  ;;  %v944_v47 = vmul.f32 %v16756_v9, %v16753_v49  ;;  %v946_v43 = vmul.f32 %v16757_v7, %v16753_v49  ;;  %v16758_v63 = vld [vmem:[#allocation82_spill] sm:$0xff]  ;;  %v16759_v56 = vld [vmem:[#allocation84_spill] sm:$0xff]  ;;  %v16760_v2 = vld [vmem:[#allocation85_spill] sm:$0xff] }
 0x216   :  { %v4868_v58 = vmax.f32 %v4866_v12, %v12112_v22  ;;  %v948_v1 = vmul.f32 %v16758_v63, %v16753_v49  ;;  %v950_v53 = vmul.f32 %v16759_v56, %v16753_v49  ;;  %v952_v17 = vmul.f32 %v16760_v2, %v16753_v49  ;;  %v16761_v36 = vld [vmem:[#allocation86_spill] sm:$0xff]  ;;  %v16763_v7 = vld [vmem:[#allocation72_spill] sm:$0xff]  ;;  %v16766_v2 = vld [vmem:[#allocation71_spill] sm:$0xff] }
 0x217   :  { %v4869_v16 = vmax.f32 %v4867_v46, %v12116_v41  ;;  %v954_v12 = vmul.f32 %v16761_v36, %v16753_v49  ;;  %v16762_v9 = vld [vmem:[#allocation70_spill] sm:$0xff]  ;;  %v958_v3 = vmul.f32 %v16763_v7, %v16753_v49  ;;  %v16765_v56 = vld [vmem:[#allocation76_spill] sm:$0xff]  ;;  %v964_v39 = vmul.f32 %v16766_v2, %v16753_v49  ;;  %v16767_v36 = vld [vmem:[#allocation73_spill] sm:$0xff] }
 0x218   :  { %v4870_v14 = vmax.f32 %v4868_v58, %v12118_v61  ;;  %v956_v40 = vmul.f32 %v16762_v9, %v16753_v49  ;;  %v16764_v63 = vld [vmem:[#allocation74_spill] sm:$0xff]  ;;  %v962_v45 = vmul.f32 %v16765_v56, %v16753_v49  ;;  %v966_v58 = vmul.f32 %v16767_v36, %v16753_v49  ;;  %v16768_v9 = vld [vmem:[#allocation75_spill] sm:$0xff]  ;;  %v16769_v7 = vld [vmem:[#allocation77_spill] sm:$0xff] }
 0x219   :  { %v960_v46 = vmul.f32 %v16764_v63, %v16753_v49  ;;  %v4871_v5 = vmax.f32 %v4869_v16, %v12120_v57  ;;  %v968_v62 = vmul.f32 %v16768_v9, %v16753_v49  ;;  %v970_v24 = vmul.f32 %v16769_v7, %v16753_v49  ;;  %v16777_v7 = vld [vmem:[#allocation62_spill] sm:$0xff] }
 0x21a   :  { %v4872_v30 = vmax.f32 %v4870_v14, %v12123_v34  ;;  %v12202_v63 = vadd.f32 %v940_v20, %v700_v18  ;;  %v12204_v16 = vadd.f32 %v942_v23, %v702_v38  ;;  %v12206_v52 = vadd.f32 %v944_v47, %v704_v0 }
 0x21b   :  { %v12208_v56 = vadd.f32 %v946_v43, %v706_v27  ;;  %v12210_v2 = vadd.f32 %v948_v1, %v708_v48  ;;  %v12212_v36 = vadd.f32 %v950_v53, %v710_v15  ;;  %v12214_v14 = vadd.f32 %v952_v17, %v712_v42  ;;  %v16771_v1 = vld [vmem:[#allocation24_spill] sm:$0xff]  ;;  %v16772_v17 = vld [vmem:[#allocation26_spill] sm:$0xff] }
 0x21c   :  { %v4873_v54 = vmax.f32 %v4871_v5, %v4872_v30  ;;  %v12216_v50 = vadd.f32 %v954_v12, %v714_v4  ;;  %v12218_v9 = vadd.f32 %v956_v40, %v716_v31  ;;  %v12220_v49 = vadd.f32 %v958_v3, %v718_v25 }
 0x21d   :  { %v12222_v18 = vadd.f32 %v960_v46, %v720_v26  ;;  %v12224_v38 = vadd.f32 %v962_v45, %v722_v60  ;;  %v12244_v26 = vadd.f32 %v966_v58, %v726_v21  ;;  %v1002_v23 = vadd.f32 %v970_v24, %v12163_v19  ;;  %v16770_v21 = vld [vmem:[#allocation137_spill] sm:$0xff]  ;;  %v16776_v19 = vld [vmem:[#allocation30_spill] sm:$0xff] }
 0x21e   :  { %v4875_v0 = vsub.f32 %v12086_v28, %v4873_v54  ;;  %v4877_v27 = vsub.f32 %v12088_v29, %v4873_v54  ;;  %v4879_v30 = vsub.f32 %v12090_v55, %v4873_v54  ;;  %v4881_v5 = vsub.f32 %v12092_v51, %v4873_v54  ;;  %v16773_v46 = vld [vmem:[#allocation25_spill] sm:$0xff] }
 0x21f   :  { %v4883_v48 = vsub.f32 %v12094_v11, %v4873_v54  ;;  %v4885_v15 = vsub.f32 %v12096_v44, %v4873_v54  ;;  %v4887_v40 = vsub.f32 %v12100_v35, %v4873_v54  ;;  %v4889_v3 = vsub.f32 %v12102_v10, %v4873_v54 }
 0x220   :  { %v4891_v42 = vsub.f32 %v12104_v8, %v4873_v54  ;;  %v4893_v45 = vsub.f32 %v12108_v59, %v4873_v54  ;;  %v4895_v28 = vsub.f32 %v12110_v37, %v4873_v54  ;;  %v4897_v29 = vsub.f32 %v12112_v22, %v4873_v54 }
 0x221   :  { %v4899_v55 = vsub.f32 %v12116_v41, %v4873_v54  ;;  %v4901_v51 = vsub.f32 %v12118_v61, %v4873_v54  ;;  %v4903_v11 = vsub.f32 %v12120_v57, %v4873_v54  ;;  %v4905_v44 = vsub.f32 %v12123_v34, %v4873_v54 }
 0x222   :  { %v4908_v4 = vmul.f32 1.442695, %v4875_v0  ;;  %v4912_v35 = vmul.f32 1.442695, %v4877_v27  ;;  %v4916_v31 = vmul.f32 1.442695, %v4879_v30  ;;  %v12242_v10 = vadd.f32 %v964_v39, %v724_v32 }
 0x223   :  { %v4920_v8 = vmul.f32 1.442695, %v4881_v5  ;;  %v4924_v25 = vmul.f32 1.442695, %v4883_v48  ;;  %v4928_v59 = vmul.f32 1.442695, %v4885_v15  ;;  %v1000_v32 = vadd.f32 %v968_v62, %v12158_v33 }
 0x224   :  { %9422 = vpow2.f32 %v4908_v4  ;;  %v4932_v37 = vmul.f32 1.442695, %v4887_v40  ;;  %v4936_v22 = vmul.f32 1.442695, %v4889_v3  ;;  %v4940_v41 = vmul.f32 1.442695, %v4891_v42 }
 0x225   :  { %9424 = vpow2.f32 %v4912_v35  ;;  %v4944_v61 = vmul.f32 1.442695, %v4893_v45  ;;  %v4948_v60 = vmul.f32 1.442695, %v4895_v28  ;;  %v4952_v57 = vmul.f32 1.442695, %v4897_v29 }
 0x226   :  { %9426 = vpow2.f32 %v4916_v31  ;;  %v4956_v54 = vmul.f32 1.442695, %v4899_v55  ;;  %v4960_v34 = vmul.f32 1.442695, %v4901_v51  ;;  %v4964_v20 = vmul.f32 1.442695, %v4903_v11 }
 0x227   :  { %9428 = vpow2.f32 %v4920_v8  ;;  %v4968_v39 = vmul.f32 1.442695, %v4905_v44  ;;  %v1212_v47 = vmul.f32 %v16492_v13, %v16770_v21  ;;  %v1214_v43 = vmul.f32 %v16493_v6, %v16770_v21  ;;  %v16774_v62 = vld [vmem:[#allocation27_spill] sm:$0xff]  ;;  %v16775_v33 = vld [vmem:[#allocation28_spill] sm:$0xff]  ;;  %v16779_v5 = vld [vmem:[#allocation65_spill] sm:$0xff] }
 0x228   :  { %9430 = vpow2.f32 %v4924_v25  ;;  %v1216_v53 = vmul.f32 %v16771_v1, %v16770_v21  ;;  %v1218_v12 = vmul.f32 %v16772_v17, %v16770_v21  ;;  %v1220_v58 = vmul.f32 %v16773_v46, %v16770_v21  ;;  %v16778_v27 = vld [vmem:[#allocation64_spill] sm:$0xff]  ;;  %v16781_v3 = vld [vmem:[#allocation63_spill] sm:$0xff]  ;;  %v16782_v45 = vld [vmem:[#allocation66_spill] sm:$0xff] }
 0x229   :  { %9432 = vpow2.f32 %v4928_v59  ;;  %v1222_v24 = vmul.f32 %v16774_v62, %v16770_v21  ;;  %v1224_v13 = vmul.f32 %v16775_v33, %v16770_v21  ;;  %v1226_v6 = vmul.f32 %v16776_v19, %v16770_v21  ;;  %v16780_v15 = vld [vmem:[#allocation68_spill] sm:$0xff]  ;;  %v16783_v29 = vld [vmem:[#allocation67_spill] sm:$0xff]  ;;  %v16784_v51 = vld [vmem:[#allocation69_spill] sm:$0xff] }
 0x22a   :  { %9434 = vpow2.f32 %v4932_v37  ;;  %v1228_v0 = vmul.f32 %v16777_v7, %v16770_v21  ;;  %v1230_v30 = vmul.f32 %v16778_v27, %v16770_v21  ;;  %v1232_v48 = vmul.f32 %v16779_v5, %v16770_v21  ;;  %v16793_v17 = vld [vmem:[#allocation43_spill] sm:$0xff]  ;;  %v16794_v46 = vld [vmem:[#allocation44_spill] sm:$0xff]  ;;  %v16795_v62 = vld [vmem:[#allocation46_spill] sm:$0xff] }
 0x22b   :  { %9436 = vpow2.f32 %v4936_v22  ;;  %v1234_v40 = vmul.f32 %v16780_v15, %v16770_v21  ;;  %v1236_v42 = vmul.f32 %v16781_v3, %v16770_v21  ;;  %v1238_v28 = vmul.f32 %v16782_v45, %v16770_v21  ;;  %v16796_v33 = vld [vmem:[#allocation129_spill] sm:$0xff]  ;;  %v16798_v7 = vld [vmem:[#allocation131_spill] sm:$0xff] }
 0x22c   :  { %9438 = vpow2.f32 %v4940_v41  ;;  %v1240_v55 = vmul.f32 %v16783_v29, %v16770_v21  ;;  %v1242_v11 = vmul.f32 %v16784_v51, %v16770_v21  ;;  %v1244_v44 = vadd.f32 %v1212_v47, %v12202_v63  ;;  %v16785_v21 = vld [vmem:[#allocation11_spill] sm:$0xff]  ;;  %v16799_v27 = vld [vmem:[#allocation133_spill] sm:$0xff] }
 0x22d   :  { %9440 = vpow2.f32 %v4944_v61  ;;  %v1246_v4 = vadd.f32 %v1214_v43, %v12204_v16  ;;  %v1248_v31 = vadd.f32 %v1216_v53, %v12206_v52  ;;  %v1250_v8 = vadd.f32 %v1218_v12, %v12208_v56  ;;  %v16791_v53 = vld [vmem:[#allocation41_spill] sm:$0xff]  ;;  %v16800_v5 = vld [vmem:[#allocation135_spill] sm:$0xff] }
 0x22e   :  { %v12282_v35 = vpop.eup %9422  ;;  %9442 = vpow2.f32 %v4948_v60  ;;  %v1252_v25 = vadd.f32 %v1220_v58, %v12210_v2  ;;  %v1254_v37 = vadd.f32 %v1222_v24, %v12212_v36  ;;  %v1256_v22 = vadd.f32 %v1224_v13, %v12214_v14 }
 0x22f   :  { %v12287_v59 = vpop.eup %9424  ;;  %9444 = vpow2.f32 %v4952_v57  ;;  %v1258_v63 = vadd.f32 %v1226_v6, %v12216_v50  ;;  %v1260_v52 = vadd.f32 %v1228_v0, %v12218_v9  ;;  %v1262_v56 = vadd.f32 %v1230_v30, %v12220_v49 }
 0x230   :  { %v12292_v41 = vpop.eup %9426  ;;  %9446 = vpow2.f32 %v4956_v54  ;;  %v4985_v16 = vadd.f32 %v12287_v59, %v12282_v35  ;;  %v1264_v61 = vadd.f32 %v1232_v48, %v12222_v18  ;;  %v1266_v36 = vadd.f32 %v1234_v40, %v12224_v38  ;;  %v16787_v18 = vld [vmem:[#allocation39_spill] sm:$0xff]  ;;  %v16802_v40 = vld [vmem:[#allocation132_spill] sm:$0xff] }
 0x231   :  { %v12298_v2 = vpop.eup %9428  ;;  %9448 = vpow2.f32 %v4960_v34  ;;  %v1268_v14 = vadd.f32 %v1236_v42, %v12242_v10  ;;  %v1270_v57 = vadd.f32 %v1238_v28, %v12244_v26  ;;  %v1272_v54 = vadd.f32 %v1240_v55, %v1000_v32  ;;  %v16786_v34 = vld [vmem:[#allocation38_spill] sm:$0xff]  ;;  %v16804_v28 = vld [vmem:[#allocation136_spill] sm:$0xff] }
 0x232   :  { %v12303_v50 = vpop.eup %9430  ;;  %9450 = vpow2.f32 %v4964_v20  ;;  %v4986_v60 = vadd.f32 %v12292_v41, %v4985_v16  ;;  %v1274_v49 = vadd.f32 %v1242_v11, %v1002_v23  ;;  %v1484_v47 = vmul.f32 %v16786_v34, %v16785_v21  ;;  %v16789_v20 = vld [vmem:[#allocation40_spill] sm:$0xff]  ;;  %v16790_v26 = vld [vmem:[#allocation42_spill] sm:$0xff] }
 0x233   :  { %v12307_v9 = vpop.eup %9432  ;;  %9452 = vpow2.f32 %v4968_v39  ;;  %v1486_v38 = vmul.f32 %v16787_v18, %v16785_v21  ;;  %v1488_v1 = vmul.f32 %v16789_v20, %v16785_v21  ;;  %v1490_v32 = vmul.f32 %v16790_v26, %v16785_v21  ;;  %v16803_v42 = vld [vmem:[#allocation134_spill] sm:$0xff] }
 0x234   :  { %v12313_v43 = vpop.eup %9434  ;;  %v4987_v10 = vadd.f32 %v12298_v2, %v4986_v60  ;;  %v1492_v39 = vmul.f32 %v16791_v53, %v16785_v21  ;;  %v1494_v12 = vmul.f32 %v16793_v17, %v16785_v21  ;;  %v1496_v58 = vmul.f32 %v16794_v46, %v16785_v21  ;;  %v16805_v55 = vld [vmem:[#allocation138_spill] sm:$0xff] }
 0x235   :  { %16788 = vst [vmem:[#allocation313_spill] sm:$0xff] %v12313_v43  ;;  %v12322_v23 = vpop.eup %9436  ;;  %v1498_v24 = vmul.f32 %v16795_v62, %v16785_v21  ;;  %v1500_v13 = vmul.f32 %v16796_v33, %v16785_v21  ;;  %v1502_v0 = vmul.f32 %v16798_v7, %v16785_v21  ;;  %v1504_v30 = vmul.f32 %v16799_v27, %v16785_v21 }
 0x236   :  { %16792 = vst [vmem:[#allocation314_spill] sm:$0xff] %v12322_v23  ;;  %v12332_v19 = vpop.eup %9438  ;;  %v4988_v6 = vadd.f32 %v12303_v50, %v4987_v10  ;;  %v1506_v48 = vmul.f32 %v16800_v5, %v16785_v21  ;;  %v1508_v3 = vmul.f32 %v16802_v40, %v16785_v21  ;;  %v1510_v45 = vmul.f32 %v16803_v42, %v16785_v21 }
 0x237   :  { %16797 = vst [vmem:[#allocation130_spill] sm:$0xff] %v12332_v19  ;;  %v12341_v15 = vpop.eup %9440  ;;  %v1512_v29 = vmul.f32 %v16804_v28, %v16785_v21  ;;  %v1514_v51 = vmul.f32 %v16805_v55, %v16785_v21  ;;  %v1516_v60 = vadd.f32 %v1484_v47, %v1244_v44  ;;  %v1518_v34 = vadd.f32 %v1486_v38, %v1246_v4  ;;  %v16807_v47 = vld [vmem:[#allocation54_spill] sm:$0xff] }
 0x238   :  { %16801 = vst [vmem:[#allocation188_spill] sm:$0xff] %v12341_v15  ;;  %v12351_v11 = vpop.eup %9442  ;;  %v4989_v16 = vadd.f32 %v12307_v9, %v4988_v6  ;;  %v1520_v18 = vadd.f32 %v1488_v1, %v1248_v31  ;;  %v1522_v20 = vadd.f32 %v1490_v32, %v1250_v8  ;;  %v1524_v26 = vadd.f32 %v1492_v39, %v1252_v25  ;;  %v16819_v55 = vld [vmem:[#allocation114_spill] sm:$0xff] }
 0x239   :  { %v12354_v10 = vpop.eup %9444  ;;  %v1526_v53 = vadd.f32 %v1494_v12, %v1254_v37  ;;  %v1528_v17 = vadd.f32 %v1496_v58, %v1256_v22  ;;  %v1530_v33 = vadd.f32 %v1498_v24, %v1258_v63  ;;  %v1532_v7 = vadd.f32 %v1500_v13, %v1260_v52  ;;  %v16806_v22 = vld [vmem:[#allocation14_spill] sm:$0xff]  ;;  %v16808_v63 = vld [vmem:[#allocation55_spill] sm:$0xff]  ;;  %v16813_v12 = vld [vmem:[#allocation60_spill] sm:$0xff] }
 0x23a   :  { %v12356_v46 = vpop.eup %9446  ;;  %v4990_v62 = vadd.f32 %v12313_v43, %v4989_v16  ;;  %v1534_v21 = vadd.f32 %v1502_v0, %v1262_v56  ;;  %v1536_v5 = vadd.f32 %v1504_v30, %v1264_v61  ;;  %v1538_v6 = vadd.f32 %v1506_v48, %v1266_v36  ;;  %v16809_v56 = vld [vmem:[#allocation56_spill] sm:$0xff]  ;;  %v16810_v36 = vld [vmem:[#allocation58_spill] sm:$0xff]  ;;  %v16814_v24 = vld [vmem:[#allocation61_spill] sm:$0xff] }
 0x23b   :  { %v12359_v27 = vpop.eup %9448  ;;  %v1540_v44 = vadd.f32 %v1508_v3, %v1268_v14  ;;  %v1542_v4 = vadd.f32 %v1510_v45, %v1270_v57  ;;  %v1544_v25 = vadd.f32 %v1512_v29, %v1272_v54  ;;  %v1546_v37 = vadd.f32 %v1514_v51, %v1274_v49  ;;  %v16811_v57 = vld [vmem:[#allocation57_spill] sm:$0xff]  ;;  %v16812_v49 = vld [vmem:[#allocation59_spill] sm:$0xff]  ;;  %v16817_v3 = vld [vmem:[#allocation116_spill] sm:$0xff] }
 0x23c   :  { %v12361_v31 = vpop.eup %9450  ;;  %v4991_v8 = vadd.f32 %v12322_v23, %v4990_v62  ;;  %v1756_v38 = vmul.f32 %v16807_v47, %v16806_v22  ;;  %v1758_v52 = vmul.f32 %v16808_v63, %v16806_v22  ;;  %v1760_v61 = vmul.f32 %v16809_v56, %v16806_v22  ;;  %v16815_v0 = vld [vmem:[#allocation113_spill] sm:$0xff]  ;;  %v16816_v48 = vld [vmem:[#allocation115_spill] sm:$0xff]  ;;  %v16822_v63 = vld [vmem:[#allocation120_spill] sm:$0xff] }
 0x23d   :  { %v12366_v1 = vpop.eup %9452  ;;  %v1762_v14 = vmul.f32 %v16810_v36, %v16806_v22  ;;  %v1764_v32 = vmul.f32 %v16811_v57, %v16806_v22  ;;  %v1766_v39 = vmul.f32 %v16812_v49, %v16806_v22  ;;  %v1768_v58 = vmul.f32 %v16813_v12, %v16806_v22  ;;  %v16818_v45 = vld [vmem:[#allocation119_spill] sm:$0xff]  ;;  %v16820_v16 = vld [vmem:[#allocation117_spill] sm:$0xff] }
 0x23e   :  { %v4992_v54 = vadd.f32 %v12332_v19, %v4991_v8  ;;  %v1770_v13 = vmul.f32 %v16814_v24, %v16806_v22  ;;  %v1772_v30 = vmul.f32 %v16815_v0, %v16806_v22  ;;  %v1774_v40 = vmul.f32 %v16816_v48, %v16806_v22  ;;  %v16821_v8 = vld [vmem:[#allocation118_spill] sm:$0xff] }
 0x23f   :  { %v1776_v42 = vmul.f32 %v16817_v3, %v16806_v22  ;;  %v1778_v28 = vmul.f32 %v16818_v45, %v16806_v22  ;;  %v1780_v51 = vmul.f32 %v16819_v55, %v16806_v22  ;;  %v1782_v62 = vmul.f32 %v16820_v16, %v16806_v22 }
 0x240   :  { %v4993_v29 = vadd.f32 %v12341_v15, %v4992_v54  ;;  %v1784_v47 = vmul.f32 %v16821_v8, %v16806_v22  ;;  %v1786_v56 = vmul.f32 %v16822_v63, %v16806_v22  ;;  %v1788_v36 = vadd.f32 %v1756_v38, %v1516_v60  ;;  %v16823_v60 = vld [vmem:[#allocation18_spill] sm:$0xff] }
 0x241   :  { %v1790_v57 = vadd.f32 %v1758_v52, %v1518_v34  ;;  %v1792_v49 = vadd.f32 %v1760_v61, %v1520_v18  ;;  %v1794_v24 = vadd.f32 %v1762_v14, %v1522_v20  ;;  %v1796_v0 = vadd.f32 %v1764_v32, %v1524_v26  ;;  %v16824_v34 = vld [vmem:[#allocation87_spill] sm:$0xff]  ;;  %v16825_v20 = vld [vmem:[#allocation88_spill] sm:$0xff]  ;;  %v16832_v14 = vld [vmem:[#allocation166_spill] sm:$0xff] }
 0x242   :  { %v4994_v12 = vadd.f32 %v12351_v11, %v4993_v29  ;;  %v1798_v54 = vadd.f32 %v1766_v39, %v1526_v53  ;;  %v1800_v48 = vadd.f32 %v1768_v58, %v1528_v17  ;;  %v1802_v3 = vadd.f32 %v1770_v13, %v1530_v33  ;;  %v16826_v53 = vld [vmem:[#allocation90_spill] sm:$0xff]  ;;  %v16827_v33 = vld [vmem:[#allocation91_spill] sm:$0xff]  ;;  %v16833_v39 = vld [vmem:[#allocation16_spill] sm:$0xff] }
 0x243   :  { %v1804_v45 = vadd.f32 %v1772_v30, %v1532_v7  ;;  %v1806_v55 = vadd.f32 %v1774_v40, %v1534_v21  ;;  %v1808_v15 = vadd.f32 %v1776_v42, %v1536_v5  ;;  %v1810_v19 = vadd.f32 %v1778_v28, %v1538_v6  ;;  %v16828_v21 = vld [vmem:[#allocation89_spill] sm:$0xff]  ;;  %v16829_v6 = vld [vmem:[#allocation92_spill] sm:$0xff]  ;;  %v16836_v28 = vld [vmem:[#allocation167_spill] sm:$0xff] }
 0x244   :  { %v4995_v16 = vadd.f32 %v12354_v10, %v4994_v12  ;;  %v1812_v8 = vadd.f32 %v1780_v51, %v1540_v44  ;;  %v1814_v23 = vadd.f32 %v1782_v62, %v1542_v4  ;;  %v1816_v43 = vadd.f32 %v1784_v47, %v1544_v25  ;;  %v16830_v4 = vld [vmem:[#allocation93_spill] sm:$0xff]  ;;  %v16835_v40 = vld [vmem:[#allocation168_spill] sm:$0xff]  ;;  %v16838_v47 = vld [vmem:[#allocation170_spill] sm:$0xff] }
 0x245   :  { %v1818_v22 = vadd.f32 %v1786_v56, %v1546_v37  ;;  %v2028_v18 = vmul.f32 %v16824_v34, %v16823_v60  ;;  %v2030_v26 = vmul.f32 %v16825_v20, %v16823_v60  ;;  %v2032_v17 = vmul.f32 %v16826_v53, %v16823_v60  ;;  %v16831_v37 = vld [vmem:[#allocation94_spill] sm:$0xff]  ;;  %v16834_v13 = vld [vmem:[#allocation17_spill] sm:$0xff]  ;;  %v16839_v12 = vld [vmem:[#allocation171_spill] sm:$0xff] }
 0x246   :  { %v4996_v38 = vadd.f32 %v12356_v46, %v4995_v16  ;;  %v2034_v7 = vmul.f32 %v16827_v33, %v16823_v60  ;;  %v2036_v5 = vmul.f32 %v16828_v21, %v16823_v60  ;;  %v2038_v44 = vmul.f32 %v16829_v6, %v16823_v60  ;;  %v16837_v51 = vld [vmem:[#allocation169_spill] sm:$0xff] }
 0x247   :  { %v2040_v25 = vmul.f32 %v16830_v4, %v16823_v60  ;;  %v2042_v52 = vmul.f32 %v16831_v37, %v16823_v60  ;;  %v2044_v32 = vmul.f32 %v16832_v14, %v16823_v60  ;;  %v2046_v58 = vmul.f32 %v16833_v39, %v16823_v60 }
 0x248   :  { %v4997_v61 = vadd.f32 %v12359_v27, %v4996_v38  ;;  %v2048_v30 = vmul.f32 %v16834_v13, %v16823_v60  ;;  %v2050_v42 = vmul.f32 %v16835_v40, %v16823_v60  ;;  %v2052_v29 = vmul.f32 %v16836_v28, %v16823_v60 }
 0x249   :  { %v2054_v62 = vmul.f32 %v16837_v51, %v16823_v60  ;;  %v2056_v63 = vmul.f32 %v16838_v47, %v16823_v60  ;;  %v2058_v16 = vmul.f32 %v16839_v12, %v16823_v60  ;;  %v2060_v34 = vadd.f32 %v2028_v18, %v1788_v36  ;;  %v16840_v60 = vld [vmem:[#allocation21_spill] sm:$0xff]  ;;  %v16841_v36 = vld [vmem:[#allocation104_spill] sm:$0xff]  ;;  %v16849_v18 = vld [vmem:[#allocation7_spill] sm:$0xff] }
 0x24a   :  { %v4998_v56 = vadd.f32 %v12361_v31, %v4997_v61  ;;  %v2062_v38 = vadd.f32 %v2030_v26, %v1790_v57  ;;  %v2064_v20 = vadd.f32 %v2032_v17, %v1792_v49  ;;  %v2066_v53 = vadd.f32 %v2034_v7, %v1794_v24  ;;  %v16842_v49 = vld [vmem:[#allocation105_spill] sm:$0xff]  ;;  %v16850_v17 = vld [vmem:[#allocation140_spill] sm:$0xff] }
 0x24b   :  { %v2068_v33 = vadd.f32 %v2036_v5, %v1796_v0  ;;  %v2070_v21 = vadd.f32 %v2038_v44, %v1798_v54  ;;  %v2072_v4 = vadd.f32 %v2040_v25, %v1800_v48  ;;  %v2074_v37 = vadd.f32 %v2042_v52, %v1802_v3  ;;  %v16843_v0 = vld [vmem:[#allocation106_spill] sm:$0xff]  ;;  %v16851_v5 = vld [vmem:[#allocation141_spill] sm:$0xff]  ;;  %v16852_v25 = vld [vmem:[#allocation8_spill] sm:$0xff] }
 0x24c   :  { %v4999_v6 = vadd.f32 %v12366_v1, %v4998_v56  ;;  %v2076_v14 = vadd.f32 %v2044_v32, %v1804_v45  ;;  %v2078_v39 = vadd.f32 %v2046_v58, %v1806_v55  ;;  %v2080_v13 = vadd.f32 %v2048_v30, %v1808_v15  ;;  %v16844_v48 = vld [vmem:[#allocation110_spill] sm:$0xff]  ;;  %v16845_v15 = vld [vmem:[#allocation107_spill] sm:$0xff]  ;;  %v16846_v45 = vld [vmem:[#allocation108_spill] sm:$0xff] }
 0x24d   :  { %v2082_v40 = vadd.f32 %v2050_v42, %v1810_v19  ;;  %v2084_v28 = vadd.f32 %v2052_v29, %v1812_v8  ;;  %v2086_v61 = vadd.f32 %v2054_v62, %v1814_v23  ;;  %v2088_v51 = vadd.f32 %v2056_v63, %v1816_v43  ;;  %v16847_v43 = vld [vmem:[#allocation109_spill] sm:$0xff]  ;;  %v16848_v8 = vld [vmem:[#allocation111_spill] sm:$0xff]  ;;  %v16854_v30 = vld [vmem:[#allocation142_spill] sm:$0xff] }
 0x24e   :  { %9454 = vrcp.f32 %v4999_v6  ;;  %v2090_v47 = vadd.f32 %v2058_v16, %v1818_v22  ;;  %v2300_v57 = vmul.f32 %v16841_v36, %v16840_v60  ;;  %v2302_v24 = vmul.f32 %v16842_v49, %v16840_v60  ;;  %v16853_v32 = vld [vmem:[#allocation139_spill] sm:$0xff]  ;;  %v16856_v63 = vld [vmem:[#allocation144_spill] sm:$0xff] }
 0x24f   :  { %v2304_v54 = vmul.f32 %v16843_v0, %v16840_v60  ;;  %v2306_v3 = vmul.f32 %v16844_v48, %v16840_v60  ;;  %v2308_v19 = vmul.f32 %v16845_v15, %v16840_v60  ;;  %v2310_v23 = vmul.f32 %v16846_v45, %v16840_v60  ;;  %v16855_v29 = vld [vmem:[#allocation143_spill] sm:$0xff] }
 0x250   :  { %v2312_v55 = vmul.f32 %v16847_v43, %v16840_v60  ;;  %v2314_v22 = vmul.f32 %v16848_v8, %v16840_v60  ;;  %v2316_v26 = vmul.f32 %v16849_v18, %v16840_v60  ;;  %v2318_v7 = vmul.f32 %v16850_v17, %v16840_v60 }
 0x251   :  { %v2320_v44 = vmul.f32 %v16851_v5, %v16840_v60  ;;  %v2322_v52 = vmul.f32 %v16852_v25, %v16840_v60  ;;  %v2324_v58 = vmul.f32 %v16853_v32, %v16840_v60  ;;  %v2326_v42 = vmul.f32 %v16854_v30, %v16840_v60  ;;  %v16872_v5 = vld [vmem:[#allocation313_spill] sm:$0xff] }
 0x252   :  { %v2328_v62 = vmul.f32 %v16855_v29, %v16840_v60  ;;  %v2330_v56 = vmul.f32 %v16856_v63, %v16840_v60  ;;  %v12470_v12 = vadd.f32 %v2300_v57, %v2060_v34  ;;  %v12472_v16 = vadd.f32 %v2302_v24, %v2062_v38  ;;  %v16858_v60 = vld [vmem:[#allocation96_spill] sm:$0xff] }
 0x253   :  { %v12474_v6 = vadd.f32 %v2304_v54, %v2064_v20  ;;  %v12476_v36 = vadd.f32 %v2306_v3, %v2066_v53  ;;  %v12478_v49 = vadd.f32 %v2308_v19, %v2068_v33  ;;  %v12480_v0 = vadd.f32 %v2310_v23, %v2070_v21  ;;  %v16863_v24 = vld [vmem:[#allocation100_spill] sm:$0xff]  ;;  %v16864_v3 = vld [vmem:[#allocation101_spill] sm:$0xff]  ;;  %v16865_v23 = vld [vmem:[#allocation103_spill] sm:$0xff] }
 0x254   :  { %v12482_v48 = vadd.f32 %v2312_v55, %v2072_v4  ;;  %v12484_v15 = vadd.f32 %v2314_v22, %v2074_v37  ;;  %v12486_v45 = vadd.f32 %v2316_v26, %v2076_v14  ;;  %v12488_v43 = vadd.f32 %v2318_v7, %v2078_v39  ;;  %v16857_v4 = vld [vmem:[#allocation189_spill] sm:$0xff]  ;;  %v16859_v14 = vld [vmem:[#allocation98_spill] sm:$0xff]  ;;  %v16894_v29 = vld [vmem:[#allocation292_spill] sm:$0xff] }
 0x255   :  { %v12490_v34 = vadd.f32 %v2320_v44, %v2080_v13  ;;  %v12492_v38 = vadd.f32 %v2322_v52, %v2082_v40  ;;  %v12494_v20 = vadd.f32 %v2324_v58, %v2084_v28  ;;  %v12496_v53 = vadd.f32 %v2326_v42, %v2086_v61  ;;  %v16860_v13 = vld [vmem:[#allocation99_spill] sm:$0xff]  ;;  %v16861_v28 = vld [vmem:[#allocation102_spill] sm:$0xff] }
 0x256   :  { %v12498_v33 = vadd.f32 %v2328_v62, %v2088_v51  ;;  %v12500_v21 = vadd.f32 %v2330_v56, %v2090_v47  ;;  %v12504_v37 = vmul.f32 %v16858_v60, %v16857_v4  ;;  %v12508_v39 = vmul.f32 %v16859_v14, %v16857_v4  ;;  %v16862_v47 = vld [vmem:[#allocation97_spill] sm:$0xff]  ;;  %v16897_v56 = vld [vmem:[#allocation299_spill] sm:$0xff] }
 0x257   :  { %v12512_v40 = vmul.f32 %v16860_v13, %v16857_v4  ;;  %v12516_v61 = vmul.f32 %v16861_v28, %v16857_v4  ;;  %v12520_v57 = vmul.f32 %v16862_v47, %v16857_v4  ;;  %v12524_v54 = vmul.f32 %v16863_v24, %v16857_v4  ;;  %v16895_v47 = vld [vmem:[#allocation294_spill] sm:$0xff] }
 0x258   :  { %v9455_v51 = vpop.eup %9454  ;;  %v12528_v19 = vmul.f32 %v16864_v3, %v16857_v4  ;;  %v12532_v55 = vmul.f32 %v16865_v23, %v16857_v4  ;;  %v16893_v23 = vld [vmem:[#allocation5_spill] sm:$0xff] }
 0x259   :  { %v12535_v8 = vmul.f32 %v9455_v51, %v12282_v35  ;;  %v12538_v22 = vmul.f32 %v9455_v51, %v12287_v59  ;;  %v12541_v18 = vmul.f32 %v9455_v51, %v12292_v41  ;;  %v12544_v26 = vmul.f32 %v9455_v51, %v12298_v2  ;;  %v16874_v35 = vld [vmem:[#allocation314_spill] sm:$0xff]  ;;  %v16878_v41 = vld [vmem:[#allocation188_spill] sm:$0xff] }
 0x25a   :  { %v12547_v17 = vmul.f32 %v9455_v51, %v12303_v50  ;;  %v12550_v7 = vmul.f32 %v9455_v51, %v12307_v9  ;;  %v12553_v44 = vmul.f32 %v9455_v51, %v16872_v5  ;;  %v12556_v25 = vmul.f32 %v9455_v51, %v16874_v35  ;;  %v16876_v59 = vld [vmem:[#allocation130_spill] sm:$0xff]  ;;  %v16896_v35 = vld [vmem:[#allocation296_spill] sm:$0xff] }
 0x25b   :  { %16866 = vst [vmem:[#allocation12_spill] sm:$0xff] %v12535_v8  ;;  %16867 = vst [vmem:[#allocation214_spill] sm:$0xff] %v12538_v22  ;;  %v12559_v52 = vmul.f32 %v9455_v51, %v16876_v59  ;;  %v12562_v32 = vmul.f32 %v9455_v51, %v16878_v41  ;;  %v12565_v2 = vmul.f32 %v9455_v51, %v12351_v11  ;;  %v16886_v11 = vld [vmem:[#allocation6_spill] sm:$0xff]  ;;  %v16899_v41 = vld [vmem:[#allocation301_spill] sm:$0xff] }
 0x25c   :  { %16868 = vst [vmem:[#allocation19_spill] sm:$0xff] %v12541_v18  ;;  %16869 = vst [vmem:[#allocation264_spill] sm:$0xff] %v12544_v26  ;;  %v12568_v50 = vmul.f32 %v9455_v51, %v12354_v10  ;;  %v12571_v9 = vmul.f32 %v9455_v51, %v12356_v46  ;;  %v12574_v58 = vmul.f32 %v9455_v51, %v12359_v27 }
 0x25d   :  { %16870 = vst [vmem:[#allocation284_spill] sm:$0xff] %v12547_v17  ;;  %16871 = vst [vmem:[#allocation287_spill] sm:$0xff] %v12550_v7  ;;  %v12577_v30 = vmul.f32 %v9455_v51, %v12361_v31  ;;  %v12580_v42 = vmul.f32 %v9455_v51, %v12366_v1  ;;  %v12586_v62 = vrot.slane %v12535_v8, %v16886_v11 }
 0x25e   :  { %16873 = vst [vmem:[#allocation289_spill] sm:$0xff] %v12553_v44  ;;  %16875 = vst [vmem:[#allocation286_spill] sm:$0xff] %v12556_v25  ;;  %v12592_v46 = vrot.slane %v12538_v22, %v16886_v11  ;;  %v12598_v31 = vrot.slane %v12541_v18, %v16886_v11  ;;  %v12604_v63 = vrot.slane %v12544_v26, %v16886_v11  ;;  %v16898_v18 = vld [vmem:[#allocation297_spill] sm:$0xff] }
 0x25f   :  { %16877 = vst [vmem:[#allocation95_spill] sm:$0xff] %v12559_v52  ;;  %16879 = vst [vmem:[#allocation29_spill] sm:$0xff] %v12562_v32  ;;  %v12610_v60 = vrot.slane %v12586_v62, %v16886_v11 }
 0x260   :  { %16880 = vst [vmem:[#allocation31_spill] sm:$0xff] %v12565_v2  ;;  %16881 = vst [vmem:[#allocation32_spill] sm:$0xff] %v12568_v50  ;;  %v12616_v13 = vrot.slane %v12592_v46, %v16886_v11  ;;  %v12622_v51 = vrot.slane %v12598_v31, %v16886_v11  ;;  %v12628_v24 = vrot.slane %v12604_v63, %v16886_v11 }
 0x261   :  { %16882 = vst [vmem:[#allocation34_spill] sm:$0xff] %v12571_v9  ;;  %16883 = vst [vmem:[#allocation33_spill] sm:$0xff] %v12574_v58  ;;  %v5169_v5 = vrot.slane %v12610_v60, %v16893_v23 }
 0x262   :  { %16884 = vst [vmem:[#allocation35_spill] sm:$0xff] %v12577_v30  ;;  %16885 = vst [vmem:[#allocation36_spill] sm:$0xff] %v12580_v42  ;;  %v5381_v59 = vrot.slane %v12616_v13, %v16893_v23  ;;  %v5625_v1 = vrot.slane %v12622_v51, %v16893_v23  ;;  %v5869_v10 = vrot.slane %v12628_v24, %v16893_v23 }
 0x263   :  { %16887 = vst [vmem:[#allocation37_spill] sm:$0xff] %v12598_v31  ;;  %16888 = vst [vmem:[#allocation45_spill] sm:$0xff] %v12604_v63  ;;  %v5230_v3 = vmul.f32 %v5169_v5, %v16894_v29  ;;  %v5231_v28 = vmul.f32 %v5169_v5, %v16895_v47  ;;  %v12658_v5 = vrot.slane %v12547_v17, %v16886_v11 }
 0x264   :  { %16889 = vst [vmem:[#allocation47_spill] sm:$0xff] %v12610_v60  ;;  %16890 = vst [vmem:[#allocation48_spill] sm:$0xff] %v12616_v13  ;;  %v5442_v14 = vmul.f32 %v5381_v59, %v16896_v35  ;;  %v5443_v26 = vmul.f32 %v5381_v59, %v16897_v56  ;;  %v5686_v22 = vmul.f32 %v5625_v1, %v16898_v18  ;;  %v16900_v13 = vld [vmem:[#allocation302_spill] sm:$0xff]  ;;  %v16901_v60 = vld [vmem:[#allocation307_spill] sm:$0xff] }
 0x265   :  { %16891 = vst [vmem:[#allocation50_spill] sm:$0xff] %v12622_v51  ;;  %16892 = vst [vmem:[#allocation49_spill] sm:$0xff] %v12628_v24  ;;  %v5687_v8 = vmul.f32 %v5625_v1, %v16899_v41  ;;  %v5930_v51 = vmul.f32 %v5869_v10, %v16900_v13  ;;  %v5931_v63 = vmul.f32 %v5869_v10, %v16901_v60  ;;  %v16909_v59 = vld [vmem:[#allocation308_spill] sm:$0xff]  ;;  %v16912_v13 = vld [vmem:[#allocation318_spill] sm:$0xff] }
 0x266   :  { %v5474_v27 = vadd.f32 %v5442_v14, %v5230_v3  ;;  %v5475_v31 = vadd.f32 %v5443_v26, %v5231_v28  ;;  %v12664_v18 = vrot.slane %v12550_v7, %v16886_v11  ;;  %v12670_v26 = vrot.slane %v12553_v44, %v16886_v11  ;;  %v16911_v60 = vld [vmem:[#allocation312_spill] sm:$0xff] }
 0x267   :  { %v12676_v3 = vrot.slane %v12658_v5, %v16886_v11  ;;  %v12708_v17 = vrot.slane %v12556_v25, %v16886_v11 }
 0x268   :  { %16902 = vst [vmem:[#allocation51_spill] sm:$0xff] %v12670_v26  ;;  %v5718_v10 = vadd.f32 %v5686_v22, %v5474_v27  ;;  %v5719_v14 = vadd.f32 %v5687_v8, %v5475_v31  ;;  %v12682_v24 = vrot.slane %v12664_v18, %v16886_v11  ;;  %v12688_v8 = vrot.slane %v12670_v26, %v16886_v11 }
 0x269   :  { %16903 = vst [vmem:[#allocation52_spill] sm:$0xff] %v12676_v3  ;;  %v6113_v28 = vrot.slane %v12676_v3, %v16893_v23  ;;  %16908 = vst [vmem:[#allocation79_spill] sm:$0xff] %v12708_v17  ;;  %v12718_v31 = vrot.slane %v12708_v17, %v16886_v11  ;;  %v16974_v17 = vld [vmem:[#allocation121_spill] sm:$0xff] }
 0x26a   :  { %16904 = vst [vmem:[#allocation53_spill] sm:$0xff] %v12682_v24  ;;  %16905 = vst [vmem:[#allocation78_spill] sm:$0xff] %v12688_v8  ;;  %v5962_v22 = vadd.f32 %v5930_v51, %v5718_v10  ;;  %v5963_v27 = vadd.f32 %v5931_v63, %v5719_v14  ;;  %v6357_v44 = vrot.slane %v12682_v24, %v16893_v23  ;;  %v16906_v51 = vld [vmem:[#allocation305_spill] sm:$0xff]  ;;  %v16907_v10 = vld [vmem:[#allocation315_spill] sm:$0xff] }
 0x26b   :  { %v6601_v7 = vrot.slane %v12688_v8, %v16893_v23  ;;  %v6174_v63 = vmul.f32 %v6113_v28, %v16906_v51  ;;  %v6175_v14 = vmul.f32 %v6113_v28, %v16907_v10  ;;  %v16910_v24 = vld [vmem:[#allocation317_spill] sm:$0xff]  ;;  %16913 = vst [vmem:[#allocation80_spill] sm:$0xff] %v12718_v31 }
 0x26c   :  { %v6418_v3 = vmul.f32 %v6357_v44, %v16909_v59  ;;  %v6419_v26 = vmul.f32 %v6357_v44, %v16910_v24  ;;  %v12724_v59 = vrot.slane %v12559_v52, %v16886_v11 }
 0x26d   :  { %v6662_v1 = vmul.f32 %v6601_v7, %v16911_v60  ;;  %v6663_v41 = vmul.f32 %v6601_v7, %v16912_v13  ;;  %v6206_v8 = vadd.f32 %v6174_v63, %v5962_v22  ;;  %v6207_v56 = vadd.f32 %v6175_v14, %v5963_v27 }
 0x26e   :  { %16914 = vst [vmem:[#allocation81_spill] sm:$0xff] %v12724_v59  ;;  %v12730_v7 = vrot.slane %v12562_v32, %v16886_v11  ;;  %v6845_v14 = vrot.slane %v12718_v31, %v16893_v23  ;;  %v12740_v28 = vrot.slane %v12724_v59, %v16886_v11  ;;  %v16919_v32 = vld [vmem:[#allocation319_spill] sm:$0xff] }
 0x26f   :  { %v6450_v22 = vadd.f32 %v6418_v3, %v6206_v8  ;;  %v6451_v27 = vadd.f32 %v6419_v26, %v6207_v56  ;;  %v16918_v8 = vld [vmem:[#allocation316_spill] sm:$0xff] }
 0x270   :  { %16915 = vst [vmem:[#allocation83_spill] sm:$0xff] %v12730_v7  ;;  %16916 = vst [vmem:[#allocation82_spill] sm:$0xff] %v12740_v28  ;;  %v12746_v3 = vrot.slane %v12730_v7, %v16886_v11  ;;  %v6906_v63 = vmul.f32 %v6845_v14, %v16918_v8  ;;  %v6907_v52 = vmul.f32 %v6845_v14, %v16919_v32  ;;  %v16922_v14 = vld [vmem:[#allocation22_spill] sm:$0xff]  ;;  %v16924_v8 = vld [vmem:[#allocation23_spill] sm:$0xff] }
 0x271   :  { %v6694_v56 = vadd.f32 %v6662_v1, %v6450_v22  ;;  %v6695_v26 = vadd.f32 %v6663_v41, %v6451_v27  ;;  %v7089_v31 = vrot.slane %v12740_v28, %v16893_v23  ;;  %v12762_v1 = vrot.slane %v12565_v2, %v16886_v11  ;;  %v16921_v22 = vld [vmem:[#allocation291_spill] sm:$0xff]  ;;  %v16923_v28 = vld [vmem:[#allocation293_spill] sm:$0xff] }
 0x272   :  { %16917 = vst [vmem:[#allocation84_spill] sm:$0xff] %v12746_v3  ;;  %v7333_v44 = vrot.slane %v12746_v3, %v16893_v23  ;;  %v16930_v3 = vld [vmem:[#allocation295_spill] sm:$0xff] }
 0x273   :  { %v6938_v60 = vadd.f32 %v6906_v63, %v6694_v56  ;;  %v6939_v7 = vadd.f32 %v6907_v52, %v6695_v26  ;;  %16920 = vst [vmem:[#allocation85_spill] sm:$0xff] %v12762_v1  ;;  %v7150_v27 = vmul.f32 %v7089_v31, %v16921_v22  ;;  %v7151_v25 = vmul.f32 %v7089_v31, %v16922_v14 }
 0x274   :  { %v7394_v32 = vmul.f32 %v7333_v44, %v16923_v28  ;;  %v7395_v13 = vmul.f32 %v7333_v44, %v16924_v8  ;;  %v12772_v52 = vrot.slane %v12762_v1, %v16886_v11  ;;  %v12778_v56 = vrot.slane %v12568_v50, %v16886_v11  ;;  %v16931_v50 = vld [vmem:[#allocation320_spill] sm:$0xff] }
 0x275   :  { %v7182_v26 = vadd.f32 %v7150_v27, %v6938_v60  ;;  %v7183_v31 = vadd.f32 %v7151_v25, %v6939_v7  ;;  %v12784_v44 = vrot.slane %v12571_v9, %v16886_v11 }
 0x276   :  { %16925 = vst [vmem:[#allocation86_spill] sm:$0xff] %v12772_v52  ;;  %16926 = vst [vmem:[#allocation70_spill] sm:$0xff] %v12778_v56  ;;  %v7577_v2 = vrot.slane %v12772_v52, %v16893_v23  ;;  %v12794_v60 = vrot.slane %v12778_v56, %v16886_v11  ;;  %v16936_v56 = vld [vmem:[#allocation112_spill] sm:$0xff] }
 0x277   :  { %16927 = vst [vmem:[#allocation72_spill] sm:$0xff] %v12784_v44  ;;  %v7426_v25 = vadd.f32 %v7394_v32, %v7182_v26  ;;  %v7427_v7 = vadd.f32 %v7395_v13, %v7183_v31  ;;  %v12800_v41 = vrot.slane %v12784_v44, %v16886_v11  ;;  %v12816_v31 = vrot.slane %v12574_v58, %v16886_v11 }
 0x278   :  { %16928 = vst [vmem:[#allocation74_spill] sm:$0xff] %v12794_v60  ;;  %v7638_v9 = vmul.f32 %v7577_v2, %v16930_v3  ;;  %v7639_v52 = vmul.f32 %v7577_v2, %v16931_v50  ;;  %v7821_v8 = vrot.slane %v12794_v60, %v16893_v23  ;;  %v16933_v50 = vld [vmem:[#allocation298_spill] sm:$0xff]  ;;  %v16935_v60 = vld [vmem:[#allocation300_spill] sm:$0xff] }
 0x279   :  { %16929 = vst [vmem:[#allocation76_spill] sm:$0xff] %v12800_v41  ;;  %v8065_v13 = vrot.slane %v12800_v41, %v16893_v23  ;;  %16932 = vst [vmem:[#allocation71_spill] sm:$0xff] %v12816_v31  ;;  %v16934_v3 = vld [vmem:[#allocation306_spill] sm:$0xff]  ;;  %v12826_v26 = vrot.slane %v12816_v31, %v16886_v11 }
 0x27a   :  { %v7670_v2 = vadd.f32 %v7638_v9, %v7426_v25  ;;  %v7671_v27 = vadd.f32 %v7639_v52, %v7427_v7  ;;  %v7882_v63 = vmul.f32 %v7821_v8, %v16933_v50  ;;  %v7883_v28 = vmul.f32 %v7821_v8, %v16934_v3  ;;  %v16941_v9 = vld [vmem:[#allocation304_spill] sm:$0xff]  ;;  %v16942_v41 = vld [vmem:[#allocation310_spill] sm:$0xff] }
 0x27b   :  { %v8126_v44 = vmul.f32 %v8065_v13, %v16935_v60  ;;  %v8127_v32 = vmul.f32 %v8065_v13, %v16936_v56  ;;  %16937 = vst [vmem:[#allocation73_spill] sm:$0xff] %v12826_v26  ;;  %v12832_v52 = vrot.slane %v12577_v30, %v16886_v11  ;;  %v8309_v25 = vrot.slane %v12826_v26, %v16893_v23  ;;  %v16945_v13 = vld [vmem:[#allocation190_spill] sm:$0xff] }
 0x27c   :  { %v7914_v14 = vadd.f32 %v7882_v63, %v7670_v2  ;;  %v7915_v58 = vadd.f32 %v7883_v28, %v7671_v27  ;;  %v12842_v63 = vrot.slane %v12580_v42, %v16886_v11  ;;  %v2590_v26 = vmul.f32 %v16945_v13, %v16857_v4  ;;  %v16953_v7 = vld [vmem:[#allocation194_spill] sm:$0xff] }
 0x27d   :  { %16938 = vst [vmem:[#allocation75_spill] sm:$0xff] %v12832_v52  ;;  %v12848_v2 = vrot.slane %v12832_v52, %v16886_v11  ;;  %v8370_v8 = vmul.f32 %v8309_v25, %v16941_v9  ;;  %v8371_v30 = vmul.f32 %v8309_v25, %v16942_v41  ;;  %v16950_v52 = vld [vmem:[#allocation309_spill] sm:$0xff] }
 0x27e   :  { %16939 = vst [vmem:[#allocation77_spill] sm:$0xff] %v12842_v63  ;;  %v8158_v28 = vadd.f32 %v8126_v44, %v7914_v14  ;;  %v8159_v27 = vadd.f32 %v8127_v32, %v7915_v58  ;;  %v12856_v42 = vrot.slane %v12842_v63, %v16886_v11  ;;  %v16944_v44 = vld [vmem:[#allocation187_spill] sm:$0xff] }
 0x27f   :  { %16940 = vst [vmem:[#allocation137_spill] sm:$0xff] %v12848_v2  ;;  %v8553_v14 = vrot.slane %v12848_v2, %v16893_v23  ;;  %v2588_v32 = vmul.f32 %v16944_v44, %v16857_v4  ;;  %v16946_v63 = vld [vmem:[#allocation303_spill] sm:$0xff]  ;;  %v16949_v44 = vld [vmem:[#allocation193_spill] sm:$0xff] }
 0x280   :  { %16943 = vst [vmem:[#allocation24_spill] sm:$0xff] %v12856_v42  ;;  %v8402_v25 = vadd.f32 %v8370_v8, %v8158_v28  ;;  %v8403_v41 = vadd.f32 %v8371_v30, %v8159_v27  ;;  %v8797_v9 = vrot.slane %v12856_v42, %v16893_v23  ;;  %v16947_v58 = vld [vmem:[#allocation311_spill] sm:$0xff]  ;;  %v2594_v50 = vmul.f32 %v16949_v44, %v16857_v4  ;;  %v16952_v28 = vld [vmem:[#allocation192_spill] sm:$0xff] }
 0x281   :  { %v8614_v56 = vmul.f32 %v8553_v14, %v16946_v63  ;;  %v8615_v60 = vmul.f32 %v8553_v14, %v16947_v58  ;;  %v16948_v2 = vld [vmem:[#allocation191_spill] sm:$0xff]  ;;  %v2596_v27 = vmul.f32 %v16952_v28, %v16857_v4  ;;  %v2598_v42 = vmul.f32 %v16953_v7, %v16857_v4 }
 0x282   :  { %v2592_v3 = vmul.f32 %v16948_v2, %v16857_v4  ;;  %v8858_v13 = vmul.f32 %v8797_v9, %v16950_v52  ;;  %v16951_v8 = vld [vmem:[#allocation15_spill] sm:$0xff]  ;;  %v16955_v2 = vld [vmem:[#allocation196_spill] sm:$0xff]  ;;  %v2604_v44 = vadd.f32 %v12504_v37, %v12470_v12  ;;  %v2608_v28 = vadd.f32 %v12512_v40, %v12474_v6 }
 0x283   :  { %v8859_v30 = vmul.f32 %v8797_v9, %v16951_v8  ;;  %v8646_v31 = vadd.f32 %v8614_v56, %v8402_v25  ;;  %v8647_v63 = vadd.f32 %v8615_v60, %v8403_v41  ;;  %v16954_v14 = vld [vmem:[#allocation195_spill] sm:$0xff]  ;;  %v2602_v22 = vmul.f32 %v16955_v2, %v16857_v4  ;;  %v16970_v2 = vld [vmem:[#allocation162_spill] sm:$0xff] }
 0x284   :  { %v2600_v58 = vmul.f32 %v16954_v14, %v16857_v4  ;;  %v2606_v9 = vadd.f32 %v12508_v39, %v12472_v16  ;;  %v2610_v7 = vadd.f32 %v12516_v61, %v12476_v36  ;;  %v2612_v60 = vadd.f32 %v12520_v57, %v12478_v49  ;;  %v16956_v57 = vld [vmem:[#allocation197_spill] sm:$0xff] }
 0x285   :  { %v8890_v56 = vadd.f32 %v8858_v13, %v8646_v31  ;;  %v8891_v41 = vadd.f32 %v8859_v30, %v8647_v63  ;;  %v2614_v4 = vadd.f32 %v12524_v54, %v12480_v0  ;;  %v2616_v12 = vadd.f32 %v12528_v19, %v12482_v48  ;;  %v16957_v54 = vld [vmem:[#allocation152_spill] sm:$0xff]  ;;  %v16959_v19 = vld [vmem:[#allocation154_spill] sm:$0xff] }
 0x286   :  { %v2618_v16 = vadd.f32 %v12532_v55, %v12484_v15  ;;  %v2620_v37 = vadd.f32 %v2588_v32, %v12486_v45  ;;  %v2622_v6 = vadd.f32 %v2590_v26, %v12488_v43  ;;  %v2624_v36 = vadd.f32 %v2592_v3, %v12490_v34  ;;  %v16958_v45 = vld [vmem:[#allocation10_spill] sm:$0xff]  ;;  %v16965_v26 = vld [vmem:[#allocation13_spill] sm:$0xff]  ;;  %v16966_v63 = vld [vmem:[#allocation160_spill] sm:$0xff] }
 0x287   :  { %v9302_v39 = vpack.c.bf16 %v8891_v41, %v8890_v56  ;;  %v2626_v40 = vadd.f32 %v2594_v50, %v12492_v38  ;;  %v2628_v49 = vadd.f32 %v2596_v27, %v12494_v20  ;;  %v2630_v61 = vadd.f32 %v2598_v42, %v12496_v53  ;;  %v16960_v38 = vld [vmem:[#allocation157_spill] sm:$0xff]  ;;  %v16964_v3 = vld [vmem:[#allocation158_spill] sm:$0xff]  ;;  %v16968_v13 = vld [vmem:[#allocation164_spill] sm:$0xff] }
 0x288   :  { %v2632_v0 = vadd.f32 %v2600_v58, %v12498_v33  ;;  %v2634_v48 = vadd.f32 %v2602_v22, %v12500_v21  ;;  %v2844_v15 = vmul.f32 %v16957_v54, %v16956_v57  ;;  %v2846_v43 = vmul.f32 %v16958_v45, %v16956_v57  ;;  %v16961_v20 = vld [vmem:[#allocation153_spill] sm:$0xff]  ;;  %v16962_v33 = vld [vmem:[#allocation155_spill] sm:$0xff]  ;;  %v16963_v21 = vld [vmem:[#allocation156_spill] sm:$0xff] }
 0x289   :  { %9303 = vmatprep.subr.bf16.mxu0 %v9302_v39  ;;  %v2848_v34 = vmul.f32 %v16959_v19, %v16956_v57  ;;  %v2850_v55 = vmul.f32 %v16960_v38, %v16956_v57  ;;  %v2852_v53 = vmul.f32 %v16961_v20, %v16956_v57  ;;  %v2854_v50 = vmul.f32 %v16962_v33, %v16956_v57  ;;  %v16967_v32 = vld [vmem:[#allocation161_spill] sm:$0xff]  ;;  %v16969_v27 = vld [vmem:[#allocation159_spill] sm:$0xff] }
 0x28a   :  { %v2856_v42 = vmul.f32 %v16963_v21, %v16956_v57  ;;  %v2858_v22 = vmul.f32 %v16964_v3, %v16956_v57  ;;  %v2860_v31 = vmul.f32 %v16965_v26, %v16956_v57  ;;  %v2862_v58 = vmul.f32 %v16966_v63, %v16956_v57  ;;  %v16971_v41 = vld [vmem:[#allocation163_spill] sm:$0xff]  ;;  %v16972_v54 = vld [vmem:[#allocation165_spill] sm:$0xff] }
 0x28b   :  { %v2864_v25 = vmul.f32 %v16967_v32, %v16956_v57  ;;  %v2866_v30 = vmul.f32 %v16968_v13, %v16956_v57  ;;  %v2868_v14 = vmul.f32 %v16969_v27, %v16956_v57  ;;  %v2870_v56 = vmul.f32 %v16970_v2, %v16956_v57 }
 0x28c   :  { %v2872_v39 = vmul.f32 %v16971_v41, %v16956_v57  ;;  %v2874_v45 = vmul.f32 %v16972_v54, %v16956_v57  ;;  %v2876_v19 = vadd.f32 %v2844_v15, %v2604_v44  ;;  %v2878_v38 = vadd.f32 %v2846_v43, %v2606_v9  ;;  %v16973_v41 = vld [vmem:[#allocation215_spill] sm:$0xff]  ;;  %v16975_v44 = vld [vmem:[#allocation122_spill] sm:$0xff]  ;;  %v16984_v15 = vld [vmem:[#allocation208_spill] sm:$0xff] }
 0x28d   :  { %v2880_v20 = vadd.f32 %v2848_v34, %v2608_v28  ;;  %v2882_v33 = vadd.f32 %v2850_v55, %v2610_v7  ;;  %v2884_v21 = vadd.f32 %v2852_v53, %v2612_v60  ;;  %v2886_v3 = vadd.f32 %v2854_v50, %v2614_v4  ;;  %v16976_v28 = vld [vmem:[#allocation124_spill] sm:$0xff]  ;;  %v16977_v60 = vld [vmem:[#allocation126_spill] sm:$0xff]  ;;  %v16986_v53 = vld [vmem:[#allocation209_spill] sm:$0xff] }
 0x28e   :  { %v2888_v26 = vadd.f32 %v2856_v42, %v2616_v12  ;;  %v2890_v63 = vadd.f32 %v2858_v22, %v2618_v16  ;;  %v2892_v32 = vadd.f32 %v2860_v31, %v2620_v37  ;;  %v2894_v13 = vadd.f32 %v2862_v58, %v2622_v6  ;;  %v16978_v12 = vld [vmem:[#allocation123_spill] sm:$0xff]  ;;  %v16979_v37 = vld [vmem:[#allocation125_spill] sm:$0xff]  ;;  %v16985_v34 = vld [vmem:[#allocation210_spill] sm:$0xff] }
 0x28f   :  { %v2896_v27 = vadd.f32 %v2864_v25, %v2624_v36  ;;  %v2898_v8 = vadd.f32 %v2866_v30, %v2626_v40  ;;  %v2900_v52 = vadd.f32 %v2868_v14, %v2628_v49  ;;  %v2902_v2 = vadd.f32 %v2870_v56, %v2630_v61  ;;  %v16980_v36 = vld [vmem:[#allocation127_spill] sm:$0xff]  ;;  %v16982_v61 = vld [vmem:[#allocation205_spill] sm:$0xff]  ;;  %v16988_v31 = vld [vmem:[#allocation212_spill] sm:$0xff] }
 0x290   :  { %v2904_v1 = vadd.f32 %v2872_v39, %v2632_v0  ;;  %v2906_v59 = vadd.f32 %v2874_v45, %v2634_v48  ;;  %v3116_v24 = vmul.f32 %v16974_v17, %v16973_v41  ;;  %v3118_v9 = vmul.f32 %v16975_v44, %v16973_v41  ;;  %v16981_v17 = vld [vmem:[#allocation128_spill] sm:$0xff]  ;;  %v16983_v48 = vld [vmem:[#allocation207_spill] sm:$0xff]  ;;  %v16989_v25 = vld [vmem:[#allocation213_spill] sm:$0xff] }
 0x291   :  { %v3120_v7 = vmul.f32 %v16976_v28, %v16973_v41  ;;  %v3122_v4 = vmul.f32 %v16977_v60, %v16973_v41  ;;  %v3124_v16 = vmul.f32 %v16978_v12, %v16973_v41  ;;  %v3126_v6 = vmul.f32 %v16979_v37, %v16973_v41  ;;  %v16987_v42 = vld [vmem:[#allocation211_spill] sm:$0xff] }
 0x292   :  { %v3128_v40 = vmul.f32 %v16980_v36, %v16973_v41  ;;  %v3130_v49 = vmul.f32 %v16981_v17, %v16973_v41  ;;  %v3132_v0 = vmul.f32 %v16982_v61, %v16973_v41  ;;  %v3134_v57 = vmul.f32 %v16983_v48, %v16973_v41 }
 0x293   :  { %v3136_v43 = vmul.f32 %v16984_v15, %v16973_v41  ;;  %v3138_v55 = vmul.f32 %v16985_v34, %v16973_v41  ;;  %v3140_v50 = vmul.f32 %v16986_v53, %v16973_v41  ;;  %v3142_v22 = vmul.f32 %v16987_v42, %v16973_v41  ;;  %v16990_v53 = vld [vmem:[#allocation256_spill] sm:$0xff] }
 0x294   :  { %v3144_v58 = vmul.f32 %v16988_v31, %v16973_v41  ;;  %v3146_v30 = vmul.f32 %v16989_v25, %v16973_v41  ;;  %v3148_v14 = vadd.f32 %v3116_v24, %v2876_v19  ;;  %v3150_v56 = vadd.f32 %v3118_v9, %v2878_v38  ;;  %v16991_v42 = vld [vmem:[#allocation172_spill] sm:$0xff]  ;;  %v16992_v24 = vld [vmem:[#allocation173_spill] sm:$0xff]  ;;  %v16993_v38 = vld [vmem:[#allocation174_spill] sm:$0xff] }
 0x295   :  { %v3152_v39 = vadd.f32 %v3120_v7, %v2880_v20  ;;  %v3154_v54 = vadd.f32 %v3122_v4, %v2882_v33  ;;  %v3156_v45 = vadd.f32 %v3124_v16, %v2884_v21  ;;  %v3158_v44 = vadd.f32 %v3126_v6, %v2886_v3  ;;  %v16994_v33 = vld [vmem:[#allocation176_spill] sm:$0xff]  ;;  %v16995_v3 = vld [vmem:[#allocation175_spill] sm:$0xff]  ;;  %v17001_v9 = vld [vmem:[#allocation182_spill] sm:$0xff] }
 0x296   :  { %v3160_v28 = vadd.f32 %v3128_v40, %v2888_v26  ;;  %v3162_v60 = vadd.f32 %v3130_v49, %v2890_v63  ;;  %v3164_v12 = vadd.f32 %v3132_v0, %v2892_v32  ;;  %v3166_v37 = vadd.f32 %v3134_v57, %v2894_v13  ;;  %v16998_v63 = vld [vmem:[#allocation179_spill] sm:$0xff]  ;;  %v16999_v13 = vld [vmem:[#allocation180_spill] sm:$0xff]  ;;  %v17002_v4 = vld [vmem:[#allocation185_spill] sm:$0xff] }
 0x297   :  { %v3168_v36 = vadd.f32 %v3136_v43, %v2896_v27  ;;  %v3170_v17 = vadd.f32 %v3138_v55, %v2898_v8  ;;  %v3172_v61 = vadd.f32 %v3140_v50, %v2900_v52  ;;  %v3174_v48 = vadd.f32 %v3142_v22, %v2902_v2  ;;  %v16996_v52 = vld [vmem:[#allocation177_spill] sm:$0xff]  ;;  %v17000_v2 = vld [vmem:[#allocation20_spill] sm:$0xff]  ;;  %v17004_v49 = vld [vmem:[#allocation183_spill] sm:$0xff] }
 0x298   :  { %v3176_v15 = vadd.f32 %v3144_v58, %v2904_v1  ;;  %v3178_v34 = vadd.f32 %v3146_v30, %v2906_v59  ;;  %v3388_v31 = vmul.f32 %v16991_v42, %v16990_v53  ;;  %v3390_v19 = vmul.f32 %v16992_v24, %v16990_v53  ;;  %v16997_v59 = vld [vmem:[#allocation178_spill] sm:$0xff]  ;;  %v17003_v6 = vld [vmem:[#allocation181_spill] sm:$0xff]  ;;  %v17005_v57 = vld [vmem:[#allocation184_spill] sm:$0xff] }
 0x299   :  { %v3392_v20 = vmul.f32 %v16993_v38, %v16990_v53  ;;  %v3394_v21 = vmul.f32 %v16994_v33, %v16990_v53  ;;  %v3396_v26 = vmul.f32 %v16995_v3, %v16990_v53  ;;  %v3398_v8 = vmul.f32 %v16996_v52, %v16990_v53  ;;  %v17006_v55 = vld [vmem:[#allocation186_spill] sm:$0xff] }
 0x29a   :  { %v3400_v1 = vmul.f32 %v16997_v59, %v16990_v53  ;;  %v3402_v32 = vmul.f32 %v16998_v63, %v16990_v53  ;;  %v3404_v27 = vmul.f32 %v16999_v13, %v16990_v53  ;;  %v3406_v41 = vmul.f32 %v17000_v2, %v16990_v53 }
 0x29b   :  { %v3408_v7 = vmul.f32 %v17001_v9, %v16990_v53  ;;  %v3410_v16 = vmul.f32 %v17002_v4, %v16990_v53  ;;  %v3412_v40 = vmul.f32 %v17003_v6, %v16990_v53  ;;  %v3414_v0 = vmul.f32 %v17004_v49, %v16990_v53  ;;  %v17007_v6 = vld [vmem:[#allocation276_spill] sm:$0xff]  ;;  %v17008_v49 = vld [vmem:[#allocation145_spill] sm:$0xff] }
 0x29c   :  { %v3416_v43 = vmul.f32 %v17005_v57, %v16990_v53  ;;  %v3418_v50 = vmul.f32 %v17006_v55, %v16990_v53  ;;  %v3420_v22 = vadd.f32 %v3388_v31, %v3148_v14  ;;  %v3422_v58 = vadd.f32 %v3390_v19, %v3150_v56  ;;  %v17009_v14 = vld [vmem:[#allocation146_spill] sm:$0xff]  ;;  %v17017_v53 = vld [vmem:[#allocation249_spill] sm:$0xff]  ;;  %v17018_v19 = vld [vmem:[#allocation252_spill] sm:$0xff] }
 0x29d   :  { %v3424_v25 = vadd.f32 %v3392_v20, %v3152_v39  ;;  %v3426_v30 = vadd.f32 %v3394_v21, %v3154_v54  ;;  %v3428_v42 = vadd.f32 %v3396_v26, %v3156_v45  ;;  %v3430_v24 = vadd.f32 %v3398_v8, %v3158_v44  ;;  %v17010_v39 = vld [vmem:[#allocation9_spill] sm:$0xff]  ;;  %v17020_v8 = vld [vmem:[#allocation250_spill] sm:$0xff] }
 0x29e   :  { %v3432_v38 = vadd.f32 %v3400_v1, %v3160_v28  ;;  %v3434_v33 = vadd.f32 %v3402_v32, %v3162_v60  ;;  %v3436_v3 = vadd.f32 %v3404_v27, %v3164_v12  ;;  %v3438_v52 = vadd.f32 %v3406_v41, %v3166_v37  ;;  %v17011_v45 = vld [vmem:[#allocation149_spill] sm:$0xff]  ;;  %v17012_v28 = vld [vmem:[#allocation147_spill] sm:$0xff]  ;;  %v17013_v12 = vld [vmem:[#allocation148_spill] sm:$0xff] }
 0x29f   :  { %v3440_v59 = vadd.f32 %v3408_v7, %v3168_v36  ;;  %v3442_v63 = vadd.f32 %v3410_v16, %v3170_v17  ;;  %v3444_v13 = vadd.f32 %v3412_v40, %v3172_v61  ;;  %v3446_v2 = vadd.f32 %v3414_v0, %v3174_v48  ;;  %v17014_v36 = vld [vmem:[#allocation150_spill] sm:$0xff]  ;;  %v17015_v61 = vld [vmem:[#allocation151_spill] sm:$0xff]  ;;  %v17019_v21 = vld [vmem:[#allocation253_spill] sm:$0xff] }
 0x2a0   :  { %v3448_v9 = vadd.f32 %v3416_v43, %v3176_v15  ;;  %v3450_v4 = vadd.f32 %v3418_v50, %v3178_v34  ;;  %v3660_v57 = vmul.f32 %v17008_v49, %v17007_v6  ;;  %v3662_v56 = vmul.f32 %v17009_v14, %v17007_v6  ;;  %v17016_v15 = vld [vmem:[#allocation248_spill] sm:$0xff]  ;;  %v17021_v32 = vld [vmem:[#allocation251_spill] sm:$0xff]  ;;  %v17022_v41 = vld [vmem:[#allocation254_spill] sm:$0xff] }
 0x2a1   :  { %v3664_v54 = vmul.f32 %v17010_v39, %v17007_v6  ;;  %v3666_v44 = vmul.f32 %v17011_v45, %v17007_v6  ;;  %v3668_v60 = vmul.f32 %v17012_v28, %v17007_v6  ;;  %v3670_v37 = vmul.f32 %v17013_v12, %v17007_v6  ;;  %v17023_v16 = vld [vmem:[#allocation255_spill] sm:$0xff] }
 0x2a2   :  { %v3672_v17 = vmul.f32 %v17014_v36, %v17007_v6  ;;  %v3674_v48 = vmul.f32 %v17015_v61, %v17007_v6  ;;  %v3676_v34 = vmul.f32 %v17016_v15, %v17007_v6  ;;  %v3678_v31 = vmul.f32 %v17017_v53, %v17007_v6 }
 0x2a3   :  { %v3680_v20 = vmul.f32 %v17018_v19, %v17007_v6  ;;  %v3682_v26 = vmul.f32 %v17019_v21, %v17007_v6  ;;  %v3684_v1 = vmul.f32 %v17020_v8, %v17007_v6  ;;  %v3686_v27 = vmul.f32 %v17021_v32, %v17007_v6  ;;  %v17024_v8 = vld [vmem:[#allocation285_spill] sm:$0xff]  ;;  %v17025_v32 = vld [vmem:[#allocation198_spill] sm:$0xff] }
 0x2a4   :  { %v3688_v7 = vmul.f32 %v17022_v41, %v17007_v6  ;;  %v3690_v40 = vmul.f32 %v17023_v16, %v17007_v6  ;;  %v3692_v0 = vadd.f32 %v3660_v57, %v3420_v22  ;;  %v3694_v43 = vadd.f32 %v3662_v56, %v3422_v58  ;;  %v17026_v22 = vld [vmem:[#allocation199_spill] sm:$0xff]  ;;  %v17034_v6 = vld [vmem:[#allocation234_spill] sm:$0xff]  ;;  %v17035_v56 = vld [vmem:[#allocation236_spill] sm:$0xff] }
 0x2a5   :  { %v3696_v55 = vadd.f32 %v3664_v54, %v3424_v25  ;;  %v3698_v50 = vadd.f32 %v3666_v44, %v3426_v30  ;;  %v3700_v49 = vadd.f32 %v3668_v60, %v3428_v42  ;;  %v3702_v14 = vadd.f32 %v3670_v37, %v3430_v24  ;;  %v17027_v25 = vld [vmem:[#allocation200_spill] sm:$0xff]  ;;  %v17028_v42 = vld [vmem:[#allocation202_spill] sm:$0xff]  ;;  %v17037_v37 = vld [vmem:[#allocation233_spill] sm:$0xff] }
 0x2a6   :  { %v3704_v39 = vadd.f32 %v3672_v17, %v3432_v38  ;;  %v3706_v45 = vadd.f32 %v3674_v48, %v3434_v33  ;;  %v3708_v28 = vadd.f32 %v3676_v34, %v3436_v3  ;;  %v3710_v12 = vadd.f32 %v3678_v31, %v3438_v52  ;;  %v17029_v38 = vld [vmem:[#allocation201_spill] sm:$0xff]  ;;  %v17030_v3 = vld [vmem:[#allocation203_spill] sm:$0xff]  ;;  %v17036_v44 = vld [vmem:[#allocation238_spill] sm:$0xff] }
 0x2a7   :  { %v3712_v36 = vadd.f32 %v3680_v20, %v3440_v59  ;;  %v3714_v61 = vadd.f32 %v3682_v26, %v3442_v63  ;;  %v3716_v15 = vadd.f32 %v3684_v1, %v3444_v13  ;;  %v3718_v53 = vadd.f32 %v3686_v27, %v3446_v2  ;;  %v17031_v59 = vld [vmem:[#allocation204_spill] sm:$0xff]  ;;  %v17032_v13 = vld [vmem:[#allocation206_spill] sm:$0xff]  ;;  %v17038_v48 = vld [vmem:[#allocation235_spill] sm:$0xff] }
 0x2a8   :  { %v3720_v19 = vadd.f32 %v3688_v7, %v3448_v9  ;;  %v3722_v21 = vadd.f32 %v3690_v40, %v3450_v4  ;;  %v3932_v41 = vmul.f32 %v17025_v32, %v17024_v8  ;;  %v3934_v58 = vmul.f32 %v17026_v22, %v17024_v8  ;;  %v17033_v9 = vld [vmem:[#allocation232_spill] sm:$0xff]  ;;  %v17039_v31 = vld [vmem:[#allocation237_spill] sm:$0xff]  ;;  %v17040_v26 = vld [vmem:[#allocation239_spill] sm:$0xff] }
 0x2a9   :  { %v3936_v30 = vmul.f32 %v17027_v25, %v17024_v8  ;;  %v3938_v24 = vmul.f32 %v17028_v42, %v17024_v8  ;;  %v3940_v33 = vmul.f32 %v17029_v38, %v17024_v8  ;;  %v3942_v52 = vmul.f32 %v17030_v3, %v17024_v8 }
 0x2aa   :  { %v3944_v63 = vmul.f32 %v17031_v59, %v17024_v8  ;;  %v3946_v2 = vmul.f32 %v17032_v13, %v17024_v8  ;;  %v3948_v4 = vmul.f32 %v17033_v9, %v17024_v8  ;;  %v3950_v57 = vmul.f32 %v17034_v6, %v17024_v8 }
 0x2ab   :  { %v3952_v54 = vmul.f32 %v17035_v56, %v17024_v8  ;;  %v3954_v60 = vmul.f32 %v17036_v44, %v17024_v8  ;;  %v3956_v17 = vmul.f32 %v17037_v37, %v17024_v8  ;;  %v3958_v34 = vmul.f32 %v17038_v48, %v17024_v8  ;;  %v17041_v37 = vld [vmem:[#allocation288_spill] sm:$0xff] }
 0x2ac   :  { %v3960_v20 = vmul.f32 %v17039_v31, %v17024_v8  ;;  %v3962_v1 = vmul.f32 %v17040_v26, %v17024_v8  ;;  %v3964_v27 = vadd.f32 %v3932_v41, %v3692_v0  ;;  %v3966_v7 = vadd.f32 %v3934_v58, %v3694_v43  ;;  %v17042_v48 = vld [vmem:[#allocation240_spill] sm:$0xff]  ;;  %v17043_v0 = vld [vmem:[#allocation241_spill] sm:$0xff]  ;;  %v17051_v8 = vld [vmem:[#allocation258_spill] sm:$0xff] }
 0x2ad   :  { %v3968_v16 = vadd.f32 %v3936_v30, %v3696_v55  ;;  %v3970_v40 = vadd.f32 %v3938_v24, %v3698_v50  ;;  %v3972_v32 = vadd.f32 %v3940_v33, %v3700_v49  ;;  %v3974_v22 = vadd.f32 %v3942_v52, %v3702_v14  ;;  %v17044_v55 = vld [vmem:[#allocation242_spill] sm:$0xff]  ;;  %v17045_v49 = vld [vmem:[#allocation244_spill] sm:$0xff]  ;;  %v17052_v58 = vld [vmem:[#allocation259_spill] sm:$0xff] }
 0x2ae   :  { %v3976_v25 = vadd.f32 %v3944_v63, %v3704_v39  ;;  %v3978_v42 = vadd.f32 %v3946_v2, %v3706_v45  ;;  %v3980_v38 = vadd.f32 %v3948_v4, %v3708_v28  ;;  %v3982_v3 = vadd.f32 %v3950_v57, %v3710_v12  ;;  %v17046_v39 = vld [vmem:[#allocation243_spill] sm:$0xff]  ;;  %v17047_v28 = vld [vmem:[#allocation245_spill] sm:$0xff]  ;;  %v17054_v52 = vld [vmem:[#allocation260_spill] sm:$0xff] }
 0x2af   :  { %v3984_v59 = vadd.f32 %v3952_v54, %v3712_v36  ;;  %v3986_v13 = vadd.f32 %v3954_v60, %v3714_v61  ;;  %v3988_v9 = vadd.f32 %v3956_v17, %v3716_v15  ;;  %v3990_v6 = vadd.f32 %v3958_v34, %v3718_v53  ;;  %v17048_v36 = vld [vmem:[#allocation246_spill] sm:$0xff]  ;;  %v17049_v15 = vld [vmem:[#allocation247_spill] sm:$0xff]  ;;  %v17053_v24 = vld [vmem:[#allocation261_spill] sm:$0xff] }
 0x2b0   :  { %v3992_v56 = vadd.f32 %v3960_v20, %v3720_v19  ;;  %v3994_v44 = vadd.f32 %v3962_v1, %v3722_v21  ;;  %v4204_v31 = vmul.f32 %v17042_v48, %v17041_v37  ;;  %v4206_v43 = vmul.f32 %v17043_v0, %v17041_v37  ;;  %v17050_v19 = vld [vmem:[#allocation257_spill] sm:$0xff]  ;;  %v17055_v2 = vld [vmem:[#allocation262_spill] sm:$0xff]  ;;  %v17056_v57 = vld [vmem:[#allocation263_spill] sm:$0xff] }
 0x2b1   :  { %v4208_v50 = vmul.f32 %v17044_v55, %v17041_v37  ;;  %v4210_v14 = vmul.f32 %v17045_v49, %v17041_v37  ;;  %v4212_v45 = vmul.f32 %v17046_v39, %v17041_v37  ;;  %v4214_v12 = vmul.f32 %v17047_v28, %v17041_v37  ;;  %v17057_v60 = vld [vmem:[#allocation265_spill] sm:$0xff] }
 0x2b2   :  { %v4216_v61 = vmul.f32 %v17048_v36, %v17041_v37  ;;  %v4218_v53 = vmul.f32 %v17049_v15, %v17041_v37  ;;  %v4220_v21 = vmul.f32 %v17050_v19, %v17041_v37  ;;  %v4222_v41 = vmul.f32 %v17051_v8, %v17041_v37 }
 0x2b3   :  { %v4224_v30 = vmul.f32 %v17052_v58, %v17041_v37  ;;  %v4226_v33 = vmul.f32 %v17053_v24, %v17041_v37  ;;  %v4228_v63 = vmul.f32 %v17054_v52, %v17041_v37  ;;  %v4230_v4 = vmul.f32 %v17055_v2, %v17041_v37  ;;  %v17058_v52 = vld [vmem:[#allocation290_spill] sm:$0xff]  ;;  %v17059_v2 = vld [vmem:[#allocation216_spill] sm:$0xff] }
 0x2b4   :  { %v4232_v54 = vmul.f32 %v17056_v57, %v17041_v37  ;;  %v4234_v17 = vmul.f32 %v17057_v60, %v17041_v37  ;;  %v4236_v34 = vadd.f32 %v4204_v31, %v3964_v27  ;;  %v4238_v20 = vadd.f32 %v4206_v43, %v3966_v7  ;;  %v17060_v27 = vld [vmem:[#allocation217_spill] sm:$0xff]  ;;  %v17068_v37 = vld [vmem:[#allocation267_spill] sm:$0xff]  ;;  %v17069_v43 = vld [vmem:[#allocation268_spill] sm:$0xff] }
 0x2b5   :  { %v4240_v26 = vadd.f32 %v4208_v50, %v3968_v16  ;;  %v4242_v1 = vadd.f32 %v4210_v14, %v3970_v40  ;;  %v4244_v48 = vadd.f32 %v4212_v45, %v3972_v32  ;;  %v4246_v0 = vadd.f32 %v4214_v12, %v3974_v22  ;;  %v17061_v16 = vld [vmem:[#allocation218_spill] sm:$0xff]  ;;  %v17062_v32 = vld [vmem:[#allocation220_spill] sm:$0xff]  ;;  %v17071_v12 = vld [vmem:[#allocation269_spill] sm:$0xff] }
 0x2b6   :  { %v4248_v55 = vadd.f32 %v4216_v61, %v3976_v25  ;;  %v4250_v49 = vadd.f32 %v4218_v53, %v3978_v42  ;;  %v4252_v39 = vadd.f32 %v4220_v21, %v3980_v38  ;;  %v4254_v28 = vadd.f32 %v4222_v41, %v3982_v3  ;;  %v17063_v25 = vld [vmem:[#allocation219_spill] sm:$0xff]  ;;  %v17064_v38 = vld [vmem:[#allocation221_spill] sm:$0xff]  ;;  %v17070_v14 = vld [vmem:[#allocation270_spill] sm:$0xff] }
 0x2b7   :  { %v4256_v36 = vadd.f32 %v4224_v30, %v3984_v59  ;;  %v4258_v15 = vadd.f32 %v4226_v33, %v3986_v13  ;;  %v4260_v19 = vadd.f32 %v4228_v63, %v3988_v9  ;;  %v4262_v8 = vadd.f32 %v4230_v4, %v3990_v6  ;;  %v17065_v59 = vld [vmem:[#allocation222_spill] sm:$0xff]  ;;  %v17066_v9 = vld [vmem:[#allocation223_spill] sm:$0xff]  ;;  %v17073_v41 = vld [vmem:[#allocation272_spill] sm:$0xff] }
 0x2b8   :  { %v4264_v58 = vadd.f32 %v4232_v54, %v3992_v56  ;;  %v4266_v24 = vadd.f32 %v4234_v17, %v3994_v44  ;;  %v4476_v57 = vmul.f32 %v17059_v2, %v17058_v52  ;;  %v4478_v7 = vmul.f32 %v17060_v27, %v17058_v52  ;;  %v17067_v56 = vld [vmem:[#allocation266_spill] sm:$0xff]  ;;  %v17072_v53 = vld [vmem:[#allocation271_spill] sm:$0xff]  ;;  %v17074_v33 = vld [vmem:[#allocation273_spill] sm:$0xff] }
 0x2b9   :  { %v4480_v40 = vmul.f32 %v17061_v16, %v17058_v52  ;;  %v4482_v22 = vmul.f32 %v17062_v32, %v17058_v52  ;;  %v4484_v42 = vmul.f32 %v17063_v25, %v17058_v52  ;;  %v4486_v3 = vmul.f32 %v17064_v38, %v17058_v52 }
 0x2ba   :  { %v4488_v13 = vmul.f32 %v17065_v59, %v17058_v52  ;;  %v4490_v6 = vmul.f32 %v17066_v9, %v17058_v52  ;;  %v4492_v44 = vmul.f32 %v17067_v56, %v17058_v52  ;;  %v4494_v31 = vmul.f32 %v17068_v37, %v17058_v52 }
 0x2bb   :  { %v4496_v50 = vmul.f32 %v17069_v43, %v17058_v52  ;;  %v4498_v45 = vmul.f32 %v17070_v14, %v17058_v52  ;;  %v4500_v61 = vmul.f32 %v17071_v12, %v17058_v52  ;;  %v4502_v21 = vmul.f32 %v17072_v53, %v17058_v52  ;;  %v17075_v12 = vld [vmem:[#allocation283_spill] sm:$0xff]  ;;  %v17076_v53 = vld [vmem:[#allocation224_spill] sm:$0xff] }
 0x2bc   :  { %v4504_v30 = vmul.f32 %v17073_v41, %v17058_v52  ;;  %v4506_v63 = vmul.f32 %v17074_v33, %v17058_v52  ;;  %v4508_v4 = vadd.f32 %v4476_v57, %v4236_v34  ;;  %v4510_v54 = vadd.f32 %v4478_v7, %v4238_v20  ;;  %v17077_v34 = vld [vmem:[#allocation226_spill] sm:$0xff]  ;;  %v17085_v52 = vld [vmem:[#allocation277_spill] sm:$0xff] }
 0x2bd   :  { %v4512_v60 = vadd.f32 %v4480_v40, %v4240_v26  ;;  %v4514_v17 = vadd.f32 %v4482_v22, %v4242_v1  ;;  %v4516_v2 = vadd.f32 %v4484_v42, %v4244_v48  ;;  %v4518_v27 = vadd.f32 %v4486_v3, %v4246_v0  ;;  %v17078_v26 = vld [vmem:[#allocation227_spill] sm:$0xff]  ;;  %v17079_v48 = vld [vmem:[#allocation230_spill] sm:$0xff]  ;;  %v17087_v22 = vld [vmem:[#allocation281_spill] sm:$0xff] }
 0x2be   :  { %v4520_v16 = vadd.f32 %v4488_v13, %v4248_v55  ;;  %v4522_v32 = vadd.f32 %v4490_v6, %v4250_v49  ;;  %v4524_v25 = vadd.f32 %v4492_v44, %v4252_v39  ;;  %v4526_v38 = vadd.f32 %v4494_v31, %v4254_v28  ;;  %v17080_v55 = vld [vmem:[#allocation225_spill] sm:$0xff]  ;;  %v17081_v39 = vld [vmem:[#allocation228_spill] sm:$0xff]  ;;  %v17086_v7 = vld [vmem:[#allocation278_spill] sm:$0xff] }
 0x2bf   :  { %v4528_v59 = vadd.f32 %v4496_v50, %v4256_v36  ;;  %v4530_v9 = vadd.f32 %v4498_v45, %v4258_v15  ;;  %v4532_v56 = vadd.f32 %v4500_v61, %v4260_v19  ;;  %v4534_v37 = vadd.f32 %v4502_v21, %v4262_v8  ;;  %v17082_v36 = vld [vmem:[#allocation229_spill] sm:$0xff]  ;;  %v17083_v19 = vld [vmem:[#allocation231_spill] sm:$0xff]  ;;  %v17090_v31 = vld [vmem:[#allocation280_spill] sm:$0xff] }
 0x2c0   :  { %v4536_v43 = vadd.f32 %v4504_v30, %v4264_v58  ;;  %v4538_v14 = vadd.f32 %v4506_v63, %v4266_v24  ;;  %v4748_v41 = vmul.f32 %v17076_v53, %v17075_v12  ;;  %v4750_v20 = vmul.f32 %v17077_v34, %v17075_v12  ;;  %v17084_v58 = vld [vmem:[#allocation274_spill] sm:$0xff]  ;;  %v17088_v3 = vld [vmem:[#allocation275_spill] sm:$0xff] }
 0x2c1   :  { %v4752_v1 = vmul.f32 %v17078_v26, %v17075_v12  ;;  %v4754_v0 = vmul.f32 %v17079_v48, %v17075_v12  ;;  %v4756_v49 = vmul.f32 %v17080_v55, %v17075_v12  ;;  %v4758_v28 = vmul.f32 %v17081_v39, %v17075_v12  ;;  %v17089_v6 = vld [vmem:[#allocation279_spill] sm:$0xff]  ;;  %v17091_v45 = vld [vmem:[#allocation282_spill] sm:$0xff] }
 0x2c2   :  { %v4760_v15 = vmul.f32 %v17082_v36, %v17075_v12  ;;  %v4762_v8 = vmul.f32 %v17083_v19, %v17075_v12  ;;  %v4764_v24 = vmul.f32 %v17084_v58, %v17075_v12  ;;  %v4766_v57 = vmul.f32 %v17085_v52, %v17075_v12 }
 0x2c3   :  { %v4768_v40 = vmul.f32 %v17086_v7, %v17075_v12  ;;  %v4770_v42 = vmul.f32 %v17087_v22, %v17075_v12  ;;  %v4772_v13 = vmul.f32 %v17088_v3, %v17075_v12  ;;  %v4774_v44 = vmul.f32 %v17089_v6, %v17075_v12 }
 0x2c4   :  { %v4776_v50 = vmul.f32 %v17090_v31, %v17075_v12  ;;  %v4778_v61 = vmul.f32 %v17091_v45, %v17075_v12  ;;  %v4780_v21 = vadd.f32 %v4748_v41, %v4508_v4  ;;  %v4782_v30 = vadd.f32 %v4750_v20, %v4510_v54 }
 0x2c5   :  { %v4784_v33 = vadd.f32 %v4752_v1, %v4512_v60  ;;  %v4786_v63 = vadd.f32 %v4754_v0, %v4514_v17  ;;  %v4788_v53 = vadd.f32 %v4756_v49, %v4516_v2  ;;  %v4790_v34 = vadd.f32 %v4758_v28, %v4518_v27  ;;  %v17094_v28 = vld [vmem:[#allocation37_spill] sm:$0xff] }
 0x2c6   :  { %v4792_v26 = vadd.f32 %v4760_v15, %v4520_v16  ;;  %v4794_v48 = vadd.f32 %v4762_v8, %v4522_v32  ;;  %v4796_v55 = vadd.f32 %v4764_v24, %v4524_v25  ;;  %v4798_v39 = vadd.f32 %v4766_v57, %v4526_v38  ;;  %v17096_v57 = vld [vmem:[#allocation45_spill] sm:$0xff] }
 0x2c7   :  { %v4800_v36 = vadd.f32 %v4768_v40, %v4528_v59  ;;  %v4802_v19 = vadd.f32 %v4770_v42, %v4530_v9  ;;  %v4804_v58 = vadd.f32 %v4772_v13, %v4532_v56  ;;  %v4806_v52 = vadd.f32 %v4774_v44, %v4534_v37 }
 0x2c8   :  { %v4808_v7 = vadd.f32 %v4776_v50, %v4536_v43  ;;  %v4810_v22 = vadd.f32 %v4778_v61, %v4538_v14  ;;  %v13166_v3 = vmul.f32 0.70710677, %v4780_v21  ;;  %v13168_v6 = vmul.f32 0.70710677, %v4782_v30 }
 0x2c9   :  { %v13170_v4 = vmul.f32 0.70710677, %v4784_v33  ;;  %v13172_v54 = vmul.f32 0.70710677, %v4786_v63  ;;  %v17092_v60 = vcombine.high %v12586_v62, %v12586_v62  ;;  %v13180_v2 = vmul.f32 0.70710677, %v4788_v53 }
 0x2ca   :  { %v13182_v27 = vmul.f32 0.70710677, %v4790_v34  ;;  %v13184_v16 = vmul.f32 0.70710677, %v4792_v26  ;;  %v17093_v32 = vcombine.high %v12592_v46, %v12592_v46  ;;  %v13192_v38 = vmul.f32 0.70710677, %v4794_v48 }
 0x2cb   :  { %v13178_v17 = vrot.slane %v17092_v60, %v16886_v11  ;;  %v13194_v59 = vmul.f32 0.70710677, %v4796_v55  ;;  %v13196_v9 = vmul.f32 0.70710677, %v4798_v39  ;;  %v4844_v62 = vmax.f32 %v13166_v3, %v13170_v4  ;;  %v17103_v63 = vld [vmem:[#allocation299_spill] sm:$0xff]  ;;  %v17106_v60 = vld [vmem:[#allocation302_spill] sm:$0xff] }
 0x2cc   :  { %v13190_v25 = vrot.slane %v17093_v32, %v16886_v11  ;;  %v13200_v56 = vmul.f32 0.70710677, %v4800_v36  ;;  %v13202_v37 = vmul.f32 0.70710677, %v4802_v19  ;;  %v13204_v43 = vmul.f32 0.70710677, %v4804_v58 }
 0x2cd   :  { %v4845_v46 = vmax.f32 %v13168_v6, %v13172_v54  ;;  %v13208_v14 = vmul.f32 0.70710677, %v4806_v52  ;;  %v13210_v12 = vmul.f32 0.70710677, %v4808_v7  ;;  %v13212_v41 = vmul.f32 0.70710677, %v4810_v22 }
 0x2ce   :  { %v4846_v20 = vmax.f32 %v4844_v62, %v13180_v2  ;;  %v5173_v0 = vrot.slane %v13178_v17, %v16893_v23  ;;  %v5385_v49 = vrot.slane %v13190_v25, %v16893_v23  ;;  %v17095_v15 = vcombine.high %v17094_v28, %v17094_v28  ;;  %v17104_v19 = vld [vmem:[#allocation297_spill] sm:$0xff]  ;;  %v17107_v62 = vld [vmem:[#allocation307_spill] sm:$0xff] }
 0x2cf   :  { %v4847_v1 = vmax.f32 %v4845_v46, %v13182_v27  ;;  %v17097_v40 = vcombine.high %v17096_v57, %v17096_v57  ;;  %v17099_v13 = vcombine.high %v12658_v5, %v12658_v5  ;;  %v17101_v31 = vcombine.high %v12664_v18, %v12664_v18  ;;  %v17105_v52 = vld [vmem:[#allocation301_spill] sm:$0xff] }
 0x2d0   :  { %v13224_v8 = vrot.slane %v17095_v15, %v16886_v11  ;;  %v4848_v24 = vmax.f32 %v4846_v20, %v13184_v16  ;;  %v5232_v61 = vmul.f32 %v5173_v0, %v16894_v29  ;;  %v5233_v21 = vmul.f32 %v5173_v0, %v16895_v47 }
 0x2d1   :  { %v13231_v42 = vrot.slane %v17097_v40, %v16886_v11  ;;  %v13237_v44 = vrot.slane %v17099_v13, %v16886_v11  ;;  %v13243_v50 = vrot.slane %v17101_v31, %v16886_v11  ;;  %v4849_v45 = vmax.f32 %v4847_v1, %v13192_v38  ;;  %v17109_v40 = vld [vmem:[#allocation317_spill] sm:$0xff]  ;;  %v17110_v31 = vld [vmem:[#allocation51_spill] sm:$0xff] }
 0x2d2   :  { %v5444_v30 = vmul.f32 %v5385_v49, %v16896_v35  ;;  %v4850_v33 = vmax.f32 %v4848_v24, %v13194_v59  ;;  %v5445_v5 = vmul.f32 %v5385_v49, %v17103_v63  ;;  %v5629_v53 = vrot.slane %v13224_v8, %v16893_v23  ;;  %v17108_v24 = vld [vmem:[#allocation308_spill] sm:$0xff] }
 0x2d3   :  { %17098 = vst [vmem:[#allocation26_spill] sm:$0xff] %v13231_v42  ;;  %17100 = vst [vmem:[#allocation25_spill] sm:$0xff] %v13237_v44  ;;  %v5873_v18 = vrot.slane %v13231_v42, %v16893_v23  ;;  %v4851_v34 = vmax.f32 %v4849_v45, %v13196_v9  ;;  %v6117_v48 = vrot.slane %v13237_v44, %v16893_v23 }
 0x2d4   :  { %17102 = vst [vmem:[#allocation27_spill] sm:$0xff] %v13243_v50  ;;  %v5476_v26 = vadd.f32 %v5444_v30, %v5232_v61  ;;  %v6361_v55 = vrot.slane %v13243_v50, %v16893_v23  ;;  %v4852_v39 = vmax.f32 %v4850_v33, %v13200_v56  ;;  %v5477_v36 = vadd.f32 %v5445_v5, %v5233_v21  ;;  %v17113_v5 = vld [vmem:[#allocation79_spill] sm:$0xff] }
 0x2d5   :  { %v5688_v58 = vmul.f32 %v5629_v53, %v17104_v19  ;;  %v5689_v7 = vmul.f32 %v5629_v53, %v17105_v52  ;;  %v4853_v22 = vmax.f32 %v4851_v34, %v13202_v37  ;;  %v5932_v32 = vmul.f32 %v5873_v18, %v17106_v60 }
 0x2d6   :  { %v5933_v46 = vmul.f32 %v5873_v18, %v17107_v62  ;;  %v6176_v20 = vmul.f32 %v6117_v48, %v16906_v51  ;;  %v4854_v1 = vmax.f32 %v4852_v39, %v13204_v43  ;;  %v6177_v28 = vmul.f32 %v6117_v48, %v16907_v10  ;;  %v17116_v48 = vld [vmem:[#allocation81_spill] sm:$0xff] }
 0x2d7   :  { %v5720_v0 = vadd.f32 %v5688_v58, %v5476_v26  ;;  %v5721_v49 = vadd.f32 %v5689_v7, %v5477_v36  ;;  %v4855_v15 = vmax.f32 %v4853_v22, %v13208_v14  ;;  %v6420_v57 = vmul.f32 %v6361_v55, %v17108_v24  ;;  %v17119_v36 = vld [vmem:[#allocation83_spill] sm:$0xff] }
 0x2d8   :  { %v6421_v13 = vmul.f32 %v6361_v55, %v17109_v40  ;;  %v17111_v45 = vcombine.high %v17110_v31, %v17110_v31  ;;  %v4856_v21 = vmax.f32 %v4854_v1, %v13210_v12  ;;  %v17114_v53 = vcombine.high %v17113_v5, %v17113_v5  ;;  %v17122_v1 = vld [vmem:[#allocation85_spill] sm:$0xff]  ;;  %v17125_v31 = vld [vmem:[#allocation312_spill] sm:$0xff]  ;;  %v17126_v5 = vld [vmem:[#allocation318_spill] sm:$0xff] }
 0x2d9   :  { %v5964_v30 = vadd.f32 %v5932_v32, %v5720_v0  ;;  %v5965_v33 = vadd.f32 %v5933_v46, %v5721_v49  ;;  %v4857_v34 = vmax.f32 %v4855_v15, %v13212_v41  ;;  %v17117_v55 = vcombine.high %v17116_v48, %v17116_v48 }
 0x2da   :  { %v13276_v61 = vrot.slane %v17111_v45, %v16886_v11  ;;  %v13283_v18 = vrot.slane %v17114_v53, %v16886_v11  ;;  %v17120_v58 = vcombine.high %v17119_v36, %v17119_v36  ;;  %v17123_v0 = vcombine.high %v17122_v1, %v17122_v1 }
 0x2db   :  { %v13292_v39 = vrot.slane %v17117_v55, %v16886_v11  ;;  %v6208_v22 = vadd.f32 %v6176_v20, %v5964_v30  ;;  %v6209_v32 = vadd.f32 %v6177_v28, %v5965_v33  ;;  %v4858_v15 = vmax.f32 %v4856_v21, %v4857_v34  ;;  %v17127_v28 = vld [vmem:[#allocation316_spill] sm:$0xff]  ;;  %v17128_v33 = vld [vmem:[#allocation319_spill] sm:$0xff] }
 0x2dc   :  { %17112 = vst [vmem:[#allocation28_spill] sm:$0xff] %v13276_v61  ;;  %17115 = vst [vmem:[#allocation30_spill] sm:$0xff] %v13283_v18  ;;  %v6605_v26 = vrot.slane %v13276_v61, %v16893_v23  ;;  %v13298_v7 = vrot.slane %v17120_v58, %v16886_v11  ;;  %v6849_v46 = vrot.slane %v13283_v18, %v16893_v23 }
 0x2dd   :  { %17118 = vst [vmem:[#allocation62_spill] sm:$0xff] %v13292_v39  ;;  %v13306_v49 = vrot.slane %v17123_v0, %v16886_v11  ;;  %v7093_v48 = vrot.slane %v13292_v39, %v16893_v23  ;;  %v6452_v55 = vadd.f32 %v6420_v57, %v6208_v22  ;;  %v6453_v20 = vadd.f32 %v6421_v13, %v6209_v32 }
 0x2de   :  { %17121 = vst [vmem:[#allocation64_spill] sm:$0xff] %v13298_v7  ;;  %v6664_v45 = vmul.f32 %v6605_v26, %v17125_v31  ;;  %v6665_v53 = vmul.f32 %v6605_v26, %v17126_v5  ;;  %v6908_v30 = vmul.f32 %v6849_v46, %v17127_v28  ;;  %v6909_v36 = vmul.f32 %v6849_v46, %v17128_v33 }
 0x2df   :  { %17124 = vst [vmem:[#allocation65_spill] sm:$0xff] %v13306_v49  ;;  %v4874_v58 = vsub.f32 %v13166_v3, %v4858_v15  ;;  %v4876_v1 = vsub.f32 %v13168_v6, %v4858_v15  ;;  %v4878_v0 = vsub.f32 %v13170_v4, %v4858_v15  ;;  %v4880_v21 = vsub.f32 %v13172_v54, %v4858_v15 }
 0x2e0   :  { %v4882_v34 = vsub.f32 %v13180_v2, %v4858_v15  ;;  %v4884_v26 = vsub.f32 %v13182_v27, %v4858_v15  ;;  %v4886_v39 = vsub.f32 %v13184_v16, %v4858_v15  ;;  %v4888_v57 = vsub.f32 %v13192_v38, %v4858_v15 }
 0x2e1   :  { %v4890_v13 = vsub.f32 %v13194_v59, %v4858_v15  ;;  %v4892_v22 = vsub.f32 %v13196_v9, %v4858_v15  ;;  %v4894_v3 = vsub.f32 %v13200_v56, %v4858_v15  ;;  %v4896_v6 = vsub.f32 %v13202_v37, %v4858_v15 }
 0x2e2   :  { %v4898_v4 = vsub.f32 %v13204_v43, %v4858_v15  ;;  %v4900_v54 = vsub.f32 %v13208_v14, %v4858_v15  ;;  %v4902_v2 = vsub.f32 %v13210_v12, %v4858_v15  ;;  %v4904_v27 = vsub.f32 %v13212_v41, %v4858_v15 }
 0x2e3   :  { %v4906_v32 = vmul.f32 1.442695, %v4874_v58  ;;  %v4910_v16 = vmul.f32 1.442695, %v4876_v1  ;;  %v4914_v46 = vmul.f32 1.442695, %v4878_v0  ;;  %v6696_v38 = vadd.f32 %v6664_v45, %v6452_v55 }
 0x2e4   :  { %v4918_v18 = vmul.f32 1.442695, %v4880_v21  ;;  %v4922_v59 = vmul.f32 1.442695, %v4882_v34  ;;  %v4926_v61 = vmul.f32 1.442695, %v4884_v26  ;;  %v6697_v9 = vadd.f32 %v6665_v53, %v6453_v20 }
 0x2e5   :  { %9456 = vpow2.f32 %v4906_v32  ;;  %v4930_v56 = vmul.f32 1.442695, %v4886_v39  ;;  %v4934_v50 = vmul.f32 1.442695, %v4888_v57  ;;  %v4938_v37 = vmul.f32 1.442695, %v4890_v13 }
 0x2e6   :  { %9458 = vpow2.f32 %v4910_v16  ;;  %v4942_v43 = vmul.f32 1.442695, %v4892_v22  ;;  %v4946_v44 = vmul.f32 1.442695, %v4894_v3  ;;  %v4950_v14 = vmul.f32 1.442695, %v4896_v6 }
 0x2e7   :  { %9460 = vpow2.f32 %v4914_v46  ;;  %v4954_v12 = vmul.f32 1.442695, %v4898_v4  ;;  %v4958_v42 = vmul.f32 1.442695, %v4900_v54  ;;  %v4962_v41 = vmul.f32 1.442695, %v4902_v2 }
 0x2e8   :  { %9462 = vpow2.f32 %v4918_v18  ;;  %v4966_v15 = vmul.f32 1.442695, %v4904_v27  ;;  %v6940_v58 = vadd.f32 %v6908_v30, %v6696_v38  ;;  %v6941_v45 = vadd.f32 %v6909_v36, %v6697_v9  ;;  %v17129_v55 = vld [vmem:[#allocation291_spill] sm:$0xff]  ;;  %v17130_v53 = vld [vmem:[#allocation22_spill] sm:$0xff]  ;;  %v17134_v30 = vld [vmem:[#allocation72_spill] sm:$0xff] }
 0x2e9   :  { %9464 = vpow2.f32 %v4922_v59  ;;  %v7152_v1 = vmul.f32 %v7093_v48, %v17129_v55  ;;  %v7153_v20 = vmul.f32 %v7093_v48, %v17130_v53  ;;  %v7337_v39 = vrot.slane %v13298_v7, %v16893_v23  ;;  %v17131_v21 = vld [vmem:[#allocation70_spill] sm:$0xff]  ;;  %v17137_v13 = vld [vmem:[#allocation293_spill] sm:$0xff]  ;;  %v17138_v22 = vld [vmem:[#allocation23_spill] sm:$0xff] }
 0x2ea   :  { %9466 = vpow2.f32 %v4926_v61  ;;  %v7581_v0 = vrot.slane %v13306_v49, %v16893_v23  ;;  %v17132_v34 = vcombine.high %v17131_v21, %v17131_v21  ;;  %v17135_v36 = vcombine.high %v17134_v30, %v17134_v30  ;;  %v17139_v6 = vld [vmem:[#allocation295_spill] sm:$0xff]  ;;  %v17140_v54 = vld [vmem:[#allocation320_spill] sm:$0xff] }
 0x2eb   :  { %9468 = vpow2.f32 %v4930_v56  ;;  %v7184_v48 = vadd.f32 %v7152_v1, %v6940_v58  ;;  %v7185_v57 = vadd.f32 %v7153_v20, %v6941_v45  ;;  %v7396_v61 = vmul.f32 %v7337_v39, %v17137_v13  ;;  %v17141_v38 = vld [vmem:[#allocation71_spill] sm:$0xff]  ;;  %v17148_v1 = vld [vmem:[#allocation298_spill] sm:$0xff] }
 0x2ec   :  { %v13340_v18 = vrot.slane %v17132_v34, %v16886_v11  ;;  %v13346_v26 = vrot.slane %v17135_v36, %v16886_v11  ;;  %9470 = vpow2.f32 %v4934_v50  ;;  %v7397_v3 = vmul.f32 %v7337_v39, %v17138_v22  ;;  %v17144_v9 = vld [vmem:[#allocation75_spill] sm:$0xff]  ;;  %v17151_v34 = vld [vmem:[#allocation300_spill] sm:$0xff] }
 0x2ed   :  { %v7640_v4 = vmul.f32 %v7581_v0, %v17139_v6  ;;  %v7641_v2 = vmul.f32 %v7581_v0, %v17140_v54  ;;  %9472 = vpow2.f32 %v4938_v37  ;;  %v7428_v27 = vadd.f32 %v7396_v61, %v7184_v48  ;;  %v17152_v36 = vld [vmem:[#allocation112_spill] sm:$0xff]  ;;  %v17174_v7 = vld [vmem:[#allocation15_spill] sm:$0xff] }
 0x2ee   :  { %17133 = vst [vmem:[#allocation68_spill] sm:$0xff] %v13340_v18  ;;  %17136 = vst [vmem:[#allocation63_spill] sm:$0xff] %v13346_v26  ;;  %v7825_v32 = vrot.slane %v13340_v18, %v16893_v23  ;;  %v8069_v16 = vrot.slane %v13346_v26, %v16893_v23  ;;  %9474 = vpow2.f32 %v4942_v43  ;;  %v7429_v46 = vadd.f32 %v7397_v3, %v7185_v57  ;;  %v17149_v43 = vld [vmem:[#allocation306_spill] sm:$0xff] }
 0x2ef   :  { %v17142_v50 = vcombine.high %v17141_v38, %v17141_v38  ;;  %v17145_v56 = vcombine.high %v17144_v9, %v17144_v9  ;;  %v13368_v58 = vpop.eup %9456  ;;  %9476 = vpow2.f32 %v4946_v44  ;;  %v7672_v45 = vadd.f32 %v7640_v4, %v7428_v27 }
 0x2f0   :  { %17147 = vst [vmem:[#allocation69_spill] sm:$0xff] %v13368_v58  ;;  %v7884_v20 = vmul.f32 %v7825_v32, %v17148_v1  ;;  %v7885_v39 = vmul.f32 %v7825_v32, %v17149_v43  ;;  %v13372_v0 = vpop.eup %9458  ;;  %9478 = vpow2.f32 %v4950_v14  ;;  %v7673_v21 = vadd.f32 %v7641_v2, %v7429_v46  ;;  %v17155_v2 = vld [vmem:[#allocation77_spill] sm:$0xff] }
 0x2f1   :  { %v13360_v59 = vrot.slane %v17142_v50, %v16886_v11  ;;  %v13366_v37 = vrot.slane %v17145_v56, %v16886_v11  ;;  %17150 = vst [vmem:[#allocation11_spill] sm:$0xff] %v13372_v0  ;;  %v8128_v30 = vmul.f32 %v8069_v16, %v17151_v34  ;;  %v8129_v48 = vmul.f32 %v8069_v16, %v17152_v36  ;;  %v13376_v57 = vpop.eup %9460  ;;  %v17159_v50 = vld [vmem:[#allocation304_spill] sm:$0xff] }
 0x2f2   :  { %17153 = vst [vmem:[#allocation38_spill] sm:$0xff] %v13376_v57  ;;  %9480 = vpow2.f32 %v4954_v12  ;;  %v4970_v61 = vadd.f32 %v13372_v0, %v13368_v58  ;;  %v7916_v44 = vadd.f32 %v7884_v20, %v7672_v45  ;;  %v13382_v4 = vpop.eup %9462  ;;  %v7917_v27 = vadd.f32 %v7885_v39, %v7673_v21  ;;  %v17161_v45 = vld [vmem:[#allocation310_spill] sm:$0xff]  ;;  %v17162_v39 = vld [vmem:[#allocation303_spill] sm:$0xff] }
 0x2f3   :  { %17143 = vst [vmem:[#allocation66_spill] sm:$0xff] %v13360_v59  ;;  %17146 = vst [vmem:[#allocation67_spill] sm:$0xff] %v13366_v37  ;;  %v8313_v3 = vrot.slane %v13360_v59, %v16893_v23  ;;  %9482 = vpow2.f32 %v4958_v42  ;;  %v8557_v14 = vrot.slane %v13366_v37, %v16893_v23  ;;  %v17156_v32 = vcombine.high %v17155_v2, %v17155_v2  ;;  %v13392_v12 = vpop.eup %9464  ;;  %v17164_v59 = vld [vmem:[#allocation311_spill] sm:$0xff] }
 0x2f4   :  { %17154 = vst [vmem:[#allocation39_spill] sm:$0xff] %v13382_v4  ;;  %17158 = vst [vmem:[#allocation42_spill] sm:$0xff] %v13392_v12  ;;  %9484 = vpow2.f32 %v4962_v41  ;;  %v4971_v46 = vadd.f32 %v13376_v57, %v4970_v61  ;;  %v8160_v38 = vadd.f32 %v8128_v30, %v7916_v44  ;;  %v13396_v56 = vpop.eup %9466  ;;  %v8161_v42 = vadd.f32 %v8129_v48, %v7917_v27  ;;  %v17168_v27 = vld [vmem:[#allocation48_spill] sm:$0xff] }
 0x2f5   :  { %v13390_v16 = vrot.slane %v17156_v32, %v16886_v11  ;;  %v8372_v9 = vmul.f32 %v8313_v3, %v17159_v50  ;;  %17160 = vst [vmem:[#allocation41_spill] sm:$0xff] %v13396_v56  ;;  %9486 = vpow2.f32 %v4966_v15  ;;  %v8373_v20 = vmul.f32 %v8313_v3, %v17161_v45  ;;  %v13400_v37 = vpop.eup %9468  ;;  %v17166_v15 = vld [vmem:[#allocation47_spill] sm:$0xff] }
 0x2f6   :  { %v8616_v21 = vmul.f32 %v8557_v14, %v17162_v39  ;;  %17163 = vst [vmem:[#allocation43_spill] sm:$0xff] %v13400_v37  ;;  %v4972_v2 = vadd.f32 %v13382_v4, %v4971_v46  ;;  %v8617_v41 = vmul.f32 %v8557_v14, %v17164_v59  ;;  %v13406_v61 = vpop.eup %9470  ;;  %v17167_v48 = vcombine.high %v17166_v15, %v17166_v15  ;;  %v17170_v46 = vld [vmem:[#allocation50_spill] sm:$0xff] }
 0x2f7   :  { %17157 = vst [vmem:[#allocation40_spill] sm:$0xff] %v13390_v16  ;;  %v8404_v32 = vadd.f32 %v8372_v9, %v8160_v38  ;;  %v8801_v30 = vrot.slane %v13390_v16, %v16893_v23  ;;  %17165 = vst [vmem:[#allocation44_spill] sm:$0xff] %v13406_v61  ;;  %v8405_v44 = vadd.f32 %v8373_v20, %v8161_v42  ;;  %v13420_v9 = vpop.eup %9472  ;;  %v17173_v20 = vld [vmem:[#allocation309_spill] sm:$0xff] }
 0x2f8   :  { %v5177_v3 = vrot.slane %v17167_v48, %v16893_v23  ;;  %v17169_v26 = vcombine.high %v17168_v27, %v17168_v27  ;;  %v17171_v14 = vcombine.high %v17170_v46, %v17170_v46  ;;  %17172 = vst [vmem:[#allocation46_spill] sm:$0xff] %v13420_v9  ;;  %v4973_v16 = vadd.f32 %v13392_v12, %v4972_v2  ;;  %v13425_v48 = vpop.eup %9474 }
 0x2f9   :  { %v8648_v42 = vadd.f32 %v8616_v21, %v8404_v32  ;;  %v8860_v49 = vmul.f32 %v8801_v30, %v17173_v20  ;;  %v8861_v15 = vmul.f32 %v8801_v30, %v17174_v7  ;;  %v8649_v11 = vadd.f32 %v8617_v41, %v8405_v44  ;;  %v13430_v46 = vpop.eup %9476 }
 0x2fa   :  { %v5389_v18 = vrot.slane %v17169_v26, %v16893_v23  ;;  %v5633_v38 = vrot.slane %v17171_v14, %v16893_v23  ;;  %v5234_v27 = vmul.f32 %v5177_v3, %v16894_v29  ;;  %v5235_v26 = vmul.f32 %v5177_v3, %v16895_v47  ;;  %v13437_v32 = vpop.eup %9478  ;;  %v17177_v3 = vld [vmem:[#allocation49_spill] sm:$0xff] }
 0x2fb   :  { %v4974_v14 = vadd.f32 %v13396_v56, %v4973_v16  ;;  %v13433_v57 = vadd.f32 %v8860_v49, %v8648_v42  ;;  %v13439_v30 = vadd.f32 %v8861_v15, %v8649_v11  ;;  %v17178_v12 = vcombine.high %v17177_v3, %v17177_v3  ;;  %v17181_v11 = vld [vmem:[#allocation53_spill] sm:$0xff] }
 0x2fc   :  { %v5446_v4 = vmul.f32 %v5389_v18, %v16896_v35  ;;  %v5447_v21 = vmul.f32 %v5389_v18, %v17103_v63  ;;  %v5690_v2 = vmul.f32 %v5633_v38, %v17104_v19  ;;  %v5691_v44 = vmul.f32 %v5633_v38, %v17105_v52  ;;  %v13446_v58 = vpop.eup %9480  ;;  %v17179_v18 = vld [vmem:[#allocation52_spill] sm:$0xff] }
 0x2fd   :  { %17175 = vst [vmem:[#allocation129_spill] sm:$0xff] %v13433_v57  ;;  %17176 = vst [vmem:[#allocation131_spill] sm:$0xff] %v13439_v30  ;;  %v5877_v0 = vrot.slane %v17178_v12, %v16893_v23  ;;  %v4975_v49 = vadd.f32 %v13400_v37, %v4974_v14  ;;  %v17180_v42 = vcombine.high %v17179_v18, %v17179_v18  ;;  %v13457_v15 = vpop.eup %9482  ;;  %v17187_v30 = vld [vmem:[#allocation82_spill] sm:$0xff] }
 0x2fe   :  { %v5478_v41 = vadd.f32 %v5446_v4, %v5234_v27  ;;  %v5479_v16 = vadd.f32 %v5447_v21, %v5235_v26  ;;  %v17182_v4 = vcombine.high %v17181_v11, %v17181_v11  ;;  %v13463_v14 = vpop.eup %9484 }
 0x2ff   :  { %v6121_v56 = vrot.slane %v17180_v42, %v16893_v23  ;;  %v5934_v3 = vmul.f32 %v5877_v0, %v17106_v60  ;;  %v5935_v26 = vmul.f32 %v5877_v0, %v17107_v62  ;;  %v4976_v21 = vadd.f32 %v13406_v61, %v4975_v49 }
 0x300   :  { %v6365_v38 = vrot.slane %v17182_v4, %v16893_v23  ;;  %v5722_v27 = vadd.f32 %v5690_v2, %v5478_v41  ;;  %v5723_v18 = vadd.f32 %v5691_v44, %v5479_v16  ;;  %v13468_v4 = vpop.eup %9486  ;;  %v17183_v41 = vld [vmem:[#allocation78_spill] sm:$0xff]  ;;  %v17185_v44 = vld [vmem:[#allocation80_spill] sm:$0xff] }
 0x301   :  { %v6178_v42 = vmul.f32 %v6121_v56, %v16906_v51  ;;  %v6179_v11 = vmul.f32 %v6121_v56, %v16907_v10  ;;  %v17184_v0 = vcombine.high %v17183_v41, %v17183_v41  ;;  %v4977_v57 = vadd.f32 %v13420_v9, %v4976_v21  ;;  %v17189_v41 = vld [vmem:[#allocation84_spill] sm:$0xff] }
 0x302   :  { %v5966_v37 = vadd.f32 %v5934_v3, %v5722_v27  ;;  %v6422_v52 = vmul.f32 %v6365_v38, %v17108_v24  ;;  %v6423_v2 = vmul.f32 %v6365_v38, %v17109_v40  ;;  %v5967_v49 = vadd.f32 %v5935_v26, %v5723_v18 }
 0x303   :  { %v6609_v12 = vrot.slane %v17184_v0, %v16893_v23  ;;  %v17186_v16 = vcombine.high %v17185_v44, %v17185_v44  ;;  %v17188_v27 = vcombine.high %v17187_v30, %v17187_v30  ;;  %v17190_v21 = vcombine.high %v17189_v41, %v17189_v41 }
 0x304   :  { %v6210_v61 = vadd.f32 %v6178_v42, %v5966_v37  ;;  %v4978_v18 = vadd.f32 %v13425_v48, %v4977_v57  ;;  %v6211_v0 = vadd.f32 %v6179_v11, %v5967_v49 }
 0x305   :  { %v6853_v56 = vrot.slane %v17186_v16, %v16893_v23  ;;  %v7097_v3 = vrot.slane %v17188_v27, %v16893_v23  ;;  %v6666_v38 = vmul.f32 %v6609_v12, %v17125_v31  ;;  %v6667_v40 = vmul.f32 %v6609_v12, %v17126_v5 }
 0x306   :  { %v7341_v26 = vrot.slane %v17190_v21, %v16893_v23  ;;  %v6454_v9 = vadd.f32 %v6422_v52, %v6210_v61  ;;  %v4979_v12 = vadd.f32 %v13430_v46, %v4978_v18  ;;  %v6455_v27 = vadd.f32 %v6423_v2, %v6211_v0  ;;  %v17191_v21 = vld [vmem:[#allocation86_spill] sm:$0xff]  ;;  %v17197_v2 = vld [vmem:[#allocation73_spill] sm:$0xff] }
 0x307   :  { %v6910_v44 = vmul.f32 %v6853_v56, %v17127_v28  ;;  %v6911_v16 = vmul.f32 %v6853_v56, %v17128_v33  ;;  %v7154_v30 = vmul.f32 %v7097_v3, %v17129_v55  ;;  %v7155_v37 = vmul.f32 %v7097_v3, %v17130_v53  ;;  %v17193_v56 = vld [vmem:[#allocation74_spill] sm:$0xff]  ;;  %v17195_v3 = vld [vmem:[#allocation76_spill] sm:$0xff] }
 0x308   :  { %v7398_v42 = vmul.f32 %v7341_v26, %v17137_v13  ;;  %v7399_v41 = vmul.f32 %v7341_v26, %v17138_v22  ;;  %v17192_v57 = vcombine.high %v17191_v21, %v17191_v21  ;;  %v6698_v49 = vadd.f32 %v6666_v38, %v6454_v9 }
 0x309   :  { %v17194_v52 = vcombine.high %v17193_v56, %v17193_v56  ;;  %v17196_v13 = vcombine.high %v17195_v3, %v17195_v3  ;;  %v17198_v26 = vcombine.high %v17197_v2, %v17197_v2  ;;  %v4980_v0 = vadd.f32 %v13437_v32, %v4979_v12 }
 0x30a   :  { %v7585_v11 = vrot.slane %v17192_v57, %v16893_v23  ;;  %v6699_v21 = vadd.f32 %v6667_v40, %v6455_v27  ;;  %v6942_v57 = vadd.f32 %v6910_v44, %v6698_v49  ;;  %v17199_v27 = vld [vmem:[#allocation137_spill] sm:$0xff]  ;;  %v17201_v49 = vld [vmem:[#allocation24_spill] sm:$0xff] }
 0x30b   :  { %v7829_v61 = vrot.slane %v17194_v52, %v16893_v23  ;;  %v8073_v53 = vrot.slane %v17196_v13, %v16893_v23  ;;  %v8317_v18 = vrot.slane %v17198_v26, %v16893_v23  ;;  %v4981_v13 = vadd.f32 %v13446_v58, %v4980_v0 }
 0x30c   :  { %v7642_v9 = vmul.f32 %v7585_v11, %v17139_v6  ;;  %v7643_v38 = vmul.f32 %v7585_v11, %v17140_v54  ;;  %v6943_v22 = vadd.f32 %v6911_v16, %v6699_v21  ;;  %v7186_v12 = vadd.f32 %v7154_v30, %v6942_v57 }
 0x30d   :  { %v7886_v56 = vmul.f32 %v7829_v61, %v17148_v1  ;;  %v7887_v52 = vmul.f32 %v7829_v61, %v17149_v43  ;;  %v8130_v3 = vmul.f32 %v8073_v53, %v17151_v34  ;;  %v8131_v2 = vmul.f32 %v8073_v53, %v17152_v36 }
 0x30e   :  { %v8374_v26 = vmul.f32 %v8317_v18, %v17159_v50  ;;  %v8375_v40 = vmul.f32 %v8317_v18, %v17161_v45  ;;  %v17200_v44 = vcombine.high %v17199_v27, %v17199_v27  ;;  %v17202_v61 = vcombine.high %v17201_v49, %v17201_v49 }
 0x30f   :  { %v4982_v0 = vadd.f32 %v13457_v15, %v4981_v13  ;;  %v7187_v16 = vadd.f32 %v7155_v37, %v6943_v22  ;;  %v5132_v53 = vcombine.high %v13178_v17, %v13178_v17  ;;  %v5344_v30 = vcombine.high %v13190_v25, %v13190_v25 }
 0x310   :  { %v8561_v11 = vrot.slane %v17200_v44, %v16893_v23  ;;  %v8805_v34 = vrot.slane %v17202_v61, %v16893_v23  ;;  %v7430_v18 = vadd.f32 %v7398_v42, %v7186_v12  ;;  %v5588_v25 = vcombine.high %v13224_v8, %v13224_v8  ;;  %v17203_v42 = vld [vmem:[#allocation26_spill] sm:$0xff] }
 0x311   :  { %v4983_v44 = vadd.f32 %v13463_v14, %v4982_v0  ;;  %v7431_v49 = vadd.f32 %v7399_v41, %v7187_v16  ;;  %v5181_v22 = vrot.slane %v5132_v53, %v16893_v23  ;;  %v5393_v17 = vrot.slane %v5344_v30, %v16893_v23  ;;  %v17204_v30 = vld [vmem:[#allocation25_spill] sm:$0xff] }
 0x312   :  { %v8618_v21 = vmul.f32 %v8561_v11, %v17162_v39  ;;  %v8619_v57 = vmul.f32 %v8561_v11, %v17164_v59  ;;  %v8862_v27 = vmul.f32 %v8805_v34, %v17173_v20  ;;  %v8863_v61 = vmul.f32 %v8805_v34, %v17174_v7 }
 0x313   :  { %v7674_v37 = vadd.f32 %v7642_v9, %v7430_v18  ;;  %v5832_v13 = vcombine.high %v17203_v42, %v17203_v42  ;;  %v4984_v12 = vadd.f32 %v13468_v4, %v4983_v44  ;;  %v7675_v11 = vadd.f32 %v7643_v38, %v7431_v49 }
 0x314   :  { %v5236_v20 = vmul.f32 %v5181_v22, %v16894_v29  ;;  %v5237_v41 = vmul.f32 %v5181_v22, %v16895_v47  ;;  %v5448_v34 = vmul.f32 %v5393_v17, %v16896_v35  ;;  %v5449_v9 = vmul.f32 %v5393_v17, %v17103_v63 }
 0x315   :  { %v7918_v0 = vadd.f32 %v7886_v56, %v7674_v37  ;;  %v5637_v16 = vrot.slane %v5588_v25, %v16893_v23  ;;  %9488 = vrcp.f32 %v4984_v12  ;;  %v7919_v53 = vadd.f32 %v7887_v52, %v7675_v11  ;;  %v17205_v56 = vld [vmem:[#allocation301_spill] sm:$0xff] }
 0x316   :  { %v5881_v8 = vrot.slane %v5832_v13, %v16893_v23  ;;  %v6076_v18 = vcombine.high %v17204_v30, %v17204_v30  ;;  %v5480_v38 = vadd.f32 %v5448_v34, %v5236_v20  ;;  %v5481_v49 = vadd.f32 %v5449_v9, %v5237_v41  ;;  %v17206_v13 = vld [vmem:[#allocation27_spill] sm:$0xff]  ;;  %v17207_v20 = vld [vmem:[#allocation28_spill] sm:$0xff] }
 0x317   :  { %v8162_v44 = vadd.f32 %v8130_v3, %v7918_v0  ;;  %v5692_v42 = vmul.f32 %v5637_v16, %v17104_v19  ;;  %v8163_v22 = vadd.f32 %v8131_v2, %v7919_v53  ;;  %v5693_v37 = vmul.f32 %v5637_v16, %v17205_v56  ;;  %v17208_v0 = vld [vmem:[#allocation30_spill] sm:$0xff] }
 0x318   :  { %v5936_v7 = vmul.f32 %v5881_v8, %v17106_v60  ;;  %v5937_v17 = vmul.f32 %v5881_v8, %v17107_v62  ;;  %v6125_v52 = vrot.slane %v6076_v18, %v16893_v23  ;;  %v6320_v11 = vcombine.high %v17206_v13, %v17206_v13 }
 0x319   :  { %v8406_v25 = vadd.f32 %v8374_v26, %v8162_v44  ;;  %v5724_v12 = vadd.f32 %v5692_v42, %v5480_v38  ;;  %v8407_v30 = vadd.f32 %v8375_v40, %v8163_v22  ;;  %v5725_v3 = vadd.f32 %v5693_v37, %v5481_v49  ;;  %v17210_v42 = vld [vmem:[#allocation62_spill] sm:$0xff] }
 0x31a   :  { %v6564_v41 = vcombine.high %v17207_v20, %v17207_v20  ;;  %v6808_v2 = vcombine.high %v17208_v0, %v17208_v0  ;;  %v6180_v16 = vmul.f32 %v6125_v52, %v16906_v51  ;;  %v6181_v26 = vmul.f32 %v6125_v52, %v16907_v10  ;;  %v17220_v20 = vld [vmem:[#allocation69_spill] sm:$0xff]  ;;  %v17222_v0 = vld [vmem:[#allocation11_spill] sm:$0xff] }
 0x31b   :  { %v8650_v34 = vadd.f32 %v8618_v21, %v8406_v25  ;;  %v5968_v9 = vadd.f32 %v5936_v7, %v5724_v12  ;;  %v8651_v53 = vadd.f32 %v8619_v57, %v8407_v30  ;;  %v5969_v8 = vadd.f32 %v5937_v17, %v5725_v3  ;;  %v17212_v25 = vld [vmem:[#allocation317_spill] sm:$0xff] }
 0x31c   :  { %v6369_v18 = vrot.slane %v6320_v11, %v16893_v23  ;;  %v6613_v44 = vrot.slane %v6564_v41, %v16893_v23  ;;  %v6857_v49 = vrot.slane %v6808_v2, %v16893_v23  ;;  %v7052_v22 = vcombine.high %v17210_v42, %v17210_v42  ;;  %v17234_v42 = vld [vmem:[#allocation44_spill] sm:$0xff] }
 0x31d   :  { %v13573_v40 = vadd.f32 %v8862_v27, %v8650_v34  ;;  %v6212_v38 = vadd.f32 %v6180_v16, %v5968_v9  ;;  %v13578_v21 = vadd.f32 %v8863_v61, %v8651_v53  ;;  %v6213_v7 = vadd.f32 %v6181_v26, %v5969_v8  ;;  %v17224_v34 = vld [vmem:[#allocation38_spill] sm:$0xff]  ;;  %v17226_v16 = vld [vmem:[#allocation39_spill] sm:$0xff] }
 0x31e   :  { %v6424_v37 = vmul.f32 %v6369_v18, %v17108_v24  ;;  %v6425_v57 = vmul.f32 %v6369_v18, %v17212_v25  ;;  %v13583_v17 = vmul.f32 %v6613_v44, %v17125_v31  ;;  %v13586_v12 = vmul.f32 %v6613_v44, %v17126_v5  ;;  %v17228_v53 = vld [vmem:[#allocation42_spill] sm:$0xff]  ;;  %v17230_v18 = vld [vmem:[#allocation41_spill] sm:$0xff] }
 0x31f   :  { %17209 = vst [vmem:[#allocation133_spill] sm:$0xff] %v13573_v40  ;;  %17211 = vst [vmem:[#allocation135_spill] sm:$0xff] %v13578_v21  ;;  %v13589_v27 = vmul.f32 %v6857_v49, %v17127_v28  ;;  %v13592_v52 = vmul.f32 %v6857_v49, %v17128_v33  ;;  %v9489_v13 = vpop.eup %9488  ;;  %v13601_v3 = vrot.slane %v7052_v22, %v16893_v23 }
 0x320   :  { %17213 = vst [vmem:[#allocation132_spill] sm:$0xff] %v13583_v17  ;;  %17214 = vst [vmem:[#allocation134_spill] sm:$0xff] %v13586_v12  ;;  %v13596_v11 = vadd.f32 %v6424_v37, %v6212_v38  ;;  %v13598_v30 = vadd.f32 %v6425_v57, %v6213_v7  ;;  %v13604_v41 = vmul.f32 %v9489_v13, %v17220_v20  ;;  %v17232_v38 = vld [vmem:[#allocation43_spill] sm:$0xff]  ;;  %v17236_v7 = vld [vmem:[#allocation46_spill] sm:$0xff] }
 0x321   :  { %17215 = vst [vmem:[#allocation136_spill] sm:$0xff] %v13589_v27  ;;  %17216 = vst [vmem:[#allocation138_spill] sm:$0xff] %v13592_v52  ;;  %v13607_v2 = vmul.f32 %v9489_v13, %v17222_v0  ;;  %v13610_v9 = vmul.f32 %v9489_v13, %v17224_v34  ;;  %v13613_v26 = vmul.f32 %v9489_v13, %v17226_v16 }
 0x322   :  { %17217 = vst [vmem:[#allocation14_spill] sm:$0xff] %v13596_v11  ;;  %17218 = vst [vmem:[#allocation54_spill] sm:$0xff] %v13598_v30  ;;  %v13616_v8 = vmul.f32 %v9489_v13, %v17228_v53  ;;  %v13619_v44 = vmul.f32 %v9489_v13, %v17230_v18  ;;  %v13622_v49 = vmul.f32 %v9489_v13, %v17232_v38 }
 0x323   :  { %17219 = vst [vmem:[#allocation55_spill] sm:$0xff] %v13601_v3  ;;  %17221 = vst [vmem:[#allocation56_spill] sm:$0xff] %v13604_v41  ;;  %v13625_v22 = vmul.f32 %v9489_v13, %v17234_v42  ;;  %v13628_v37 = vmul.f32 %v9489_v13, %v17236_v7  ;;  %v13631_v57 = vmul.f32 %v9489_v13, %v13425_v48 }
 0x324   :  { %17223 = vst [vmem:[#allocation58_spill] sm:$0xff] %v13607_v2  ;;  %17225 = vst [vmem:[#allocation57_spill] sm:$0xff] %v13610_v9  ;;  %v13634_v20 = vmul.f32 %v9489_v13, %v13430_v46  ;;  %v13637_v0 = vmul.f32 %v9489_v13, %v13437_v32  ;;  %v13640_v34 = vmul.f32 %v9489_v13, %v13446_v58  ;;  %v17245_v46 = vld [vmem:[#allocation6_spill] sm:$0xff] }
 0x325   :  { %17227 = vst [vmem:[#allocation59_spill] sm:$0xff] %v13613_v26  ;;  %17229 = vst [vmem:[#allocation60_spill] sm:$0xff] %v13616_v8  ;;  %v13643_v16 = vmul.f32 %v9489_v13, %v13457_v15  ;;  %v13646_v53 = vmul.f32 %v9489_v13, %v13463_v14  ;;  %v13649_v18 = vmul.f32 %v9489_v13, %v13468_v4 }
 0x326   :  { %17231 = vst [vmem:[#allocation61_spill] sm:$0xff] %v13619_v44  ;;  %17233 = vst [vmem:[#allocation113_spill] sm:$0xff] %v13622_v49  ;;  %v13655_v38 = vrot.slane %v13604_v41, %v17245_v46  ;;  %v13661_v32 = vrot.slane %v13607_v2, %v17245_v46  ;;  %v13667_v14 = vrot.slane %v13610_v9, %v17245_v46 }
 0x327   :  { %17235 = vst [vmem:[#allocation115_spill] sm:$0xff] %v13625_v22  ;;  %17237 = vst [vmem:[#allocation116_spill] sm:$0xff] %v13628_v37  ;;  %v13673_v13 = vrot.slane %v13613_v26, %v17245_v46  ;;  %v13733_v21 = vrot.slane %v13619_v44, %v17245_v46 }
 0x328   :  { %17238 = vst [vmem:[#allocation119_spill] sm:$0xff] %v13631_v57  ;;  %17239 = vst [vmem:[#allocation114_spill] sm:$0xff] %v13634_v20  ;;  %v13679_v7 = vrot.slane %v13655_v38, %v17245_v46  ;;  %v13685_v58 = vrot.slane %v13661_v32, %v17245_v46  ;;  %v13691_v48 = vrot.slane %v13667_v14, %v17245_v46 }
 0x329   :  { %17240 = vst [vmem:[#allocation117_spill] sm:$0xff] %v13637_v0  ;;  %17241 = vst [vmem:[#allocation118_spill] sm:$0xff] %v13640_v34  ;;  %v13697_v42 = vrot.slane %v13673_v13, %v17245_v46  ;;  %v13751_v40 = vrot.slane %v13733_v21, %v17245_v46 }
 0x32a   :  { %17242 = vst [vmem:[#allocation120_spill] sm:$0xff] %v13643_v16  ;;  %17243 = vst [vmem:[#allocation18_spill] sm:$0xff] %v13646_v53  ;;  %v5137_v26 = vrot.slane %v13679_v7, %v16893_v23  ;;  %v5349_v9 = vrot.slane %v13685_v58, %v16893_v23  ;;  %v5593_v61 = vrot.slane %v13691_v48, %v16893_v23 }
 0x32b   :  { %17244 = vst [vmem:[#allocation87_spill] sm:$0xff] %v13649_v18  ;;  %17246 = vst [vmem:[#allocation88_spill] sm:$0xff] %v13679_v7  ;;  %v5837_v15 = vrot.slane %v13697_v42, %v16893_v23 }
 0x32c   :  { %17247 = vst [vmem:[#allocation90_spill] sm:$0xff] %v13685_v58  ;;  %17248 = vst [vmem:[#allocation91_spill] sm:$0xff] %v13691_v48  ;;  %v5214_v52 = vmul.f32 %v5137_v26, %v16894_v29  ;;  %v5215_v27 = vmul.f32 %v5137_v26, %v16895_v47  ;;  %v5426_v4 = vmul.f32 %v5349_v9, %v16896_v35  ;;  %v17258_v48 = vld [vmem:[#allocation23_spill] sm:$0xff] }
 0x32d   :  { %17249 = vst [vmem:[#allocation89_spill] sm:$0xff] %v13697_v42  ;;  %v5427_v3 = vmul.f32 %v5349_v9, %v17103_v63  ;;  %v5670_v12 = vmul.f32 %v5593_v61, %v17104_v19  ;;  %v5671_v2 = vmul.f32 %v5593_v61, %v17205_v56  ;;  %v5914_v30 = vmul.f32 %v5837_v15, %v17106_v60 }
 0x32e   :  { %v5915_v17 = vmul.f32 %v5837_v15, %v17107_v62  ;;  %v5458_v41 = vadd.f32 %v5426_v4, %v5214_v52  ;;  %v13727_v26 = vrot.slane %v13616_v8, %v17245_v46  ;;  %17251 = vst [vmem:[#allocation93_spill] sm:$0xff] %v13751_v40 }
 0x32f   :  { %v5459_v11 = vadd.f32 %v5427_v3, %v5215_v27  ;;  %v13739_v27 = vrot.slane %v13622_v49, %v17245_v46  ;;  %v6325_v49 = vrot.slane %v13751_v40, %v16893_v23 }
 0x330   :  { %v5702_v52 = vadd.f32 %v5670_v12, %v5458_v41  ;;  %v13745_v4 = vrot.slane %v13727_v26, %v17245_v46 }
 0x331   :  { %v5703_v3 = vadd.f32 %v5671_v2, %v5459_v11  ;;  %v13757_v12 = vrot.slane %v13739_v27, %v17245_v46  ;;  %v6402_v9 = vmul.f32 %v6325_v49, %v17108_v24  ;;  %v6403_v2 = vmul.f32 %v6325_v49, %v17212_v25 }
 0x332   :  { %17250 = vst [vmem:[#allocation92_spill] sm:$0xff] %v13745_v4  ;;  %v5946_v11 = vadd.f32 %v5914_v30, %v5702_v52  ;;  %v6081_v15 = vrot.slane %v13745_v4, %v16893_v23  ;;  %v13793_v4 = vrot.slane %v13628_v37, %v17245_v46 }
 0x333   :  { %17252 = vst [vmem:[#allocation94_spill] sm:$0xff] %v13757_v12  ;;  %v5947_v41 = vadd.f32 %v5915_v17, %v5703_v3  ;;  %v6569_v44 = vrot.slane %v13757_v12, %v16893_v23  ;;  %v13777_v3 = vrot.slane %v13625_v22, %v17245_v46  ;;  %v17257_v22 = vld [vmem:[#allocation293_spill] sm:$0xff] }
 0x334   :  { %v6158_v17 = vmul.f32 %v6081_v15, %v16906_v51  ;;  %v6159_v30 = vmul.f32 %v6081_v15, %v16907_v10  ;;  %v13809_v15 = vrot.slane %v13793_v4, %v17245_v46 }
 0x335   :  { %v6646_v61 = vmul.f32 %v6569_v44, %v17125_v31  ;;  %v6647_v8 = vmul.f32 %v6569_v44, %v17126_v5  ;;  %v13787_v52 = vrot.slane %v13777_v3, %v17245_v46  ;;  %v13799_v44 = vrot.slane %v13631_v57, %v17245_v46 }
 0x336   :  { %v6190_v12 = vadd.f32 %v6158_v17, %v5946_v11  ;;  %v6191_v40 = vadd.f32 %v6159_v30, %v5947_v41  ;;  %17254 = vst [vmem:[#allocation16_spill] sm:$0xff] %v13809_v15  ;;  %v7057_v57 = vrot.slane %v13809_v15, %v16893_v23 }
 0x337   :  { %17253 = vst [vmem:[#allocation166_spill] sm:$0xff] %v13787_v52  ;;  %v6813_v30 = vrot.slane %v13787_v52, %v16893_v23 }
 0x338   :  { %v6434_v11 = vadd.f32 %v6402_v9, %v6190_v12  ;;  %v6435_v41 = vadd.f32 %v6403_v2, %v6191_v40  ;;  %v13815_v9 = vrot.slane %v13799_v44, %v17245_v46 }
 0x339   :  { %v6890_v2 = vmul.f32 %v6813_v30, %v17127_v28  ;;  %v6891_v17 = vmul.f32 %v6813_v30, %v17128_v33 }
 0x33a   :  { %17255 = vst [vmem:[#allocation17_spill] sm:$0xff] %v13815_v9  ;;  %v6678_v40 = vadd.f32 %v6646_v61, %v6434_v11  ;;  %v6679_v12 = vadd.f32 %v6647_v8, %v6435_v41  ;;  %v7301_v49 = vrot.slane %v13815_v9, %v16893_v23  ;;  %v13831_v61 = vrot.slane %v13634_v20, %v17245_v46  ;;  %v17256_v41 = vld [vmem:[#allocation22_spill] sm:$0xff] }
 0x33b   :  { %v7134_v11 = vmul.f32 %v7057_v57, %v17129_v55  ;;  %v7135_v30 = vmul.f32 %v7057_v57, %v17256_v41 }
 0x33c   :  { %v6922_v52 = vadd.f32 %v6890_v2, %v6678_v40  ;;  %v6923_v42 = vadd.f32 %v6891_v17, %v6679_v12  ;;  %v7378_v15 = vmul.f32 %v7301_v49, %v17257_v22  ;;  %v7379_v37 = vmul.f32 %v7301_v49, %v17258_v48 }
 0x33d   :  { %v13841_v17 = vrot.slane %v13831_v61, %v17245_v46  ;;  %v13847_v12 = vrot.slane %v13637_v0, %v17245_v46  ;;  %v13853_v49 = vrot.slane %v13640_v34, %v17245_v46 }
 0x33e   :  { %v7166_v2 = vadd.f32 %v7134_v11, %v6922_v52  ;;  %v7167_v57 = vadd.f32 %v7135_v30, %v6923_v42 }
 0x33f   :  { %17259 = vst [vmem:[#allocation168_spill] sm:$0xff] %v13841_v17  ;;  %v7545_v20 = vrot.slane %v13841_v17, %v16893_v23  ;;  %v13863_v52 = vrot.slane %v13847_v12, %v17245_v46  ;;  %v13869_v8 = vrot.slane %v13853_v49, %v17245_v46 }
 0x340   :  { %v7410_v42 = vadd.f32 %v7378_v15, %v7166_v2  ;;  %v7411_v11 = vadd.f32 %v7379_v37, %v7167_v57  ;;  %v13885_v57 = vrot.slane %v13643_v16, %v17245_v46 }
 0x341   :  { %17260 = vst [vmem:[#allocation167_spill] sm:$0xff] %v13863_v52  ;;  %17261 = vst [vmem:[#allocation169_spill] sm:$0xff] %v13869_v8  ;;  %v7622_v9 = vmul.f32 %v7545_v20, %v17139_v6  ;;  %v7623_v34 = vmul.f32 %v7545_v20, %v17140_v54  ;;  %v7789_v0 = vrot.slane %v13863_v52, %v16893_v23  ;;  %v17262_v52 = vld [vmem:[#allocation300_spill] sm:$0xff] }
 0x342   :  { %v8033_v15 = vrot.slane %v13869_v8, %v16893_v23  ;;  %v13895_v2 = vrot.slane %v13885_v57, %v17245_v46 }
 0x343   :  { %v7654_v20 = vadd.f32 %v7622_v9, %v7410_v42  ;;  %v7655_v30 = vadd.f32 %v7623_v34, %v7411_v11  ;;  %v7866_v40 = vmul.f32 %v7789_v0, %v17148_v1  ;;  %v7867_v17 = vmul.f32 %v7789_v0, %v17149_v43 }
 0x344   :  { %v8110_v58 = vmul.f32 %v8033_v15, %v17262_v52  ;;  %v8111_v37 = vmul.f32 %v8033_v15, %v17152_v36  ;;  %17263 = vst [vmem:[#allocation170_spill] sm:$0xff] %v13895_v2  ;;  %v13901_v9 = vrot.slane %v13646_v53, %v17245_v46  ;;  %v8277_v42 = vrot.slane %v13895_v2, %v16893_v23 }
 0x345   :  { %v7898_v7 = vadd.f32 %v7866_v40, %v7654_v20  ;;  %v7899_v16 = vadd.f32 %v7867_v17, %v7655_v30  ;;  %v13911_v40 = vrot.slane %v13649_v18, %v17245_v46 }
 0x346   :  { %v13917_v20 = vrot.slane %v13901_v9, %v17245_v46  ;;  %v8354_v34 = vmul.f32 %v8277_v42, %v17159_v50  ;;  %v8355_v0 = vmul.f32 %v8277_v42, %v17161_v45  ;;  %v17268_v42 = vcombine.high %v13661_v32, %v13661_v32 }
 0x347   :  { %v8142_v17 = vadd.f32 %v8110_v58, %v7898_v7  ;;  %v8143_v30 = vadd.f32 %v8111_v37, %v7899_v16  ;;  %v13925_v8 = vrot.slane %v13911_v40, %v17245_v46  ;;  %v17266_v7 = vcombine.high %v13655_v38, %v13655_v38 }
 0x348   :  { %17264 = vst [vmem:[#allocation171_spill] sm:$0xff] %v13917_v20  ;;  %v8521_v58 = vrot.slane %v13917_v20, %v16893_v23  ;;  %v13941_v11 = vrot.slane %v17268_v42, %v17245_v46  ;;  %v17270_v42 = vld [vmem:[#allocation309_spill] sm:$0xff] }
 0x349   :  { %17265 = vst [vmem:[#allocation21_spill] sm:$0xff] %v13925_v8  ;;  %v13935_v37 = vrot.slane %v17266_v7, %v17245_v46  ;;  %v8386_v15 = vadd.f32 %v8354_v34, %v8142_v17  ;;  %v8387_v18 = vadd.f32 %v8355_v0, %v8143_v30  ;;  %v8765_v53 = vrot.slane %v13925_v8, %v16893_v23  ;;  %v17271_v34 = vld [vmem:[#allocation15_spill] sm:$0xff] }
 0x34a   :  { %17269 = vst [vmem:[#allocation105_spill] sm:$0xff] %v13941_v11  ;;  %v8598_v20 = vmul.f32 %v8521_v58, %v17162_v39  ;;  %v8599_v38 = vmul.f32 %v8521_v58, %v17164_v59  ;;  %v5353_v32 = vrot.slane %v13941_v11, %v16893_v23  ;;  %v17272_v17 = vcombine.high %v13667_v14, %v13667_v14 }
 0x34b   :  { %17267 = vst [vmem:[#allocation104_spill] sm:$0xff] %v13935_v37  ;;  %v5141_v7 = vrot.slane %v13935_v37, %v16893_v23  ;;  %v8842_v2 = vmul.f32 %v8765_v53, %v17270_v42  ;;  %v8843_v0 = vmul.f32 %v8765_v53, %v17271_v34  ;;  %v17273_v58 = vcombine.high %v13673_v13, %v13673_v13 }
 0x34c   :  { %v13959_v30 = vrot.slane %v17272_v17, %v17245_v46  ;;  %v8630_v37 = vadd.f32 %v8598_v20, %v8386_v15  ;;  %v8631_v8 = vadd.f32 %v8599_v38, %v8387_v18  ;;  %v5428_v53 = vmul.f32 %v5353_v32, %v16896_v35 }
 0x34d   :  { %v13965_v16 = vrot.slane %v17273_v58, %v17245_v46  ;;  %v5216_v11 = vmul.f32 %v5141_v7, %v16894_v29  ;;  %v5217_v42 = vmul.f32 %v5141_v7, %v16895_v47  ;;  %v5429_v34 = vmul.f32 %v5353_v32, %v17103_v63 }
 0x34e   :  { %v5597_v14 = vrot.slane %v13959_v30, %v16893_v23  ;;  %v8874_v59 = vadd.f32 %v8842_v2, %v8630_v37  ;;  %v8875_v13 = vadd.f32 %v8843_v0, %v8631_v8  ;;  %v17275_v18 = vcombine.high %v13727_v26, %v13727_v26 }
 0x34f   :  { %17274 = vst [vmem:[#allocation106_spill] sm:$0xff] %v13965_v16  ;;  %v5841_v17 = vrot.slane %v13965_v16, %v16893_v23  ;;  %v17276_v20 = vcombine.high %v13733_v21, %v13733_v21  ;;  %v5460_v7 = vadd.f32 %v5428_v53, %v5216_v11  ;;  %v5461_v32 = vadd.f32 %v5429_v34, %v5217_v42 }
 0x350   :  { %v13979_v15 = vrot.slane %v17275_v18, %v17245_v46  ;;  %v5672_v58 = vmul.f32 %v5597_v14, %v17104_v19  ;;  %v5673_v16 = vmul.f32 %v5597_v14, %v17205_v56  ;;  %v9304_v2 = vpack.c.bf16 %v8875_v13, %v8874_v59  ;;  %v17285_v13 = vld [vmem:[#allocation129_spill] sm:$0xff] }
 0x351   :  { %v13985_v38 = vrot.slane %v17276_v20, %v17245_v46  ;;  %v5916_v8 = vmul.f32 %v5841_v17, %v17106_v60  ;;  %v5917_v37 = vmul.f32 %v5841_v17, %v17107_v62  ;;  %v17278_v11 = vcombine.high %v13739_v27, %v13739_v27  ;;  %v17284_v27 = vld [vmem:[#allocation131_spill] sm:$0xff] }
 0x352   :  { %v6085_v26 = vrot.slane %v13979_v15, %v16893_v23  ;;  %v5704_v0 = vadd.f32 %v5672_v58, %v5460_v7  ;;  %v5705_v18 = vadd.f32 %v5673_v16, %v5461_v32  ;;  %9305 = vmatpush3.bf16.msra.mxu0 %v9304_v2  ;;  %v17280_v53 = vcombine.high %v13777_v3, %v13777_v3 }
 0x353   :  { %17277 = vst [vmem:[#allocation110_spill] sm:$0xff] %v13985_v38  ;;  %v6329_v21 = vrot.slane %v13985_v38, %v16893_v23  ;;  %v13999_v42 = vrot.slane %v17278_v11, %v17245_v46  ;;  %v17282_v16 = vcombine.high %v13793_v4, %v13793_v4  ;;  %v17286_v20 = vpack.c.bf16 %v17284_v27, %v17285_v13 }
 0x354   :  { %v6160_v59 = vmul.f32 %v6085_v26, %v16906_v51  ;;  %v6161_v34 = vmul.f32 %v6085_v26, %v16907_v10  ;;  %v14007_v14 = vrot.slane %v17280_v53, %v17245_v46  ;;  %v5948_v7 = vadd.f32 %v5916_v8, %v5704_v0 }
 0x355   :  { %17279 = vst [vmem:[#allocation107_spill] sm:$0xff] %v13999_v42  ;;  %v14013_v17 = vrot.slane %v17282_v16, %v17245_v46  ;;  %9307 = vmatprep.subr.bf16.mxu0 %v17286_v20  ;;  %v5949_v32 = vadd.f32 %v5917_v37, %v5705_v18  ;;  %v6404_v58 = vmul.f32 %v6329_v21, %v17108_v24 }
 0x356   :  { %17281 = vst [vmem:[#allocation108_spill] sm:$0xff] %v14007_v14  ;;  %v6405_v2 = vmul.f32 %v6329_v21, %v17212_v25  ;;  %v6573_v3 = vrot.slane %v13999_v42, %v16893_v23  ;;  %v6817_v26 = vrot.slane %v14007_v14, %v16893_v23  ;;  %v17287_v11 = vcombine.high %v13799_v44, %v13799_v44  ;;  %v17310_v42 = vld [vmem:[#allocation89_spill] sm:$0xff] }
 0x357   :  { %17283 = vst [vmem:[#allocation109_spill] sm:$0xff] %v14013_v17  ;;  %v7061_v4 = vrot.slane %v14013_v17, %v16893_v23  ;;  %v6192_v8 = vadd.f32 %v6160_v59, %v5948_v7  ;;  %v6193_v37 = vadd.f32 %v6161_v34, %v5949_v32  ;;  %v17289_v0 = vcombine.high %v13831_v61, %v13831_v61 }
 0x358   :  { %v14030_v53 = vrot.slane %v17287_v11, %v17245_v46  ;;  %v17291_v21 = vcombine.high %v13847_v12, %v13847_v12  ;;  %v6648_v27 = vmul.f32 %v6573_v3, %v17125_v31  ;;  %v6649_v44 = vmul.f32 %v6573_v3, %v17126_v5 }
 0x359   :  { %v14036_v18 = vrot.slane %v17289_v0, %v17245_v46  ;;  %v6892_v13 = vmul.f32 %v6817_v26, %v17127_v28  ;;  %v6893_v59 = vmul.f32 %v6817_v26, %v17128_v33  ;;  %v6436_v34 = vadd.f32 %v6404_v58, %v6192_v8 }
 0x35a   :  { %17288 = vst [vmem:[#allocation111_spill] sm:$0xff] %v14030_v53  ;;  %v14042_v16 = vrot.slane %v17291_v21, %v17245_v46  ;;  %v6437_v20 = vadd.f32 %v6405_v2, %v6193_v37  ;;  %v7136_v61 = vmul.f32 %v7061_v4, %v17129_v55  ;;  %v7137_v7 = vmul.f32 %v7061_v4, %v17256_v41 }
 0x35b   :  { %17290 = vst [vmem:[#allocation7_spill] sm:$0xff] %v14036_v18  ;;  %v7305_v32 = vrot.slane %v14030_v53, %v16893_v23  ;;  %v7549_v12 = vrot.slane %v14036_v18, %v16893_v23  ;;  %v17293_v3 = vcombine.high %v13853_v49, %v13853_v49  ;;  %v6680_v58 = vadd.f32 %v6648_v27, %v6436_v34 }
 0x35c   :  { %17292 = vst [vmem:[#allocation140_spill] sm:$0xff] %v14042_v16  ;;  %v7793_v11 = vrot.slane %v14042_v16, %v16893_v23  ;;  %v6681_v2 = vadd.f32 %v6649_v44, %v6437_v20  ;;  %v17295_v4 = vcombine.high %v13885_v57, %v13885_v57  ;;  %v17297_v37 = vcombine.high %v13901_v9, %v13901_v9 }
 0x35d   :  { %v14060_v26 = vrot.slane %v17293_v3, %v17245_v46  ;;  %v7380_v21 = vmul.f32 %v7305_v32, %v17257_v22  ;;  %v7381_v49 = vmul.f32 %v7305_v32, %v17258_v48  ;;  %v7624_v3 = vmul.f32 %v7549_v12, %v17139_v6 }
 0x35e   :  { %v14066_v8 = vrot.slane %v17295_v4, %v17245_v46  ;;  %v14072_v0 = vrot.slane %v17297_v37, %v17245_v46  ;;  %v7625_v27 = vmul.f32 %v7549_v12, %v17140_v54  ;;  %v6924_v44 = vadd.f32 %v6892_v13, %v6680_v58  ;;  %v17301_v58 = vld [vmem:[#allocation88_spill] sm:$0xff] }
 0x35f   :  { %17294 = vst [vmem:[#allocation141_spill] sm:$0xff] %v14060_v26  ;;  %v6925_v34 = vadd.f32 %v6893_v59, %v6681_v2  ;;  %v7868_v57 = vmul.f32 %v7793_v11, %v17148_v1  ;;  %v7869_v20 = vmul.f32 %v7793_v11, %v17149_v43  ;;  %v8037_v4 = vrot.slane %v14060_v26, %v16893_v23  ;;  %v17303_v26 = vld [vmem:[#allocation90_spill] sm:$0xff] }
 0x360   :  { %17296 = vst [vmem:[#allocation8_spill] sm:$0xff] %v14066_v8  ;;  %17298 = vst [vmem:[#allocation139_spill] sm:$0xff] %v14072_v0  ;;  %v8281_v9 = vrot.slane %v14066_v8, %v16893_v23  ;;  %v8525_v37 = vrot.slane %v14072_v0, %v16893_v23  ;;  %v17299_v32 = vcombine.high %v13911_v40, %v13911_v40 }
 0x361   :  { %v7168_v13 = vadd.f32 %v7136_v61, %v6924_v44  ;;  %v7169_v59 = vadd.f32 %v7137_v7, %v6925_v34  ;;  %v17302_v11 = vcombine.high %v17301_v58, %v17301_v58  ;;  %v17304_v8 = vcombine.high %v17303_v26, %v17303_v26  ;;  %v17305_v34 = vld [vmem:[#allocation311_spill] sm:$0xff] }
 0x362   :  { %v14090_v12 = vrot.slane %v17299_v32, %v17245_v46  ;;  %v8112_v0 = vmul.f32 %v8037_v4, %v17262_v52  ;;  %v8113_v18 = vmul.f32 %v8037_v4, %v17152_v36  ;;  %v8356_v40 = vmul.f32 %v8281_v9, %v17159_v50 }
 0x363   :  { %v5145_v2 = vrot.slane %v17302_v11, %v16893_v23  ;;  %v5357_v16 = vrot.slane %v17304_v8, %v16893_v23  ;;  %v8357_v32 = vmul.f32 %v8281_v9, %v17161_v45  ;;  %v7412_v61 = vadd.f32 %v7380_v21, %v7168_v13  ;;  %v17306_v21 = vld [vmem:[#allocation91_spill] sm:$0xff]  ;;  %v17308_v13 = vld [vmem:[#allocation309_spill] sm:$0xff] }
 0x364   :  { %17300 = vst [vmem:[#allocation142_spill] sm:$0xff] %v14090_v12  ;;  %v7413_v7 = vadd.f32 %v7381_v49, %v7169_v59  ;;  %v8600_v44 = vmul.f32 %v8525_v37, %v17162_v39  ;;  %v8601_v58 = vmul.f32 %v8525_v37, %v17305_v34  ;;  %v8769_v11 = vrot.slane %v14090_v12, %v16893_v23  ;;  %v17309_v59 = vld [vmem:[#allocation15_spill] sm:$0xff] }
 0x365   :  { %v5218_v26 = vmul.f32 %v5145_v2, %v16894_v29  ;;  %v5219_v8 = vmul.f32 %v5145_v2, %v16895_v47  ;;  %v5430_v46 = vmul.f32 %v5357_v16, %v16896_v35  ;;  %v7656_v4 = vadd.f32 %v7624_v3, %v7412_v61 }
 0x366   :  { %v7657_v53 = vadd.f32 %v7625_v27, %v7413_v7  ;;  %v5431_v17 = vmul.f32 %v5357_v16, %v17103_v63  ;;  %v17307_v49 = vcombine.high %v17306_v21, %v17306_v21  ;;  %v8844_v37 = vmul.f32 %v8769_v11, %v17308_v13 }
 0x367   :  { %v8845_v14 = vmul.f32 %v8769_v11, %v17309_v59  ;;  %v5462_v12 = vadd.f32 %v5430_v46, %v5218_v26  ;;  %v17311_v2 = vcombine.high %v17310_v42, %v17310_v42  ;;  %v7900_v35 = vadd.f32 %v7868_v57, %v7656_v4  ;;  %v17314_v57 = vld [vmem:[#allocation93_spill] sm:$0xff] }
 0x368   :  { %v5601_v9 = vrot.slane %v17307_v49, %v16893_v23  ;;  %v7901_v3 = vadd.f32 %v7869_v20, %v7657_v53  ;;  %v5463_v27 = vadd.f32 %v5431_v17, %v5219_v8  ;;  %v17312_v49 = vld [vmem:[#allocation92_spill] sm:$0xff]  ;;  %v17315_v17 = vcombine.high %v17314_v57, %v17314_v57  ;;  %v17318_v57 = vld [vmem:[#allocation166_spill] sm:$0xff] }
 0x369   :  { %v5845_v38 = vrot.slane %v17311_v2, %v16893_v23  ;;  %v17313_v46 = vcombine.high %v17312_v49, %v17312_v49  ;;  %v8144_v26 = vadd.f32 %v8112_v0, %v7900_v35 }
 0x36a   :  { %v5674_v16 = vmul.f32 %v5601_v9, %v17104_v19  ;;  %v5675_v61 = vmul.f32 %v5601_v9, %v17205_v56  ;;  %v8145_v63 = vadd.f32 %v8113_v18, %v7901_v3  ;;  %v6333_v53 = vrot.slane %v17315_v17, %v16893_v23 }
 0x36b   :  { %v5918_v7 = vmul.f32 %v5845_v38, %v17106_v60  ;;  %v5919_v21 = vmul.f32 %v5845_v38, %v17107_v62  ;;  %v6089_v11 = vrot.slane %v17313_v46, %v16893_v23  ;;  %v17316_v38 = vld [vmem:[#allocation94_spill] sm:$0xff]  ;;  %v8388_v49 = vadd.f32 %v8356_v40, %v8144_v26 }
 0x36c   :  { %v5706_v42 = vadd.f32 %v5674_v16, %v5462_v12  ;;  %v5707_v20 = vadd.f32 %v5675_v61, %v5463_v27  ;;  %v17317_v9 = vcombine.high %v17316_v38, %v17316_v38  ;;  %v8389_v46 = vadd.f32 %v8357_v32, %v8145_v63  ;;  %v17320_v63 = vld [vmem:[#allocation16_spill] sm:$0xff] }
 0x36d   :  { %v6162_v8 = vmul.f32 %v6089_v11, %v16906_v51  ;;  %v6163_v4 = vmul.f32 %v6089_v11, %v16907_v10  ;;  %v6406_v18 = vmul.f32 %v6333_v53, %v17108_v24  ;;  %v6407_v12 = vmul.f32 %v6333_v53, %v17212_v25 }
 0x36e   :  { %v6577_v2 = vrot.slane %v17317_v9, %v16893_v23  ;;  %v5950_v35 = vadd.f32 %v5918_v7, %v5706_v42  ;;  %v5951_v0 = vadd.f32 %v5919_v21, %v5707_v20  ;;  %v8632_v16 = vadd.f32 %v8600_v44, %v8388_v49  ;;  %v17322_v21 = vld [vmem:[#allocation17_spill] sm:$0xff]  ;;  %v17324_v44 = vld [vmem:[#allocation168_spill] sm:$0xff] }
 0x36f   :  { %v8633_v61 = vadd.f32 %v8601_v58, %v8389_v46  ;;  %v17319_v17 = vcombine.high %v17318_v57, %v17318_v57  ;;  %v17321_v32 = vcombine.high %v17320_v63, %v17320_v63  ;;  %v17323_v26 = vcombine.high %v17322_v21, %v17322_v21  ;;  %v17332_v21 = vld [vmem:[#allocation171_spill] sm:$0xff] }
 0x370   :  { %v6650_v3 = vmul.f32 %v6577_v2, %v17125_v31  ;;  %v6651_v27 = vmul.f32 %v6577_v2, %v17126_v5  ;;  %v6194_v11 = vadd.f32 %v6162_v8, %v5950_v35  ;;  %v6195_v40 = vadd.f32 %v6163_v4, %v5951_v0 }
 0x371   :  { %v6821_v38 = vrot.slane %v17319_v17, %v16893_v23  ;;  %v7065_v7 = vrot.slane %v17321_v32, %v16893_v23  ;;  %v7309_v42 = vrot.slane %v17323_v26, %v16893_v23  ;;  %v17325_v58 = vcombine.high %v17324_v44, %v17324_v44  ;;  %v17334_v44 = vld [vmem:[#allocation135_spill] sm:$0xff] }
 0x372   :  { %v8876_v20 = vadd.f32 %v8844_v37, %v8632_v16  ;;  %v8877_v8 = vadd.f32 %v8845_v14, %v8633_v61  ;;  %v6438_v9 = vadd.f32 %v6406_v18, %v6194_v11  ;;  %v6439_v2 = vadd.f32 %v6407_v12, %v6195_v40  ;;  %v17326_v18 = vld [vmem:[#allocation167_spill] sm:$0xff]  ;;  %v17328_v11 = vld [vmem:[#allocation169_spill] sm:$0xff]  ;;  %v17330_v40 = vld [vmem:[#allocation170_spill] sm:$0xff] }
 0x373   :  { %v7553_v53 = vrot.slane %v17325_v58, %v16893_v23  ;;  %v6894_v4 = vmul.f32 %v6821_v38, %v17127_v28  ;;  %v6895_v49 = vmul.f32 %v6821_v38, %v17128_v33  ;;  %v7138_v46 = vmul.f32 %v7065_v7, %v17129_v55  ;;  %v17335_v58 = vld [vmem:[#allocation133_spill] sm:$0xff] }
 0x374   :  { %v7139_v35 = vmul.f32 %v7065_v7, %v17256_v41  ;;  %v9308_v0 = vpack.c.bf16 %v8877_v8, %v8876_v20  ;;  %v6682_v57 = vadd.f32 %v6650_v3, %v6438_v9  ;;  %v7382_v17 = vmul.f32 %v7309_v42, %v17257_v22 }
 0x375   :  { %v7383_v63 = vmul.f32 %v7309_v42, %v17258_v48  ;;  %v6683_v32 = vadd.f32 %v6651_v27, %v6439_v2  ;;  %v7626_v37 = vmul.f32 %v7553_v53, %v17139_v6  ;;  %v7627_v14 = vmul.f32 %v7553_v53, %v17140_v54 }
 0x376   :  { %v17327_v12 = vcombine.high %v17326_v18, %v17326_v18  ;;  %9309 = vmatpush3.bf16.msra.mxu0 %v9308_v0  ;;  %v6926_v61 = vadd.f32 %v6894_v4, %v6682_v57  ;;  %v17329_v3 = vcombine.high %v17328_v11, %v17328_v11  ;;  %v17331_v27 = vcombine.high %v17330_v40, %v17330_v40  ;;  %v17337_v4 = vld [vmem:[#allocation21_spill] sm:$0xff] }
 0x377   :  { %v17333_v26 = vcombine.high %v17332_v21, %v17332_v21  ;;  %v17336_v53 = vpack.c.bf16 %v17334_v44, %v17335_v58  ;;  %v6927_v20 = vadd.f32 %v6895_v49, %v6683_v32  ;;  %v17338_v2 = vcombine.high %v17337_v4, %v17337_v4  ;;  %v17341_v58 = vld [vmem:[#allocation54_spill] sm:$0xff] }
 0x378   :  { %v7797_v16 = vrot.slane %v17327_v12, %v16893_v23  ;;  %v8041_v38 = vrot.slane %v17329_v3, %v16893_v23  ;;  %v8285_v7 = vrot.slane %v17331_v27, %v16893_v23  ;;  %v7170_v57 = vadd.f32 %v7138_v46, %v6926_v61  ;;  %v17340_v46 = vld [vmem:[#allocation132_spill] sm:$0xff] }
 0x379   :  { %v8529_v42 = vrot.slane %v17333_v26, %v16893_v23  ;;  %9311 = vmatprep.subr.bf16.mxu0 %v17336_v53  ;;  %v8773_v0 = vrot.slane %v17338_v2, %v16893_v23  ;;  %v7171_v3 = vadd.f32 %v7139_v35, %v6927_v20  ;;  %v17339_v26 = vld [vmem:[#allocation14_spill] sm:$0xff]  ;;  %v17343_v35 = vld [vmem:[#allocation55_spill] sm:$0xff]  ;;  %v17345_v2 = vld [vmem:[#allocation64_spill] sm:$0xff] }
 0x37a   :  { %v7870_v8 = vmul.f32 %v7797_v16, %v17148_v1  ;;  %v7871_v9 = vmul.f32 %v7797_v16, %v17149_v43  ;;  %v8114_v18 = vmul.f32 %v8041_v38, %v17262_v52  ;;  %v8115_v12 = vmul.f32 %v8041_v38, %v17152_v36  ;;  %v17342_v38 = vld [vmem:[#allocation134_spill] sm:$0xff] }
 0x37b   :  { %v8358_v11 = vmul.f32 %v8285_v7, %v17159_v50  ;;  %v8359_v40 = vmul.f32 %v8285_v7, %v17161_v45  ;;  %v8602_v49 = vmul.f32 %v8529_v42, %v17162_v39  ;;  %v8603_v32 = vmul.f32 %v8529_v42, %v17305_v34  ;;  %v17344_v42 = vld [vmem:[#allocation136_spill] sm:$0xff] }
 0x37c   :  { %v7414_v16 = vadd.f32 %v7382_v17, %v7170_v57  ;;  %v8846_v27 = vmul.f32 %v8773_v0, %v17308_v13  ;;  %v8847_v21 = vmul.f32 %v8773_v0, %v17309_v59  ;;  %v6700_v61 = vadd.f32 %v17340_v46, %v17339_v26  ;;  %v17346_v0 = vld [vmem:[#allocation65_spill] sm:$0xff]  ;;  %v17348_v46 = vld [vmem:[#allocation68_spill] sm:$0xff] }
 0x37d   :  { %v7415_v44 = vadd.f32 %v7383_v63, %v7171_v3  ;;  %v6701_v53 = vadd.f32 %v17342_v38, %v17341_v58  ;;  %v7156_v20 = vmul.f32 %v17343_v35, %v17129_v55  ;;  %v7157_v7 = vmul.f32 %v17343_v35, %v17256_v41  ;;  %v17347_v63 = vld [vmem:[#allocation138_spill] sm:$0xff]  ;;  %v17349_v38 = vld [vmem:[#allocation63_spill] sm:$0xff] }
 0x37e   :  { %v7658_v4 = vadd.f32 %v7626_v37, %v7414_v16  ;;  %v6944_v17 = vadd.f32 %v17344_v42, %v6700_v61  ;;  %v7296_v57 = vcombine.high %v17345_v2, %v17345_v2  ;;  %v7540_v33 = vcombine.high %v17346_v0, %v17346_v0 }
 0x37f   :  { %v7659_v26 = vadd.f32 %v7627_v14, %v7415_v44  ;;  %v6945_v3 = vadd.f32 %v17347_v63, %v6701_v53  ;;  %v7784_v58 = vcombine.high %v17348_v46, %v17348_v46  ;;  %v8028_v55 = vcombine.high %v17349_v38, %v17349_v38 }
 0x380   :  { %v7902_v28 = vadd.f32 %v7870_v8, %v7658_v4  ;;  %v7188_v35 = vadd.f32 %v7156_v20, %v6944_v17  ;;  %v7345_v37 = vrot.slane %v7296_v57, %v16893_v23  ;;  %v7589_v16 = vrot.slane %v7540_v33, %v16893_v23 }
 0x381   :  { %v7903_v61 = vadd.f32 %v7871_v9, %v7659_v26  ;;  %v7189_v42 = vadd.f32 %v7157_v7, %v6945_v3  ;;  %v7833_v2 = vrot.slane %v7784_v58, %v16893_v23  ;;  %v8077_v14 = vrot.slane %v8028_v55, %v16893_v23  ;;  %v17351_v26 = vld [vmem:[#allocation67_spill] sm:$0xff] }
 0x382   :  { %v8146_v44 = vadd.f32 %v8114_v18, %v7902_v28  ;;  %v7400_v53 = vmul.f32 %v7345_v37, %v17257_v22  ;;  %v7401_v0 = vmul.f32 %v7345_v37, %v17258_v48  ;;  %v7644_v63 = vmul.f32 %v7589_v16, %v17139_v6  ;;  %v17350_v18 = vld [vmem:[#allocation66_spill] sm:$0xff]  ;;  %v17352_v37 = vld [vmem:[#allocation40_spill] sm:$0xff] }
 0x383   :  { %v8147_v46 = vadd.f32 %v8115_v12, %v7903_v61  ;;  %v7645_v8 = vmul.f32 %v7589_v16, %v17140_v54  ;;  %v7888_v20 = vmul.f32 %v7833_v2, %v17148_v1  ;;  %v7889_v33 = vmul.f32 %v7833_v2, %v17149_v43 }
 0x384   :  { %v8390_v9 = vadd.f32 %v8358_v11, %v8146_v44  ;;  %v7432_v7 = vadd.f32 %v7400_v53, %v7188_v35  ;;  %v7433_v4 = vadd.f32 %v7401_v0, %v7189_v42  ;;  %v8132_v17 = vmul.f32 %v8077_v14, %v17262_v52 }
 0x385   :  { %v8391_v55 = vadd.f32 %v8359_v40, %v8147_v46  ;;  %v8133_v28 = vmul.f32 %v8077_v14, %v17152_v36  ;;  %v8272_v57 = vcombine.high %v17350_v18, %v17350_v18  ;;  %v8516_v12 = vcombine.high %v17351_v26, %v17351_v26  ;;  %v17353_v40 = vld [vmem:[#allocation104_spill] sm:$0xff]  ;;  %v17355_v26 = vld [vmem:[#allocation106_spill] sm:$0xff] }
 0x386   :  { %v8634_v3 = vadd.f32 %v8602_v49, %v8390_v9  ;;  %v7676_v58 = vadd.f32 %v7644_v63, %v7432_v7  ;;  %v7677_v38 = vadd.f32 %v7645_v8, %v7433_v4  ;;  %v8760_v16 = vcombine.high %v17352_v37, %v17352_v37 }
 0x387   :  { %v8635_v11 = vadd.f32 %v8603_v32, %v8391_v55  ;;  %v8321_v35 = vrot.slane %v8272_v57, %v16893_v23  ;;  %v8565_v61 = vrot.slane %v8516_v12, %v16893_v23  ;;  %v5083_v42 = vcombine.high %v17353_v40, %v17353_v40 }
 0x388   :  { %v8878_v2 = vadd.f32 %v8846_v27, %v8634_v3  ;;  %v7920_v14 = vadd.f32 %v7888_v20, %v7676_v58  ;;  %v7921_v44 = vadd.f32 %v7889_v33, %v7677_v38  ;;  %v8809_v53 = vrot.slane %v8760_v16, %v16893_v23  ;;  %v17354_v33 = vld [vmem:[#allocation105_spill] sm:$0xff] }
 0x389   :  { %v8879_v0 = vadd.f32 %v8847_v21, %v8635_v11  ;;  %v8376_v49 = vmul.f32 %v8321_v35, %v17159_v50  ;;  %v8377_v63 = vmul.f32 %v8321_v35, %v17161_v45  ;;  %v8620_v46 = vmul.f32 %v8565_v61, %v17162_v39 }
 0x38a   :  { %v8164_v32 = vadd.f32 %v8132_v17, %v7920_v14  ;;  %v8165_v8 = vadd.f32 %v8133_v28, %v7921_v44  ;;  %v8621_v9 = vmul.f32 %v8565_v61, %v17305_v34  ;;  %v8864_v7 = vmul.f32 %v8809_v53, %v17308_v13  ;;  %v17357_v61 = vld [vmem:[#allocation299_spill] sm:$0xff] }
 0x38b   :  { %v9312_v4 = vpack.c.bf16 %v8879_v0, %v8878_v2  ;;  %v8865_v27 = vmul.f32 %v8809_v53, %v17309_v59  ;;  %v5149_v20 = vrot.slane %v5083_v42, %v16893_v23  ;;  %v5295_v21 = vcombine.high %v17354_v33, %v17354_v33  ;;  %v17358_v2 = vld [vmem:[#allocation110_spill] sm:$0xff] }
 0x38c   :  { %v8408_v55 = vadd.f32 %v8376_v49, %v8164_v32  ;;  %v8409_v18 = vadd.f32 %v8377_v63, %v8165_v8  ;;  %v5539_v57 = vcombine.high %v13959_v30, %v13959_v30  ;;  %v5783_v17 = vcombine.high %v17355_v26, %v17355_v26  ;;  %v17356_v30 = vld [vmem:[#allocation296_spill] sm:$0xff] }
 0x38d   :  { %9313 = vmatpush3.bf16.msra.mxu0 %v9312_v4  ;;  %v5220_v28 = vmul.f32 %v5149_v20, %v16894_v29  ;;  %v5221_v12 = vmul.f32 %v5149_v20, %v16895_v47  ;;  %v5361_v3 = vrot.slane %v5295_v21, %v16893_v23  ;;  %v6027_v58 = vcombine.high %v13979_v15, %v13979_v15 }
 0x38e   :  { %v8652_v38 = vadd.f32 %v8620_v46, %v8408_v55  ;;  %v8653_v37 = vadd.f32 %v8621_v9, %v8409_v18  ;;  %v5605_v16 = vrot.slane %v5539_v57, %v16893_v23  ;;  %v5849_v11 = vrot.slane %v5783_v17, %v16893_v23  ;;  %v17360_v55 = vld [vmem:[#allocation108_spill] sm:$0xff]  ;;  %v17361_v17 = vld [vmem:[#allocation109_spill] sm:$0xff] }
 0x38f   :  { %v5432_v35 = vmul.f32 %v5361_v3, %v17356_v30  ;;  %v5433_v40 = vmul.f32 %v5361_v3, %v17357_v61  ;;  %v6093_v42 = vrot.slane %v6027_v58, %v16893_v23  ;;  %v6271_v14 = vcombine.high %v17358_v2, %v17358_v2  ;;  %v17364_v2 = vld [vmem:[#allocation140_spill] sm:$0xff] }
 0x390   :  { %v8896_v44 = vadd.f32 %v8864_v7, %v8652_v38  ;;  %v8897_v53 = vadd.f32 %v8865_v27, %v8653_v37  ;;  %v5676_v0 = vmul.f32 %v5605_v16, %v17104_v19  ;;  %v5677_v15 = vmul.f32 %v5605_v16, %v17205_v56  ;;  %v17359_v27 = vld [vmem:[#allocation107_spill] sm:$0xff] }
 0x391   :  { %v5464_v49 = vadd.f32 %v5432_v35, %v5220_v28  ;;  %v5465_v63 = vadd.f32 %v5433_v40, %v5221_v12  ;;  %v5920_v46 = vmul.f32 %v5849_v11, %v17106_v60  ;;  %v5921_v32 = vmul.f32 %v5849_v11, %v17107_v62  ;;  %v17362_v12 = vld [vmem:[#allocation111_spill] sm:$0xff] }
 0x392   :  { %v9314_v8 = vpack.c.bf16 %v8897_v53, %v8896_v44  ;;  %v6164_v9 = vmul.f32 %v6093_v42, %v16906_v51  ;;  %v6165_v4 = vmul.f32 %v6093_v42, %v16907_v10  ;;  %v6337_v20 = vrot.slane %v6271_v14, %v16893_v23  ;;  %v17363_v40 = vld [vmem:[#allocation7_spill] sm:$0xff] }
 0x393   :  { %v5708_v33 = vadd.f32 %v5676_v0, %v5464_v49  ;;  %v5709_v7 = vadd.f32 %v5677_v15, %v5465_v63  ;;  %v6515_v21 = vcombine.high %v17359_v27, %v17359_v27  ;;  %v6759_v18 = vcombine.high %v17360_v55, %v17360_v55  ;;  %v17365_v49 = vld [vmem:[#allocation316_spill] sm:$0xff] }
 0x394   :  { %9315 = vmatprep.subr.bf16.mxu0 %v9314_v8  ;;  %v6408_v57 = vmul.f32 %v6337_v20, %v17108_v24  ;;  %v6409_v26 = vmul.f32 %v6337_v20, %v17212_v25  ;;  %v7003_v28 = vcombine.high %v17361_v17, %v17361_v17  ;;  %v7247_v3 = vcombine.high %v17362_v12, %v17362_v12  ;;  %v17367_v8 = vld [vmem:[#allocation291_spill] sm:$0xff] }
 0x395   :  { %v5952_v58 = vadd.f32 %v5920_v46, %v5708_v33  ;;  %v5953_v38 = vadd.f32 %v5921_v32, %v5709_v7  ;;  %v6581_v37 = vrot.slane %v6515_v21, %v16893_v23  ;;  %v6825_v16 = vrot.slane %v6759_v18, %v16893_v23  ;;  %v17366_v46 = vld [vmem:[#allocation319_spill] sm:$0xff]  ;;  %v17368_v18 = vld [vmem:[#allocation141_spill] sm:$0xff] }
 0x396   :  { %v7069_v11 = vrot.slane %v7003_v28, %v16893_v23  ;;  %v7313_v35 = vrot.slane %v7247_v3, %v16893_v23  ;;  %v7491_v42 = vcombine.high %v17363_v40, %v17363_v40  ;;  %v7735_v14 = vcombine.high %v17364_v2, %v17364_v2  ;;  %v17369_v28 = vld [vmem:[#allocation8_spill] sm:$0xff] }
 0x397   :  { %v6196_v44 = vadd.f32 %v6164_v9, %v5952_v58  ;;  %v6197_v53 = vadd.f32 %v6165_v4, %v5953_v38  ;;  %v6652_v0 = vmul.f32 %v6581_v37, %v17125_v31  ;;  %v6653_v15 = vmul.f32 %v6581_v37, %v17126_v5  ;;  %v17370_v38 = vld [vmem:[#allocation139_spill] sm:$0xff] }
 0x398   :  { %v6896_v63 = vmul.f32 %v6825_v16, %v17365_v49  ;;  %v6897_v32 = vmul.f32 %v6825_v16, %v17366_v46  ;;  %v7140_v20 = vmul.f32 %v7069_v11, %v17367_v8  ;;  %v7141_v33 = vmul.f32 %v7069_v11, %v17256_v41 }
 0x399   :  { %v6440_v7 = vadd.f32 %v6408_v57, %v6196_v44  ;;  %v6441_v27 = vadd.f32 %v6409_v26, %v6197_v53  ;;  %v7384_v21 = vmul.f32 %v7313_v35, %v17257_v22  ;;  %v7385_v55 = vmul.f32 %v7313_v35, %v17258_v48  ;;  %v17371_v26 = vld [vmem:[#allocation142_spill] sm:$0xff] }
 0x39a   :  { %v7557_v9 = vrot.slane %v7491_v42, %v16893_v23  ;;  %v7801_v4 = vrot.slane %v7735_v14, %v16893_v23  ;;  %v7979_v17 = vcombine.high %v17368_v18, %v17368_v18  ;;  %v8223_v12 = vcombine.high %v17369_v28, %v17369_v28 }
 0x39b   :  { %v6684_v3 = vadd.f32 %v6652_v0, %v6440_v7  ;;  %v6685_v58 = vadd.f32 %v6653_v15, %v6441_v27  ;;  %v8467_v57 = vcombine.high %v17370_v38, %v17370_v38  ;;  %v8711_v37 = vcombine.high %v17371_v26, %v17371_v26  ;;  %v17372_v15 = vld [vmem:[#allocation6_spill] sm:$0xff]  ;;  %v17373_v7 = vld [vmem:[#allocation12_spill] sm:$0xff] }
 0x39c   :  { %v7628_v16 = vmul.f32 %v7557_v9, %v17139_v6  ;;  %v7629_v11 = vmul.f32 %v7557_v9, %v17140_v54  ;;  %v7872_v35 = vmul.f32 %v7801_v4, %v17148_v1  ;;  %v7873_v40 = vmul.f32 %v7801_v4, %v17149_v43  ;;  %v17375_v9 = vld [vmem:[#allocation214_spill] sm:$0xff] }
 0x39d   :  { %v6928_v42 = vadd.f32 %v6896_v63, %v6684_v3  ;;  %v6929_v2 = vadd.f32 %v6897_v32, %v6685_v58  ;;  %v8045_v14 = vrot.slane %v7979_v17, %v16893_v23  ;;  %v8289_v44 = vrot.slane %v8223_v12, %v16893_v23 }
 0x39e   :  { %v8533_v53 = vrot.slane %v8467_v57, %v16893_v23  ;;  %v8777_v0 = vrot.slane %v8711_v37, %v16893_v23  ;;  %v17374_v27 = vcombine.high %v17373_v7, %v17373_v7  ;;  %v17376_v4 = vcombine.high %v17375_v9, %v17375_v9  ;;  %v17386_v9 = vld [vmem:[#allocation284_spill] sm:$0xff] }
 0x39f   :  { %v7172_v32 = vadd.f32 %v7140_v20, %v6928_v42  ;;  %v7173_v17 = vadd.f32 %v7141_v33, %v6929_v2  ;;  %v8116_v28 = vmul.f32 %v8045_v14, %v17262_v52  ;;  %v8117_v12 = vmul.f32 %v8045_v14, %v17152_v36  ;;  %v17380_v42 = vld [vmem:[#allocation19_spill] sm:$0xff] }
 0x3a0   :  { %v14322_v18 = vrot.slane %v17374_v27, %v17372_v15  ;;  %v14328_v63 = vrot.slane %v17376_v4, %v17372_v15  ;;  %v8360_v3 = vmul.f32 %v8289_v44, %v17159_v50  ;;  %v8361_v58 = vmul.f32 %v8289_v44, %v17161_v45 }
 0x3a1   :  { %v8604_v38 = vmul.f32 %v8533_v53, %v17162_v39  ;;  %v8605_v57 = vmul.f32 %v8533_v53, %v17305_v34  ;;  %v7416_v26 = vadd.f32 %v7384_v21, %v7172_v32  ;;  %v7417_v37 = vadd.f32 %v7385_v55, %v7173_v17  ;;  %v17383_v21 = vld [vmem:[#allocation264_spill] sm:$0xff]  ;;  %v17389_v17 = vld [vmem:[#allocation287_spill] sm:$0xff] }
 0x3a2   :  { %17377 = vst [vmem:[#allocation143_spill] sm:$0xff] %v14328_v63  ;;  %v8848_v7 = vmul.f32 %v8777_v0, %v17308_v13  ;;  %v8849_v27 = vmul.f32 %v8777_v0, %v17309_v59  ;;  %v14340_v20 = vrot.slane %v14322_v18, %v17372_v15  ;;  %v14344_v33 = vrot.slane %v14328_v63, %v17372_v15 }
 0x3a3   :  { %v17381_v2 = vcombine.high %v17380_v42, %v17380_v42  ;;  %v17384_v55 = vcombine.high %v17383_v21, %v17383_v21  ;;  %v7660_v53 = vadd.f32 %v7628_v16, %v7416_v26  ;;  %v7661_v0 = vadd.f32 %v7629_v11, %v7417_v37 }
 0x3a4   :  { %17378 = vst [vmem:[#allocation144_spill] sm:$0xff] %v14340_v20  ;;  %17379 = vst [vmem:[#allocation189_spill] sm:$0xff] %v14344_v33  ;;  %v17387_v4 = vcombine.high %v17386_v9, %v17386_v9  ;;  %v17390_v42 = vcombine.high %v17389_v17, %v17389_v17  ;;  %v5185_v63 = vrot.slane %v14340_v20, %v16893_v23 }
 0x3a5   :  { %v14350_v14 = vrot.slane %v17381_v2, %v17372_v15  ;;  %v14356_v44 = vrot.slane %v17384_v55, %v17372_v15  ;;  %v5397_v21 = vrot.slane %v14344_v33, %v16893_v23  ;;  %v7904_v26 = vadd.f32 %v7872_v35, %v7660_v53 }
 0x3a6   :  { %v14362_v32 = vrot.slane %v17387_v4, %v17372_v15  ;;  %v14368_v2 = vrot.slane %v17390_v42, %v17372_v15  ;;  %v7905_v37 = vadd.f32 %v7873_v40, %v7661_v0  ;;  %v5238_v4 = vmul.f32 %v5185_v63, %v16894_v29 }
 0x3a7   :  { %17382 = vst [vmem:[#allocation96_spill] sm:$0xff] %v14350_v14  ;;  %17385 = vst [vmem:[#allocation98_spill] sm:$0xff] %v14356_v44  ;;  %v14376_v16 = vrot.slane %v14350_v14, %v17372_v15  ;;  %v14380_v11 = vrot.slane %v14356_v44, %v17372_v15  ;;  %v5239_v17 = vmul.f32 %v5185_v63, %v16895_v47 }
 0x3a8   :  { %17388 = vst [vmem:[#allocation99_spill] sm:$0xff] %v14362_v32  ;;  %17391 = vst [vmem:[#allocation102_spill] sm:$0xff] %v14368_v2  ;;  %v14384_v55 = vrot.slane %v14362_v32, %v17372_v15  ;;  %v14388_v9 = vrot.slane %v14368_v2, %v17372_v15  ;;  %v5450_v42 = vmul.f32 %v5397_v21, %v17356_v30 }
 0x3a9   :  { %17392 = vst [vmem:[#allocation97_spill] sm:$0xff] %v14376_v16  ;;  %17393 = vst [vmem:[#allocation100_spill] sm:$0xff] %v14380_v11  ;;  %v5451_v33 = vmul.f32 %v5397_v21, %v17357_v61  ;;  %v8148_v20 = vadd.f32 %v8116_v28, %v7904_v26  ;;  %v8149_v44 = vadd.f32 %v8117_v12, %v7905_v37 }
 0x3aa   :  { %17394 = vst [vmem:[#allocation101_spill] sm:$0xff] %v14384_v55  ;;  %17395 = vst [vmem:[#allocation103_spill] sm:$0xff] %v14388_v9  ;;  %v5641_v35 = vrot.slane %v14376_v16, %v16893_v23  ;;  %v5885_v40 = vrot.slane %v14380_v11, %v16893_v23  ;;  %v5482_v53 = vadd.f32 %v5450_v42, %v5238_v4 }
 0x3ab   :  { %v5483_v0 = vadd.f32 %v5451_v33, %v5239_v17  ;;  %v6129_v2 = vrot.slane %v14384_v55, %v16893_v23  ;;  %v6373_v63 = vrot.slane %v14388_v9, %v16893_v23  ;;  %v8392_v32 = vadd.f32 %v8360_v3, %v8148_v20 }
 0x3ac   :  { %v8393_v14 = vadd.f32 %v8361_v58, %v8149_v44  ;;  %v5694_v21 = vmul.f32 %v5641_v35, %v17104_v19  ;;  %v5695_v28 = vmul.f32 %v5641_v35, %v17205_v56  ;;  %v5938_v12 = vmul.f32 %v5885_v40, %v17106_v60  ;;  %v17396_v58 = vld [vmem:[#allocation289_spill] sm:$0xff]  ;;  %v17398_v35 = vld [vmem:[#allocation286_spill] sm:$0xff] }
 0x3ad   :  { %v5939_v26 = vmul.f32 %v5885_v40, %v17107_v62  ;;  %v6182_v37 = vmul.f32 %v6129_v2, %v16906_v51  ;;  %v6183_v33 = vmul.f32 %v6129_v2, %v16907_v10  ;;  %v8636_v4 = vadd.f32 %v8604_v38, %v8392_v32 }
 0x3ae   :  { %v8637_v17 = vadd.f32 %v8605_v57, %v8393_v14  ;;  %v5726_v42 = vadd.f32 %v5694_v21, %v5482_v53  ;;  %v5727_v55 = vadd.f32 %v5695_v28, %v5483_v0  ;;  %v6426_v9 = vmul.f32 %v6373_v63, %v17108_v24  ;;  %v17402_v0 = vld [vmem:[#allocation95_spill] sm:$0xff]  ;;  %v17405_v28 = vld [vmem:[#allocation29_spill] sm:$0xff] }
 0x3af   :  { %v6427_v3 = vmul.f32 %v6373_v63, %v17212_v25  ;;  %v17397_v20 = vcombine.high %v17396_v58, %v17396_v58  ;;  %v17399_v40 = vcombine.high %v17398_v35, %v17398_v35  ;;  %v8880_v38 = vadd.f32 %v8848_v7, %v8636_v4  ;;  %v17408_v4 = vld [vmem:[#allocation31_spill] sm:$0xff] }
 0x3b0   :  { %v8881_v57 = vadd.f32 %v8849_v27, %v8637_v17  ;;  %v5970_v14 = vadd.f32 %v5938_v12, %v5726_v42  ;;  %v5971_v32 = vadd.f32 %v5939_v26, %v5727_v55  ;;  %v17403_v63 = vcombine.high %v17402_v0, %v17402_v0 }
 0x3b1   :  { %v14414_v44 = vrot.slane %v17397_v20, %v17372_v15  ;;  %v14420_v11 = vrot.slane %v17399_v40, %v17372_v15  ;;  %v17406_v7 = vcombine.high %v17405_v28, %v17405_v28  ;;  %v17409_v17 = vcombine.high %v17408_v4, %v17408_v4 }
 0x3b2   :  { %v14434_v21 = vrot.slane %v17403_v63, %v17372_v15  ;;  %v9316_v55 = vpack.c.bf16 %v8881_v57, %v8880_v38  ;;  %v6214_v12 = vadd.f32 %v6182_v37, %v5970_v14  ;;  %v6215_v26 = vadd.f32 %v6183_v33, %v5971_v32  ;;  %v17414_v57 = vld [vmem:[#allocation32_spill] sm:$0xff] }
 0x3b3   :  { %v14424_v2 = vrot.slane %v14414_v44, %v17372_v15  ;;  %v14428_v53 = vrot.slane %v14420_v11, %v17372_v15  ;;  %v14440_v27 = vrot.slane %v17406_v7, %v17372_v15  ;;  %v14446_v42 = vrot.slane %v17409_v17, %v17372_v15  ;;  %v17418_v17 = vld [vmem:[#allocation34_spill] sm:$0xff] }
 0x3b4   :  { %17404 = vst [vmem:[#allocation130_spill] sm:$0xff] %v14434_v21  ;;  %v14454_v35 = vrot.slane %v14434_v21, %v17372_v15  ;;  %9317 = vmatpush3.bf16.msra.mxu0 %v9316_v55  ;;  %v6458_v33 = vadd.f32 %v6426_v9, %v6214_v12  ;;  %v6459_v40 = vadd.f32 %v6427_v3, %v6215_v26 }
 0x3b5   :  { %17400 = vst [vmem:[#allocation313_spill] sm:$0xff] %v14424_v2  ;;  %17401 = vst [vmem:[#allocation314_spill] sm:$0xff] %v14428_v53  ;;  %v6617_v58 = vrot.slane %v14424_v2, %v16893_v23  ;;  %v6861_v20 = vrot.slane %v14428_v53, %v16893_v23  ;;  %v14458_v37 = vrot.slane %v14440_v27, %v17372_v15  ;;  %v17432_v2 = vld [vmem:[#allocation56_spill] sm:$0xff] }
 0x3b6   :  { %17407 = vst [vmem:[#allocation188_spill] sm:$0xff] %v14440_v27  ;;  %17410 = vst [vmem:[#allocation5_spill] sm:$0xff] %v14446_v42  ;;  %v14462_v38 = vrot.slane %v14446_v42, %v17372_v15  ;;  %v17415_v14 = vcombine.high %v17414_v57, %v17414_v57  ;;  %v7105_v9 = vrot.slane %v14454_v35, %v16893_v23  ;;  %v17421_v57 = vld [vmem:[#allocation33_spill] sm:$0xff] }
 0x3b7   :  { %17411 = vst [vmem:[#allocation305_spill] sm:$0xff] %v14454_v35  ;;  %17412 = vst [vmem:[#allocation315_spill] sm:$0xff] %v14458_v37  ;;  %v6670_v0 = vmul.f32 %v6617_v58, %v17125_v31  ;;  %v6671_v63 = vmul.f32 %v6617_v58, %v17126_v5  ;;  %v6914_v28 = vmul.f32 %v6861_v20, %v17365_v49 }
 0x3b8   :  { %17413 = vst [vmem:[#allocation187_spill] sm:$0xff] %v14462_v38  ;;  %v14468_v32 = vrot.slane %v17415_v14, %v17372_v15  ;;  %v6915_v7 = vmul.f32 %v6861_v20, %v17366_v46  ;;  %v7349_v3 = vrot.slane %v14458_v37, %v16893_v23  ;;  %v7593_v55 = vrot.slane %v14462_v38, %v16893_v23 }
 0x3b9   :  { %v6702_v26 = vadd.f32 %v6670_v0, %v6458_v33  ;;  %v6703_v4 = vadd.f32 %v6671_v63, %v6459_v40  ;;  %v17419_v58 = vcombine.high %v17418_v17, %v17418_v17  ;;  %v17422_v14 = vcombine.high %v17421_v57, %v17421_v57 }
 0x3ba   :  { %17416 = vst [vmem:[#allocation190_spill] sm:$0xff] %v14468_v32  ;;  %v14482_v12 = vrot.slane %v14468_v32, %v17372_v15  ;;  %v7158_v38 = vmul.f32 %v7105_v9, %v17367_v8  ;;  %v7159_v35 = vmul.f32 %v7105_v9, %v17256_v41  ;;  %v7402_v53 = vmul.f32 %v7349_v3, %v17257_v22 }
 0x3bb   :  { %v14488_v20 = vrot.slane %v17419_v58, %v17372_v15  ;;  %v14494_v37 = vrot.slane %v17422_v14, %v17372_v15  ;;  %v7403_v33 = vmul.f32 %v7349_v3, %v17258_v48  ;;  %v6946_v40 = vadd.f32 %v6914_v28, %v6702_v26  ;;  %v17426_v14 = vld [vmem:[#allocation35_spill] sm:$0xff] }
 0x3bc   :  { %17417 = vst [vmem:[#allocation191_spill] sm:$0xff] %v14482_v12  ;;  %v6947_v0 = vadd.f32 %v6915_v7, %v6703_v4  ;;  %v7646_v63 = vmul.f32 %v7593_v55, %v17139_v6  ;;  %v7647_v17 = vmul.f32 %v7593_v55, %v17140_v54  ;;  %v7837_v58 = vrot.slane %v14482_v12, %v16893_v23  ;;  %v17429_v55 = vld [vmem:[#allocation36_spill] sm:$0xff] }
 0x3bd   :  { %17420 = vst [vmem:[#allocation193_spill] sm:$0xff] %v14488_v20  ;;  %17423 = vst [vmem:[#allocation192_spill] sm:$0xff] %v14494_v37  ;;  %v14506_v57 = vrot.slane %v14488_v20, %v17372_v15  ;;  %v14510_v9 = vrot.slane %v14494_v37, %v17372_v15  ;;  %v17427_v28 = vcombine.high %v17426_v14, %v17426_v14 }
 0x3be   :  { %v7190_v3 = vadd.f32 %v7158_v38, %v6946_v40  ;;  %v7191_v26 = vadd.f32 %v7159_v35, %v6947_v0  ;;  %v17430_v4 = vcombine.high %v17429_v55, %v17429_v55  ;;  %v17433_v16 = vcombine.high %v17432_v2, %v17432_v2 }
 0x3bf   :  { %17424 = vst [vmem:[#allocation194_spill] sm:$0xff] %v14506_v57  ;;  %17425 = vst [vmem:[#allocation195_spill] sm:$0xff] %v14510_v9  ;;  %v14516_v7 = vrot.slane %v17427_v28, %v17372_v15  ;;  %v7890_v20 = vmul.f32 %v7837_v58, %v17148_v1  ;;  %v7891_v14 = vmul.f32 %v7837_v58, %v17149_v43 }
 0x3c0   :  { %v14522_v12 = vrot.slane %v17430_v4, %v17372_v15  ;;  %v14528_v37 = vrot.slane %v17433_v16, %v17372_v15  ;;  %v8081_v38 = vrot.slane %v14506_v57, %v16893_v23  ;;  %v8325_v35 = vrot.slane %v14510_v9, %v16893_v23 }
 0x3c1   :  { %17428 = vst [vmem:[#allocation196_spill] sm:$0xff] %v14516_v7  ;;  %v7434_v40 = vadd.f32 %v7402_v53, %v7190_v3  ;;  %v7435_v0 = vadd.f32 %v7403_v33, %v7191_v26  ;;  %v14538_v28 = vrot.slane %v14516_v7, %v17372_v15  ;;  %v17438_v26 = vld [vmem:[#allocation58_spill] sm:$0xff] }
 0x3c2   :  { %17431 = vst [vmem:[#allocation197_spill] sm:$0xff] %v14522_v12  ;;  %17434 = vst [vmem:[#allocation152_spill] sm:$0xff] %v14528_v37  ;;  %v14542_v16 = vrot.slane %v14522_v12, %v17372_v15  ;;  %v8134_v2 = vmul.f32 %v8081_v38, %v17262_v52  ;;  %v8135_v58 = vmul.f32 %v8081_v38, %v17152_v36 }
 0x3c3   :  { %17435 = vst [vmem:[#allocation10_spill] sm:$0xff] %v14538_v28  ;;  %v8378_v55 = vmul.f32 %v8325_v35, %v17159_v50  ;;  %v8379_v4 = vmul.f32 %v8325_v35, %v17161_v45  ;;  %v7678_v57 = vadd.f32 %v7646_v63, %v7434_v40  ;;  %v7679_v9 = vadd.f32 %v7647_v17, %v7435_v0  ;;  %v17441_v35 = vld [vmem:[#allocation57_spill] sm:$0xff]  ;;  %v17444_v40 = vld [vmem:[#allocation59_spill] sm:$0xff] }
 0x3c4   :  { %17436 = vst [vmem:[#allocation154_spill] sm:$0xff] %v14542_v16  ;;  %v8569_v53 = vrot.slane %v14538_v28, %v16893_v23  ;;  %v8813_v33 = vrot.slane %v14542_v16, %v16893_v23  ;;  %v14554_v3 = vrot.slane %v14528_v37, %v17372_v15  ;;  %v17439_v38 = vcombine.high %v17438_v26, %v17438_v26 }
 0x3c5   :  { %v17442_v63 = vcombine.high %v17441_v35, %v17441_v35  ;;  %v17445_v0 = vcombine.high %v17444_v40, %v17444_v40  ;;  %v7922_v28 = vadd.f32 %v7890_v20, %v7678_v57  ;;  %v7923_v37 = vadd.f32 %v7891_v14, %v7679_v9 }
 0x3c6   :  { %17437 = vst [vmem:[#allocation157_spill] sm:$0xff] %v14554_v3  ;;  %v14560_v12 = vrot.slane %v17439_v38, %v17372_v15  ;;  %v8622_v7 = vmul.f32 %v8569_v53, %v17162_v39  ;;  %v8623_v26 = vmul.f32 %v8569_v53, %v17305_v34  ;;  %v8866_v38 = vmul.f32 %v8813_v33, %v17308_v13 }
 0x3c7   :  { %v14566_v17 = vrot.slane %v17442_v63, %v17372_v15  ;;  %v14572_v16 = vrot.slane %v17445_v0, %v17372_v15  ;;  %v8867_v32 = vmul.f32 %v8813_v33, %v17309_v59  ;;  %v5153_v35 = vrot.slane %v14554_v3, %v16893_v23  ;;  %v17450_v33 = vld [vmem:[#allocation60_spill] sm:$0xff] }
 0x3c8   :  { %17440 = vst [vmem:[#allocation153_spill] sm:$0xff] %v14560_v12  ;;  %v14582_v63 = vrot.slane %v14560_v12, %v17372_v15  ;;  %v8166_v40 = vadd.f32 %v8134_v2, %v7922_v28  ;;  %v8167_v0 = vadd.f32 %v8135_v58, %v7923_v37  ;;  %v17451_v28 = vcombine.high %v17450_v33, %v17450_v33  ;;  %v17454_v33 = vld [vmem:[#allocation61_spill] sm:$0xff] }
 0x3c9   :  { %17443 = vst [vmem:[#allocation155_spill] sm:$0xff] %v14566_v17  ;;  %17446 = vst [vmem:[#allocation156_spill] sm:$0xff] %v14572_v16  ;;  %v14586_v20 = vrot.slane %v14566_v17, %v17372_v15  ;;  %v14590_v57 = vrot.slane %v14572_v16, %v17372_v15  ;;  %v5222_v9 = vmul.f32 %v5153_v35, %v16894_v29 }
 0x3ca   :  { %17447 = vst [vmem:[#allocation158_spill] sm:$0xff] %v14582_v63  ;;  %v5223_v14 = vmul.f32 %v5153_v35, %v16895_v47  ;;  %v5365_v53 = vrot.slane %v14582_v63, %v16893_v23  ;;  %v14600_v37 = vrot.slane %v17451_v28, %v17372_v15  ;;  %v8410_v2 = vadd.f32 %v8378_v55, %v8166_v40 }
 0x3cb   :  { %17448 = vst [vmem:[#allocation13_spill] sm:$0xff] %v14586_v20  ;;  %17449 = vst [vmem:[#allocation160_spill] sm:$0xff] %v14590_v57  ;;  %v8411_v58 = vadd.f32 %v8379_v4, %v8167_v0  ;;  %v5609_v3 = vrot.slane %v14586_v20, %v16893_v23  ;;  %v5853_v16 = vrot.slane %v14590_v57, %v16893_v23 }
 0x3cc   :  { %17452 = vst [vmem:[#allocation161_spill] sm:$0xff] %v14600_v37  ;;  %v5434_v17 = vmul.f32 %v5365_v53, %v17356_v30  ;;  %v5435_v35 = vmul.f32 %v5365_v53, %v17357_v61  ;;  %v14610_v63 = vrot.slane %v14600_v37, %v17372_v15  ;;  %v17455_v28 = vcombine.high %v17454_v33, %v17454_v33 }
 0x3cd   :  { %v8654_v4 = vadd.f32 %v8622_v7, %v8410_v2  ;;  %v8655_v40 = vadd.f32 %v8623_v26, %v8411_v58  ;;  %v5678_v0 = vmul.f32 %v5609_v3, %v17104_v19  ;;  %v5679_v57 = vmul.f32 %v5609_v3, %v17205_v56  ;;  %v17457_v2 = vld [vmem:[#allocation113_spill] sm:$0xff] }
 0x3ce   :  { %17453 = vst [vmem:[#allocation164_spill] sm:$0xff] %v14610_v63  ;;  %v14616_v55 = vrot.slane %v17455_v28, %v17372_v15  ;;  %v5466_v20 = vadd.f32 %v5434_v17, %v5222_v9  ;;  %v5467_v12 = vadd.f32 %v5435_v35, %v5223_v14  ;;  %v5922_v53 = vmul.f32 %v5853_v16, %v17106_v60  ;;  %v17459_v9 = vld [vmem:[#allocation115_spill] sm:$0xff] }
 0x3cf   :  { %v5923_v42 = vmul.f32 %v5853_v16, %v17107_v62  ;;  %v8898_v37 = vadd.f32 %v8866_v38, %v8654_v4  ;;  %v8899_v27 = vadd.f32 %v8867_v32, %v8655_v40  ;;  %v6097_v21 = vrot.slane %v14610_v63, %v16893_v23 }
 0x3d0   :  { %v14626_v33 = vrot.slane %v14616_v55, %v17372_v15  ;;  %v5710_v7 = vadd.f32 %v5678_v0, %v5466_v20  ;;  %v5711_v26 = vadd.f32 %v5679_v57, %v5467_v12  ;;  %v17458_v3 = vcombine.high %v17457_v2, %v17457_v2 }
 0x3d1   :  { %v17460_v16 = vcombine.high %v17459_v9, %v17459_v9  ;;  %v9318_v38 = vpack.c.bf16 %v8899_v27, %v8898_v37  ;;  %v6166_v14 = vmul.f32 %v6097_v21, %v16906_v51  ;;  %v6167_v58 = vmul.f32 %v6097_v21, %v16907_v10  ;;  %v17463_v21 = vld [vmem:[#allocation116_spill] sm:$0xff] }
 0x3d2   :  { %17456 = vst [vmem:[#allocation159_spill] sm:$0xff] %v14626_v33  ;;  %v14632_v17 = vrot.slane %v17458_v3, %v17372_v15  ;;  %v6341_v12 = vrot.slane %v14626_v33, %v16893_v23  ;;  %v5954_v20 = vadd.f32 %v5922_v53, %v5710_v7  ;;  %v5955_v57 = vadd.f32 %v5923_v42, %v5711_v26  ;;  %v17466_v42 = vld [vmem:[#allocation119_spill] sm:$0xff] }
 0x3d3   :  { %v14638_v32 = vrot.slane %v17460_v16, %v17372_v15  ;;  %9319 = vmatprep.subr.bf16.mxu0 %v9318_v38  ;;  %v17464_v4 = vcombine.high %v17463_v21, %v17463_v21  ;;  %v17467_v0 = vcombine.high %v17466_v42, %v17466_v42  ;;  %v17471_v38 = vld [vmem:[#allocation114_spill] sm:$0xff] }
 0x3d4   :  { %v14646_v35 = vrot.slane %v14632_v17, %v17372_v15  ;;  %v6410_v27 = vmul.f32 %v6341_v12, %v17108_v24  ;;  %v6411_v37 = vmul.f32 %v6341_v12, %v17212_v25  ;;  %v6198_v7 = vadd.f32 %v6166_v14, %v5954_v20 }
 0x3d5   :  { %v14650_v28 = vrot.slane %v14638_v32, %v17372_v15  ;;  %v14658_v40 = vrot.slane %v17464_v4, %v17372_v15  ;;  %v14664_v53 = vrot.slane %v17467_v0, %v17372_v15  ;;  %v6199_v26 = vadd.f32 %v6167_v58, %v5955_v57  ;;  %v17474_v58 = vld [vmem:[#allocation117_spill] sm:$0xff] }
 0x3d6   :  { %17461 = vst [vmem:[#allocation162_spill] sm:$0xff] %v14646_v35  ;;  %v6585_v2 = vrot.slane %v14646_v35, %v16893_v23  ;;  %v17472_v12 = vcombine.high %v17471_v38, %v17471_v38  ;;  %v17475_v20 = vcombine.high %v17474_v58, %v17474_v58  ;;  %v6442_v21 = vadd.f32 %v6410_v27, %v6198_v7 }
 0x3d7   :  { %17462 = vst [vmem:[#allocation163_spill] sm:$0xff] %v14650_v28  ;;  %17465 = vst [vmem:[#allocation165_spill] sm:$0xff] %v14658_v40  ;;  %v6829_v3 = vrot.slane %v14650_v28, %v16893_v23  ;;  %v14672_v9 = vrot.slane %v14658_v40, %v17372_v15  ;;  %v14676_v16 = vrot.slane %v14664_v53, %v17372_v15 }
 0x3d8   :  { %17468 = vst [vmem:[#allocation215_spill] sm:$0xff] %v14664_v53  ;;  %v14682_v14 = vrot.slane %v17472_v12, %v17372_v15  ;;  %v14688_v57 = vrot.slane %v17475_v20, %v17372_v15  ;;  %v6443_v4 = vadd.f32 %v6411_v37, %v6199_v26  ;;  %v6654_v42 = vmul.f32 %v6585_v2, %v17125_v31  ;;  %v17498_v53 = vld [vmem:[#allocation96_spill] sm:$0xff] }
 0x3d9   :  { %17469 = vst [vmem:[#allocation121_spill] sm:$0xff] %v14672_v9  ;;  %17470 = vst [vmem:[#allocation122_spill] sm:$0xff] %v14676_v16  ;;  %v6655_v0 = vmul.f32 %v6585_v2, %v17126_v5  ;;  %v6898_v28 = vmul.f32 %v6829_v3, %v17365_v49  ;;  %v6899_v35 = vmul.f32 %v6829_v3, %v17366_v46 }
 0x3da   :  { %17473 = vst [vmem:[#allocation124_spill] sm:$0xff] %v14682_v14  ;;  %17476 = vst [vmem:[#allocation126_spill] sm:$0xff] %v14688_v57  ;;  %v7073_v38 = vrot.slane %v14672_v9, %v16893_v23  ;;  %v7317_v12 = vrot.slane %v14676_v16, %v16893_v23  ;;  %v6686_v33 = vadd.f32 %v6654_v42, %v6442_v21  ;;  %v17479_v42 = vld [vmem:[#allocation118_spill] sm:$0xff] }
 0x3db   :  { %v6687_v58 = vadd.f32 %v6655_v0, %v6443_v4  ;;  %v14700_v27 = vrot.slane %v14682_v14, %v17372_v15  ;;  %v14704_v37 = vrot.slane %v14688_v57, %v17372_v15  ;;  %v17480_v0 = vcombine.high %v17479_v42, %v17479_v42 }
 0x3dc   :  { %v7142_v7 = vmul.f32 %v7073_v38, %v17367_v8  ;;  %v7143_v26 = vmul.f32 %v7073_v38, %v17256_v41  ;;  %v7386_v2 = vmul.f32 %v7317_v12, %v17257_v22  ;;  %v7387_v3 = vmul.f32 %v7317_v12, %v17258_v48  ;;  %v17482_v38 = vld [vmem:[#allocation120_spill] sm:$0xff]  ;;  %v17488_v12 = vld [vmem:[#allocation87_spill] sm:$0xff] }
 0x3dd   :  { %17477 = vst [vmem:[#allocation123_spill] sm:$0xff] %v14700_v27  ;;  %17478 = vst [vmem:[#allocation125_spill] sm:$0xff] %v14704_v37  ;;  %v6930_v20 = vadd.f32 %v6898_v28, %v6686_v33  ;;  %v6931_v16 = vadd.f32 %v6899_v35, %v6687_v58  ;;  %v7561_v21 = vrot.slane %v14700_v27, %v16893_v23  ;;  %v17485_v33 = vld [vmem:[#allocation18_spill] sm:$0xff] }
 0x3de   :  { %v7805_v4 = vrot.slane %v14704_v37, %v16893_v23  ;;  %v14718_v9 = vrot.slane %v17480_v0, %v17372_v15  ;;  %v17483_v63 = vcombine.high %v17482_v38, %v17482_v38  ;;  %v17486_v35 = vcombine.high %v17485_v33, %v17485_v33 }
 0x3df   :  { %v17489_v58 = vcombine.high %v17488_v12, %v17488_v12  ;;  %v7174_v42 = vadd.f32 %v7142_v7, %v6930_v20  ;;  %v7175_v0 = vadd.f32 %v7143_v26, %v6931_v16  ;;  %v7630_v27 = vmul.f32 %v7561_v21, %v17139_v6 }
 0x3e0   :  { %17481 = vst [vmem:[#allocation127_spill] sm:$0xff] %v14718_v9  ;;  %v14724_v57 = vrot.slane %v17483_v63, %v17372_v15  ;;  %v14730_v28 = vrot.slane %v17486_v35, %v17372_v15  ;;  %v7631_v38 = vmul.f32 %v7561_v21, %v17140_v54  ;;  %v7874_v63 = vmul.f32 %v7805_v4, %v17148_v1 }
 0x3e1   :  { %v14736_v37 = vrot.slane %v17489_v58, %v17372_v15  ;;  %v7875_v14 = vmul.f32 %v7805_v4, %v17149_v43  ;;  %v14744_v33 = vrot.slane %v14718_v9, %v17372_v15  ;;  %v7418_v12 = vadd.f32 %v7386_v2, %v7174_v42  ;;  %v17495_v4 = vld [vmem:[#allocation143_spill] sm:$0xff] }
 0x3e2   :  { %17484 = vst [vmem:[#allocation128_spill] sm:$0xff] %v14724_v57  ;;  %17487 = vst [vmem:[#allocation205_spill] sm:$0xff] %v14730_v28  ;;  %v14748_v35 = vrot.slane %v14724_v57, %v17372_v15  ;;  %v7419_v58 = vadd.f32 %v7387_v3, %v7175_v0  ;;  %v14752_v16 = vrot.slane %v14730_v28, %v17372_v15 }
 0x3e3   :  { %17490 = vst [vmem:[#allocation207_spill] sm:$0xff] %v14736_v37  ;;  %17491 = vst [vmem:[#allocation208_spill] sm:$0xff] %v14744_v33  ;;  %v14756_v7 = vrot.slane %v14736_v37, %v17372_v15  ;;  %v8049_v26 = vrot.slane %v14744_v33, %v16893_v23  ;;  %v5101_v21 = vcombine.high %v14322_v18, %v14322_v18 }
 0x3e4   :  { %17492 = vst [vmem:[#allocation210_spill] sm:$0xff] %v14748_v35  ;;  %17493 = vst [vmem:[#allocation209_spill] sm:$0xff] %v14752_v16  ;;  %v8293_v20 = vrot.slane %v14748_v35, %v16893_v23  ;;  %v5313_v2 = vcombine.high %v17495_v4, %v17495_v4  ;;  %v7662_v3 = vadd.f32 %v7630_v27, %v7418_v12 }
 0x3e5   :  { %17494 = vst [vmem:[#allocation211_spill] sm:$0xff] %v14756_v7  ;;  %v7663_v42 = vadd.f32 %v7631_v38, %v7419_v58  ;;  %v8537_v0 = vrot.slane %v14752_v16, %v16893_v23  ;;  %v8781_v37 = vrot.slane %v14756_v7, %v16893_v23  ;;  %v8118_v28 = vmul.f32 %v8049_v26, %v17262_v52 }
 0x3e6   :  { %v8119_v33 = vmul.f32 %v8049_v26, %v17152_v36  ;;  %v8362_v35 = vmul.f32 %v8293_v20, %v17159_v50  ;;  %v8363_v57 = vmul.f32 %v8293_v20, %v17161_v45  ;;  %v7906_v18 = vadd.f32 %v7874_v63, %v7662_v3 }
 0x3e7   :  { %v7907_v9 = vadd.f32 %v7875_v14, %v7663_v42  ;;  %v8606_v4 = vmul.f32 %v8537_v0, %v17162_v39  ;;  %v8607_v27 = vmul.f32 %v8537_v0, %v17305_v34  ;;  %v8850_v38 = vmul.f32 %v8781_v37, %v17308_v13  ;;  %v17499_v14 = vld [vmem:[#allocation98_spill] sm:$0xff]  ;;  %v17500_v42 = vld [vmem:[#allocation99_spill] sm:$0xff] }
 0x3e8   :  { %v8851_v12 = vmul.f32 %v8781_v37, %v17309_v59  ;;  %v14779_v58 = vrot.slane %v5101_v21, %v17372_v15  ;;  %v14782_v7 = vrot.slane %v5313_v2, %v17372_v15  ;;  %v8150_v26 = vadd.f32 %v8118_v28, %v7906_v18  ;;  %v17501_v0 = vld [vmem:[#allocation102_spill] sm:$0xff] }
 0x3e9   :  { %v8151_v16 = vadd.f32 %v8119_v33, %v7907_v9  ;;  %v5557_v63 = vcombine.high %v17498_v53, %v17498_v53  ;;  %v5801_v20 = vcombine.high %v17499_v14, %v17499_v14  ;;  %v6045_v21 = vcombine.high %v17500_v42, %v17500_v42 }
 0x3ea   :  { %17496 = vst [vmem:[#allocation212_spill] sm:$0xff] %v14779_v58  ;;  %17497 = vst [vmem:[#allocation213_spill] sm:$0xff] %v14782_v7  ;;  %v5189_v3 = vrot.slane %v14779_v58, %v16893_v23  ;;  %v5401_v37 = vrot.slane %v14782_v7, %v16893_v23  ;;  %v6289_v2 = vcombine.high %v17501_v0, %v17501_v0 }
 0x3eb   :  { %v8394_v28 = vadd.f32 %v8362_v35, %v8150_v26  ;;  %v8395_v9 = vadd.f32 %v8363_v57, %v8151_v16  ;;  %v14797_v33 = vrot.slane %v5557_v63, %v17372_v15  ;;  %v14800_v53 = vrot.slane %v5801_v20, %v17372_v15 }
 0x3ec   :  { %v5240_v18 = vmul.f32 %v5189_v3, %v16894_v29  ;;  %v5241_v14 = vmul.f32 %v5189_v3, %v16895_v47  ;;  %v5452_v7 = vmul.f32 %v5401_v37, %v17356_v30  ;;  %v5453_v58 = vmul.f32 %v5401_v37, %v17357_v61 }
 0x3ed   :  { %17502 = vst [vmem:[#allocation256_spill] sm:$0xff] %v14800_v53  ;;  %v8638_v42 = vadd.f32 %v8606_v4, %v8394_v28  ;;  %v8639_v40 = vadd.f32 %v8607_v27, %v8395_v9  ;;  %v5645_v35 = vrot.slane %v14797_v33, %v16893_v23  ;;  %v5889_v57 = vrot.slane %v14800_v53, %v16893_v23  ;;  %v17528_v53 = vld [vmem:[#allocation156_spill] sm:$0xff] }
 0x3ee   :  { %v5484_v16 = vadd.f32 %v5452_v7, %v5240_v18  ;;  %v5485_v26 = vadd.f32 %v5453_v58, %v5241_v14  ;;  %v14811_v63 = vrot.slane %v6045_v21, %v17372_v15  ;;  %v14814_v20 = vrot.slane %v6289_v2, %v17372_v15 }
 0x3ef   :  { %v8882_v3 = vadd.f32 %v8850_v38, %v8638_v42  ;;  %v8883_v0 = vadd.f32 %v8851_v12, %v8639_v40  ;;  %v5696_v37 = vmul.f32 %v5645_v35, %v17104_v19  ;;  %v5697_v4 = vmul.f32 %v5645_v35, %v17205_v56 }
 0x3f0   :  { %17503 = vst [vmem:[#allocation172_spill] sm:$0xff] %v14811_v63  ;;  %17504 = vst [vmem:[#allocation173_spill] sm:$0xff] %v14814_v20  ;;  %v5940_v27 = vmul.f32 %v5889_v57, %v17106_v60  ;;  %v5941_v28 = vmul.f32 %v5889_v57, %v17107_v62  ;;  %v6133_v7 = vrot.slane %v14811_v63, %v16893_v23 }
 0x3f1   :  { %v6377_v58 = vrot.slane %v14814_v20, %v16893_v23  ;;  %v9320_v21 = vpack.c.bf16 %v8883_v0, %v8882_v3  ;;  %v5728_v9 = vadd.f32 %v5696_v37, %v5484_v16  ;;  %v5729_v2 = vadd.f32 %v5697_v4, %v5485_v26  ;;  %v17506_v26 = vld [vmem:[#allocation130_spill] sm:$0xff]  ;;  %v17507_v3 = vld [vmem:[#allocation188_spill] sm:$0xff]  ;;  %v17508_v37 = vld [vmem:[#allocation5_spill] sm:$0xff] }
 0x3f2   :  { %v6533_v40 = vcombine.high %v14414_v44, %v14414_v44  ;;  %v6184_v38 = vmul.f32 %v6133_v7, %v16906_v51  ;;  %v6185_v12 = vmul.f32 %v6133_v7, %v16907_v10  ;;  %v6777_v16 = vcombine.high %v14420_v11, %v14420_v11  ;;  %v17509_v7 = vld [vmem:[#allocation190_spill] sm:$0xff] }
 0x3f3   :  { %v6428_v18 = vmul.f32 %v6377_v58, %v17108_v24  ;;  %v6429_v14 = vmul.f32 %v6377_v58, %v17212_v25  ;;  %9321 = vmatpush3.bf16.msra.mxu0 %v9320_v21  ;;  %v5972_v42 = vadd.f32 %v5940_v27, %v5728_v9  ;;  %v5973_v35 = vadd.f32 %v5941_v28, %v5729_v2 }
 0x3f4   :  { %v14831_v57 = vrot.slane %v6533_v40, %v17372_v15  ;;  %v7021_v44 = vcombine.high %v17506_v26, %v17506_v26  ;;  %v7265_v0 = vcombine.high %v17507_v3, %v17507_v3  ;;  %v7509_v4 = vcombine.high %v17508_v37, %v17508_v37 }
 0x3f5   :  { %v7753_v58 = vcombine.high %v17509_v7, %v17509_v7  ;;  %v6216_v27 = vadd.f32 %v6184_v38, %v5972_v42  ;;  %v6217_v28 = vadd.f32 %v6185_v12, %v5973_v35  ;;  %v14846_v9 = vrot.slane %v6777_v16, %v17372_v15 }
 0x3f6   :  { %17505 = vst [vmem:[#allocation174_spill] sm:$0xff] %v14831_v57  ;;  %v6621_v21 = vrot.slane %v14831_v57, %v16893_v23  ;;  %v14849_v11 = vrot.slane %v7021_v44, %v17372_v15  ;;  %v14852_v2 = vrot.slane %v7265_v0, %v17372_v15  ;;  %v14855_v40 = vrot.slane %v7509_v4, %v17372_v15 }
 0x3f7   :  { %17510 = vst [vmem:[#allocation176_spill] sm:$0xff] %v14846_v9  ;;  %v14858_v26 = vrot.slane %v7753_v58, %v17372_v15  ;;  %v6460_v38 = vadd.f32 %v6428_v18, %v6216_v27  ;;  %v6461_v12 = vadd.f32 %v6429_v14, %v6217_v28  ;;  %v6865_v16 = vrot.slane %v14846_v9, %v16893_v23  ;;  %v17515_v14 = vld [vmem:[#allocation193_spill] sm:$0xff]  ;;  %v17518_v9 = vld [vmem:[#allocation196_spill] sm:$0xff] }
 0x3f8   :  { %17511 = vst [vmem:[#allocation175_spill] sm:$0xff] %v14849_v11  ;;  %17512 = vst [vmem:[#allocation177_spill] sm:$0xff] %v14852_v2  ;;  %v6672_v42 = vmul.f32 %v6621_v21, %v17125_v31  ;;  %v6673_v35 = vmul.f32 %v6621_v21, %v17126_v5  ;;  %v7109_v44 = vrot.slane %v14849_v11, %v16893_v23  ;;  %v17517_v11 = vld [vmem:[#allocation192_spill] sm:$0xff] }
 0x3f9   :  { %17513 = vst [vmem:[#allocation178_spill] sm:$0xff] %v14855_v40  ;;  %17514 = vst [vmem:[#allocation179_spill] sm:$0xff] %v14858_v26  ;;  %v7353_v3 = vrot.slane %v14852_v2, %v16893_v23  ;;  %v7597_v0 = vrot.slane %v14855_v40, %v16893_v23  ;;  %v7841_v18 = vrot.slane %v14858_v26, %v16893_v23 }
 0x3fa   :  { %v6704_v37 = vadd.f32 %v6672_v42, %v6460_v38  ;;  %v6705_v4 = vadd.f32 %v6673_v35, %v6461_v12  ;;  %v7997_v7 = vcombine.high %v17515_v14, %v17515_v14  ;;  %v6916_v58 = vmul.f32 %v6865_v16, %v17365_v49 }
 0x3fb   :  { %v6917_v27 = vmul.f32 %v6865_v16, %v17366_v46  ;;  %v7160_v28 = vmul.f32 %v7109_v44, %v17367_v8  ;;  %v7161_v21 = vmul.f32 %v7109_v44, %v17256_v41  ;;  %v7404_v2 = vmul.f32 %v7353_v3, %v17257_v22 }
 0x3fc   :  { %v7405_v40 = vmul.f32 %v7353_v3, %v17258_v48  ;;  %v7648_v38 = vmul.f32 %v7597_v0, %v17139_v6  ;;  %v7649_v12 = vmul.f32 %v7597_v0, %v17140_v54  ;;  %v6948_v42 = vadd.f32 %v6916_v58, %v6704_v37  ;;  %v17519_v3 = vld [vmem:[#allocation197_spill] sm:$0xff]  ;;  %v17520_v37 = vld [vmem:[#allocation152_spill] sm:$0xff] }
 0x3fd   :  { %v6949_v35 = vadd.f32 %v6917_v27, %v6705_v4  ;;  %v7892_v14 = vmul.f32 %v7841_v18, %v17148_v1  ;;  %v7893_v26 = vmul.f32 %v7841_v18, %v17149_v43  ;;  %v14885_v16 = vrot.slane %v7997_v7, %v17372_v15  ;;  %v17521_v58 = vld [vmem:[#allocation153_spill] sm:$0xff] }
 0x3fe   :  { %v8241_v44 = vcombine.high %v17517_v11, %v17517_v11  ;;  %v8485_v57 = vcombine.high %v17518_v9, %v17518_v9  ;;  %v8729_v20 = vcombine.high %v17519_v3, %v17519_v3  ;;  %v7192_v63 = vadd.f32 %v7160_v28, %v6948_v42 }
 0x3ff   :  { %17516 = vst [vmem:[#allocation180_spill] sm:$0xff] %v14885_v16  ;;  %v7193_v0 = vadd.f32 %v7161_v21, %v6949_v35  ;;  %v5052_v4 = vcombine.high %v17520_v37, %v17520_v37  ;;  %v5264_v18 = vcombine.high %v17521_v58, %v17521_v58  ;;  %v8085_v7 = vrot.slane %v14885_v16, %v16893_v23 }
 0x400   :  { %v14900_v27 = vrot.slane %v8241_v44, %v17372_v15  ;;  %v14903_v11 = vrot.slane %v8485_v57, %v17372_v15  ;;  %v14906_v9 = vrot.slane %v8729_v20, %v17372_v15  ;;  %v7436_v28 = vadd.f32 %v7404_v2, %v7192_v63 }
 0x401   :  { %v7437_v21 = vadd.f32 %v7405_v40, %v7193_v0  ;;  %v14909_v42 = vrot.slane %v5052_v4, %v17372_v15  ;;  %v14912_v35 = vrot.slane %v5264_v18, %v17372_v15  ;;  %v8136_v3 = vmul.f32 %v8085_v7, %v17262_v52 }
 0x402   :  { %17522 = vst [vmem:[#allocation20_spill] sm:$0xff] %v14900_v27  ;;  %17523 = vst [vmem:[#allocation182_spill] sm:$0xff] %v14903_v11  ;;  %v8137_v37 = vmul.f32 %v8085_v7, %v17152_v36  ;;  %v8329_v44 = vrot.slane %v14900_v27, %v16893_v23  ;;  %v8573_v57 = vrot.slane %v14903_v11, %v16893_v23 }
 0x403   :  { %17524 = vst [vmem:[#allocation185_spill] sm:$0xff] %v14906_v9  ;;  %17525 = vst [vmem:[#allocation181_spill] sm:$0xff] %v14909_v42  ;;  %v7680_v20 = vadd.f32 %v7648_v38, %v7436_v28  ;;  %v7681_v58 = vadd.f32 %v7649_v12, %v7437_v21  ;;  %v8817_v63 = vrot.slane %v14906_v9, %v16893_v23 }
 0x404   :  { %17526 = vst [vmem:[#allocation183_spill] sm:$0xff] %v14912_v35  ;;  %v5157_v2 = vrot.slane %v14909_v42, %v16893_v23  ;;  %v8380_v40 = vmul.f32 %v8329_v44, %v17159_v50  ;;  %v8381_v0 = vmul.f32 %v8329_v44, %v17161_v45  ;;  %v8624_v4 = vmul.f32 %v8573_v57, %v17162_v39  ;;  %v17527_v42 = vld [vmem:[#allocation155_spill] sm:$0xff] }
 0x405   :  { %v8625_v18 = vmul.f32 %v8573_v57, %v17305_v34  ;;  %v7924_v7 = vadd.f32 %v7892_v14, %v7680_v20  ;;  %v7925_v27 = vadd.f32 %v7893_v26, %v7681_v58  ;;  %v8868_v11 = vmul.f32 %v8817_v63, %v17308_v13  ;;  %v17529_v26 = vld [vmem:[#allocation161_spill] sm:$0xff] }
 0x406   :  { %v8869_v38 = vmul.f32 %v8817_v63, %v17309_v59  ;;  %v5224_v12 = vmul.f32 %v5157_v2, %v16894_v29  ;;  %v5225_v28 = vmul.f32 %v5157_v2, %v16895_v47  ;;  %v5369_v21 = vrot.slane %v14912_v35, %v16893_v23 }
 0x407   :  { %v5508_v44 = vcombine.high %v17527_v42, %v17527_v42  ;;  %v8168_v9 = vadd.f32 %v8136_v3, %v7924_v7  ;;  %v8169_v16 = vadd.f32 %v8137_v37, %v7925_v27  ;;  %v5752_v14 = vcombine.high %v17528_v53, %v17528_v53 }
 0x408   :  { %v5996_v57 = vcombine.high %v17529_v26, %v17529_v26  ;;  %v5436_v20 = vmul.f32 %v5369_v21, %v17356_v30  ;;  %v5437_v58 = vmul.f32 %v5369_v21, %v17357_v61  ;;  %v6240_v2 = vcombine.high %v14616_v55, %v14616_v55 }
 0x409   :  { %v14943_v63 = vrot.slane %v5508_v44, %v17372_v15  ;;  %v8412_v35 = vadd.f32 %v8380_v40, %v8168_v9  ;;  %v8413_v42 = vadd.f32 %v8381_v0, %v8169_v16  ;;  %v14948_v27 = vrot.slane %v5752_v14, %v17372_v15 }
 0x40a   :  { %v14951_v53 = vrot.slane %v5996_v57, %v17372_v15  ;;  %v5468_v3 = vadd.f32 %v5436_v20, %v5224_v12  ;;  %v5469_v37 = vadd.f32 %v5437_v58, %v5225_v28  ;;  %v14956_v21 = vrot.slane %v6240_v2, %v17372_v15  ;;  %v8907_v2 = vld [vmem:[%s15446_s6 + $0x8] sm:$0xff] }
 0x40b   :  { %17530 = vst [vmem:[#allocation184_spill] sm:$0xff] %v14943_v63  ;;  %17531 = vst [vmem:[#allocation186_spill] sm:$0xff] %v14948_v27  ;;  %v5613_v7 = vrot.slane %v14943_v63, %v16893_v23  ;;  %v8656_v44 = vadd.f32 %v8624_v4, %v8412_v35  ;;  %v8657_v26 = vadd.f32 %v8625_v18, %v8413_v42  ;;  %9034 = vmatprep.mubr.f32.mxu0 %v8907_v2 }
 0x40c   :  { %17532 = vst [vmem:[#allocation276_spill] sm:$0xff] %v14951_v53  ;;  %17533 = vst [vmem:[#allocation145_spill] sm:$0xff] %v14956_v21  ;;  %v5857_v55 = vrot.slane %v14948_v27, %v16893_v23  ;;  %v6101_v16 = vrot.slane %v14951_v53, %v16893_v23  ;;  %v6345_v0 = vrot.slane %v14956_v21, %v16893_v23  ;;  %v17558_v21 = vld [vmem:[#allocation313_spill] sm:$0xff] }
 0x40d   :  { %v5680_v9 = vmul.f32 %v5613_v7, %v17104_v19  ;;  %v5681_v40 = vmul.f32 %v5613_v7, %v17205_v56  ;;  %v6484_v12 = vcombine.high %v14632_v17, %v14632_v17  ;;  %v8900_v28 = vadd.f32 %v8868_v11, %v8656_v44  ;;  %v17535_v44 = vld [vmem:[#allocation165_spill] sm:$0xff] }
 0x40e   :  { %v8901_v14 = vadd.f32 %v8869_v38, %v8657_v26  ;;  %v5924_v35 = vmul.f32 %v5857_v55, %v17106_v60  ;;  %v5925_v4 = vmul.f32 %v5857_v55, %v17107_v62  ;;  %v6168_v20 = vmul.f32 %v6101_v16, %v16906_v51 }
 0x40f   :  { %v5712_v18 = vadd.f32 %v5680_v9, %v5468_v3  ;;  %v5713_v57 = vadd.f32 %v5681_v40, %v5469_v37  ;;  %v6169_v58 = vmul.f32 %v6101_v16, %v16907_v10  ;;  %v6412_v7 = vmul.f32 %v6345_v0, %v17108_v24  ;;  %v17536_v16 = vld [vmem:[#allocation215_spill] sm:$0xff]  ;;  %v17537_v40 = vld [vmem:[#allocation124_spill] sm:$0xff] }
 0x410   :  { %v9322_v42 = vpack.c.bf16 %v8901_v14, %v8900_v28  ;;  %v6413_v17 = vmul.f32 %v6345_v0, %v17212_v25  ;;  %v14978_v11 = vrot.slane %v6484_v12, %v17372_v15  ;;  %v6728_v37 = vcombine.high %v14638_v32, %v14638_v32  ;;  %v17538_v12 = vld [vmem:[#allocation126_spill] sm:$0xff] }
 0x411   :  { %v5956_v38 = vadd.f32 %v5924_v35, %v5712_v18  ;;  %v5957_v3 = vadd.f32 %v5925_v4, %v5713_v57  ;;  %v6972_v26 = vcombine.high %v17535_v44, %v17535_v44  ;;  %v7216_v9 = vcombine.high %v17536_v16, %v17536_v16 }
 0x412   :  { %17534 = vst [vmem:[#allocation146_spill] sm:$0xff] %v14978_v11  ;;  %9323 = vmatprep.subr.bf16.mxu0 %v9322_v42  ;;  %v6589_v55 = vrot.slane %v14978_v11, %v16893_v23  ;;  %v7460_v0 = vcombine.high %v17537_v40, %v17537_v40  ;;  %v7704_v28 = vcombine.high %v17538_v12, %v17538_v12  ;;  %v17555_v11 = vld [vmem:[#allocation100_spill] sm:$0xff] }
 0x413   :  { %v6200_v14 = vadd.f32 %v6168_v20, %v5956_v38  ;;  %v6201_v35 = vadd.f32 %v6169_v58, %v5957_v3  ;;  %v14993_v32 = vrot.slane %v6728_v37, %v17372_v15  ;;  %v14996_v4 = vrot.slane %v6972_v26, %v17372_v15  ;;  %v17544_v26 = vld [vmem:[#allocation127_spill] sm:$0xff] }
 0x414   :  { %v6656_v18 = vmul.f32 %v6589_v55, %v17125_v31  ;;  %v6657_v57 = vmul.f32 %v6589_v55, %v17126_v5  ;;  %v15001_v2 = vrot.slane %v7216_v9, %v17372_v15  ;;  %v15004_v42 = vrot.slane %v7460_v0, %v17372_v15 }
 0x415   :  { %17539 = vst [vmem:[#allocation9_spill] sm:$0xff] %v14993_v32  ;;  %17540 = vst [vmem:[#allocation149_spill] sm:$0xff] %v14996_v4  ;;  %v6444_v44 = vadd.f32 %v6412_v7, %v6200_v14  ;;  %v6445_v16 = vadd.f32 %v6413_v17, %v6201_v35  ;;  %v6833_v20 = vrot.slane %v14993_v32, %v16893_v23 }
 0x416   :  { %17541 = vst [vmem:[#allocation147_spill] sm:$0xff] %v15001_v2  ;;  %17542 = vst [vmem:[#allocation148_spill] sm:$0xff] %v15004_v42  ;;  %v7077_v58 = vrot.slane %v14996_v4, %v16893_v23  ;;  %v7321_v38 = vrot.slane %v15001_v2, %v16893_v23  ;;  %v7565_v3 = vrot.slane %v15004_v42, %v16893_v23 }
 0x417   :  { %v15015_v37 = vrot.slane %v7704_v28, %v17372_v15  ;;  %v7948_v55 = vcombine.high %v17544_v26, %v17544_v26  ;;  %v6688_v7 = vadd.f32 %v6656_v18, %v6444_v44  ;;  %v6689_v17 = vadd.f32 %v6657_v57, %v6445_v16  ;;  %v17546_v44 = vld [vmem:[#allocation128_spill] sm:$0xff] }
 0x418   :  { %v6900_v9 = vmul.f32 %v6833_v20, %v17365_v49  ;;  %v6901_v40 = vmul.f32 %v6833_v20, %v17366_v46  ;;  %v7144_v0 = vmul.f32 %v7077_v58, %v17367_v8  ;;  %v7145_v12 = vmul.f32 %v7077_v58, %v17256_v41  ;;  %v17547_v20 = vld [vmem:[#allocation205_spill] sm:$0xff] }
 0x419   :  { %17543 = vst [vmem:[#allocation150_spill] sm:$0xff] %v15015_v37  ;;  %v7388_v14 = vmul.f32 %v7321_v38, %v17257_v22  ;;  %v7389_v35 = vmul.f32 %v7321_v38, %v17258_v48  ;;  %v7632_v2 = vmul.f32 %v7565_v3, %v17139_v6  ;;  %v7633_v26 = vmul.f32 %v7565_v3, %v17140_v54 }
 0x41a   :  { %v6932_v42 = vadd.f32 %v6900_v9, %v6688_v7  ;;  %v6933_v28 = vadd.f32 %v6901_v40, %v6689_v17  ;;  %v7809_v18 = vrot.slane %v15015_v37, %v16893_v23  ;;  %v15030_v57 = vrot.slane %v7948_v55, %v17372_v15  ;;  %v17548_v7 = vld [vmem:[#allocation207_spill] sm:$0xff]  ;;  %v17549_v9 = vld [vmem:[#allocation144_spill] sm:$0xff] }
 0x41b   :  { %v8192_v16 = vcombine.high %v17546_v44, %v17546_v44  ;;  %v8436_v58 = vcombine.high %v17547_v20, %v17547_v20  ;;  %v8680_v17 = vcombine.high %v17548_v7, %v17548_v7  ;;  %v5131_v3 = vcombine.high %v17549_v9, %v17549_v9 }
 0x41c   :  { %17545 = vst [vmem:[#allocation151_spill] sm:$0xff] %v15030_v57  ;;  %v7176_v4 = vadd.f32 %v7144_v0, %v6932_v42  ;;  %v7177_v38 = vadd.f32 %v7145_v12, %v6933_v28  ;;  %v7876_v40 = vmul.f32 %v7809_v18, %v17148_v1  ;;  %v7877_v37 = vmul.f32 %v7809_v18, %v17149_v43 }
 0x41d   :  { %v8053_v55 = vrot.slane %v15030_v57, %v16893_v23  ;;  %v15045_v44 = vrot.slane %v8192_v16, %v17372_v15  ;;  %v15048_v42 = vrot.slane %v8436_v58, %v17372_v15  ;;  %v15051_v0 = vrot.slane %v8680_v17, %v17372_v15 }
 0x41e   :  { %v7420_v32 = vadd.f32 %v7388_v14, %v7176_v4  ;;  %v7421_v20 = vadd.f32 %v7389_v35, %v7177_v38  ;;  %v5193_v7 = vrot.slane %v5131_v3, %v16893_v23 }
 0x41f   :  { %17550 = vst [vmem:[#allocation248_spill] sm:$0xff] %v15045_v44  ;;  %17551 = vst [vmem:[#allocation249_spill] sm:$0xff] %v15048_v42  ;;  %v8120_v12 = vmul.f32 %v8053_v55, %v17262_v52  ;;  %v8121_v28 = vmul.f32 %v8053_v55, %v17152_v36  ;;  %v8297_v18 = vrot.slane %v15045_v44, %v16893_v23 }
 0x420   :  { %17552 = vst [vmem:[#allocation252_spill] sm:$0xff] %v15051_v0  ;;  %v7664_v9 = vadd.f32 %v7632_v2, %v7420_v32  ;;  %v7665_v16 = vadd.f32 %v7633_v26, %v7421_v20  ;;  %v8541_v4 = vrot.slane %v15048_v42, %v16893_v23  ;;  %v8785_v14 = vrot.slane %v15051_v0, %v16893_v23  ;;  %v17553_v20 = vld [vmem:[#allocation189_spill] sm:$0xff] }
 0x421   :  { %v8364_v15 = vmul.f32 %v8297_v18, %v17159_v50  ;;  %v8365_v35 = vmul.f32 %v8297_v18, %v17161_v45  ;;  %v5242_v58 = vmul.f32 %v5193_v7, %v16894_v29  ;;  %v5243_v38 = vmul.f32 %v5193_v7, %v16895_v47  ;;  %v17554_v42 = vld [vmem:[#allocation97_spill] sm:$0xff] }
 0x422   :  { %v7908_v17 = vadd.f32 %v7876_v40, %v7664_v9  ;;  %v7909_v55 = vadd.f32 %v7877_v37, %v7665_v16  ;;  %v8608_v3 = vmul.f32 %v8541_v4, %v17162_v39  ;;  %v8609_v32 = vmul.f32 %v8541_v4, %v17305_v34  ;;  %v17556_v37 = vld [vmem:[#allocation101_spill] sm:$0xff]  ;;  %v17557_v4 = vld [vmem:[#allocation103_spill] sm:$0xff] }
 0x423   :  { %v8852_v2 = vmul.f32 %v8785_v14, %v17308_v13  ;;  %v8853_v26 = vmul.f32 %v8785_v14, %v17309_v59  ;;  %v5343_v0 = vcombine.high %v17553_v20, %v17553_v20  ;;  %v5587_v18 = vcombine.high %v17554_v42, %v17554_v42 }
 0x424   :  { %v8152_v44 = vadd.f32 %v8120_v12, %v7908_v17  ;;  %v8153_v57 = vadd.f32 %v8121_v28, %v7909_v55  ;;  %v5831_v40 = vcombine.high %v17555_v11, %v17555_v11  ;;  %v6075_v7 = vcombine.high %v17556_v37, %v17556_v37 }
 0x425   :  { %v5405_v9 = vrot.slane %v5343_v0, %v16893_v23  ;;  %v5649_v16 = vrot.slane %v5587_v18, %v16893_v23  ;;  %v6319_v14 = vcombine.high %v17557_v4, %v17557_v4  ;;  %v6563_v20 = vcombine.high %v17558_v21, %v17558_v21 }
 0x426   :  { %v8396_v53 = vadd.f32 %v8364_v15, %v8152_v44  ;;  %v8397_v42 = vadd.f32 %v8365_v35, %v8153_v57  ;;  %v5893_v12 = vrot.slane %v5831_v40, %v16893_v23  ;;  %v6137_v28 = vrot.slane %v6075_v7, %v16893_v23 }
 0x427   :  { %v5454_v11 = vmul.f32 %v5405_v9, %v17356_v30  ;;  %v5455_v17 = vmul.f32 %v5405_v9, %v17357_v61  ;;  %v5698_v0 = vmul.f32 %v5649_v16, %v17104_v19  ;;  %v5699_v55 = vmul.f32 %v5649_v16, %v17205_v56 }
 0x428   :  { %v8640_v18 = vadd.f32 %v8608_v3, %v8396_v53  ;;  %v8641_v37 = vadd.f32 %v8609_v32, %v8397_v42  ;;  %v5942_v4 = vmul.f32 %v5893_v12, %v17106_v60  ;;  %v5943_v21 = vmul.f32 %v5893_v12, %v17107_v62  ;;  %v17559_v53 = vld [vmem:[#allocation314_spill] sm:$0xff]  ;;  %v17560_v32 = vld [vmem:[#allocation305_spill] sm:$0xff] }
 0x429   :  { %v5486_v44 = vadd.f32 %v5454_v11, %v5242_v58  ;;  %v5487_v57 = vadd.f32 %v5455_v17, %v5243_v38  ;;  %v6186_v15 = vmul.f32 %v6137_v28, %v16906_v51  ;;  %v6187_v35 = vmul.f32 %v6137_v28, %v16907_v10  ;;  %v17561_v17 = vld [vmem:[#allocation315_spill] sm:$0xff] }
 0x42a   :  { %v8884_v40 = vadd.f32 %v8852_v2, %v8640_v18  ;;  %v8885_v7 = vadd.f32 %v8853_v26, %v8641_v37  ;;  %v6381_v9 = vrot.slane %v6319_v14, %v16893_v23  ;;  %v6625_v27 = vrot.slane %v6563_v20, %v16893_v23  ;;  %v17563_v37 = vld [vmem:[#allocation191_spill] sm:$0xff] }
 0x42b   :  { %v5730_v63 = vadd.f32 %v5698_v0, %v5486_v44  ;;  %v5731_v16 = vadd.f32 %v5699_v55, %v5487_v57  ;;  %v6807_v3 = vcombine.high %v17559_v53, %v17559_v53  ;;  %v7051_v42 = vcombine.high %v17560_v32, %v17560_v32  ;;  %v17562_v55 = vld [vmem:[#allocation187_spill] sm:$0xff]  ;;  %v17564_v32 = vld [vmem:[#allocation194_spill] sm:$0xff] }
 0x42c   :  { %v9324_v58 = vpack.c.bf16 %v8885_v7, %v8884_v40  ;;  %v6430_v38 = vmul.f32 %v6381_v9, %v17108_v24  ;;  %v6431_v12 = vmul.f32 %v6381_v9, %v17212_v25  ;;  %v6674_v2 = vmul.f32 %v6625_v27, %v17125_v31 }
 0x42d   :  { %v5974_v26 = vadd.f32 %v5942_v4, %v5730_v63  ;;  %v5975_v28 = vadd.f32 %v5943_v21, %v5731_v16  ;;  %v6675_v14 = vmul.f32 %v6625_v27, %v17126_v5  ;;  %v6869_v20 = vrot.slane %v6807_v3, %v16893_v23 }
 0x42e   :  { %9325 = vmatpush3.bf16.msra.mxu0 %v9324_v58  ;;  %v7113_v11 = vrot.slane %v7051_v42, %v16893_v23  ;;  %v7295_v0 = vcombine.high %v17561_v17, %v17561_v17  ;;  %v7539_v18 = vcombine.high %v17562_v55, %v17562_v55  ;;  %v7783_v44 = vcombine.high %v17563_v37, %v17563_v37  ;;  %v17565_v17 = vld [vmem:[#allocation195_spill] sm:$0xff]  ;;  %v17566_v55 = vld [vmem:[#allocation10_spill] sm:$0xff] }
 0x42f   :  { %v6218_v57 = vadd.f32 %v6186_v15, %v5974_v26  ;;  %v6219_v40 = vadd.f32 %v6187_v35, %v5975_v28  ;;  %v6918_v63 = vmul.f32 %v6869_v20, %v17365_v49  ;;  %v6919_v27 = vmul.f32 %v6869_v20, %v17366_v46  ;;  %v17567_v37 = vld [vmem:[#allocation154_spill] sm:$0xff] }
 0x430   :  { %v7162_v4 = vmul.f32 %v7113_v11, %v17367_v8  ;;  %v7163_v21 = vmul.f32 %v7113_v11, %v17256_v41  ;;  %v7357_v7 = vrot.slane %v7295_v0, %v16893_v23  ;;  %v7601_v9 = vrot.slane %v7539_v18, %v16893_v23 }
 0x431   :  { %v6462_v16 = vadd.f32 %v6430_v38, %v6218_v57  ;;  %v6463_v53 = vadd.f32 %v6431_v12, %v6219_v40  ;;  %v7845_v3 = vrot.slane %v7783_v44, %v16893_v23  ;;  %v8027_v15 = vcombine.high %v17564_v32, %v17564_v32 }
 0x432   :  { %v7406_v35 = vmul.f32 %v7357_v7, %v17257_v22  ;;  %v7407_v42 = vmul.f32 %v7357_v7, %v17258_v48  ;;  %v7650_v58 = vmul.f32 %v7601_v9, %v17139_v6  ;;  %v7651_v26 = vmul.f32 %v7601_v9, %v17140_v54  ;;  %v17568_v7 = vld [vmem:[#allocation157_spill] sm:$0xff] }
 0x433   :  { %v6706_v28 = vadd.f32 %v6674_v2, %v6462_v16  ;;  %v6707_v20 = vadd.f32 %v6675_v14, %v6463_v53  ;;  %v7894_v11 = vmul.f32 %v7845_v3, %v17148_v1  ;;  %v7895_v38 = vmul.f32 %v7845_v3, %v17149_v43  ;;  %v17569_v14 = vld [vmem:[#allocation158_spill] sm:$0xff] }
 0x434   :  { %v8089_v12 = vrot.slane %v8027_v15, %v16893_v23  ;;  %v8271_v0 = vcombine.high %v17565_v17, %v17565_v17  ;;  %v8515_v18 = vcombine.high %v17566_v55, %v17566_v55  ;;  %v8759_v44 = vcombine.high %v17567_v37, %v17567_v37 }
 0x435   :  { %v6950_v57 = vadd.f32 %v6918_v63, %v6706_v28  ;;  %v6951_v40 = vadd.f32 %v6919_v27, %v6707_v20  ;;  %v5082_v2 = vcombine.high %v17568_v7, %v17568_v7  ;;  %v5294_v9 = vcombine.high %v17569_v14, %v17569_v14 }
 0x436   :  { %v8138_v16 = vmul.f32 %v8089_v12, %v17262_v52  ;;  %v8139_v53 = vmul.f32 %v8089_v12, %v17152_v36  ;;  %v8333_v3 = vrot.slane %v8271_v0, %v16893_v23  ;;  %v8577_v32 = vrot.slane %v8515_v18, %v16893_v23 }
 0x437   :  { %v7194_v15 = vadd.f32 %v7162_v4, %v6950_v57  ;;  %v7195_v17 = vadd.f32 %v7163_v21, %v6951_v40  ;;  %v8821_v55 = vrot.slane %v8759_v44, %v16893_v23  ;;  %v5161_v63 = vrot.slane %v5082_v2, %v16893_v23  ;;  %v17570_v57 = vld [vmem:[#allocation13_spill] sm:$0xff] }
 0x438   :  { %v8382_v27 = vmul.f32 %v8333_v3, %v17159_v50  ;;  %v8383_v28 = vmul.f32 %v8333_v3, %v17161_v45  ;;  %v8626_v20 = vmul.f32 %v8577_v32, %v17162_v39  ;;  %v8627_v37 = vmul.f32 %v8577_v32, %v17305_v34  ;;  %v17571_v3 = vld [vmem:[#allocation160_spill] sm:$0xff] }
 0x439   :  { %v7438_v7 = vadd.f32 %v7406_v35, %v7194_v15  ;;  %v7439_v12 = vadd.f32 %v7407_v42, %v7195_v17  ;;  %v8870_v0 = vmul.f32 %v8821_v55, %v17308_v13  ;;  %v8871_v18 = vmul.f32 %v8821_v55, %v17309_v59  ;;  %v17572_v35 = vld [vmem:[#allocation164_spill] sm:$0xff] }
 0x43a   :  { %v5226_v4 = vmul.f32 %v5161_v63, %v16894_v29  ;;  %v5227_v21 = vmul.f32 %v5161_v63, %v16895_v47  ;;  %v5373_v44 = vrot.slane %v5294_v9, %v16893_v23  ;;  %v5538_v40 = vcombine.high %v17570_v57, %v17570_v57  ;;  %v17573_v63 = vld [vmem:[#allocation159_spill] sm:$0xff] }
 0x43b   :  { %v7682_v2 = vadd.f32 %v7650_v58, %v7438_v7  ;;  %v7683_v14 = vadd.f32 %v7651_v26, %v7439_v12  ;;  %v5782_v32 = vcombine.high %v17571_v3, %v17571_v3  ;;  %v6026_v42 = vcombine.high %v17572_v35, %v17572_v35 }
 0x43c   :  { %v5438_v15 = vmul.f32 %v5373_v44, %v17356_v30  ;;  %v5439_v17 = vmul.f32 %v5373_v44, %v17357_v61  ;;  %v5617_v55 = vrot.slane %v5538_v40, %v16893_v23  ;;  %v6270_v9 = vcombine.high %v17573_v63, %v17573_v63 }
 0x43d   :  { %v7926_v47 = vadd.f32 %v7894_v11, %v7682_v2  ;;  %v7927_v29 = vadd.f32 %v7895_v38, %v7683_v14  ;;  %v5861_v58 = vrot.slane %v5782_v32, %v16893_v23  ;;  %v6105_v26 = vrot.slane %v6026_v42, %v16893_v23 }
 0x43e   :  { %v5470_v7 = vadd.f32 %v5438_v15, %v5226_v4  ;;  %v5471_v12 = vadd.f32 %v5439_v17, %v5227_v21  ;;  %v5682_v57 = vmul.f32 %v5617_v55, %v17104_v19  ;;  %v5683_v3 = vmul.f32 %v5617_v55, %v17205_v56  ;;  %v17574_v21 = vld [vmem:[#allocation162_spill] sm:$0xff] }
 0x43f   :  { %v8170_v35 = vadd.f32 %v8138_v16, %v7926_v47  ;;  %v8171_v30 = vadd.f32 %v8139_v53, %v7927_v29  ;;  %v5926_v44 = vmul.f32 %v5861_v58, %v17106_v60  ;;  %v5927_v40 = vmul.f32 %v5861_v58, %v17107_v62  ;;  %v17575_v29 = vld [vmem:[#allocation163_spill] sm:$0xff]  ;;  %v17576_v53 = vld [vmem:[#allocation121_spill] sm:$0xff] }
 0x440   :  { %v5714_v61 = vadd.f32 %v5682_v57, %v5470_v7  ;;  %v5715_v63 = vadd.f32 %v5683_v3, %v5471_v12  ;;  %v6170_v11 = vmul.f32 %v6105_v26, %v16906_v51  ;;  %v6171_v38 = vmul.f32 %v6105_v26, %v16907_v10  ;;  %v17577_v57 = vld [vmem:[#allocation122_spill] sm:$0xff] }
 0x441   :  { %v8414_v2 = vadd.f32 %v8382_v27, %v8170_v35  ;;  %v8415_v14 = vadd.f32 %v8383_v28, %v8171_v30  ;;  %v6349_v4 = vrot.slane %v6270_v9, %v16893_v23  ;;  %v6514_v32 = vcombine.high %v17574_v21, %v17574_v21 }
 0x442   :  { %v5958_v42 = vadd.f32 %v5926_v44, %v5714_v61  ;;  %v5959_v47 = vadd.f32 %v5927_v40, %v5715_v63  ;;  %v6758_v16 = vcombine.high %v17575_v29, %v17575_v29  ;;  %v7002_v15 = vcombine.high %v17576_v53, %v17576_v53 }
 0x443   :  { %v8658_v17 = vadd.f32 %v8626_v20, %v8414_v2  ;;  %v8659_v55 = vadd.f32 %v8627_v37, %v8415_v14  ;;  %v6414_v58 = vmul.f32 %v6349_v4, %v17108_v24  ;;  %v6415_v27 = vmul.f32 %v6349_v4, %v17212_v25  ;;  %v17578_v4 = vld [vmem:[#allocation123_spill] sm:$0xff] }
 0x444   :  { %v6202_v30 = vadd.f32 %v6170_v11, %v5958_v42  ;;  %v6203_v28 = vadd.f32 %v6171_v38, %v5959_v47  ;;  %v6593_v9 = vrot.slane %v6514_v32, %v16893_v23  ;;  %v6837_v26 = vrot.slane %v6758_v16, %v16893_v23  ;;  %v17579_v32 = vld [vmem:[#allocation125_spill] sm:$0xff]  ;;  %v17580_v47 = vld [vmem:[#allocation208_spill] sm:$0xff]  ;;  %v17581_v16 = vld [vmem:[#allocation210_spill] sm:$0xff] }
 0x445   :  { %v8902_v61 = vadd.f32 %v8870_v0, %v8658_v17  ;;  %v8903_v7 = vadd.f32 %v8871_v18, %v8659_v55  ;;  %v7081_v12 = vrot.slane %v7002_v15, %v16893_v23  ;;  %v7246_v3 = vcombine.high %v17577_v57, %v17577_v57  ;;  %v17583_v57 = vld [vmem:[#allocation211_spill] sm:$0xff] }
 0x446   :  { %v6446_v35 = vadd.f32 %v6414_v58, %v6202_v30  ;;  %v6447_v20 = vadd.f32 %v6415_v27, %v6203_v28  ;;  %v6658_v37 = vmul.f32 %v6593_v9, %v17125_v31  ;;  %v6659_v44 = vmul.f32 %v6593_v9, %v17126_v5 }
 0x447   :  { %v9326_v40 = vpack.c.bf16 %v8903_v7, %v8902_v61  ;;  %v6902_v63 = vmul.f32 %v6837_v26, %v17365_v49  ;;  %v6903_v11 = vmul.f32 %v6837_v26, %v17366_v46  ;;  %v7146_v38 = vmul.f32 %v7081_v12, %v17367_v8  ;;  %v17582_v7 = vld [vmem:[#allocation209_spill] sm:$0xff] }
 0x448   :  { %v6690_v0 = vadd.f32 %v6658_v37, %v6446_v35  ;;  %v6691_v18 = vadd.f32 %v6659_v44, %v6447_v20  ;;  %v7147_v2 = vmul.f32 %v7081_v12, %v17256_v41  ;;  %v7325_v14 = vrot.slane %v7246_v3, %v16893_v23 }
 0x449   :  { %9327 = vmatprep.subr.bf16.mxu0 %v9326_v40  ;;  %v7490_v21 = vcombine.high %v17578_v4, %v17578_v4  ;;  %v7734_v42 = vcombine.high %v17579_v32, %v17579_v32  ;;  %v7978_v29 = vcombine.high %v17580_v47, %v17580_v47  ;;  %v8222_v53 = vcombine.high %v17581_v16, %v17581_v16  ;;  %v17584_v32 = vld [vmem:[#allocation212_spill] sm:$0xff]  ;;  %v17585_v47 = vld [vmem:[#allocation213_spill] sm:$0xff] }
 0x44a   :  { %v6934_v15 = vadd.f32 %v6902_v63, %v6690_v0  ;;  %v6935_v17 = vadd.f32 %v6903_v11, %v6691_v18  ;;  %v7390_v55 = vmul.f32 %v7325_v14, %v17257_v22  ;;  %v7391_v58 = vmul.f32 %v7325_v14, %v17258_v48 }
 0x44b   :  { %v7569_v27 = vrot.slane %v7490_v21, %v16893_v23  ;;  %v7813_v30 = vrot.slane %v7734_v42, %v16893_v23  ;;  %v8057_v28 = vrot.slane %v7978_v29, %v16893_v23  ;;  %v8301_v9 = vrot.slane %v8222_v53, %v16893_v23 }
 0x44c   :  { %v7178_v26 = vadd.f32 %v7146_v38, %v6934_v15  ;;  %v7179_v61 = vadd.f32 %v7147_v2, %v6935_v17  ;;  %v8466_v12 = vcombine.high %v17582_v7, %v17582_v7  ;;  %v8710_v3 = vcombine.high %v17583_v57, %v17583_v57 }
 0x44d   :  { %v7634_v35 = vmul.f32 %v7569_v27, %v17139_v6  ;;  %v7635_v20 = vmul.f32 %v7569_v27, %v17140_v54  ;;  %v7878_v37 = vmul.f32 %v7813_v30, %v17148_v1  ;;  %v7879_v44 = vmul.f32 %v7813_v30, %v17149_v43 }
 0x44e   :  { %v7422_v40 = vadd.f32 %v7390_v55, %v7178_v26  ;;  %v7423_v63 = vadd.f32 %v7391_v58, %v7179_v61  ;;  %v8122_v11 = vmul.f32 %v8057_v28, %v17262_v52  ;;  %v8123_v38 = vmul.f32 %v8057_v28, %v17152_v36  ;;  %v17587_v61 = vld [vmem:[#allocation172_spill] sm:$0xff] }
 0x44f   :  { %v8366_v0 = vmul.f32 %v8301_v9, %v17159_v50  ;;  %v8367_v18 = vmul.f32 %v8301_v9, %v17161_v45  ;;  %v8545_v2 = vrot.slane %v8466_v12, %v16893_v23  ;;  %v8789_v14 = vrot.slane %v8710_v3, %v16893_v23  ;;  %v17586_v9 = vld [vmem:[#allocation256_spill] sm:$0xff]  ;;  %v17588_v12 = vld [vmem:[#allocation173_spill] sm:$0xff] }
 0x450   :  { %v7666_v4 = vadd.f32 %v7634_v35, %v7422_v40  ;;  %v7667_v21 = vadd.f32 %v7635_v20, %v7423_v63  ;;  %v5133_v42 = vcombine.high %v17584_v32, %v17584_v32  ;;  %v5345_v29 = vcombine.high %v17585_v47, %v17585_v47  ;;  %v17589_v20 = vld [vmem:[#allocation292_spill] sm:$0xff] }
 0x451   :  { %v8610_v16 = vmul.f32 %v8545_v2, %v17162_v39  ;;  %v8611_v53 = vmul.f32 %v8545_v2, %v17305_v34  ;;  %v8854_v15 = vmul.f32 %v8789_v14, %v17308_v13  ;;  %v8855_v17 = vmul.f32 %v8789_v14, %v17309_v59  ;;  %v17591_v63 = vld [vmem:[#allocation296_spill] sm:$0xff]  ;;  %v17592_v14 = vld [vmem:[#allocation299_spill] sm:$0xff] }
 0x452   :  { %v7910_v55 = vadd.f32 %v7878_v37, %v7666_v4  ;;  %v7911_v58 = vadd.f32 %v7879_v44, %v7667_v21  ;;  %v5197_v27 = vrot.slane %v5133_v42, %v16893_v23  ;;  %v5409_v30 = vrot.slane %v5345_v29, %v16893_v23  ;;  %v17590_v44 = vld [vmem:[#allocation294_spill] sm:$0xff] }
 0x453   :  { %v5589_v28 = vcombine.high %v14797_v33, %v14797_v33  ;;  %v5833_v26 = vcombine.high %v17586_v9, %v17586_v9  ;;  %v6077_v7 = vcombine.high %v17587_v61, %v17587_v61  ;;  %v6321_v57 = vcombine.high %v17588_v12, %v17588_v12 }
 0x454   :  { %v8154_v3 = vadd.f32 %v8122_v11, %v7910_v55  ;;  %v8155_v35 = vadd.f32 %v8123_v38, %v7911_v58  ;;  %v5244_v37 = vmul.f32 %v5197_v27, %v17589_v20  ;;  %v5245_v40 = vmul.f32 %v5197_v27, %v17590_v44 }
 0x455   :  { %v5456_v2 = vmul.f32 %v5409_v30, %v17591_v63  ;;  %v5457_v4 = vmul.f32 %v5409_v30, %v17592_v14  ;;  %v5653_v33 = vrot.slane %v5589_v28, %v16893_v23  ;;  %v5897_v21 = vrot.slane %v5833_v26, %v16893_v23 }
 0x456   :  { %v8398_v32 = vadd.f32 %v8366_v0, %v8154_v3  ;;  %v8399_v42 = vadd.f32 %v8367_v18, %v8155_v35  ;;  %v6141_v47 = vrot.slane %v6077_v7, %v16893_v23  ;;  %v6385_v29 = vrot.slane %v6321_v57, %v16893_v23 }
 0x457   :  { %v5488_v11 = vadd.f32 %v5456_v2, %v5244_v37  ;;  %v5489_v38 = vadd.f32 %v5457_v4, %v5245_v40  ;;  %v5700_v55 = vmul.f32 %v5653_v33, %v17104_v19  ;;  %v5701_v58 = vmul.f32 %v5653_v33, %v17205_v56  ;;  %v17594_v40 = vld [vmem:[#allocation176_spill] sm:$0xff]  ;;  %v17595_v33 = vld [vmem:[#allocation175_spill] sm:$0xff] }
 0x458   :  { %v8642_v27 = vadd.f32 %v8610_v16, %v8398_v32  ;;  %v8643_v9 = vadd.f32 %v8611_v53, %v8399_v42  ;;  %v5944_v30 = vmul.f32 %v5897_v21, %v17106_v60  ;;  %v5945_v28 = vmul.f32 %v5897_v21, %v17107_v62  ;;  %v17593_v16 = vld [vmem:[#allocation174_spill] sm:$0xff]  ;;  %v17596_v32 = vld [vmem:[#allocation177_spill] sm:$0xff] }
 0x459   :  { %v5732_v61 = vadd.f32 %v5700_v55, %v5488_v11  ;;  %v5733_v26 = vadd.f32 %v5701_v58, %v5489_v38  ;;  %v6188_v0 = vmul.f32 %v6141_v47, %v16906_v51  ;;  %v6189_v18 = vmul.f32 %v6141_v47, %v16907_v10  ;;  %v17598_v58 = vld [vmem:[#allocation179_spill] sm:$0xff] }
 0x45a   :  { %v8886_v7 = vadd.f32 %v8854_v15, %v8642_v27  ;;  %v8887_v12 = vadd.f32 %v8855_v17, %v8643_v9  ;;  %v6432_v57 = vmul.f32 %v6385_v29, %v17108_v24  ;;  %v6433_v3 = vmul.f32 %v6385_v29, %v17212_v25  ;;  %v17597_v17 = vld [vmem:[#allocation178_spill] sm:$0xff] }
 0x45b   :  { %v5976_v35 = vadd.f32 %v5944_v30, %v5732_v61  ;;  %v5977_v37 = vadd.f32 %v5945_v28, %v5733_v26  ;;  %v6565_v53 = vcombine.high %v17593_v16, %v17593_v16  ;;  %v6809_v2 = vcombine.high %v17594_v40, %v17594_v40 }
 0x45c   :  { %v9328_v4 = vpack.c.bf16 %v8887_v12, %v8886_v7  ;;  %v7053_v21 = vcombine.high %v17595_v33, %v17595_v33  ;;  %v7297_v15 = vcombine.high %v17596_v32, %v17596_v32  ;;  %v7541_v42 = vcombine.high %v17597_v17, %v17597_v17 }
 0x45d   :  { %v6220_v47 = vadd.f32 %v6188_v0, %v5976_v35  ;;  %v6221_v29 = vadd.f32 %v6189_v18, %v5977_v37  ;;  %v6629_v11 = vrot.slane %v6565_v53, %v16893_v23  ;;  %v6873_v38 = vrot.slane %v6809_v2, %v16893_v23 }
 0x45e   :  { %9329 = vmatpush3.bf16.msra.mxu0 %v9328_v4  ;;  %v7117_v55 = vrot.slane %v7053_v21, %v16893_v23  ;;  %v7785_v27 = vcombine.high %v17598_v58, %v17598_v58  ;;  %v7361_v26 = vrot.slane %v7297_v15, %v16893_v23  ;;  %v7605_v0 = vrot.slane %v7541_v42, %v16893_v23  ;;  %v17600_v4 = vld [vmem:[#allocation20_spill] sm:$0xff]  ;;  %v17601_v21 = vld [vmem:[#allocation182_spill] sm:$0xff]  ;;  %v17602_v42 = vld [vmem:[#allocation185_spill] sm:$0xff] }
 0x45f   :  { %v6464_v9 = vadd.f32 %v6432_v57, %v6220_v47  ;;  %v6465_v30 = vadd.f32 %v6433_v3, %v6221_v29  ;;  %v6676_v28 = vmul.f32 %v6629_v11, %v17125_v31  ;;  %v6677_v61 = vmul.f32 %v6629_v11, %v17126_v5  ;;  %v17599_v3 = vld [vmem:[#allocation180_spill] sm:$0xff] }
 0x460   :  { %v6920_v12 = vmul.f32 %v6873_v38, %v17365_v49  ;;  %v6921_v35 = vmul.f32 %v6873_v38, %v17366_v46  ;;  %v7164_v37 = vmul.f32 %v7117_v55, %v17367_v8  ;;  %v7165_v16 = vmul.f32 %v7117_v55, %v17256_v41 }
 0x461   :  { %v6708_v18 = vadd.f32 %v6676_v28, %v6464_v9  ;;  %v6709_v7 = vadd.f32 %v6677_v61, %v6465_v30  ;;  %v7849_v57 = vrot.slane %v7785_v27, %v16893_v23  ;;  %v8029_v53 = vcombine.high %v17599_v3, %v17599_v3  ;;  %v17603_v30 = vld [vmem:[#allocation181_spill] sm:$0xff] }
 0x462   :  { %v8273_v33 = vcombine.high %v17600_v4, %v17600_v4  ;;  %v8517_v32 = vcombine.high %v17601_v21, %v17601_v21  ;;  %v7408_v15 = vmul.f32 %v7361_v26, %v17257_v22  ;;  %v8761_v47 = vcombine.high %v17602_v42, %v17602_v42 }
 0x463   :  { %v6952_v40 = vadd.f32 %v6920_v12, %v6708_v18  ;;  %v6953_v2 = vadd.f32 %v6921_v35, %v6709_v7  ;;  %v8093_v17 = vrot.slane %v8029_v53, %v16893_v23  ;;  %v7409_v38 = vmul.f32 %v7361_v26, %v17258_v48 }
 0x464   :  { %v8337_v55 = vrot.slane %v8273_v33, %v16893_v23  ;;  %v7652_v58 = vmul.f32 %v7605_v0, %v17139_v6  ;;  %v7653_v27 = vmul.f32 %v7605_v0, %v17140_v54  ;;  %v8581_v9 = vrot.slane %v8517_v32, %v16893_v23  ;;  %v17606_v32 = vld [vmem:[#allocation186_spill] sm:$0xff] }
 0x465   :  { %v7196_v29 = vadd.f32 %v7164_v37, %v6952_v40  ;;  %v7197_v11 = vadd.f32 %v7165_v16, %v6953_v2  ;;  %v5084_v28 = vcombine.high %v17603_v30, %v17603_v30  ;;  %v7896_v7 = vmul.f32 %v7849_v57, %v17148_v1  ;;  %v17604_v40 = vld [vmem:[#allocation183_spill] sm:$0xff] }
 0x466   :  { %v7897_v12 = vmul.f32 %v7849_v57, %v17149_v43  ;;  %v8140_v35 = vmul.f32 %v8093_v17, %v17262_v52  ;;  %v8141_v26 = vmul.f32 %v8093_v17, %v17152_v36  ;;  %v8384_v37 = vmul.f32 %v8337_v55, %v17159_v50  ;;  %v17605_v57 = vld [vmem:[#allocation184_spill] sm:$0xff] }
 0x467   :  { %v7440_v61 = vadd.f32 %v7408_v15, %v7196_v29  ;;  %v7441_v18 = vadd.f32 %v7409_v38, %v7197_v11  ;;  %v8825_v16 = vrot.slane %v8761_v47, %v16893_v23  ;;  %v5165_v53 = vrot.slane %v5084_v28, %v16893_v23  ;;  %v17607_v29 = vld [vmem:[#allocation276_spill] sm:$0xff] }
 0x468   :  { %v5296_v2 = vcombine.high %v17604_v40, %v17604_v40  ;;  %v8385_v4 = vmul.f32 %v8337_v55, %v17161_v45  ;;  %v8628_v33 = vmul.f32 %v8581_v9, %v17162_v39  ;;  %v5540_v21 = vcombine.high %v17605_v57, %v17605_v57  ;;  %v17609_v40 = vld [vmem:[#allocation146_spill] sm:$0xff] }
 0x469   :  { %v7684_v0 = vadd.f32 %v7652_v58, %v7440_v61  ;;  %v7685_v3 = vadd.f32 %v7653_v27, %v7441_v18  ;;  %v5784_v15 = vcombine.high %v17606_v32, %v17606_v32  ;;  %v8629_v47 = vmul.f32 %v8581_v9, %v17305_v34  ;;  %v17608_v18 = vld [vmem:[#allocation145_spill] sm:$0xff] }
 0x46a   :  { %v6028_v11 = vcombine.high %v17607_v29, %v17607_v29  ;;  %v5228_v38 = vmul.f32 %v5165_v53, %v17589_v20  ;;  %v5229_v58 = vmul.f32 %v5165_v53, %v17590_v44  ;;  %v5377_v55 = vrot.slane %v5296_v2, %v16893_v23 }
 0x46b   :  { %v7928_v17 = vadd.f32 %v7896_v7, %v7684_v0  ;;  %v7929_v42 = vadd.f32 %v7897_v12, %v7685_v3  ;;  %v5621_v27 = vrot.slane %v5540_v21, %v16893_v23  ;;  %v5865_v61 = vrot.slane %v5784_v15, %v16893_v23 }
 0x46c   :  { %v6272_v7 = vcombine.high %v17608_v18, %v17608_v18  ;;  %v8872_v9 = vmul.f32 %v8825_v16, %v17308_v13  ;;  %v8873_v12 = vmul.f32 %v8825_v16, %v17309_v59  ;;  %v5440_v0 = vmul.f32 %v5377_v55, %v17591_v63 }
 0x46d   :  { %v8172_v30 = vadd.f32 %v8140_v35, %v7928_v17  ;;  %v8173_v28 = vadd.f32 %v8141_v26, %v7929_v42  ;;  %v5441_v20 = vmul.f32 %v5377_v55, %v17592_v14  ;;  %v6109_v53 = vrot.slane %v6028_v11, %v16893_v23  ;;  %v17610_v17 = vld [vmem:[#allocation9_spill] sm:$0xff] }
 0x46e   :  { %v6516_v35 = vcombine.high %v17609_v40, %v17609_v40  ;;  %v5472_v26 = vadd.f32 %v5440_v0, %v5228_v38  ;;  %v5684_v57 = vmul.f32 %v5621_v27, %v17104_v19  ;;  %v5685_v21 = vmul.f32 %v5621_v27, %v17205_v56  ;;  %v17611_v19 = vld [vmem:[#allocation149_spill] sm:$0xff] }
 0x46f   :  { %v8416_v44 = vadd.f32 %v8384_v37, %v8172_v30  ;;  %v8417_v3 = vadd.f32 %v8385_v4, %v8173_v28  ;;  %v5473_v2 = vadd.f32 %v5441_v20, %v5229_v58  ;;  %v5928_v16 = vmul.f32 %v5865_v61, %v17106_v60 }
 0x470   :  { %v6353_v63 = vrot.slane %v6272_v7, %v16893_v23  ;;  %v5716_v14 = vadd.f32 %v5684_v57, %v5472_v26  ;;  %v5929_v4 = vmul.f32 %v5865_v61, %v17107_v62  ;;  %v6760_v42 = vcombine.high %v17610_v17, %v17610_v17  ;;  %v17612_v62 = vld [vmem:[#allocation147_spill] sm:$0xff]  ;;  %v17617_v17 = vld [vmem:[#allocation249_spill] sm:$0xff] }
 0x471   :  { %v8660_v32 = vadd.f32 %v8628_v33, %v8416_v44  ;;  %v8661_v15 = vadd.f32 %v8629_v47, %v8417_v3  ;;  %v5717_v37 = vadd.f32 %v5685_v21, %v5473_v2  ;;  %v6172_v38 = vmul.f32 %v6109_v53, %v16906_v51  ;;  %v17614_v3 = vld [vmem:[#allocation150_spill] sm:$0xff] }
 0x472   :  { %v7004_v56 = vcombine.high %v17611_v19, %v17611_v19  ;;  %v5960_v33 = vadd.f32 %v5928_v16, %v5716_v14  ;;  %v6173_v60 = vmul.f32 %v6109_v53, %v16907_v10  ;;  %v6597_v58 = vrot.slane %v6516_v35, %v16893_v23  ;;  %v17618_v19 = vld [vmem:[#allocation252_spill] sm:$0xff] }
 0x473   :  { %v8904_v29 = vadd.f32 %v8872_v9, %v8660_v32  ;;  %v8905_v11 = vadd.f32 %v8873_v12, %v8661_v15  ;;  %v5961_v47 = vadd.f32 %v5929_v4, %v5717_v37  ;;  %v6416_v27 = vmul.f32 %v6353_v63, %v17108_v24  ;;  %v17613_v9 = vld [vmem:[#allocation148_spill] sm:$0xff] }
 0x474   :  { %v7248_v30 = vcombine.high %v17612_v62, %v17612_v62  ;;  %v6204_v28 = vadd.f32 %v6172_v38, %v5960_v33  ;;  %v6417_v18 = vmul.f32 %v6353_v63, %v17212_v25  ;;  %v6841_v51 = vrot.slane %v6760_v42, %v16893_v23 }
 0x475   :  { %v9330_v55 = vpack.c.bf16 %v8905_v11, %v8904_v29  ;;  %v6205_v61 = vadd.f32 %v6173_v60, %v5961_v47  ;;  %v7085_v7 = vrot.slane %v7004_v56, %v16893_v23  ;;  %v7492_v10 = vcombine.high %v17613_v9, %v17613_v9 }
 0x476   :  { %v6448_v12 = vadd.f32 %v6416_v27, %v6204_v28  ;;  %v6660_v20 = vmul.f32 %v6597_v58, %v17125_v31  ;;  %v6661_v24 = vmul.f32 %v6597_v58, %v17126_v5  ;;  %v7329_v44 = vrot.slane %v7248_v30, %v16893_v23  ;;  %v17615_v5 = vld [vmem:[#allocation151_spill] sm:$0xff] }
 0x477   :  { %9331 = vmatprep.subr.bf16.mxu0 %v9330_v55  ;;  %v6449_v0 = vadd.f32 %v6417_v18, %v6205_v61  ;;  %v7736_v53 = vcombine.high %v17614_v3, %v17614_v3  ;;  %v6904_v35 = vmul.f32 %v6841_v51, %v17365_v49  ;;  %v6905_v26 = vmul.f32 %v6841_v51, %v17366_v46  ;;  %v17616_v46 = vld [vmem:[#allocation248_spill] sm:$0xff] }
 0x478   :  { %v6692_v25 = vadd.f32 %v6660_v20, %v6448_v12  ;;  %v7148_v2 = vmul.f32 %v7085_v7, %v17367_v8  ;;  %v7573_v57 = vrot.slane %v7492_v10, %v16893_v23  ;;  %v7149_v31 = vmul.f32 %v7085_v7, %v17256_v41  ;;  %v8912_v20 = vld [vmem:[%s15446_s6 + $0x30] sm:$0xff]  ;;  %v8917_v3 = vld [vmem:[%s15446_s6 + $0x58] sm:$0xff] }
 0x479   :  { %v6693_v40 = vadd.f32 %v6661_v24, %v6449_v0  ;;  %v7980_v15 = vcombine.high %v17615_v5, %v17615_v5  ;;  %v7392_v16 = vmul.f32 %v7329_v44, %v17257_v22  ;;  %v7817_v63 = vrot.slane %v7736_v53, %v16893_v23  ;;  %v8915_v24 = vld [vmem:[%s15446_s6 + $0x48] sm:$0xff]  ;;  %v8916_v53 = vld [vmem:[%s15446_s6 + $0x50] sm:$0xff]  ;;  %v8933_v5 = vpop.permute.xlu0 %8932 }
 0x47a   :  { %v6936_v21 = vadd.f32 %v6904_v35, %v6692_v25  ;;  %v7393_v49 = vmul.f32 %v7329_v44, %v17258_v48  ;;  %v8224_v8 = vcombine.high %v17616_v46, %v17616_v46  ;;  %v7636_v4 = vmul.f32 %v7573_v57, %v17139_v6  ;;  %v8914_v44 = vld [vmem:[%s15446_s6 + $0x40] sm:$0xff]  ;;  %v8919_v25 = vld [vmem:[%s15446_s6 + $0x68] sm:$0xff]  ;;  %v8921_v35 = vld [vmem:[%s15446_s6 + $0x78] sm:$0xff] }
 0x47b   :  { %v6937_v32 = vadd.f32 %v6905_v26, %v6693_v40  ;;  %v8468_v42 = vcombine.high %v17617_v17, %v17617_v17  ;;  %v7637_v11 = vmul.f32 %v7573_v57, %v17140_v54  ;;  %v8061_v22 = vrot.slane %v7980_v15, %v16893_v23  ;;  %v8918_v40 = vld [vmem:[%s15446_s6 + $0x60] sm:$0xff]  ;;  %v8920_v26 = vld [vmem:[%s15446_s6 + $0x70] sm:$0xff] }
 0x47c   :  { %v7180_v14 = vadd.f32 %v7148_v2, %v6936_v21  ;;  %v7880_v38 = vmul.f32 %v7817_v63, %v17148_v1  ;;  %v8712_v56 = vcombine.high %v17618_v19, %v17618_v19  ;;  %v7881_v47 = vmul.f32 %v7817_v63, %v17149_v43 }
 0x47d   :  { %v7181_v37 = vadd.f32 %v7149_v31, %v6937_v32  ;;  %v8305_v6 = vrot.slane %v8224_v8, %v16893_v23  ;;  %v8549_v60 = vrot.slane %v8468_v42, %v16893_v23  ;;  %v8124_v27 = vmul.f32 %v8061_v22, %v17262_v52 }
 0x47e   :  { %v7424_v41 = vadd.f32 %v7392_v16, %v7180_v14  ;;  %v8125_v54 = vmul.f32 %v8061_v22, %v17152_v36  ;;  %v8793_v62 = vrot.slane %v8712_v56, %v16893_v23  ;;  %v9525_v2 = vmov 0.0|0.0  }
 0x47f   :  { %v7425_v29 = vadd.f32 %v7393_v49, %v7181_v37  ;;  %v8368_v28 = vmul.f32 %v8305_v6, %v17159_v50  ;;  %v8369_v61 = vmul.f32 %v8305_v6, %v17161_v45  ;;  %v8612_v51 = vmul.f32 %v8549_v60, %v17162_v39  ;;  %v8906_v50 = vld [vmem:[%s15446_s6] sm:$0xff]  ;;  %v8909_v45 = vld [vmem:[%s15446_s6 + $0x18] sm:$0xff]  ;;  %v8908_v39 = vld [vmem:[%s15446_s6 + $0x10] sm:$0xff]  ;;  %9334 = vmatprep.subr.bf16.mxu1 %v9525_v2  ;;  %v8938_v37 = vpop.permute.xlu1 %8937 }
 0x480   :  { %v7668_v48 = vadd.f32 %v7636_v4, %v7424_v41  ;;  %v8613_v7 = vmul.f32 %v8549_v60, %v17305_v34  ;;  %v8856_v52 = vmul.f32 %v8793_v62, %v17308_v13  ;;  %v8857_v36 = vmul.f32 %v8793_v62, %v17309_v59  ;;  %v8911_v34 = vld [vmem:[%s15446_s6 + $0x28] sm:$0xff]  ;;  %v8910_v13 = vld [vmem:[%s15446_s6 + $0x20] sm:$0xff]  ;;  %v8913_v59 = vld [vmem:[%s15446_s6 + $0x38] sm:$0xff]  ;;  %v8943_v41 = vpop.permute.xlu0 %8942 }
 0x481   :  { %v7669_v33 = vadd.f32 %v7637_v11, %v7425_v29  ;;  %v9527_v57 = vmov 0.0  }
 0x482   :  { %v7912_v58 = vadd.f32 %v7880_v38, %v7668_v48  ;;  %9299 = vmatprep.mubr.msk.f32.mxu1 %vm9526_vm0, %v9527_v57 }
 0x483   :  { %v7913_v55 = vadd.f32 %v7881_v47, %v7669_v33  ;;  %v8948_v33 = vpop.permute.xlu1 %8947 }
 0x484   :  { %v8156_v1 = vadd.f32 %v8124_v27, %v7912_v58 }
 0x485   :  { %v8157_v30 = vadd.f32 %v8125_v54, %v7913_v55  ;;  %v8953_v54 = vpop.permute.xlu0 %8952 }
 0x486   :  { %v8400_v18 = vadd.f32 %v8368_v28, %v8156_v1 }
 0x487   :  { %v8401_v43 = vadd.f32 %v8369_v61, %v8157_v30 }
 0x488   :  { %v8644_v9 = vadd.f32 %v8612_v51, %v8400_v18  ;;  %v8958_v51 = vpop.permute.xlu1 %8957 }
 0x489   :  { %v8645_v10 = vadd.f32 %v8613_v7, %v8401_v43 }
 0x48a   :  { %v8888_v12 = vadd.f32 %v8856_v52, %v8644_v9 }
 0x48b   :  { %v8889_v23 = vadd.f32 %v8857_v36, %v8645_v10 }
 0x48d   :  { %v9332_v0 = vpack.c.bf16 %v8889_v23, %v8888_v12  ;;  %v8963_v23 = vpop.permute.xlu0 %8962 }
 0x48f   :  { %9333 = vmatpush3.bf16.msra.mxu0 %v9332_v0 }
 0x492   :  { %9035 = vmatmul.mubr.f32.vlgmr.msra.gmra.mrb[0].mxu0 %v8906_v50 }
 0x493   :  { %9039 = vmatprep.mubr.f32.mxu0 %v8909_v45 }
 0x496   :  { %9040 = vmatmul.mubr.f32.gmra.mrb[2].mxu0 %v8908_v39 }
 0x497   :  { %9044 = vmatprep.mubr.f32.mxu0 %v8911_v34 }
 0x49a   :  { %9045 = vmatmul.mubr.f32.gmra.mrb[4].mxu0 %v8910_v13 }
 0x49b   :  { %9049 = vmatprep.mubr.f32.mxu0 %v8913_v59 }
 0x49e   :  { %9050 = vmatmul.mubr.f32.gmra.mrb[6].mxu0 %v8912_v20  ;;  %v8968_v20 = vpop.permute.xlu1 %8967 }
 0x49f   :  { %9054 = vmatprep.mubr.f32.mxu0 %v8915_v24 }
 0x4a2   :  { %9055 = vmatmul.mubr.f32.gmra.mrb[8].mxu0 %v8914_v44 }
 0x4a3   :  { %9059 = vmatprep.mubr.f32.mxu0 %v8917_v3 }
 0x4a6   :  { %9060 = vmatmul.mubr.f32.gmra.mrb[10].mxu0 %v8916_v53 }
 0x4a7   :  { %9064 = vmatprep.mubr.f32.mxu0 %v8919_v25 }
 0x4aa   :  { %9065 = vmatmul.mubr.f32.gmra.mrb[12].mxu0 %v8918_v40 }
 0x4ab   :  { %9069 = vmatprep.mubr.f32.mxu0 %v8921_v35  ;;  %v9099_v35 = vld [vmem:[%s15448_s8] sm:$0xf] }
 0x4ae   :  { %9070 = vmatmul.mubr.f32.gmra.mrb[14].mxu0 %v8920_v26  ;;  %v9104_v26 = vpop.permute.xlu0 %9103 }
 0x565   :  { %v9250_v21 = vpop.f32.mrb[0].mxu0 }
 0x566   :  { %v9251_v32 = vpop.f32.mrb[1].mxu0 }
 0x567   :  { %v9252_v31 = vadd.f32 %v9251_v32, %v9250_v21 }
 0x569   :  { %v9037_v15 = vadd.f32 %v9252_v31, %v8933_v5  ;;  %v9253_v16 = vpop.f32.mrb[2].mxu0 }
 0x56a   :  { %v9254_v63 = vpop.f32.mrb[3].mxu0 }
 0x56b   :  { %v9255_v14 = vadd.f32 %v9254_v63, %v9253_v16  ;;  %v9083_v8 = vmul.f32 0.01, %v9037_v15  ;;  %vm9075_vm1 = vcmp.ge.f32.partialorder %v9037_v15, 0.0 }
 0x56d   :  { %v9042_v49 = vadd.f32 %v9255_v14, %v8938_v37  ;;  %v9256_v46 = vpop.f32.mrb[4].mxu0  ;;  %v9091_v22 = vsel %vm9075_vm1, %v9037_v15, %v9083_v8 }
 0x56e   :  { %v9257_v4 = vpop.f32.mrb[5].mxu0 }
 0x56f   :  { %v9258_v17 = vadd.f32 %v9257_v4, %v9256_v46  ;;  %vm9076_vm2 = vcmp.ge.f32.partialorder %v9042_v49, 0.0  ;;  %v9084_v42 = vmul.f32 0.01, %v9042_v49 }
 0x571   :  { %v9047_v29 = vadd.f32 %v9258_v17, %v8943_v41  ;;  %v9259_v11 = vpop.f32.mrb[6].mxu0  ;;  %v9092_v38 = vsel %vm9076_vm2, %v9042_v49, %v9084_v42 }
 0x572   :  { %v9260_v19 = vpop.f32.mrb[7].mxu0  ;;  %v9335_v56 = vpack.c.bf16 %v9092_v38, %v9091_v22 }
 0x573   :  { %v9261_v48 = vadd.f32 %v9260_v19, %v9259_v11  ;;  %v9085_v47 = vmul.f32 0.01, %v9047_v29  ;;  %vm9077_vm3 = vcmp.ge.f32.partialorder %v9047_v29, 0.0 }
 0x574   :  { %9336 = vmatpush3.bf16.msra.mxu1 %v9335_v56 }
 0x575   :  { %v9052_v6 = vadd.f32 %v9261_v48, %v8948_v33  ;;  %v9262_v60 = vpop.f32.mrb[8].mxu0  ;;  %9337 = vmatprep.subr.bf16.mxu1 %v9525_v2  ;;  %v9093_v30 = vsel %vm9077_vm3, %v9047_v29, %v9085_v47 }
 0x576   :  { %v9263_v58 = vpop.f32.mrb[9].mxu0 }
 0x577   :  { %vm9078_vm4 = vcmp.ge.f32.partialorder %v9052_v6, 0.0  ;;  %v9086_v55 = vmul.f32 0.01, %v9052_v6  ;;  %v9264_v27 = vadd.f32 %v9263_v58, %v9262_v60 }
 0x579   :  { %v9057_v62 = vadd.f32 %v9264_v27, %v8953_v54  ;;  %v9265_v1 = vpop.f32.mrb[10].mxu0  ;;  %v9094_v28 = vsel %vm9078_vm4, %v9052_v6, %v9086_v55 }
 0x57a   :  { %v9266_v61 = vpop.f32.mrb[11].mxu0  ;;  %v9338_v18 = vpack.c.bf16 %v9094_v28, %v9093_v30 }
 0x57b   :  { %v9267_v43 = vadd.f32 %v9266_v61, %v9265_v1  ;;  %v9087_v7 = vmul.f32 0.01, %v9057_v62  ;;  %vm9079_vm5 = vcmp.ge.f32.partialorder %v9057_v62, 0.0 }
 0x57c   :  { %9339 = vmatpush3.bf16.msra.mxu1 %v9338_v18 }
 0x57d   :  { %v9062_v9 = vadd.f32 %v9267_v43, %v8958_v51  ;;  %v9268_v10 = vpop.f32.mrb[12].mxu0  ;;  %9340 = vmatprep.subr.bf16.mxu1 %v9525_v2  ;;  %v9095_v45 = vsel %vm9079_vm5, %v9057_v62, %v9087_v7 }
 0x57e   :  { %v9269_v52 = vpop.f32.mrb[13].mxu0 }
 0x57f   :  { %vm9080_vm6 = vcmp.ge.f32.partialorder %v9062_v9, 0.0  ;;  %v9088_v36 = vmul.f32 0.01, %v9062_v9  ;;  %v9270_v12 = vadd.f32 %v9269_v52, %v9268_v10 }
 0x581   :  { %v9067_v0 = vadd.f32 %v9270_v12, %v8963_v23  ;;  %v9271_v50 = vpop.f32.mrb[14].mxu0  ;;  %v9096_v39 = vsel %vm9080_vm6, %v9062_v9, %v9088_v36 }
 0x582   :  { %v9272_v34 = vpop.f32.mrb[15].mxu0  ;;  %v9341_v13 = vpack.c.bf16 %v9096_v39, %v9095_v45 }
 0x583   :  { %v9273_v59 = vadd.f32 %v9272_v34, %v9271_v50  ;;  %v9089_v24 = vmul.f32 0.01, %v9067_v0  ;;  %vm9081_vm7 = vcmp.ge.f32.partialorder %v9067_v0, 0.0 }
 0x584   :  { %9342 = vmatpush3.bf16.msra.mxu1 %v9341_v13 }
 0x585   :  { %v9072_v44 = vadd.f32 %v9273_v59, %v8968_v20  ;;  %9343 = vmatprep.subr.bf16.mxu1 %v9525_v2  ;;  %v9097_v53 = vsel %vm9081_vm7, %v9067_v0, %v9089_v24 }
 0x587   :  { %vm9082_vm8 = vcmp.ge.f32.partialorder %v9072_v44, 0.0  ;;  %v9090_v3 = vmul.f32 0.01, %v9072_v44 }
 0x589   :  { %v9098_v25 = vsel %vm9082_vm8, %v9072_v44, %v9090_v3 }
 0x58a   :  { %v9344_v40 = vpack.c.bf16 %v9098_v25, %v9097_v53 }
 0x58c   :  { %9345 = vmatpush3.bf16.msra.mxu1 %v9344_v40 }
 0x58f   :  { %9300 = vmatmul.mubr.msk.f32.vlgmr.msra.gmra.mrb[0].mxu1 %vm9106_vm9, %v9099_v35 }
 0x662   :  { %v9176_v57 = vpop.f32.mrb[0].mxu1 }
 0x663   :  { %v9177_v21 = vadd.f32 %v9176_v57, %v9104_v26  ;;  %v9301_v32 = vpop.f32.mrb[1].mxu1 }
 0x665   :  { %9180 = vst [vmem:[%s15450_s10] sm:$0xf] %v9177_v21 }
 0x666   :  { %9185 = vsyncpa [#allocation3], 1 }

</bundles_post_ra>
